<compile_context>
chip_gen: v7x
topology: tpu7x:2x2x1
jax: 0.10.0
libtpu: 0.0.40
codegen_flags: <defaults>
</compile_context>

<pallas_src>
import math

import jax
import jax.numpy as jnp
from jax.experimental import pallas as pl
from jax.experimental.pallas import tpu as pltpu

EPS = 1e-5
N_CLASSES = 10
N_COMPUTATIONS = 5


# ----------------------------- Pallas kernels -------------------------------

def _mm_bias_relu_kernel(x_ref, w_ref, b_ref, o_ref):
    # out = relu(x @ w + bias)   (bf16 operands, f32 accumulate, cast on store)
    acc = jnp.dot(x_ref[...], w_ref[...], preferred_element_type=jnp.float32)
    o_ref[...] = jnp.maximum(acc + b_ref[...], 0.0).astype(o_ref.dtype)


def _mm_scale_shift_relu_kernel(x_ref, w_ref, s_ref, t_ref, o_ref):
    # out = relu((x @ w) * scale + shift)   (conv + folded BatchNorm + ReLU)
    acc = jnp.dot(x_ref[...], w_ref[...], preferred_element_type=jnp.float32)
    o_ref[...] = jnp.maximum(acc * s_ref[...] + t_ref[...], 0.0).astype(o_ref.dtype)


def _kitchen_kernel(xpad_ref, c1_ref, s_ref, t_ref, o_ref):
    """Per-sample 3x3 conv (padding=1) + folded BN + ReLU + residual add.

    xpad_ref: (G, H+2, W+2, C) f32   zero-padded activation (residual source)
    c1_ref:   (G, 9*C, C)      bf16  per-sample weights, rows ordered (kh,kw,cin)
    o_ref:    (G, H*W, C)      f32

    The 3x3 im2col is done in-kernel as 9 accumulating per-tap batched
    matmuls, so no inflated patch tensor ever touches HBM.
    """
    G = o_ref.shape[0]
    C = o_ref.shape[2]
    H = xpad_ref.shape[1] - 2
    W = xpad_ref.shape[2] - 2
    P = H * W
    acc = jnp.zeros((G, P, C), jnp.float32)
    for t in range(9):                                   # unrolled: static slices
        di, dj = divmod(t, 3)
        xt = xpad_ref[:, di:di + H, dj:dj + W, :].astype(jnp.bfloat16)
        xt = xt.reshape(G, P, C)                         # merge (H,W) -> P (layout-trivial)
        wt = c1_ref[:, t * C:(t + 1) * C, :]             # (G, C, C) bf16
        acc = acc + jnp.einsum('gpc,gco->gpo', xt, wt,
                               preferred_element_type=jnp.float32)
    y = jnp.maximum(acc * s_ref[...] + t_ref[...], 0.0)
    res = xpad_ref[:, 1:1 + H, 1:1 + W, :].reshape(G, P, C)   # f32 residual
    o_ref[...] = res + y
    # TODO(synk): output last dim is C=64 (<128 lanes) -> masked stores; a
    # lane-dense (G, P*C) store would need an in-kernel relayout of acc.


def _head_kernel(x_ref, w_ref, b_ref, o_ref):
    # linear -> softmax -> log  == log_softmax(linear), numerically stable.
    logits = jnp.dot(x_ref[...], w_ref[...], preferred_element_type=jnp.float32)
    logits = logits + b_ref[...]
    m = jnp.max(logits, axis=1, keepdims=True)
    z = logits - m
    lse = jnp.log(jnp.sum(jnp.exp(z), axis=1, keepdims=True))
    o_ref[...] = z - lse


# ----------------------------- helpers (glue) --------------------------------

def _round_up(x, m):
    return (x + m - 1) // m * m


def _pick_tm(m):
    """Largest convenient M-tile (single tile if small, else biggest divisor)."""
    if m <= 4096:
        return m
    for cand in (4096, 2048, 1024, 512, 256, 128, 64, 32, 16, 8):
        if m % cand == 0:
            return cand
    return m


def _tiled_matmul(kernel, lhs, w, extras, tn=None, out_dtype=jnp.float32,
                  vmem_limit=None):
    """out = kernel(lhs @ w, *extras), tiled over (M, N).

    lhs: (M, K) bf16, w: (K, N) bf16, extras: per-output-channel (1, N) f32.
    M is padded to a multiple of 8; K is carried whole in each block.
    `out_dtype` lets the kernel store bf16 directly (no separate cast pass).
    """
    M, K = lhs.shape
    N = w.shape[1]
    if tn is None:
        tn = N
    assert N % tn == 0, (N, tn)          # guard against silent truncation
    m_pad = _round_up(M, 8)
    if m_pad != M:
        lhs = jnp.pad(lhs, ((0, m_pad - M), (0, 0)))
    tm = _pick_tm(m_pad)
    grid = (m_pad // tm, N // tn)

    in_specs = [
        pl.BlockSpec((tm, K), lambda i, j: (i, 0)),
        pl.BlockSpec((K, tn), lambda i, j: (0, j)),
    ]
    for _ in extras:
        in_specs.append(pl.BlockSpec((1, tn), lambda i, j: (0, j)))

    cparams = dict(dimension_semantics=("parallel", "parallel"))
    if vmem_limit is not None:
        cparams["vmem_limit_bytes"] = vmem_limit

    out = pl.pallas_call(
        kernel,
        out_shape=jax.ShapeDtypeStruct((m_pad, N), out_dtype),
        grid=grid,
        in_specs=in_specs,
        out_specs=pl.BlockSpec((tm, tn), lambda i, j: (i, j)),
        compiler_params=pltpu.CompilerParams(**cparams),
    )(lhs, w, *extras)
    return out[:M] if m_pad != M else out


def _im2col_nhwc(x, kh, kw, stride, pad):
    """x: (B,H,W,C) -> patches (B*Ho*Wo, kh*kw*C), taps ordered (kh, kw, C).

    Only used for the stem; pass x already in bf16 so the inflated patch
    tensor is materialized at half width."""
    B, H, W, C = x.shape
    if pad:
        x = jnp.pad(x, ((0, 0), (pad, pad), (pad, pad), (0, 0)))
    Ho = (H + 2 * pad - kh) // stride + 1
    Wo = (W + 2 * pad - kw) // stride + 1
    taps = []
    for i in range(kh):
        for j in range(kw):
            taps.append(x[:, i:i + stride * Ho:stride, j:j + stride * Wo:stride, :])
    p = jnp.stack(taps, axis=3)                       # (B, Ho, Wo, kh*kw, C)
    return p.reshape(B * Ho * Wo, kh * kw * C), Ho, Wo
# TODO(synk): stem im2col is still materialized host-side (XLA-fused, bf16);
# a fully in-kernel halo gather would cut its HBM traffic further.


def maxpool_3x3_s2_p1_nhwc(x):
    """3x3 stride-2 pad-1 maxpool on NHWC as an XLA-fused maximum tree."""
    B, H, W, C = x.shape
    Ho = (H + 2 - 3) // 2 + 1
    Wo = (W + 2 - 3) // 2 + 1
    xp = jnp.pad(x, ((0, 0), (1, 1), (1, 1), (0, 0)), constant_values=-jnp.inf)
    out = None
    for i in range(3):
        for j in range(3):
            tap = xp[:, i:i + 2 * Ho:2, j:j + 2 * Wo:2, :]
            out = tap if out is None else jnp.maximum(out, tap)
    return out


# ----------------------------- module pieces --------------------------------

def vision_forward(x_nhwc, q):
    """resnet18 stem: conv7x7/2 (no bias) -> BN -> ReLU -> maxpool3x3/2."""
    B = x_nhwc.shape[0]
    # bf16-first im2col halves the inflated stem patch tensor in HBM.
    patches, Ho, Wo = _im2col_nhwc(x_nhwc.astype(jnp.bfloat16), 7, 7, 2, 3)
    h = _tiled_matmul(_mm_scale_shift_relu_kernel,
                      patches, q['stem_w'],
                      [q['vbn_scale'], q['vbn_shift']],
                      vmem_limit=32 * 1024 * 1024)
    h = h.reshape(B, Ho, Wo, 64)                               # NHWC, no transpose
    return maxpool_3x3_s2_p1_nhwc(h)                           # (B, 8, 8, 64)


def brain_menu_forward(x_nhwc, q):
    """brain_menu: Conv2d(64,192,4,s=4)+ReLU ; Conv2d(192, 64*64*3*3, 2)+ReLU.

    Returns per-sample kitchen weight matrices in (B, 576, 64) bf16 layout
    (the output-channel permutation is folded into q['menu_w2'], and the
    output is emitted as bf16 straight from the kernel)."""
    B, H, W, C = x_nhwc.shape                                   # (B, 8, 8, 64)
    # conv1 4x4/s4: taps don't overlap -> pure reshape/transpose, no im2col.
    xb = x_nhwc.astype(jnp.bfloat16)
    p1 = (xb.reshape(B, H // 4, 4, W // 4, 4, C)
            .transpose(0, 1, 3, 2, 4, 5)
            .reshape(B * (H // 4) * (W // 4), 4 * 4 * C))       # (B*4, 1024)
    h = _tiled_matmul(_mm_bias_relu_kernel, p1, q['menu_w1'], [q['menu_b1']],
                      out_dtype=jnp.bfloat16)                   # (B*4, 192) bf16
    # rows are (b, i, j) ordered; flatten to (i, j, c) per sample for conv2
    h2 = h.reshape(B, (H // 4) * (W // 4) * 192)                # (B, 768) bf16
    # conv2: (B,768) x (768, 36864) -- the HBM-dominant matmul: bf16 weight
    # stream, tn=2304 (bf16 tile 3.4 MiB), bf16 output (consumed as bf16).
    out = _tiled_matmul(_mm_bias_relu_kernel, h2, q['menu_w2'], [q['menu_b2']],
                        tn=2304, out_dtype=jnp.bfloat16,
                        vmem_limit=32 * 1024 * 1024)            # (B, 36864) bf16
    # columns are pre-permuted to (kh, kw, cin, cout) -> kitchen weights
    return out.reshape(B, 3 * 3 * 64, 64)                       # free bitcast


def brain_kitchen_forward(c1mat, x_nhwc, q):
    """out = x + relu(BN(per-sample conv2d(x[b], c1[b], padding=1)))."""
    B, H, W, C = x_nhwc.shape                                   # (B, 8, 8, 64)
    P = H * W
    # Zero-pad once (f32, ~5 MiB at B=192); the kernel builds the 3x3 taps
    # from this block in VMEM, so no 9x-inflated patch tensor is materialized.
    xpad = jnp.pad(x_nhwc, ((0, 0), (1, 1), (1, 1), (0, 0)))    # (B, H+2, W+2, C)
    G = math.gcd(B, 32)                                         # samples / grid step
    out = pl.pallas_call(
        _kitchen_kernel,
        out_shape=jax.ShapeDtypeStruct((B, P, C), jnp.float32),
        grid=(B // G,),
        in_specs=[
            pl.BlockSpec((G, H + 2, W + 2, C), lambda g: (g, 0, 0, 0)),
            pl.BlockSpec((G, 9 * C, C), lambda g: (g, 0, 0)),
            pl.BlockSpec((1, C), lambda g: (0, 0)),
            pl.BlockSpec((1, C), lambda g: (0, 0)),
        ],
        out_specs=pl.BlockSpec((G, P, C), lambda g: (g, 0, 0)),
        compiler_params=pltpu.CompilerParams(
            dimension_semantics=("parallel",),
            vmem_limit_bytes=32 * 1024 * 1024),
    )(xpad, c1mat, q['kbn_scale'], q['kbn_shift'])
    return out.reshape(B, H, W, C)                              # free bitcast


def head_forward(x_nhwc, q):
    """Flatten -> Dropout (identity at inference) -> Linear -> log(Softmax)."""
    # TODO(synk): Dropout(p=0.3) is identity at inference; training-mode RNG dropout not implemented.
    B = x_nhwc.shape[0]
    xf = x_nhwc.reshape(B, -1)          # (H,W,C) order; head_w rows pre-permuted to match
    D = xf.shape[1]
    return pl.pallas_call(
        _head_kernel,
        out_shape=jax.ShapeDtypeStruct((B, N_CLASSES), jnp.float32),
        grid=(1,),
        in_specs=[pl.BlockSpec((B, D), lambda i: (0, 0)),
                  pl.BlockSpec((D, N_CLASSES), lambda i: (0, 0)),
                  pl.BlockSpec((1, N_CLASSES), lambda i: (0, 0))],
        out_specs=pl.BlockSpec((B, N_CLASSES), lambda i: (0, 0)),
        compiler_params=pltpu.CompilerParams(
            dimension_semantics=("arbitrary",)),
    )(xf, q['head_w'], q['head_b'])


def agent_forward(I_nchw, q):
    x = jnp.transpose(I_nchw, (0, 2, 3, 1))          # NCHW -> NHWC once
    out = vision_forward(x, q)                       # (B, 8, 8, 64) f32
    for _ in range(N_COMPUTATIONS):
        c1mat = brain_menu_forward(out, q)           # (B, 576, 64) bf16
        out = brain_kitchen_forward(c1mat, out, q)   # (B, 8, 8, 64) f32
    return head_forward(out, q)                      # (B, 10) log-probs


# ----------------------------- params ---------------------------------------

def init_params(key):
    """Random parameters with the PyTorch module's native shapes/layouts."""
    ks = jax.random.split(key, 16)

    def w_init(k, shape, fan_in, scale):
        return jax.random.normal(k, shape, jnp.float32) * (scale / jnp.sqrt(fan_in))

    def bn_fold(kg, kb, km, kv, c):
        gamma = 1.0 + 0.1 * jax.random.normal(kg, (c,), jnp.float32)
        beta = 0.1 * jax.random.normal(kb, (c,), jnp.float32)
        rmean = 0.1 * jax.random.normal(km, (c,), jnp.float32)
        rvar = 1.0 + 0.1 * jnp.abs(jax.random.normal(kv, (c,), jnp.float32))
        scale = gamma / jnp.sqrt(rvar + EPS)
        return scale, beta - rmean * scale

    p = {}
    # vision_processesor: resnet18 conv1 (64,3,7,7) no bias + BatchNorm2d(64)
    p['conv1_w'] = w_init(ks[0], (64, 3, 7, 7), 3 * 7 * 7, 1.0)
    p['vbn_scale'], p['vbn_shift'] = bn_fold(ks[1], ks[2], ks[3], ks[4], 64)
    # brain_menu: Conv2d(64,192,4,stride=4) ; Conv2d(192, 64*64*3*3, 2)
    p['menu_w1'] = w_init(ks[5], (192, 64, 4, 4), 64 * 4 * 4, 0.1)
    p['menu_b1'] = 0.01 * jax.random.normal(ks[6], (192,), jnp.float32)
    p['menu_w2'] = w_init(ks[7], (64 * 64 * 3 * 3, 192, 2, 2), 192 * 2 * 2, 0.1)
    p['menu_b2'] = 0.01 * jax.random.normal(ks[8], (64 * 64 * 3 * 3,), jnp.float32)
    # brain_kitchen: BatchNorm2d(64)
    p['kbn_scale'], p['kbn_shift'] = bn_fold(ks[9], ks[10], ks[11], ks[12], 64)
    # head: Linear(64*8*8 -> 10)
    p['head_w'] = w_init(ks[13], (64 * 8 * 8, N_CLASSES), 64 * 8 * 8, 1.0)
    p['head_b'] = 0.01 * jax.random.normal(ks[14], (N_CLASSES,), jnp.float32)
    return p


def prepare_params(p):
    """One-time re-layout of weights for the NHWC/im2col Pallas kernels.

    All relabelings are pure permutations consumed consistently by the
    forward pass, so the numerics match the PyTorch module (up to the bf16
    casts of matmul operands)."""
    q = {}
    # stem: (Cout,Cin,kh,kw) -> (kh,kw,Cin,Cout) matrix, bf16
    q['stem_w'] = p['conv1_w'].transpose(2, 3, 1, 0).reshape(7 * 7 * 3, 64).astype(jnp.bfloat16)
    q['vbn_scale'] = p['vbn_scale'].reshape(1, 64)
    q['vbn_shift'] = p['vbn_shift'].reshape(1, 64)
    # menu conv1
    q['menu_w1'] = p['menu_w1'].transpose(2, 3, 1, 0).reshape(4 * 4 * 64, 192).astype(jnp.bfloat16)
    q['menu_b1'] = p['menu_b1'].reshape(1, 192)
    # menu conv2: rows -> (kh2,kw2,cin) to match the (i,j,c) flatten of the
    # conv1 output; columns permuted from (o,ci,kh,kw) to (kh,kw,ci,o) so the
    # kernel output reshapes directly into per-sample kitchen weight matrices
    # (no per-iteration transpose of c1).  Stored bf16.
    w2 = p['menu_w2'].transpose(2, 3, 1, 0).reshape(2 * 2 * 192, 64, 64, 3, 3)
    w2 = w2.transpose(0, 3, 4, 2, 1).reshape(2 * 2 * 192, 64 * 64 * 3 * 3)
    q['menu_w2'] = w2.astype(jnp.bfloat16)
    q['menu_b2'] = (p['menu_b2'].reshape(64, 64, 3, 3)
                    .transpose(2, 3, 1, 0).reshape(1, 64 * 64 * 3 * 3))
    # kitchen BN
    q['kbn_scale'] = p['kbn_scale'].reshape(1, 64)
    q['kbn_shift'] = p['kbn_shift'].reshape(1, 64)
    # head: rows reordered (C,H,W) -> (H,W,C) to match NHWC flatten; kept f32
    q['head_w'] = (p['head_w'].reshape(64, 8, 8, N_CLASSES)
                   .transpose(1, 2, 0, 3).reshape(64 * 8 * 8, N_CLASSES))
    q['head_b'] = p['head_b'].reshape(1, N_CLASSES)
    return q


# ----------------------------- main ------------------------------------------

if __name__ == "__main__":
    key = jax.random.PRNGKey(0)
    pkey, xkey = jax.random.split(key)
    raw_params = init_params(pkey)
    params = jax.tree_util.tree_map(jnp.asarray, prepare_params(raw_params))

    # small batch for the harness (the reference hard-codes batch_size=192;
    # per-sample semantics are identical — benchmark at the real batch).
    I = jax.random.normal(xkey, (2, 3, 32, 32), jnp.float32)   # NCHW, 32x32 -> 8x8 embed

    logprob = jax.jit(agent_forward)(I, params)
    jax.block_until_ready(logprob)

    assert logprob.shape == (2, N_CLASSES), logprob.shape
    assert bool(jnp.all(jnp.isfinite(logprob)))
    prob_sum = jnp.sum(jnp.exp(logprob), axis=1)
    assert bool(jnp.all(jnp.abs(prob_sum - 1.0) < 1e-3)), prob_sum
    print("KERNEL_OK")
</pallas_src>

<mosaic_0001>
module attributes {stable_mosaic.version = 11 : i64} {
  func.func @_mm_scale_shift_relu_kernel(%arg0: i32, %arg1: i32, %arg2: memref<512x147xbf16, #tpu.memory_space<vmem>>, %arg3: memref<147x64xbf16, #tpu.memory_space<vmem>>, %arg4: memref<1x64xf32, #tpu.memory_space<vmem>>, %arg5: memref<1x64xf32, #tpu.memory_space<vmem>>, %arg6: memref<512x64xf32, #tpu.memory_space<vmem>>) attributes {dimension_semantics = [#tpu.dimension_semantics<parallel>, #tpu.dimension_semantics<parallel>], iteration_bounds = array<i64: 1, 1>, scalar_prefetch = 0 : i64, scratch_operands = 0 : i64, tpu.core_type = #tpu.core_type<tc>, window_params = [{transform_indices = @transform_0, window_bounds = array<i64: 512, 147>}, {transform_indices = @transform_1, window_bounds = array<i64: 147, 64>}, {transform_indices = @transform_2, window_bounds = array<i64: 1, 64>}, {transform_indices = @transform_3, window_bounds = array<i64: 1, 64>}, {transform_indices = @transform_4, window_bounds = array<i64: 512, 64>}]} {
    %c0 = arith.constant 0 : index
    %c0_0 = arith.constant 0 : index
    %0 = vector.load %arg2[%c0, %c0_0] : memref<512x147xbf16, #tpu.memory_space<vmem>>, vector<512x147xbf16>
    %c0_1 = arith.constant 0 : index
    %c0_2 = arith.constant 0 : index
    %1 = vector.load %arg3[%c0_1, %c0_2] : memref<147x64xbf16, #tpu.memory_space<vmem>>, vector<147x64xbf16>
    %cst = arith.constant dense<0.000000e+00> : vector<512x64xf32>
    %2 = tpu.matmul %0, %1, %cst {dimension_numbers = #tpu.dot_dimension_numbers<[1], [0], [0], [1], [0, 0, 1, 1], [], []>} : vector<512x147xbf16>, vector<147x64xbf16>, vector<512x64xf32> -> vector<512x64xf32>
    %c0_3 = arith.constant 0 : index
    %c0_4 = arith.constant 0 : index
    %3 = vector.load %arg4[%c0_3, %c0_4] : memref<1x64xf32, #tpu.memory_space<vmem>>, vector<1x64xf32>
    %4 = vector.broadcast %3 : vector<1x64xf32> to vector<512x64xf32>
    %5 = arith.mulf %2, %4 : vector<512x64xf32>
    %c0_5 = arith.constant 0 : index
    %c0_6 = arith.constant 0 : index
    %6 = vector.load %arg5[%c0_5, %c0_6] : memref<1x64xf32, #tpu.memory_space<vmem>>, vector<1x64xf32>
    %7 = vector.broadcast %6 : vector<1x64xf32> to vector<512x64xf32>
    %8 = arith.addf %5, %7 : vector<512x64xf32>
    %cst_7 = arith.constant 0.000000e+00 : f32
    %9 = vector.broadcast %cst_7 : f32 to vector<512x64xf32>
    %10 = arith.maximumf %8, %9 : vector<512x64xf32>
    %c0_8 = arith.constant 0 : index
    %c0_9 = arith.constant 0 : index
    %11 = vector.load %arg6[%c0_8, %c0_9] : memref<512x64xf32, #tpu.memory_space<vmem>>, vector<512x64xf32>
    tpu.vector_store %arg6[%c0_8, %c0_9], %10 {strides = array<i32>} : memref<512x64xf32, #tpu.memory_space<vmem>>, vector<512x64xf32>,
    return
  }
  func.func @transform_0(%arg0: i32, %arg1: i32) -> (i32, i32) {
    %c0_i32 = arith.constant 0 : i32
    %c0_i32_0 = arith.constant 0 : i32
    return %arg0, %c0_i32 : i32, i32
  }
  func.func @transform_1(%arg0: i32, %arg1: i32) -> (i32, i32) {
    %c0_i32 = arith.constant 0 : i32
    %c0_i32_0 = arith.constant 0 : i32
    return %c0_i32, %arg1 : i32, i32
  }
  func.func @transform_2(%arg0: i32, %arg1: i32) -> (i32, i32) {
    %c0_i32 = arith.constant 0 : i32
    %c0_i32_0 = arith.constant 0 : i32
    return %c0_i32, %arg1 : i32, i32
  }
  func.func @transform_3(%arg0: i32, %arg1: i32) -> (i32, i32) {
    %c0_i32 = arith.constant 0 : i32
    %c0_i32_0 = arith.constant 0 : i32
    return %c0_i32, %arg1 : i32, i32
  }
  func.func @transform_4(%arg0: i32, %arg1: i32) -> (i32, i32) {
    %c0_i32 = arith.constant 0 : i32
    return %arg0, %arg1 : i32, i32
  }
}

module attributes {stable_mosaic.version = 11 : i64} {
  func.func @_mm_bias_relu_kernel(%arg0: i32, %arg1: i32, %arg2: memref<8x1024xbf16, #tpu.memory_space<vmem>>, %arg3: memref<1024x192xbf16, #tpu.memory_space<vmem>>, %arg4: memref<1x192xf32, #tpu.memory_space<vmem>>, %arg5: memref<8x192xbf16, #tpu.memory_space<vmem>>) attributes {dimension_semantics = [#tpu.dimension_semantics<parallel>, #tpu.dimension_semantics<parallel>], iteration_bounds = array<i64: 1, 1>, scalar_prefetch = 0 : i64, scratch_operands = 0 : i64, tpu.core_type = #tpu.core_type<tc>, window_params = [{transform_indices = @transform_0, window_bounds = array<i64: 8, 1024>}, {transform_indices = @transform_1, window_bounds = array<i64: 1024, 192>}, {transform_indices = @transform_2, window_bounds = array<i64: 1, 192>}, {transform_indices = @transform_3, window_bounds = array<i64: 8, 192>}]} {
    %c0 = arith.constant 0 : index
    %c0_0 = arith.constant 0 : index
    %0 = vector.load %arg2[%c0, %c0_0] : memref<8x1024xbf16, #tpu.memory_space<vmem>>, vector<8x1024xbf16>
    %c0_1 = arith.constant 0 : index
    %c0_2 = arith.constant 0 : index
    %1 = vector.load %arg3[%c0_1, %c0_2] : memref<1024x192xbf16, #tpu.memory_space<vmem>>, vector<1024x192xbf16>
    %cst = arith.constant dense<0.000000e+00> : vector<8x192xf32>
    %2 = tpu.matmul %0, %1, %cst {dimension_numbers = #tpu.dot_dimension_numbers<[1], [0], [0], [1], [0, 0, 1, 1], [], []>} : vector<8x1024xbf16>, vector<1024x192xbf16>, vector<8x192xf32> -> vector<8x192xf32>
    %c0_3 = arith.constant 0 : index
    %c0_4 = arith.constant 0 : index
    %3 = vector.load %arg4[%c0_3, %c0_4] : memref<1x192xf32, #tpu.memory_space<vmem>>, vector<1x192xf32>
    %4 = vector.broadcast %3 : vector<1x192xf32> to vector<8x192xf32>
    %5 = arith.addf %2, %4 : vector<8x192xf32>
    %cst_5 = arith.constant 0.000000e+00 : f32
    %6 = vector.broadcast %cst_5 : f32 to vector<8x192xf32>
    %7 = arith.maximumf %5, %6 : vector<8x192xf32>
    %8 = arith.truncf %7 : vector<8x192xf32> to vector<8x192xbf16>
    %c0_6 = arith.constant 0 : index
    %c0_7 = arith.constant 0 : index
    %9 = vector.load %arg5[%c0_6, %c0_7] : memref<8x192xbf16, #tpu.memory_space<vmem>>, vector<8x192xbf16>
    tpu.vector_store %arg5[%c0_6, %c0_7], %8 {strides = array<i32>} : memref<8x192xbf16, #tpu.memory_space<vmem>>, vector<8x192xbf16>,
    return
  }
  func.func @transform_0(%arg0: i32, %arg1: i32) -> (i32, i32) {
    %c0_i32 = arith.constant 0 : i32
    %c0_i32_0 = arith.constant 0 : i32
    return %arg0, %c0_i32 : i32, i32
  }
  func.func @transform_1(%arg0: i32, %arg1: i32) -> (i32, i32) {
    %c0_i32 = arith.constant 0 : i32
    %c0_i32_0 = arith.constant 0 : i32
    return %c0_i32, %arg1 : i32, i32
  }
  func.func @transform_2(%arg0: i32, %arg1: i32) -> (i32, i32) {
    %c0_i32 = arith.constant 0 : i32
    %c0_i32_0 = arith.constant 0 : i32
    return %c0_i32, %arg1 : i32, i32
  }
  func.func @transform_3(%arg0: i32, %arg1: i32) -> (i32, i32) {
    %c0_i32 = arith.constant 0 : i32
    return %arg0, %arg1 : i32, i32
  }
}

module attributes {stable_mosaic.version = 11 : i64} {
  func.func @_mm_bias_relu_kernel(%arg0: i32, %arg1: i32, %arg2: memref<8x768xbf16, #tpu.memory_space<vmem>>, %arg3: memref<768x2304xbf16, #tpu.memory_space<vmem>>, %arg4: memref<1x2304xf32, #tpu.memory_space<vmem>>, %arg5: memref<8x2304xbf16, #tpu.memory_space<vmem>>) attributes {dimension_semantics = [#tpu.dimension_semantics<parallel>, #tpu.dimension_semantics<parallel>], iteration_bounds = array<i64: 1, 16>, scalar_prefetch = 0 : i64, scratch_operands = 0 : i64, tpu.core_type = #tpu.core_type<tc>, window_params = [{transform_indices = @transform_0, window_bounds = array<i64: 8, 768>}, {transform_indices = @transform_1, window_bounds = array<i64: 768, 2304>}, {transform_indices = @transform_2, window_bounds = array<i64: 1, 2304>}, {transform_indices = @transform_3, window_bounds = array<i64: 8, 2304>}]} {
    %c0 = arith.constant 0 : index
    %c0_0 = arith.constant 0 : index
    %0 = vector.load %arg2[%c0, %c0_0] : memref<8x768xbf16, #tpu.memory_space<vmem>>, vector<8x768xbf16>
    %c0_1 = arith.constant 0 : index
    %c0_2 = arith.constant 0 : index
    %1 = vector.load %arg3[%c0_1, %c0_2] : memref<768x2304xbf16, #tpu.memory_space<vmem>>, vector<768x2304xbf16>
    %cst = arith.constant dense<0.000000e+00> : vector<8x2304xf32>
    %2 = tpu.matmul %0, %1, %cst {dimension_numbers = #tpu.dot_dimension_numbers<[1], [0], [0], [1], [0, 0, 1, 1], [], []>} : vector<8x768xbf16>, vector<768x2304xbf16>, vector<8x2304xf32> -> vector<8x2304xf32>
    %c0_3 = arith.constant 0 : index
    %c0_4 = arith.constant 0 : index
    %3 = vector.load %arg4[%c0_3, %c0_4] : memref<1x2304xf32, #tpu.memory_space<vmem>>, vector<1x2304xf32>
    %4 = vector.broadcast %3 : vector<1x2304xf32> to vector<8x2304xf32>
    %5 = arith.addf %2, %4 : vector<8x2304xf32>
    %cst_5 = arith.constant 0.000000e+00 : f32
    %6 = vector.broadcast %cst_5 : f32 to vector<8x2304xf32>
    %7 = arith.maximumf %5, %6 : vector<8x2304xf32>
    %8 = arith.truncf %7 : vector<8x2304xf32> to vector<8x2304xbf16>
    %c0_6 = arith.constant 0 : index
    %c0_7 = arith.constant 0 : index
    %9 = vector.load %arg5[%c0_6, %c0_7] : memref<8x2304xbf16, #tpu.memory_space<vmem>>, vector<8x2304xbf16>
    tpu.vector_store %arg5[%c0_6, %c0_7], %8 {strides = array<i32>} : memref<8x2304xbf16, #tpu.memory_space<vmem>>, vector<8x2304xbf16>,
    return
  }
  func.func @transform_0(%arg0: i32, %arg1: i32) -> (i32, i32) {
    %c0_i32 = arith.constant 0 : i32
    %c0_i32_0 = arith.constant 0 : i32
    return %arg0, %c0_i32 : i32, i32
  }
  func.func @transform_1(%arg0: i32, %arg1: i32) -> (i32, i32) {
    %c0_i32 = arith.constant 0 : i32
    %c0_i32_0 = arith.constant 0 : i32
    return %c0_i32, %arg1 : i32, i32
  }
  func.func @transform_2(%arg0: i32, %arg1: i32) -> (i32, i32) {
    %c0_i32 = arith.constant 0 : i32
    %c0_i32_0 = arith.constant 0 : i32
    return %c0_i32, %arg1 : i32, i32
  }
  func.func @transform_3(%arg0: i32, %arg1: i32) -> (i32, i32) {
    %c0_i32 = arith.constant 0 : i32
    return %arg0, %arg1 : i32, i32
  }
}

module attributes {stable_mosaic.version = 11 : i64} {
  func.func @_kitchen_kernel(%arg0: i32, %arg1: memref<2x10x10x64xf32, #tpu.memory_space<vmem>>, %arg2: memref<2x576x64xbf16, #tpu.memory_space<vmem>>, %arg3: memref<1x64xf32, #tpu.memory_space<vmem>>, %arg4: memref<1x64xf32, #tpu.memory_space<vmem>>, %arg5: memref<2x64x64xf32, #tpu.memory_space<vmem>>) attributes {dimension_semantics = [#tpu.dimension_semantics<parallel>], iteration_bounds = array<i64: 1>, scalar_prefetch = 0 : i64, scratch_operands = 0 : i64, tpu.core_type = #tpu.core_type<tc>, window_params = [{transform_indices = @transform_0, window_bounds = array<i64: 2, 10, 10, 64>}, {transform_indices = @transform_1, window_bounds = array<i64: 2, 576, 64>}, {pipeline_mode = #tpu.pipeline_mode<synchronous>, transform_indices = @transform_2, window_bounds = array<i64: 1, 64>}, {pipeline_mode = #tpu.pipeline_mode<synchronous>, transform_indices = @transform_3, window_bounds = array<i64: 1, 64>}, {transform_indices = @transform_4, window_bounds = array<i64: 2, 64, 64>}]} {
    %cst = arith.constant 0.000000e+00 : f32
    %0 = vector.broadcast %cst : f32 to vector<2x64x64xf32>
    %c0 = arith.constant 0 : index
    %c0_0 = arith.constant 0 : index
    %c0_1 = arith.constant 0 : index
    %c0_2 = arith.constant 0 : index
    %1 = vector.load %arg1[%c0, %c0_0, %c0_1, %c0_2] : memref<2x10x10x64xf32, #tpu.memory_space<vmem>>, vector<2x8x8x64xf32>
    %2 = arith.truncf %1 : vector<2x8x8x64xf32> to vector<2x8x8x64xbf16>
    %3 = vector.shape_cast %2 : vector<2x8x8x64xbf16> to vector<2x64x64xbf16>
    %c0_3 = arith.constant 0 : index
    %c0_4 = arith.constant 0 : index
    %c0_5 = arith.constant 0 : index
    %4 = vector.load %arg2[%c0_3, %c0_4, %c0_5] : memref<2x576x64xbf16, #tpu.memory_space<vmem>>, vector<2x64x64xbf16>
    "tpu.trace_start"() <{level = 10 : i32, message = "gpc,gco->gpo"}> : () -> ()
    %cst_6 = arith.constant dense<0.000000e+00> : vector<2x64x64xf32>
    %5 = tpu.matmul %3, %4, %cst_6 {dimension_numbers = #tpu.dot_dimension_numbers<[2], [1], [1], [2], [0, 0, 0, 1, 1, 2], [0], [0]>} : vector<2x64x64xbf16>, vector<2x64x64xbf16>, vector<2x64x64xf32> -> vector<2x64x64xf32>
    "tpu.trace_stop"() : () -> ()
    %6 = arith.addf %0, %5 : vector<2x64x64xf32>
    %c0_7 = arith.constant 0 : index
    %c0_8 = arith.constant 0 : index
    %c1 = arith.constant 1 : index
    %c0_9 = arith.constant 0 : index
    %7 = vector.load %arg1[%c0_7, %c0_8, %c1, %c0_9] : memref<2x10x10x64xf32, #tpu.memory_space<vmem>>, vector<2x8x8x64xf32>
    %8 = arith.truncf %7 : vector<2x8x8x64xf32> to vector<2x8x8x64xbf16>
    %9 = vector.shape_cast %8 : vector<2x8x8x64xbf16> to vector<2x64x64xbf16>
    %c0_10 = arith.constant 0 : index
    %c64 = arith.constant 64 : index
    %c0_11 = arith.constant 0 : index
    %10 = vector.load %arg2[%c0_10, %c64, %c0_11] : memref<2x576x64xbf16, #tpu.memory_space<vmem>>, vector<2x64x64xbf16>
    "tpu.trace_start"() <{level = 10 : i32, message = "gpc,gco->gpo"}> : () -> ()
    %cst_12 = arith.constant dense<0.000000e+00> : vector<2x64x64xf32>
    %11 = tpu.matmul %9, %10, %cst_12 {dimension_numbers = #tpu.dot_dimension_numbers<[2], [1], [1], [2], [0, 0, 0, 1, 1, 2], [0], [0]>} : vector<2x64x64xbf16>, vector<2x64x64xbf16>, vector<2x64x64xf32> -> vector<2x64x64xf32>
    "tpu.trace_stop"() : () -> ()
    %12 = arith.addf %6, %11 : vector<2x64x64xf32>
    %c0_13 = arith.constant 0 : index
    %c0_14 = arith.constant 0 : index
    %c2 = arith.constant 2 : index
    %c0_15 = arith.constant 0 : index
    %13 = vector.load %arg1[%c0_13, %c0_14, %c2, %c0_15] : memref<2x10x10x64xf32, #tpu.memory_space<vmem>>, vector<2x8x8x64xf32>
    %14 = arith.truncf %13 : vector<2x8x8x64xf32> to vector<2x8x8x64xbf16>
    %15 = vector.shape_cast %14 : vector<2x8x8x64xbf16> to vector<2x64x64xbf16>
    %c0_16 = arith.constant 0 : index
    %c128 = arith.constant 128 : index
    %c0_17 = arith.constant 0 : index
    %16 = vector.load %arg2[%c0_16, %c128, %c0_17] : memref<2x576x64xbf16, #tpu.memory_space<vmem>>, vector<2x64x64xbf16>
    "tpu.trace_start"() <{level = 10 : i32, message = "gpc,gco->gpo"}> : () -> ()
    %cst_18 = arith.constant dense<0.000000e+00> : vector<2x64x64xf32>
    %17 = tpu.matmul %15, %16, %cst_18 {dimension_numbers = #tpu.dot_dimension_numbers<[2], [1], [1], [2], [0, 0, 0, 1, 1, 2], [0], [0]>} : vector<2x64x64xbf16>, vector<2x64x64xbf16>, vector<2x64x64xf32> -> vector<2x64x64xf32>
    "tpu.trace_stop"() : () -> ()
    %18 = arith.addf %12, %17 : vector<2x64x64xf32>
    %c0_19 = arith.constant 0 : index
    %c1_20 = arith.constant 1 : index
    %c0_21 = arith.constant 0 : index
    %c0_22 = arith.constant 0 : index
    %19 = vector.load %arg1[%c0_19, %c1_20, %c0_21, %c0_22] : memref<2x10x10x64xf32, #tpu.memory_space<vmem>>, vector<2x8x8x64xf32>
    %20 = arith.truncf %19 : vector<2x8x8x64xf32> to vector<2x8x8x64xbf16>
    %21 = vector.shape_cast %20 : vector<2x8x8x64xbf16> to vector<2x64x64xbf16>
    %c0_23 = arith.constant 0 : index
    %c192 = arith.constant 192 : index
    %c0_24 = arith.constant 0 : index
    %22 = vector.load %arg2[%c0_23, %c192, %c0_24] : memref<2x576x64xbf16, #tpu.memory_space<vmem>>, vector<2x64x64xbf16>
    "tpu.trace_start"() <{level = 10 : i32, message = "gpc,gco->gpo"}> : () -> ()
    %cst_25 = arith.constant dense<0.000000e+00> : vector<2x64x64xf32>
    %23 = tpu.matmul %21, %22, %cst_25 {dimension_numbers = #tpu.dot_dimension_numbers<[2], [1], [1], [2], [0, 0, 0, 1, 1, 2], [0], [0]>} : vector<2x64x64xbf16>, vector<2x64x64xbf16>, vector<2x64x64xf32> -> vector<2x64x64xf32>
    "tpu.trace_stop"() : () -> ()
    %24 = arith.addf %18, %23 : vector<2x64x64xf32>
    %c0_26 = arith.constant 0 : index
    %c1_27 = arith.constant 1 : index
    %c1_28 = arith.constant 1 : index
    %c0_29 = arith.constant 0 : index
    %25 = vector.load %arg1[%c0_26, %c1_27, %c1_28, %c0_29] : memref<2x10x10x64xf32, #tpu.memory_space<vmem>>, vector<2x8x8x64xf32>
    %26 = arith.truncf %25 : vector<2x8x8x64xf32> to vector<2x8x8x64xbf16>
    %27 = vector.shape_cast %26 : vector<2x8x8x64xbf16> to vector<2x64x64xbf16>
    %c0_30 = arith.constant 0 : index
    %c256 = arith.constant 256 : index
    %c0_31 = arith.constant 0 : index
    %28 = vector.load %arg2[%c0_30, %c256, %c0_31] : memref<2x576x64xbf16, #tpu.memory_space<vmem>>, vector<2x64x64xbf16>
    "tpu.trace_start"() <{level = 10 : i32, message = "gpc,gco->gpo"}> : () -> ()
    %cst_32 = arith.constant dense<0.000000e+00> : vector<2x64x64xf32>
    %29 = tpu.matmul %27, %28, %cst_32 {dimension_numbers = #tpu.dot_dimension_numbers<[2], [1], [1], [2], [0, 0, 0, 1, 1, 2], [0], [0]>} : vector<2x64x64xbf16>, vector<2x64x64xbf16>, vector<2x64x64xf32> -> vector<2x64x64xf32>
    "tpu.trace_stop"() : () -> ()
    %30 = arith.addf %24, %29 : vector<2x64x64xf32>
    %c0_33 = arith.constant 0 : index
    %c1_34 = arith.constant 1 : index
    %c2_35 = arith.constant 2 : index
    %c0_36 = arith.constant 0 : index
    %31 = vector.load %arg1[%c0_33, %c1_34, %c2_35, %c0_36] : memref<2x10x10x64xf32, #tpu.memory_space<vmem>>, vector<2x8x8x64xf32>
    %32 = arith.truncf %31 : vector<2x8x8x64xf32> to vector<2x8x8x64xbf16>
    %33 = vector.shape_cast %32 : vector<2x8x8x64xbf16> to vector<2x64x64xbf16>
    %c0_37 = arith.constant 0 : index
    %c320 = arith.constant 320 : index
    %c0_38 = arith.constant 0 : index
    %34 = vector.load %arg2[%c0_37, %c320, %c0_38] : memref<2x576x64xbf16, #tpu.memory_space<vmem>>, vector<2x64x64xbf16>
    "tpu.trace_start"() <{level = 10 : i32, message = "gpc,gco->gpo"}> : () -> ()
    %cst_39 = arith.constant dense<0.000000e+00> : vector<2x64x64xf32>
    %35 = tpu.matmul %33, %34, %cst_39 {dimension_numbers = #tpu.dot_dimension_numbers<[2], [1], [1], [2], [0, 0, 0, 1, 1, 2], [0], [0]>} : vector<2x64x64xbf16>, vector<2x64x64xbf16>, vector<2x64x64xf32> -> vector<2x64x64xf32>
    "tpu.trace_stop"() : () -> ()
    %36 = arith.addf %30, %35 : vector<2x64x64xf32>
    %c0_40 = arith.constant 0 : index
    %c2_41 = arith.constant 2 : index
    %c0_42 = arith.constant 0 : index
    %c0_43 = arith.constant 0 : index
    %37 = vector.load %arg1[%c0_40, %c2_41, %c0_42, %c0_43] : memref<2x10x10x64xf32, #tpu.memory_space<vmem>>, vector<2x8x8x64xf32>
    %38 = arith.truncf %37 : vector<2x8x8x64xf32> to vector<2x8x8x64xbf16>
    %39 = vector.shape_cast %38 : vector<2x8x8x64xbf16> to vector<2x64x64xbf16>
    %c0_44 = arith.constant 0 : index
    %c384 = arith.constant 384 : index
    %c0_45 = arith.constant 0 : index
    %40 = vector.load %arg2[%c0_44, %c384, %c0_45] : memref<2x576x64xbf16, #tpu.memory_space<vmem>>, vector<2x64x64xbf16>
    "tpu.trace_start"() <{level = 10 : i32, message = "gpc,gco->gpo"}> : () -> ()
    %cst_46 = arith.constant dense<0.000000e+00> : vector<2x64x64xf32>
    %41 = tpu.matmul %39, %40, %cst_46 {dimension_numbers = #tpu.dot_dimension_numbers<[2], [1], [1], [2], [0, 0, 0, 1, 1, 2], [0], [0]>} : vector<2x64x64xbf16>, vector<2x64x64xbf16>, vector<2x64x64xf32> -> vector<2x64x64xf32>
    "tpu.trace_stop"() : () -> ()
    %42 = arith.addf %36, %41 : vector<2x64x64xf32>
    %c0_47 = arith.constant 0 : index
    %c2_48 = arith.constant 2 : index
    %c1_49 = arith.constant 1 : index
    %c0_50 = arith.constant 0 : index
    %43 = vector.load %arg1[%c0_47, %c2_48, %c1_49, %c0_50] : memref<2x10x10x64xf32, #tpu.memory_space<vmem>>, vector<2x8x8x64xf32>
    %44 = arith.truncf %43 : vector<2x8x8x64xf32> to vector<2x8x8x64xbf16>
    %45 = vector.shape_cast %44 : vector<2x8x8x64xbf16> to vector<2x64x64xbf16>
    %c0_51 = arith.constant 0 : index
    %c448 = arith.constant 448 : index
    %c0_52 = arith.constant 0 : index
    %46 = vector.load %arg2[%c0_51, %c448, %c0_52] : memref<2x576x64xbf16, #tpu.memory_space<vmem>>, vector<2x64x64xbf16>
    "tpu.trace_start"() <{level = 10 : i32, message = "gpc,gco->gpo"}> : () -> ()
    %cst_53 = arith.constant dense<0.000000e+00> : vector<2x64x64xf32>
    %47 = tpu.matmul %45, %46, %cst_53 {dimension_numbers = #tpu.dot_dimension_numbers<[2], [1], [1], [2], [0, 0, 0, 1, 1, 2], [0], [0]>} : vector<2x64x64xbf16>, vector<2x64x64xbf16>, vector<2x64x64xf32> -> vector<2x64x64xf32>
    "tpu.trace_stop"() : () -> ()
    %48 = arith.addf %42, %47 : vector<2x64x64xf32>
    %c0_54 = arith.constant 0 : index
    %c2_55 = arith.constant 2 : index
    %c2_56 = arith.constant 2 : index
    %c0_57 = arith.constant 0 : index
    %49 = vector.load %arg1[%c0_54, %c2_55, %c2_56, %c0_57] : memref<2x10x10x64xf32, #tpu.memory_space<vmem>>, vector<2x8x8x64xf32>
    %50 = arith.truncf %49 : vector<2x8x8x64xf32> to vector<2x8x8x64xbf16>
    %51 = vector.shape_cast %50 : vector<2x8x8x64xbf16> to vector<2x64x64xbf16>
    %c0_58 = arith.constant 0 : index
    %c512 = arith.constant 512 : index
    %c0_59 = arith.constant 0 : index
    %52 = vector.load %arg2[%c0_58, %c512, %c0_59] : memref<2x576x64xbf16, #tpu.memory_space<vmem>>, vector<2x64x64xbf16>
    "tpu.trace_start"() <{level = 10 : i32, message = "gpc,gco->gpo"}> : () -> ()
    %cst_60 = arith.constant dense<0.000000e+00> : vector<2x64x64xf32>
    %53 = tpu.matmul %51, %52, %cst_60 {dimension_numbers = #tpu.dot_dimension_numbers<[2], [1], [1], [2], [0, 0, 0, 1, 1, 2], [0], [0]>} : vector<2x64x64xbf16>, vector<2x64x64xbf16>, vector<2x64x64xf32> -> vector<2x64x64xf32>
    "tpu.trace_stop"() : () -> ()
    %54 = arith.addf %48, %53 : vector<2x64x64xf32>
    %c0_61 = arith.constant 0 : index
    %c0_62 = arith.constant 0 : index
    %55 = vector.load %arg3[%c0_61, %c0_62] : memref<1x64xf32, #tpu.memory_space<vmem>>, vector<1x64xf32>
    %56 = vector.shape_cast %55 : vector<1x64xf32> to vector<1x1x64xf32>
    %57 = vector.broadcast %56 : vector<1x1x64xf32> to vector<2x64x64xf32>
    %58 = arith.mulf %54, %57 : vector<2x64x64xf32>
    %c0_63 = arith.constant 0 : index
    %c0_64 = arith.constant 0 : index
    %59 = vector.load %arg4[%c0_63, %c0_64] : memref<1x64xf32, #tpu.memory_space<vmem>>, vector<1x64xf32>
    %60 = vector.shape_cast %59 : vector<1x64xf32> to vector<1x1x64xf32>
    %61 = vector.broadcast %60 : vector<1x1x64xf32> to vector<2x64x64xf32>
    %62 = arith.addf %58, %61 : vector<2x64x64xf32>
    %cst_65 = arith.constant 0.000000e+00 : f32
    %63 = vector.broadcast %cst_65 : f32 to vector<2x64x64xf32>
    %64 = arith.maximumf %62, %63 : vector<2x64x64xf32>
    %c0_66 = arith.constant 0 : index
    %c1_67 = arith.constant 1 : index
    %c1_68 = arith.constant 1 : index
    %c0_69 = arith.constant 0 : index
    %65 = vector.load %arg1[%c0_66, %c1_67, %c1_68, %c0_69] : memref<2x10x10x64xf32, #tpu.memory_space<vmem>>, vector<2x8x8x64xf32>
    %66 = vector.shape_cast %65 : vector<2x8x8x64xf32> to vector<2x64x64xf32>
    %67 = arith.addf %66, %64 : vector<2x64x64xf32>
    %c0_70 = arith.constant 0 : index
    %c0_71 = arith.constant 0 : index
    %c0_72 = arith.constant 0 : index
    %68 = vector.load %arg5[%c0_70, %c0_71, %c0_72] : memref<2x64x64xf32, #tpu.memory_space<vmem>>, vector<2x64x64xf32>
    tpu.vector_store %arg5[%c0_70, %c0_71, %c0_72], %67 {strides = array<i32>} : memref<2x64x64xf32, #tpu.memory_space<vmem>>, vector<2x64x64xf32>,
    return
  }
  func.func @transform_0(%arg0: i32) -> (i32, i32, i32, i32) {
    %c0_i32 = arith.constant 0 : i32
    %c0_i32_0 = arith.constant 0 : i32
    %c0_i32_1 = arith.constant 0 : i32
    %c0_i32_2 = arith.constant 0 : i32
    return %arg0, %c0_i32, %c0_i32_0, %c0_i32_1 : i32, i32, i32, i32
  }
  func.func @transform_1(%arg0: i32) -> (i32, i32, i32) {
    %c0_i32 = arith.constant 0 : i32
    %c0_i32_0 = arith.constant 0 : i32
    %c0_i32_1 = arith.constant 0 : i32
    return %arg0, %c0_i32, %c0_i32_0 : i32, i32, i32
  }
  func.func @transform_2(%arg0: i32) -> (i32, i32) {
    %c0_i32 = arith.constant 0 : i32
    %c0_i32_0 = arith.constant 0 : i32
    %c0_i32_1 = arith.constant 0 : i32
    return %c0_i32, %c0_i32_0 : i32, i32
  }
  func.func @transform_3(%arg0: i32) -> (i32, i32) {
    %c0_i32 = arith.constant 0 : i32
    %c0_i32_0 = arith.constant 0 : i32
    %c0_i32_1 = arith.constant 0 : i32
    return %c0_i32, %c0_i32_0 : i32, i32
  }
  func.func @transform_4(%arg0: i32) -> (i32, i32, i32) {
    %c0_i32 = arith.constant 0 : i32
    %c0_i32_0 = arith.constant 0 : i32
    %c0_i32_1 = arith.constant 0 : i32
    return %arg0, %c0_i32, %c0_i32_0 : i32, i32, i32
  }
}

module attributes {stable_mosaic.version = 11 : i64} {
  func.func @_head_kernel(%arg0: i32, %arg1: memref<2x4096xf32, #tpu.memory_space<vmem>>, %arg2: memref<4096x10xf32, #tpu.memory_space<vmem>>, %arg3: memref<1x10xf32, #tpu.memory_space<vmem>>, %arg4: memref<2x10xf32, #tpu.memory_space<vmem>>) attributes {dimension_semantics = [#tpu.dimension_semantics<arbitrary>], iteration_bounds = array<i64: 1>, scalar_prefetch = 0 : i64, scratch_operands = 0 : i64, tpu.core_type = #tpu.core_type<tc>, window_params = [{pipeline_mode = #tpu.pipeline_mode<synchronous>, transform_indices = @transform_0, window_bounds = array<i64: 2, 4096>}, {pipeline_mode = #tpu.pipeline_mode<synchronous>, transform_indices = @transform_1, window_bounds = array<i64: 4096, 10>}, {pipeline_mode = #tpu.pipeline_mode<synchronous>, transform_indices = @transform_2, window_bounds = array<i64: 1, 10>}, {pipeline_mode = #tpu.pipeline_mode<synchronous>, transform_indices = @transform_3, window_bounds = array<i64: 2, 10>}]} {
    %c0 = arith.constant 0 : index
    %c0_0 = arith.constant 0 : index
    %0 = vector.load %arg1[%c0, %c0_0] : memref<2x4096xf32, #tpu.memory_space<vmem>>, vector<2x4096xf32>
    %c0_1 = arith.constant 0 : index
    %c0_2 = arith.constant 0 : index
    %1 = vector.load %arg2[%c0_1, %c0_2] : memref<4096x10xf32, #tpu.memory_space<vmem>>, vector<4096x10xf32>
    %cst = arith.constant dense<0.000000e+00> : vector<2x10xf32>
    %2 = tpu.matmul %0, %1, %cst {dimension_numbers = #tpu.dot_dimension_numbers<[1], [0], [0], [1], [0, 0, 1, 1], [], []>} : vector<2x4096xf32>, vector<4096x10xf32>, vector<2x10xf32> -> vector<2x10xf32>
    %c0_3 = arith.constant 0 : index
    %c0_4 = arith.constant 0 : index
    %3 = vector.load %arg3[%c0_3, %c0_4] : memref<1x10xf32, #tpu.memory_space<vmem>>, vector<1x10xf32>
    %4 = vector.broadcast %3 : vector<1x10xf32> to vector<2x10xf32>
    %5 = arith.addf %2, %4 : vector<2x10xf32>
    %cst_5 = arith.constant dense<0xFF800000> : vector<2xf32>
    %6 = vector.multi_reduction <maximumf>, %5, %cst_5 [1] : vector<2x10xf32> to vector<2xf32>
    %7 = vector.shape_cast %6 : vector<2xf32> to vector<2x1xf32>
    %8 = vector.broadcast %7 : vector<2x1xf32> to vector<2x10xf32>
    %9 = arith.subf %5, %8 : vector<2x10xf32>
    %10 = math.exp %9 : vector<2x10xf32>
    %cst_6 = arith.constant dense<0.000000e+00> : vector<2xf32>
    %11 = vector.multi_reduction <add>, %10, %cst_6 [1] : vector<2x10xf32> to vector<2xf32>
    %12 = vector.shape_cast %11 : vector<2xf32> to vector<2x1xf32>
    %13 = math.log %12 : vector<2x1xf32>
    %14 = vector.broadcast %13 : vector<2x1xf32> to vector<2x10xf32>
    %15 = arith.subf %9, %14 : vector<2x10xf32>
    %c0_7 = arith.constant 0 : index
    %c0_8 = arith.constant 0 : index
    %16 = vector.load %arg4[%c0_7, %c0_8] : memref<2x10xf32, #tpu.memory_space<vmem>>, vector<2x10xf32>
    tpu.vector_store %arg4[%c0_7, %c0_8], %15 {strides = array<i32>} : memref<2x10xf32, #tpu.memory_space<vmem>>, vector<2x10xf32>,
    return
  }
  func.func @transform_0(%arg0: i32) -> (i32, i32) {
    %c0_i32 = arith.constant 0 : i32
    %c0_i32_0 = arith.constant 0 : i32
    %c0_i32_1 = arith.constant 0 : i32
    return %c0_i32, %c0_i32_0 : i32, i32
  }
  func.func @transform_1(%arg0: i32) -> (i32, i32) {
    %c0_i32 = arith.constant 0 : i32
    %c0_i32_0 = arith.constant 0 : i32
    %c0_i32_1 = arith.constant 0 : i32
    return %c0_i32, %c0_i32_0 : i32, i32
  }
  func.func @transform_2(%arg0: i32) -> (i32, i32) {
    %c0_i32 = arith.constant 0 : i32
    %c0_i32_0 = arith.constant 0 : i32
    %c0_i32_1 = arith.constant 0 : i32
    return %c0_i32, %c0_i32_0 : i32, i32
  }
  func.func @transform_3(%arg0: i32) -> (i32, i32) {
    %c0_i32 = arith.constant 0 : i32
    %c0_i32_0 = arith.constant 0 : i32
    %c0_i32_1 = arith.constant 0 : i32
    return %c0_i32, %c0_i32_0 : i32, i32
  }
}

</mosaic_0001>

<bundles_post_ra>
// kernel: agent_forward.17
= control target key start
LH: loop header
LB: loop body
LE: loop exit
PB: predicated region body
PF: predicated region fallthrough
CT: control target
= control target key end

     0   :  { %v1350_v0 = vmov 0   ;;  %vm446_vm0 = vcmask 154624   ;;  %vm543_vm1 = vcmask 1040384   ;;  %vm544_vm2 = vcmask 1041408   ;;  %s2025_s1 = inlined_call_operand.vmem [shape: bf16[147,64], index: 1, kind: input, shape index: {}]   ;;  %s2026_s0 = inlined_call_operand.vmem [shape: bf16[512,147], index: 0, kind: input, shape index: {}]   ;;  %s2027_s2 = inlined_call_operand.vmem [shape: f32[1,64], index: 2, kind: input, shape index: {}]   ;;  %s2028_s3 = inlined_call_operand.vmem [shape: f32[1,64], index: 3, kind: input, shape index: {}]   ;;  %s2029_s4 = inlined_call_operand.vmem [shape: f32[512,64], index: 4, kind: output, shape index: {}]  }
   0x1   :  { %550 = vmatprep.subr.bf16.mxu0 %v1350_v0  ;;  %1222 = vmatprep.subr.bf16.mxu1 %v1350_v0  ;;  %v1244_v1 = vld [vmem:[%s2025_s1] sm:$0xff]   ;;  %v1245_v2 = vld [vmem:[%s2025_s1 + $0x8] sm:$0xff]   ;;  %v1246_v3 = vld [vmem:[%s2025_s1 + $0x10] sm:$0xff]   ;;  %v1351_v11 = vmov 65535   ;;  %vm1045_vm3 = vcmask 523264  }
   0x2   :  { %551 = vmatpush1.bf16.msra.mxu0 %v1244_v1  ;;  %1232 = vmatpush1.bf16.msra.mxu1 %v1244_v1  ;;  %v1247_v4 = vld [vmem:[%s2025_s1 + $0x18] sm:$0xff]   ;;  %v1256_v5 = vld [vmem:[%s2026_s0 + $0x4] ss:$8 sps:$4 sm:$0xff]   ;;  %v1250_v9 = vld [vmem:[%s2025_s1 + $0x30] sm:$0xff]   ;;  %v545_v12 = vsel %vm543_vm1, 4294967295, %v1351_v11 }
   0x3   :  { %552 = vmatprep.subr.bf16.mxu0 %v1350_v0  ;;  %1223 = vmatprep.subr.bf16.mxu1 %v1350_v0  ;;  %v1259_v6 = vld [vmem:[%s2026_s0 + $0x104] ss:$8 sps:$4 sm:$0xff]   ;;  %v1251_v10 = vld [vmem:[%s2025_s1 + $0x38] sm:$0xff]   ;;  %v1253_v14 = vld [vmem:[%s2025_s1 + $0x48] ss:$0 sps:$4 sm:$0x33]  }
   0x4   :  { %1188 = vmatprep.mubr.msk.bf16.mxu0 %vm446_vm0, %v1256_v5  ;;  %v1248_v7 = vld [vmem:[%s2025_s1 + $0x20] sm:$0xff]   ;;  %1204 = vmatprep.mubr.msk.bf16.mxu1 %vm446_vm0, %v1259_v6  ;;  %v1249_v8 = vld [vmem:[%s2025_s1 + $0x28] sm:$0xff]   ;;  %v546_v15 = vsel %vm544_vm2, %v545_v12, 0  ;;  %v1260_v19 = vld [vmem:[%s2026_s0 + $0x14] ss:$8 sps:$4 sm:$0xff]  }
   0x5   :  { %v1252_v13 = vld [vmem:[%s2025_s1 + $0x40] sm:$0xff]   ;;  %v548_v16 = vand.u32 %v1253_v14, %v546_v15  ;;  %v1262_v20 = vld [vmem:[%s2026_s0 + $0x114] ss:$8 sps:$4 sm:$0xff]   ;;  %v1264_v21 = vld [vmem:[%s2026_s0 + $0x10] ss:$8 sps:$4 sm:$0xff]  }
   0x6   :  { %553 = vmatpush1.bf16.msra.mxu0 %v1245_v2  ;;  %1233 = vmatpush1.bf16.msra.mxu1 %v1245_v2  ;;  %v1254_v17 = vld [vmem:[%s2026_s0] ss:$8 sps:$4 sm:$0xff]   ;;  %v1265_v22 = vld [vmem:[%s2026_s0 + $0x110] ss:$8 sps:$4 sm:$0xff]   ;;  %v1266_v23 = vld [vmem:[%s2026_s0 + $0x24] ss:$8 sps:$4 sm:$0xff]  }
   0x7   :  { %554 = vmatprep.subr.bf16.mxu0 %v1350_v0  ;;  %1224 = vmatprep.subr.bf16.mxu1 %v1350_v0  ;;  %v1257_v18 = vld [vmem:[%s2026_s0 + $0x100] ss:$8 sps:$4 sm:$0xff]   ;;  %v1268_v24 = vld [vmem:[%s2026_s0 + $0x124] ss:$8 sps:$4 sm:$0xff]   ;;  %v1272_v27 = vld [vmem:[%s2026_s0 + $0x34] ss:$8 sps:$4 sm:$0xff]  }
   0x8   :  { %v1270_v25 = vld [vmem:[%s2026_s0 + $0x20] ss:$8 sps:$4 sm:$0xff]   ;;  %v1274_v28 = vld [vmem:[%s2026_s0 + $0x134] ss:$8 sps:$4 sm:$0xff]   ;;  %v1276_v29 = vld [vmem:[%s2026_s0 + $0x30] ss:$8 sps:$4 sm:$0xff]  }
   0x9   :  { %v1271_v26 = vld [vmem:[%s2026_s0 + $0x120] ss:$8 sps:$4 sm:$0xff]   ;;  %v1277_v30 = vld [vmem:[%s2026_s0 + $0x130] ss:$8 sps:$4 sm:$0xff]   ;;  %v1278_v31 = vld [vmem:[%s2026_s0 + $0x44] ss:$8 sps:$4 sm:$0xff]  }
   0xa   :  { %555 = vmatpush1.bf16.msra.mxu0 %v1246_v3  ;;  %1234 = vmatpush1.bf16.msra.mxu1 %v1246_v3  ;;  %v1280_v32 = vld [vmem:[%s2026_s0 + $0x144] ss:$8 sps:$4 sm:$0xff]   ;;  %v1282_v33 = vld [vmem:[%s2026_s0 + $0x40] ss:$8 sps:$4 sm:$0xff]   ;;  %v1284_v35 = vld [vmem:[%s2026_s0 + $0x54] ss:$8 sps:$4 sm:$0xff]  }
   0xb   :  { %556 = vmatprep.subr.bf16.mxu0 %v1350_v0  ;;  %1225 = vmatprep.subr.bf16.mxu1 %v1350_v0  ;;  %v1283_v34 = vld [vmem:[%s2026_s0 + $0x140] ss:$8 sps:$4 sm:$0xff]   ;;  %v1286_v36 = vld [vmem:[%s2026_s0 + $0x154] ss:$8 sps:$4 sm:$0xff]   ;;  %v1288_v37 = vld [vmem:[%s2026_s0 + $0x50] ss:$8 sps:$4 sm:$0xff]  }
   0xc   :  { %v1289_v38 = vld [vmem:[%s2026_s0 + $0x150] ss:$8 sps:$4 sm:$0xff]   ;;  %v1290_v39 = vld [vmem:[%s2026_s0 + $0x64] ss:$8 sps:$4 sm:$0xff]   ;;  %v1294_v41 = vld [vmem:[%s2026_s0 + $0x60] ss:$8 sps:$4 sm:$0xff]  }
   0xd   :  { %v1292_v40 = vld [vmem:[%s2026_s0 + $0x164] ss:$8 sps:$4 sm:$0xff]   ;;  %v1295_v42 = vld [vmem:[%s2026_s0 + $0x160] ss:$8 sps:$4 sm:$0xff]   ;;  %v1296_v43 = vld [vmem:[%s2026_s0 + $0x74] ss:$8 sps:$4 sm:$0xff]  }
   0xe   :  { %557 = vmatpush1.bf16.msra.mxu0 %v1247_v4  ;;  %1235 = vmatpush1.bf16.msra.mxu1 %v1247_v4  ;;  %v1298_v44 = vld [vmem:[%s2026_s0 + $0x174] ss:$8 sps:$4 sm:$0xff]   ;;  %v1300_v45 = vld [vmem:[%s2026_s0 + $0x70] ss:$8 sps:$4 sm:$0xff]   ;;  %v1302_v47 = vld [vmem:[%s2026_s0 + $0x84] ss:$8 sps:$4 sm:$0xff]  }
   0xf   :  { %558 = vmatprep.subr.bf16.mxu0 %v1350_v0  ;;  %1226 = vmatprep.subr.bf16.mxu1 %v1350_v0  ;;  %v1301_v46 = vld [vmem:[%s2026_s0 + $0x170] ss:$8 sps:$4 sm:$0xff]   ;;  %v1304_v48 = vld [vmem:[%s2026_s0 + $0x184] ss:$8 sps:$4 sm:$0xff]   ;;  %v1306_v49 = vld [vmem:[%s2026_s0 + $0x80] ss:$8 sps:$4 sm:$0xff]  }
  0x10   :  { %v1307_v50 = vld [vmem:[%s2026_s0 + $0x180] ss:$8 sps:$4 sm:$0xff]   ;;  %v1308_v51 = vld [vmem:[%s2026_s0 + $0x94] ss:$8 sps:$4 sm:$0xff]   ;;  %v1312_v53 = vld [vmem:[%s2026_s0 + $0x90] ss:$8 sps:$4 sm:$0xff]  }
  0x11   :  { %v1310_v52 = vld [vmem:[%s2026_s0 + $0x194] ss:$8 sps:$4 sm:$0xff]   ;;  %v1313_v54 = vld [vmem:[%s2026_s0 + $0x190] ss:$8 sps:$4 sm:$0xff]   ;;  %v1314_v55 = vld [vmem:[%s2026_s0 + $0xa4] ss:$8 sps:$4 sm:$0xff]  }
  0x12   :  { %559 = vmatpush1.bf16.msra.mxu0 %v1248_v7  ;;  %1236 = vmatpush1.bf16.msra.mxu1 %v1248_v7  ;;  %v1316_v56 = vld [vmem:[%s2026_s0 + $0x1a4] ss:$8 sps:$4 sm:$0xff]   ;;  %v1318_v57 = vld [vmem:[%s2026_s0 + $0xa0] ss:$8 sps:$4 sm:$0xff]   ;;  %v1320_v59 = vld [vmem:[%s2026_s0 + $0xb4] ss:$8 sps:$4 sm:$0xff]  }
  0x13   :  { %560 = vmatprep.subr.bf16.mxu0 %v1350_v0  ;;  %1227 = vmatprep.subr.bf16.mxu1 %v1350_v0  ;;  %v1319_v58 = vld [vmem:[%s2026_s0 + $0x1a0] ss:$8 sps:$4 sm:$0xff]   ;;  %v1322_v60 = vld [vmem:[%s2026_s0 + $0x1b4] ss:$8 sps:$4 sm:$0xff]   ;;  %v1324_v61 = vld [vmem:[%s2026_s0 + $0xb0] ss:$8 sps:$4 sm:$0xff]  }
  0x14   :  { %v1325_v62 = vld [vmem:[%s2026_s0 + $0x1b0] ss:$8 sps:$4 sm:$0xff]   ;;  %v1326_v63 = vld [vmem:[%s2026_s0 + $0xc4] ss:$8 sps:$4 sm:$0xff]   ;;  %v1330_v1 = vld [vmem:[%s2026_s0 + $0xc0] ss:$8 sps:$4 sm:$0xff]  }
  0x15   :  { %v1331_v2 = vld [vmem:[%s2026_s0 + $0x1c0] ss:$8 sps:$4 sm:$0xff]   ;;  %v1332_v3 = vld [vmem:[%s2026_s0 + $0xd4] ss:$8 sps:$4 sm:$0xff]   ;;  %v1336_v5 = vld [vmem:[%s2026_s0 + $0xd0] ss:$8 sps:$4 sm:$0xff]  }
  0x16   :  { %561 = vmatpush1.bf16.msra.mxu0 %v1249_v8  ;;  %1237 = vmatpush1.bf16.msra.mxu1 %v1249_v8  ;;  %v1334_v4 = vld [vmem:[%s2026_s0 + $0x1d4] ss:$8 sps:$4 sm:$0xff]   ;;  %v1337_v6 = vld [vmem:[%s2026_s0 + $0x1d0] ss:$8 sps:$4 sm:$0xff]   ;;  %v1338_v7 = vld [vmem:[%s2026_s0 + $0xe4] ss:$8 sps:$4 sm:$0xff]  }
  0x17   :  { %562 = vmatprep.subr.bf16.mxu0 %v1350_v0  ;;  %1228 = vmatprep.subr.bf16.mxu1 %v1350_v0  ;;  %v1340_v8 = vld [vmem:[%s2026_s0 + $0x1e4] ss:$8 sps:$4 sm:$0xff]   ;;  %v1344_v11 = vld [vmem:[%s2026_s0 + $0xf4] ss:$8 sps:$4 sm:$0xff]   ;;  %v1349_v14 = vld [vmem:[%s2026_s0 + $0x1f0] ss:$8 sps:$4 sm:$0xff]  }
  0x18   :  { %v1346_v12 = vld [vmem:[%s2026_s0 + $0x1f4] ss:$8 sps:$4 sm:$0xff]   ;;  %v1634_v15 = vld [vmem:[%s2027_s2] ss:$0 sm:$0xff] }
  0x1a   :  { %563 = vmatpush1.bf16.msra.mxu0 %v1250_v9  ;;  %1238 = vmatpush1.bf16.msra.mxu1 %v1250_v9  ;;  %v1342_v9 = vld [vmem:[%s2026_s0 + $0xe0] ss:$8 sps:$4 sm:$0xff]  }
  0x1b   :  { %564 = vmatprep.subr.bf16.mxu0 %v1350_v0  ;;  %1229 = vmatprep.subr.bf16.mxu1 %v1350_v0 }
  0x1e   :  { %565 = vmatpush1.bf16.msra.mxu0 %v1251_v10  ;;  %1239 = vmatpush1.bf16.msra.mxu1 %v1251_v10  ;;  %v1343_v10 = vld [vmem:[%s2026_s0 + $0x1e0] ss:$8 sps:$4 sm:$0xff]  }
  0x1f   :  { %566 = vmatprep.subr.bf16.mxu0 %v1350_v0  ;;  %1230 = vmatprep.subr.bf16.mxu1 %v1350_v0 }
  0x22   :  { %567 = vmatpush1.bf16.msra.mxu0 %v1252_v13  ;;  %1240 = vmatpush1.bf16.msra.mxu1 %v1252_v13  ;;  %v1348_v13 = vld [vmem:[%s2026_s0 + $0xf0] ss:$8 sps:$4 sm:$0xff]  }
  0x23   :  { %568 = vmatprep.subr.bf16.mxu0 %v1350_v0  ;;  %1231 = vmatprep.subr.bf16.mxu1 %v1350_v0  ;;  %v1328_v0 = vld [vmem:[%s2026_s0 + $0x1c4] ss:$8 sps:$4 sm:$0xff]  }
  0x26   :  { %569 = vmatpush1.bf16.msra.mxu0 %v548_v16  ;;  %1241 = vmatpush1.bf16.msra.mxu1 %v548_v16 }
  0x29   :  { %583 = vmatmul.mubr.bf16.vlgmr.msra.gmra.mrb[0].mxu0 %v1254_v17  ;;  %711 = vmatmul.mubr.bf16.vlgmr.msra.gmra.mrb[0].mxu1 %v1257_v18  ;;  %v1639_v17 = vld [vmem:[%s2028_s3] ss:$0 sm:$0xff] }
  0x2a   :  { %1189 = vmatprep.mubr.msk.bf16.mxu0 %vm446_vm0, %v1260_v19  ;;  %1205 = vmatprep.mubr.msk.bf16.mxu1 %vm446_vm0, %v1262_v20 }
  0x31   :  { %591 = vmatmul.mubr.bf16.gmra.mrb[4].mxu0 %v1264_v21  ;;  %719 = vmatmul.mubr.bf16.gmra.mrb[4].mxu1 %v1265_v22 }
  0x32   :  { %1190 = vmatprep.mubr.msk.bf16.mxu0 %vm446_vm0, %v1266_v23  ;;  %1206 = vmatprep.mubr.msk.bf16.mxu1 %vm446_vm0, %v1268_v24 }
  0x39   :  { %599 = vmatmul.mubr.bf16.gmra.mrb[8].mxu0 %v1270_v25  ;;  %727 = vmatmul.mubr.bf16.gmra.mrb[8].mxu1 %v1271_v26 }
  0x3a   :  { %1191 = vmatprep.mubr.msk.bf16.mxu0 %vm446_vm0, %v1272_v27  ;;  %1207 = vmatprep.mubr.msk.bf16.mxu1 %vm446_vm0, %v1274_v28 }
  0x41   :  { %607 = vmatmul.mubr.bf16.gmra.mrb[12].mxu0 %v1276_v29  ;;  %735 = vmatmul.mubr.bf16.gmra.mrb[12].mxu1 %v1277_v30 }
  0x42   :  { %1192 = vmatprep.mubr.msk.bf16.mxu0 %vm446_vm0, %v1278_v31  ;;  %1208 = vmatprep.mubr.msk.bf16.mxu1 %vm446_vm0, %v1280_v32 }
  0x49   :  { %615 = vmatmul.mubr.bf16.gmra.mrb[16].mxu0 %v1282_v33  ;;  %743 = vmatmul.mubr.bf16.gmra.mrb[16].mxu1 %v1283_v34 }
  0x4a   :  { %1193 = vmatprep.mubr.msk.bf16.mxu0 %vm446_vm0, %v1284_v35  ;;  %1209 = vmatprep.mubr.msk.bf16.mxu1 %vm446_vm0, %v1286_v36 }
  0x51   :  { %623 = vmatmul.mubr.bf16.gmra.mrb[20].mxu0 %v1288_v37  ;;  %751 = vmatmul.mubr.bf16.gmra.mrb[20].mxu1 %v1289_v38 }
  0x52   :  { %1194 = vmatprep.mubr.msk.bf16.mxu0 %vm446_vm0, %v1290_v39  ;;  %1210 = vmatprep.mubr.msk.bf16.mxu1 %vm446_vm0, %v1292_v40 }
  0x59   :  { %631 = vmatmul.mubr.bf16.gmra.mrb[24].mxu0 %v1294_v41  ;;  %759 = vmatmul.mubr.bf16.gmra.mrb[24].mxu1 %v1295_v42 }
  0x5a   :  { %1195 = vmatprep.mubr.msk.bf16.mxu0 %vm446_vm0, %v1296_v43  ;;  %1211 = vmatprep.mubr.msk.bf16.mxu1 %vm446_vm0, %v1298_v44 }
  0x61   :  { %639 = vmatmul.mubr.bf16.gmra.mrb[28].mxu0 %v1300_v45  ;;  %767 = vmatmul.mubr.bf16.gmra.mrb[28].mxu1 %v1301_v46 }
  0x62   :  { %1196 = vmatprep.mubr.msk.bf16.mxu0 %vm446_vm0, %v1302_v47  ;;  %1212 = vmatprep.mubr.msk.bf16.mxu1 %vm446_vm0, %v1304_v48 }
  0x69   :  { %647 = vmatmul.mubr.bf16.gmra.mrb[32].mxu0 %v1306_v49  ;;  %775 = vmatmul.mubr.bf16.gmra.mrb[32].mxu1 %v1307_v50 }
  0x6a   :  { %1197 = vmatprep.mubr.msk.bf16.mxu0 %vm446_vm0, %v1308_v51  ;;  %1213 = vmatprep.mubr.msk.bf16.mxu1 %vm446_vm0, %v1310_v52 }
  0x71   :  { %655 = vmatmul.mubr.bf16.gmra.mrb[36].mxu0 %v1312_v53  ;;  %783 = vmatmul.mubr.bf16.gmra.mrb[36].mxu1 %v1313_v54 }
  0x72   :  { %1198 = vmatprep.mubr.msk.bf16.mxu0 %vm446_vm0, %v1314_v55  ;;  %1214 = vmatprep.mubr.msk.bf16.mxu1 %vm446_vm0, %v1316_v56 }
  0x79   :  { %663 = vmatmul.mubr.bf16.gmra.mrb[40].mxu0 %v1318_v57  ;;  %791 = vmatmul.mubr.bf16.gmra.mrb[40].mxu1 %v1319_v58 }
  0x7a   :  { %1199 = vmatprep.mubr.msk.bf16.mxu0 %vm446_vm0, %v1320_v59  ;;  %1215 = vmatprep.mubr.msk.bf16.mxu1 %vm446_vm0, %v1322_v60 }
  0x81   :  { %671 = vmatmul.mubr.bf16.gmra.mrb[44].mxu0 %v1324_v61  ;;  %799 = vmatmul.mubr.bf16.gmra.mrb[44].mxu1 %v1325_v62 }
  0x82   :  { %1200 = vmatprep.mubr.msk.bf16.mxu0 %vm446_vm0, %v1326_v63  ;;  %1216 = vmatprep.mubr.msk.bf16.mxu1 %vm446_vm0, %v1328_v0 }
  0x89   :  { %679 = vmatmul.mubr.bf16.gmra.mrb[48].mxu0 %v1330_v1  ;;  %807 = vmatmul.mubr.bf16.gmra.mrb[48].mxu1 %v1331_v2 }
  0x8a   :  { %1201 = vmatprep.mubr.msk.bf16.mxu0 %vm446_vm0, %v1332_v3  ;;  %1217 = vmatprep.mubr.msk.bf16.mxu1 %vm446_vm0, %v1334_v4 }
  0x91   :  { %687 = vmatmul.mubr.bf16.gmra.mrb[52].mxu0 %v1336_v5  ;;  %815 = vmatmul.mubr.bf16.gmra.mrb[52].mxu1 %v1337_v6 }
  0x92   :  { %1202 = vmatprep.mubr.msk.bf16.mxu0 %vm446_vm0, %v1338_v7  ;;  %1218 = vmatprep.mubr.msk.bf16.mxu1 %vm446_vm0, %v1340_v8 }
  0x99   :  { %695 = vmatmul.mubr.bf16.gmra.mrb[56].mxu0 %v1342_v9  ;;  %823 = vmatmul.mubr.bf16.gmra.mrb[56].mxu1 %v1343_v10 }
  0x9a   :  { %1203 = vmatprep.mubr.msk.bf16.mxu0 %vm446_vm0, %v1344_v11  ;;  %1219 = vmatprep.mubr.msk.bf16.mxu1 %vm446_vm0, %v1346_v12 }
  0xa1   :  { %703 = vmatmul.mubr.bf16.gmra.mrb[60].mxu0 %v1348_v13  ;;  %831 = vmatmul.mubr.bf16.gmra.mrb[60].mxu1 %v1349_v14 }
  0xfc   :  { %v584_v16 = vpop.f32.mrb[0].mxu0  ;;  %v712_v18 = vpop.f32.mrb[0].mxu1 }
  0xfd   :  { %v846_v19 = vmul.f32 %v1634_v15, %v584_v16  ;;  %v878_v20 = vmul.f32 %v1634_v15, %v712_v18  ;;  %v586_v21 = vpop.f32.mrb[1].mxu0  ;;  %v714_v22 = vpop.f32.mrb[1].mxu1 }
  0xfe   :  { %v587_v23 = vpop.f32.mrb[2].mxu0  ;;  %v715_v24 = vpop.f32.mrb[2].mxu1 }
  0xff   :  { %v917_v25 = vadd.f32 %v1639_v17, %v846_v19  ;;  %v949_v26 = vadd.f32 %v1639_v17, %v878_v20  ;;  %v847_v27 = vmul.f32 %v1634_v15, %v587_v23  ;;  %v879_v28 = vmul.f32 %v1634_v15, %v715_v24  ;;  %v589_v29 = vpop.f32.mrb[3].mxu0  ;;  %v717_v30 = vpop.f32.mrb[3].mxu1 }
 0x101   :  { %v981_v31 = vmax.f32 %v917_v25, 0.0  ;;  %v1013_v32 = vmax.f32 %v949_v26, 0.0  ;;  %v918_v33 = vadd.f32 %v1639_v17, %v847_v27  ;;  %v950_v34 = vadd.f32 %v1639_v17, %v879_v28 }
 0x103   :  { %1046 = vst.msk [vmem:[%s2029_s4] sm:$0xff] %vm1045_vm3, %v981_v31  ;;  %1078 = vst.msk [vmem:[%s2029_s4 + $0x100] sm:$0xff] %vm1045_vm3, %v1013_v32  ;;  %v982_v35 = vmax.f32 %v918_v33, 0.0  ;;  %v1014_v36 = vmax.f32 %v950_v34, 0.0 }
 0x104   :  { %v592_v37 = vpop.f32.mrb[4].mxu0  ;;  %v720_v38 = vpop.f32.mrb[4].mxu1 }
 0x105   :  { %1047 = vst.msk [vmem:[%s2029_s4 + $0x8] sm:$0xff] %vm1045_vm3, %v982_v35  ;;  %1079 = vst.msk [vmem:[%s2029_s4 + $0x108] sm:$0xff] %vm1045_vm3, %v1014_v36  ;;  %v848_v39 = vmul.f32 %v1634_v15, %v592_v37  ;;  %v880_v40 = vmul.f32 %v1634_v15, %v720_v38  ;;  %v594_v41 = vpop.f32.mrb[5].mxu0  ;;  %v722_v42 = vpop.f32.mrb[5].mxu1 }
 0x106   :  { %v595_v43 = vpop.f32.mrb[6].mxu0  ;;  %v723_v44 = vpop.f32.mrb[6].mxu1 }
 0x107   :  { %v919_v45 = vadd.f32 %v1639_v17, %v848_v39  ;;  %v951_v46 = vadd.f32 %v1639_v17, %v880_v40  ;;  %v849_v47 = vmul.f32 %v1634_v15, %v595_v43  ;;  %v881_v48 = vmul.f32 %v1634_v15, %v723_v44  ;;  %v597_v49 = vpop.f32.mrb[7].mxu0  ;;  %v725_v50 = vpop.f32.mrb[7].mxu1 }
 0x109   :  { %v983_v51 = vmax.f32 %v919_v45, 0.0  ;;  %v1015_v52 = vmax.f32 %v951_v46, 0.0  ;;  %v920_v53 = vadd.f32 %v1639_v17, %v849_v47  ;;  %v952_v54 = vadd.f32 %v1639_v17, %v881_v48 }
 0x10b   :  { %1048 = vst.msk [vmem:[%s2029_s4 + $0x10] sm:$0xff] %vm1045_vm3, %v983_v51  ;;  %1080 = vst.msk [vmem:[%s2029_s4 + $0x110] sm:$0xff] %vm1045_vm3, %v1015_v52  ;;  %v984_v55 = vmax.f32 %v920_v53, 0.0  ;;  %v1016_v56 = vmax.f32 %v952_v54, 0.0 }
 0x10c   :  { %v600_v57 = vpop.f32.mrb[8].mxu0  ;;  %v728_v58 = vpop.f32.mrb[8].mxu1 }
 0x10d   :  { %1049 = vst.msk [vmem:[%s2029_s4 + $0x18] sm:$0xff] %vm1045_vm3, %v984_v55  ;;  %1081 = vst.msk [vmem:[%s2029_s4 + $0x118] sm:$0xff] %vm1045_vm3, %v1016_v56  ;;  %v850_v59 = vmul.f32 %v1634_v15, %v600_v57  ;;  %v882_v60 = vmul.f32 %v1634_v15, %v728_v58  ;;  %v602_v61 = vpop.f32.mrb[9].mxu0  ;;  %v730_v62 = vpop.f32.mrb[9].mxu1 }
 0x10e   :  { %v603_v63 = vpop.f32.mrb[10].mxu0  ;;  %v731_v0 = vpop.f32.mrb[10].mxu1 }
 0x10f   :  { %v921_v1 = vadd.f32 %v1639_v17, %v850_v59  ;;  %v953_v2 = vadd.f32 %v1639_v17, %v882_v60  ;;  %v851_v3 = vmul.f32 %v1634_v15, %v603_v63  ;;  %v883_v4 = vmul.f32 %v1634_v15, %v731_v0  ;;  %v605_v5 = vpop.f32.mrb[11].mxu0  ;;  %v733_v6 = vpop.f32.mrb[11].mxu1 }
 0x111   :  { %v985_v7 = vmax.f32 %v921_v1, 0.0  ;;  %v1017_v8 = vmax.f32 %v953_v2, 0.0  ;;  %v922_v9 = vadd.f32 %v1639_v17, %v851_v3  ;;  %v954_v10 = vadd.f32 %v1639_v17, %v883_v4 }
 0x113   :  { %1050 = vst.msk [vmem:[%s2029_s4 + $0x20] sm:$0xff] %vm1045_vm3, %v985_v7  ;;  %1082 = vst.msk [vmem:[%s2029_s4 + $0x120] sm:$0xff] %vm1045_vm3, %v1017_v8  ;;  %v986_v11 = vmax.f32 %v922_v9, 0.0  ;;  %v1018_v12 = vmax.f32 %v954_v10, 0.0 }
 0x114   :  { %v608_v13 = vpop.f32.mrb[12].mxu0  ;;  %v736_v14 = vpop.f32.mrb[12].mxu1 }
 0x115   :  { %1051 = vst.msk [vmem:[%s2029_s4 + $0x28] sm:$0xff] %vm1045_vm3, %v986_v11  ;;  %1083 = vst.msk [vmem:[%s2029_s4 + $0x128] sm:$0xff] %vm1045_vm3, %v1018_v12  ;;  %v852_v16 = vmul.f32 %v1634_v15, %v608_v13  ;;  %v884_v18 = vmul.f32 %v1634_v15, %v736_v14  ;;  %v610_v19 = vpop.f32.mrb[13].mxu0  ;;  %v738_v20 = vpop.f32.mrb[13].mxu1 }
 0x116   :  { %v611_v21 = vpop.f32.mrb[14].mxu0  ;;  %v739_v22 = vpop.f32.mrb[14].mxu1 }
 0x117   :  { %v923_v23 = vadd.f32 %v1639_v17, %v852_v16  ;;  %v955_v24 = vadd.f32 %v1639_v17, %v884_v18  ;;  %v853_v25 = vmul.f32 %v1634_v15, %v611_v21  ;;  %v885_v26 = vmul.f32 %v1634_v15, %v739_v22  ;;  %v613_v27 = vpop.f32.mrb[15].mxu0  ;;  %v741_v28 = vpop.f32.mrb[15].mxu1 }
 0x119   :  { %v987_v29 = vmax.f32 %v923_v23, 0.0  ;;  %v1019_v30 = vmax.f32 %v955_v24, 0.0  ;;  %v924_v31 = vadd.f32 %v1639_v17, %v853_v25  ;;  %v956_v32 = vadd.f32 %v1639_v17, %v885_v26 }
 0x11b   :  { %1052 = vst.msk [vmem:[%s2029_s4 + $0x30] sm:$0xff] %vm1045_vm3, %v987_v29  ;;  %1084 = vst.msk [vmem:[%s2029_s4 + $0x130] sm:$0xff] %vm1045_vm3, %v1019_v30  ;;  %v988_v33 = vmax.f32 %v924_v31, 0.0  ;;  %v1020_v34 = vmax.f32 %v956_v32, 0.0 }
 0x11c   :  { %v616_v35 = vpop.f32.mrb[16].mxu0  ;;  %v744_v36 = vpop.f32.mrb[16].mxu1 }
 0x11d   :  { %1053 = vst.msk [vmem:[%s2029_s4 + $0x38] sm:$0xff] %vm1045_vm3, %v988_v33  ;;  %1085 = vst.msk [vmem:[%s2029_s4 + $0x138] sm:$0xff] %vm1045_vm3, %v1020_v34  ;;  %v854_v37 = vmul.f32 %v1634_v15, %v616_v35  ;;  %v886_v38 = vmul.f32 %v1634_v15, %v744_v36  ;;  %v618_v39 = vpop.f32.mrb[17].mxu0  ;;  %v746_v40 = vpop.f32.mrb[17].mxu1 }
 0x11e   :  { %v619_v41 = vpop.f32.mrb[18].mxu0  ;;  %v747_v42 = vpop.f32.mrb[18].mxu1 }
 0x11f   :  { %v925_v43 = vadd.f32 %v1639_v17, %v854_v37  ;;  %v957_v44 = vadd.f32 %v1639_v17, %v886_v38  ;;  %v855_v45 = vmul.f32 %v1634_v15, %v619_v41  ;;  %v887_v46 = vmul.f32 %v1634_v15, %v747_v42  ;;  %v621_v47 = vpop.f32.mrb[19].mxu0  ;;  %v749_v48 = vpop.f32.mrb[19].mxu1 }
 0x121   :  { %v989_v49 = vmax.f32 %v925_v43, 0.0  ;;  %v1021_v50 = vmax.f32 %v957_v44, 0.0  ;;  %v926_v51 = vadd.f32 %v1639_v17, %v855_v45  ;;  %v958_v52 = vadd.f32 %v1639_v17, %v887_v46 }
 0x123   :  { %1054 = vst.msk [vmem:[%s2029_s4 + $0x40] sm:$0xff] %vm1045_vm3, %v989_v49  ;;  %1086 = vst.msk [vmem:[%s2029_s4 + $0x140] sm:$0xff] %vm1045_vm3, %v1021_v50  ;;  %v990_v53 = vmax.f32 %v926_v51, 0.0  ;;  %v1022_v54 = vmax.f32 %v958_v52, 0.0 }
 0x124   :  { %v624_v55 = vpop.f32.mrb[20].mxu0  ;;  %v752_v56 = vpop.f32.mrb[20].mxu1 }
 0x125   :  { %1055 = vst.msk [vmem:[%s2029_s4 + $0x48] sm:$0xff] %vm1045_vm3, %v990_v53  ;;  %1087 = vst.msk [vmem:[%s2029_s4 + $0x148] sm:$0xff] %vm1045_vm3, %v1022_v54  ;;  %v856_v57 = vmul.f32 %v1634_v15, %v624_v55  ;;  %v888_v58 = vmul.f32 %v1634_v15, %v752_v56  ;;  %v626_v59 = vpop.f32.mrb[21].mxu0  ;;  %v754_v60 = vpop.f32.mrb[21].mxu1 }
 0x126   :  { %v627_v61 = vpop.f32.mrb[22].mxu0  ;;  %v755_v62 = vpop.f32.mrb[22].mxu1 }
 0x127   :  { %v927_v63 = vadd.f32 %v1639_v17, %v856_v57  ;;  %v959_v0 = vadd.f32 %v1639_v17, %v888_v58  ;;  %v857_v1 = vmul.f32 %v1634_v15, %v627_v61  ;;  %v889_v2 = vmul.f32 %v1634_v15, %v755_v62  ;;  %v629_v3 = vpop.f32.mrb[23].mxu0  ;;  %v757_v4 = vpop.f32.mrb[23].mxu1 }
 0x129   :  { %v991_v5 = vmax.f32 %v927_v63, 0.0  ;;  %v1023_v6 = vmax.f32 %v959_v0, 0.0  ;;  %v928_v7 = vadd.f32 %v1639_v17, %v857_v1  ;;  %v960_v8 = vadd.f32 %v1639_v17, %v889_v2 }
 0x12b   :  { %1056 = vst.msk [vmem:[%s2029_s4 + $0x50] sm:$0xff] %vm1045_vm3, %v991_v5  ;;  %1088 = vst.msk [vmem:[%s2029_s4 + $0x150] sm:$0xff] %vm1045_vm3, %v1023_v6  ;;  %v992_v9 = vmax.f32 %v928_v7, 0.0  ;;  %v1024_v10 = vmax.f32 %v960_v8, 0.0 }
 0x12c   :  { %v632_v11 = vpop.f32.mrb[24].mxu0  ;;  %v760_v12 = vpop.f32.mrb[24].mxu1 }
 0x12d   :  { %1057 = vst.msk [vmem:[%s2029_s4 + $0x58] sm:$0xff] %vm1045_vm3, %v992_v9  ;;  %1089 = vst.msk [vmem:[%s2029_s4 + $0x158] sm:$0xff] %vm1045_vm3, %v1024_v10  ;;  %v858_v13 = vmul.f32 %v1634_v15, %v632_v11  ;;  %v890_v14 = vmul.f32 %v1634_v15, %v760_v12  ;;  %v634_v16 = vpop.f32.mrb[25].mxu0  ;;  %v762_v18 = vpop.f32.mrb[25].mxu1 }
 0x12e   :  { %v635_v19 = vpop.f32.mrb[26].mxu0  ;;  %v763_v20 = vpop.f32.mrb[26].mxu1 }
 0x12f   :  { %v929_v21 = vadd.f32 %v1639_v17, %v858_v13  ;;  %v961_v22 = vadd.f32 %v1639_v17, %v890_v14  ;;  %v859_v23 = vmul.f32 %v1634_v15, %v635_v19  ;;  %v891_v24 = vmul.f32 %v1634_v15, %v763_v20  ;;  %v637_v25 = vpop.f32.mrb[27].mxu0  ;;  %v765_v26 = vpop.f32.mrb[27].mxu1 }
 0x131   :  { %v993_v27 = vmax.f32 %v929_v21, 0.0  ;;  %v1025_v28 = vmax.f32 %v961_v22, 0.0  ;;  %v930_v29 = vadd.f32 %v1639_v17, %v859_v23  ;;  %v962_v30 = vadd.f32 %v1639_v17, %v891_v24 }
 0x133   :  { %1058 = vst.msk [vmem:[%s2029_s4 + $0x60] sm:$0xff] %vm1045_vm3, %v993_v27  ;;  %1090 = vst.msk [vmem:[%s2029_s4 + $0x160] sm:$0xff] %vm1045_vm3, %v1025_v28  ;;  %v994_v31 = vmax.f32 %v930_v29, 0.0  ;;  %v1026_v32 = vmax.f32 %v962_v30, 0.0 }
 0x134   :  { %v640_v33 = vpop.f32.mrb[28].mxu0  ;;  %v768_v34 = vpop.f32.mrb[28].mxu1 }
 0x135   :  { %1059 = vst.msk [vmem:[%s2029_s4 + $0x68] sm:$0xff] %vm1045_vm3, %v994_v31  ;;  %1091 = vst.msk [vmem:[%s2029_s4 + $0x168] sm:$0xff] %vm1045_vm3, %v1026_v32  ;;  %v860_v35 = vmul.f32 %v1634_v15, %v640_v33  ;;  %v892_v36 = vmul.f32 %v1634_v15, %v768_v34  ;;  %v642_v37 = vpop.f32.mrb[29].mxu0  ;;  %v770_v38 = vpop.f32.mrb[29].mxu1 }
 0x136   :  { %v643_v39 = vpop.f32.mrb[30].mxu0  ;;  %v771_v40 = vpop.f32.mrb[30].mxu1 }
 0x137   :  { %v931_v41 = vadd.f32 %v1639_v17, %v860_v35  ;;  %v963_v42 = vadd.f32 %v1639_v17, %v892_v36  ;;  %v861_v43 = vmul.f32 %v1634_v15, %v643_v39  ;;  %v893_v44 = vmul.f32 %v1634_v15, %v771_v40  ;;  %v645_v45 = vpop.f32.mrb[31].mxu0  ;;  %v773_v46 = vpop.f32.mrb[31].mxu1 }
 0x139   :  { %v995_v47 = vmax.f32 %v931_v41, 0.0  ;;  %v1027_v48 = vmax.f32 %v963_v42, 0.0  ;;  %v932_v49 = vadd.f32 %v1639_v17, %v861_v43  ;;  %v964_v50 = vadd.f32 %v1639_v17, %v893_v44 }
 0x13b   :  { %1060 = vst.msk [vmem:[%s2029_s4 + $0x70] sm:$0xff] %vm1045_vm3, %v995_v47  ;;  %1092 = vst.msk [vmem:[%s2029_s4 + $0x170] sm:$0xff] %vm1045_vm3, %v1027_v48  ;;  %v996_v51 = vmax.f32 %v932_v49, 0.0  ;;  %v1028_v52 = vmax.f32 %v964_v50, 0.0 }
 0x13c   :  { %v648_v53 = vpop.f32.mrb[32].mxu0  ;;  %v776_v54 = vpop.f32.mrb[32].mxu1 }
 0x13d   :  { %1061 = vst.msk [vmem:[%s2029_s4 + $0x78] sm:$0xff] %vm1045_vm3, %v996_v51  ;;  %1093 = vst.msk [vmem:[%s2029_s4 + $0x178] sm:$0xff] %vm1045_vm3, %v1028_v52  ;;  %v862_v55 = vmul.f32 %v1634_v15, %v648_v53  ;;  %v894_v56 = vmul.f32 %v1634_v15, %v776_v54  ;;  %v650_v57 = vpop.f32.mrb[33].mxu0  ;;  %v778_v58 = vpop.f32.mrb[33].mxu1 }
 0x13e   :  { %v651_v59 = vpop.f32.mrb[34].mxu0  ;;  %v779_v60 = vpop.f32.mrb[34].mxu1 }
 0x13f   :  { %v933_v61 = vadd.f32 %v1639_v17, %v862_v55  ;;  %v965_v62 = vadd.f32 %v1639_v17, %v894_v56  ;;  %v863_v63 = vmul.f32 %v1634_v15, %v651_v59  ;;  %v895_v0 = vmul.f32 %v1634_v15, %v779_v60  ;;  %v653_v1 = vpop.f32.mrb[35].mxu0  ;;  %v781_v2 = vpop.f32.mrb[35].mxu1 }
 0x141   :  { %v997_v3 = vmax.f32 %v933_v61, 0.0  ;;  %v1029_v4 = vmax.f32 %v965_v62, 0.0  ;;  %v934_v5 = vadd.f32 %v1639_v17, %v863_v63  ;;  %v966_v6 = vadd.f32 %v1639_v17, %v895_v0 }
 0x143   :  { %1062 = vst.msk [vmem:[%s2029_s4 + $0x80] sm:$0xff] %vm1045_vm3, %v997_v3  ;;  %1094 = vst.msk [vmem:[%s2029_s4 + $0x180] sm:$0xff] %vm1045_vm3, %v1029_v4  ;;  %v998_v7 = vmax.f32 %v934_v5, 0.0  ;;  %v1030_v8 = vmax.f32 %v966_v6, 0.0 }
 0x144   :  { %v656_v9 = vpop.f32.mrb[36].mxu0  ;;  %v784_v10 = vpop.f32.mrb[36].mxu1 }
 0x145   :  { %1063 = vst.msk [vmem:[%s2029_s4 + $0x88] sm:$0xff] %vm1045_vm3, %v998_v7  ;;  %1095 = vst.msk [vmem:[%s2029_s4 + $0x188] sm:$0xff] %vm1045_vm3, %v1030_v8  ;;  %v864_v11 = vmul.f32 %v1634_v15, %v656_v9  ;;  %v896_v12 = vmul.f32 %v1634_v15, %v784_v10  ;;  %v658_v13 = vpop.f32.mrb[37].mxu0  ;;  %v786_v14 = vpop.f32.mrb[37].mxu1 }
 0x146   :  { %v659_v16 = vpop.f32.mrb[38].mxu0  ;;  %v787_v18 = vpop.f32.mrb[38].mxu1 }
 0x147   :  { %v935_v19 = vadd.f32 %v1639_v17, %v864_v11  ;;  %v967_v20 = vadd.f32 %v1639_v17, %v896_v12  ;;  %v865_v21 = vmul.f32 %v1634_v15, %v659_v16  ;;  %v897_v22 = vmul.f32 %v1634_v15, %v787_v18  ;;  %v661_v23 = vpop.f32.mrb[39].mxu0  ;;  %v789_v24 = vpop.f32.mrb[39].mxu1 }
 0x149   :  { %v999_v25 = vmax.f32 %v935_v19, 0.0  ;;  %v1031_v26 = vmax.f32 %v967_v20, 0.0  ;;  %v936_v27 = vadd.f32 %v1639_v17, %v865_v21  ;;  %v968_v28 = vadd.f32 %v1639_v17, %v897_v22 }
 0x14b   :  { %1064 = vst.msk [vmem:[%s2029_s4 + $0x90] sm:$0xff] %vm1045_vm3, %v999_v25  ;;  %1096 = vst.msk [vmem:[%s2029_s4 + $0x190] sm:$0xff] %vm1045_vm3, %v1031_v26  ;;  %v1000_v29 = vmax.f32 %v936_v27, 0.0  ;;  %v1032_v30 = vmax.f32 %v968_v28, 0.0 }
 0x14c   :  { %v664_v31 = vpop.f32.mrb[40].mxu0  ;;  %v792_v32 = vpop.f32.mrb[40].mxu1 }
 0x14d   :  { %1065 = vst.msk [vmem:[%s2029_s4 + $0x98] sm:$0xff] %vm1045_vm3, %v1000_v29  ;;  %1097 = vst.msk [vmem:[%s2029_s4 + $0x198] sm:$0xff] %vm1045_vm3, %v1032_v30  ;;  %v866_v33 = vmul.f32 %v1634_v15, %v664_v31  ;;  %v898_v34 = vmul.f32 %v1634_v15, %v792_v32  ;;  %v666_v35 = vpop.f32.mrb[41].mxu0  ;;  %v794_v36 = vpop.f32.mrb[41].mxu1 }
 0x14e   :  { %v667_v37 = vpop.f32.mrb[42].mxu0  ;;  %v795_v38 = vpop.f32.mrb[42].mxu1 }
 0x14f   :  { %v937_v39 = vadd.f32 %v1639_v17, %v866_v33  ;;  %v969_v40 = vadd.f32 %v1639_v17, %v898_v34  ;;  %v867_v41 = vmul.f32 %v1634_v15, %v667_v37  ;;  %v899_v42 = vmul.f32 %v1634_v15, %v795_v38  ;;  %v669_v43 = vpop.f32.mrb[43].mxu0  ;;  %v797_v44 = vpop.f32.mrb[43].mxu1 }
 0x151   :  { %v1001_v45 = vmax.f32 %v937_v39, 0.0  ;;  %v1033_v46 = vmax.f32 %v969_v40, 0.0  ;;  %v938_v47 = vadd.f32 %v1639_v17, %v867_v41  ;;  %v970_v48 = vadd.f32 %v1639_v17, %v899_v42 }
 0x153   :  { %1066 = vst.msk [vmem:[%s2029_s4 + $0xa0] sm:$0xff] %vm1045_vm3, %v1001_v45  ;;  %1098 = vst.msk [vmem:[%s2029_s4 + $0x1a0] sm:$0xff] %vm1045_vm3, %v1033_v46  ;;  %v1002_v49 = vmax.f32 %v938_v47, 0.0  ;;  %v1034_v50 = vmax.f32 %v970_v48, 0.0 }
 0x154   :  { %v672_v51 = vpop.f32.mrb[44].mxu0  ;;  %v800_v52 = vpop.f32.mrb[44].mxu1 }
 0x155   :  { %1067 = vst.msk [vmem:[%s2029_s4 + $0xa8] sm:$0xff] %vm1045_vm3, %v1002_v49  ;;  %1099 = vst.msk [vmem:[%s2029_s4 + $0x1a8] sm:$0xff] %vm1045_vm3, %v1034_v50  ;;  %v868_v53 = vmul.f32 %v1634_v15, %v672_v51  ;;  %v900_v54 = vmul.f32 %v1634_v15, %v800_v52  ;;  %v674_v55 = vpop.f32.mrb[45].mxu0  ;;  %v802_v56 = vpop.f32.mrb[45].mxu1 }
 0x156   :  { %v675_v57 = vpop.f32.mrb[46].mxu0  ;;  %v803_v58 = vpop.f32.mrb[46].mxu1 }
 0x157   :  { %v939_v59 = vadd.f32 %v1639_v17, %v868_v53  ;;  %v971_v60 = vadd.f32 %v1639_v17, %v900_v54  ;;  %v869_v61 = vmul.f32 %v1634_v15, %v675_v57  ;;  %v901_v62 = vmul.f32 %v1634_v15, %v803_v58  ;;  %v677_v63 = vpop.f32.mrb[47].mxu0  ;;  %v805_v0 = vpop.f32.mrb[47].mxu1 }
 0x159   :  { %v1003_v1 = vmax.f32 %v939_v59, 0.0  ;;  %v1035_v2 = vmax.f32 %v971_v60, 0.0  ;;  %v940_v3 = vadd.f32 %v1639_v17, %v869_v61  ;;  %v972_v4 = vadd.f32 %v1639_v17, %v901_v62 }
 0x15b   :  { %1068 = vst.msk [vmem:[%s2029_s4 + $0xb0] sm:$0xff] %vm1045_vm3, %v1003_v1  ;;  %1100 = vst.msk [vmem:[%s2029_s4 + $0x1b0] sm:$0xff] %vm1045_vm3, %v1035_v2  ;;  %v1004_v5 = vmax.f32 %v940_v3, 0.0  ;;  %v1036_v6 = vmax.f32 %v972_v4, 0.0 }
 0x15c   :  { %v680_v7 = vpop.f32.mrb[48].mxu0  ;;  %v808_v8 = vpop.f32.mrb[48].mxu1 }
 0x15d   :  { %1069 = vst.msk [vmem:[%s2029_s4 + $0xb8] sm:$0xff] %vm1045_vm3, %v1004_v5  ;;  %1101 = vst.msk [vmem:[%s2029_s4 + $0x1b8] sm:$0xff] %vm1045_vm3, %v1036_v6  ;;  %v870_v9 = vmul.f32 %v1634_v15, %v680_v7  ;;  %v902_v10 = vmul.f32 %v1634_v15, %v808_v8  ;;  %v682_v11 = vpop.f32.mrb[49].mxu0  ;;  %v810_v12 = vpop.f32.mrb[49].mxu1 }
 0x15e   :  { %v683_v13 = vpop.f32.mrb[50].mxu0  ;;  %v811_v14 = vpop.f32.mrb[50].mxu1 }
 0x15f   :  { %v941_v16 = vadd.f32 %v1639_v17, %v870_v9  ;;  %v973_v18 = vadd.f32 %v1639_v17, %v902_v10  ;;  %v871_v19 = vmul.f32 %v1634_v15, %v683_v13  ;;  %v903_v20 = vmul.f32 %v1634_v15, %v811_v14  ;;  %v685_v21 = vpop.f32.mrb[51].mxu0  ;;  %v813_v22 = vpop.f32.mrb[51].mxu1 }
 0x161   :  { %v1005_v23 = vmax.f32 %v941_v16, 0.0  ;;  %v1037_v24 = vmax.f32 %v973_v18, 0.0  ;;  %v942_v25 = vadd.f32 %v1639_v17, %v871_v19  ;;  %v974_v26 = vadd.f32 %v1639_v17, %v903_v20 }
 0x163   :  { %1070 = vst.msk [vmem:[%s2029_s4 + $0xc0] sm:$0xff] %vm1045_vm3, %v1005_v23  ;;  %1102 = vst.msk [vmem:[%s2029_s4 + $0x1c0] sm:$0xff] %vm1045_vm3, %v1037_v24  ;;  %v1006_v27 = vmax.f32 %v942_v25, 0.0  ;;  %v1038_v28 = vmax.f32 %v974_v26, 0.0 }
 0x164   :  { %v688_v29 = vpop.f32.mrb[52].mxu0  ;;  %v816_v30 = vpop.f32.mrb[52].mxu1 }
 0x165   :  { %1071 = vst.msk [vmem:[%s2029_s4 + $0xc8] sm:$0xff] %vm1045_vm3, %v1006_v27  ;;  %1103 = vst.msk [vmem:[%s2029_s4 + $0x1c8] sm:$0xff] %vm1045_vm3, %v1038_v28  ;;  %v872_v31 = vmul.f32 %v1634_v15, %v688_v29  ;;  %v904_v32 = vmul.f32 %v1634_v15, %v816_v30  ;;  %v690_v33 = vpop.f32.mrb[53].mxu0  ;;  %v818_v34 = vpop.f32.mrb[53].mxu1 }
 0x166   :  { %v691_v35 = vpop.f32.mrb[54].mxu0  ;;  %v819_v36 = vpop.f32.mrb[54].mxu1 }
 0x167   :  { %v943_v37 = vadd.f32 %v1639_v17, %v872_v31  ;;  %v975_v38 = vadd.f32 %v1639_v17, %v904_v32  ;;  %v873_v39 = vmul.f32 %v1634_v15, %v691_v35  ;;  %v905_v40 = vmul.f32 %v1634_v15, %v819_v36  ;;  %v693_v41 = vpop.f32.mrb[55].mxu0  ;;  %v821_v42 = vpop.f32.mrb[55].mxu1 }
 0x169   :  { %v1007_v43 = vmax.f32 %v943_v37, 0.0  ;;  %v1039_v44 = vmax.f32 %v975_v38, 0.0  ;;  %v944_v45 = vadd.f32 %v1639_v17, %v873_v39  ;;  %v976_v46 = vadd.f32 %v1639_v17, %v905_v40 }
 0x16b   :  { %1072 = vst.msk [vmem:[%s2029_s4 + $0xd0] sm:$0xff] %vm1045_vm3, %v1007_v43  ;;  %1104 = vst.msk [vmem:[%s2029_s4 + $0x1d0] sm:$0xff] %vm1045_vm3, %v1039_v44  ;;  %v1008_v47 = vmax.f32 %v944_v45, 0.0  ;;  %v1040_v48 = vmax.f32 %v976_v46, 0.0 }
 0x16c   :  { %v696_v49 = vpop.f32.mrb[56].mxu0  ;;  %v824_v50 = vpop.f32.mrb[56].mxu1 }
 0x16d   :  { %1073 = vst.msk [vmem:[%s2029_s4 + $0xd8] sm:$0xff] %vm1045_vm3, %v1008_v47  ;;  %1105 = vst.msk [vmem:[%s2029_s4 + $0x1d8] sm:$0xff] %vm1045_vm3, %v1040_v48  ;;  %v874_v51 = vmul.f32 %v1634_v15, %v696_v49  ;;  %v906_v52 = vmul.f32 %v1634_v15, %v824_v50  ;;  %v698_v53 = vpop.f32.mrb[57].mxu0  ;;  %v826_v54 = vpop.f32.mrb[57].mxu1 }
 0x16e   :  { %v699_v55 = vpop.f32.mrb[58].mxu0  ;;  %v827_v56 = vpop.f32.mrb[58].mxu1 }
 0x16f   :  { %v945_v57 = vadd.f32 %v1639_v17, %v874_v51  ;;  %v977_v58 = vadd.f32 %v1639_v17, %v906_v52  ;;  %v875_v59 = vmul.f32 %v1634_v15, %v699_v55  ;;  %v907_v60 = vmul.f32 %v1634_v15, %v827_v56  ;;  %v701_v61 = vpop.f32.mrb[59].mxu0  ;;  %v829_v62 = vpop.f32.mrb[59].mxu1 }
 0x171   :  { %v1009_v63 = vmax.f32 %v945_v57, 0.0  ;;  %v1041_v0 = vmax.f32 %v977_v58, 0.0  ;;  %v946_v1 = vadd.f32 %v1639_v17, %v875_v59  ;;  %v978_v2 = vadd.f32 %v1639_v17, %v907_v60 }
 0x173   :  { %1074 = vst.msk [vmem:[%s2029_s4 + $0xe0] sm:$0xff] %vm1045_vm3, %v1009_v63  ;;  %1106 = vst.msk [vmem:[%s2029_s4 + $0x1e0] sm:$0xff] %vm1045_vm3, %v1041_v0  ;;  %v1010_v3 = vmax.f32 %v946_v1, 0.0  ;;  %v1042_v4 = vmax.f32 %v978_v2, 0.0 }
 0x174   :  { %v704_v5 = vpop.f32.mrb[60].mxu0  ;;  %v832_v6 = vpop.f32.mrb[60].mxu1 }
 0x175   :  { %1075 = vst.msk [vmem:[%s2029_s4 + $0xe8] sm:$0xff] %vm1045_vm3, %v1010_v3  ;;  %1107 = vst.msk [vmem:[%s2029_s4 + $0x1e8] sm:$0xff] %vm1045_vm3, %v1042_v4  ;;  %v876_v7 = vmul.f32 %v1634_v15, %v704_v5  ;;  %v908_v8 = vmul.f32 %v1634_v15, %v832_v6  ;;  %v706_v9 = vpop.f32.mrb[61].mxu0  ;;  %v834_v10 = vpop.f32.mrb[61].mxu1 }
 0x176   :  { %v707_v11 = vpop.f32.mrb[62].mxu0  ;;  %v835_v12 = vpop.f32.mrb[62].mxu1 }
 0x177   :  { %v947_v13 = vadd.f32 %v1639_v17, %v876_v7  ;;  %v979_v14 = vadd.f32 %v1639_v17, %v908_v8  ;;  %v877_v16 = vmul.f32 %v1634_v15, %v707_v11  ;;  %v909_v18 = vmul.f32 %v1634_v15, %v835_v12  ;;  %v709_v19 = vpop.f32.mrb[63].mxu0  ;;  %v837_v20 = vpop.f32.mrb[63].mxu1 }
 0x179   :  { %v1011_v21 = vmax.f32 %v947_v13, 0.0  ;;  %v1043_v22 = vmax.f32 %v979_v14, 0.0  ;;  %v948_v23 = vadd.f32 %v1639_v17, %v877_v16  ;;  %v980_v24 = vadd.f32 %v1639_v17, %v909_v18 }
 0x17b   :  { %1076 = vst.msk [vmem:[%s2029_s4 + $0xf0] sm:$0xff] %vm1045_vm3, %v1011_v21  ;;  %1108 = vst.msk [vmem:[%s2029_s4 + $0x1f0] sm:$0xff] %vm1045_vm3, %v1043_v22  ;;  %v1012_v25 = vmax.f32 %v948_v23, 0.0  ;;  %v1044_v15 = vmax.f32 %v980_v24, 0.0 }
 0x17d   :  { %1077 = vst.msk [vmem:[%s2029_s4 + $0xf8] sm:$0xff] %vm1045_vm3, %v1012_v25  ;;  %1109 = vst.msk [vmem:[%s2029_s4 + $0x1f8] sm:$0xff] %vm1045_vm3, %v1044_v15 }

// kernel: agent_forward.18
= control target key start
LH: loop header
LB: loop body
LE: loop exit
PB: predicated region body
PF: predicated region fallthrough
CT: control target
= control target key end

     0   :  { %vm1000_vm0 = vcmask 1043456   ;;  %vm1001_vm1 = vcmask 523268   ;;  %s1792_s1 = inlined_call_operand.vmem [shape: bf16[1024,192], index: 1, kind: input, shape index: {}]   ;;  %s1793_s0 = inlined_call_operand.vmem [shape: bf16[8,1024], index: 0, kind: input, shape index: {}]   ;;  %s1794_s2 = inlined_call_operand.vmem [shape: f32[1,192], index: 2, kind: input, shape index: {}]   ;;  %s1795_s3 = inlined_call_operand.vmem [shape: bf16[8,192], index: 3, kind: output, shape index: {}]  }
   0x1   :  { %v1158_v0 = vld [vmem:[%s1792_s1 + $0x4] ss:$8 sps:$4 sm:$0xff]   ;;  %v1162_v2 = vld [vmem:[%s1792_s1] ss:$8 sps:$4 sm:$0xff]   ;;  %v1164_v4 = vld [vmem:[%s1792_s1 + $0x14] ss:$8 sps:$4 sm:$0xff]  }
   0x2   :  { %v1160_v1 = vld [vmem:[%s1792_s1 + $0x204] ss:$8 sps:$4 sm:$0xff]   ;;  %826 = vmatprep.subr.bf16.mxu1 %v1158_v0  ;;  %v1163_v3 = vld [vmem:[%s1792_s1 + $0x200] ss:$8 sps:$4 sm:$0xff]   ;;  %v1166_v5 = vld [vmem:[%s1792_s1 + $0x214] ss:$8 sps:$4 sm:$0xff]  }
   0x3   :  { %908 = vmatprep.subr.bf16.mxu0 %v1160_v1  ;;  %827 = vmatpush1.bf16.msra.mxu1 %v1162_v2  ;;  %v1168_v6 = vld [vmem:[%s1792_s1 + $0x10] ss:$8 sps:$4 sm:$0xff]   ;;  %v1170_v8 = vld [vmem:[%s1792_s1 + $0x24] ss:$8 sps:$4 sm:$0xff]   ;;  %v1174_v10 = vld [vmem:[%s1792_s1 + $0x20] ss:$8 sps:$4 sm:$0xff]  }
   0x4   :  { %909 = vmatpush1.bf16.msra.mxu0 %v1163_v3  ;;  %828 = vmatprep.subr.bf16.mxu1 %v1164_v4  ;;  %v1169_v7 = vld [vmem:[%s1792_s1 + $0x210] ss:$8 sps:$4 sm:$0xff]   ;;  %v1172_v9 = vld [vmem:[%s1792_s1 + $0x224] ss:$8 sps:$4 sm:$0xff]   ;;  %v1175_v11 = vld [vmem:[%s1792_s1 + $0x220] ss:$8 sps:$4 sm:$0xff]  }
   0x5   :  { %910 = vmatprep.subr.bf16.mxu0 %v1166_v5  ;;  %v1176_v12 = vld [vmem:[%s1792_s1 + $0x34] ss:$8 sps:$4 sm:$0xff]   ;;  %v1180_v14 = vld [vmem:[%s1792_s1 + $0x30] ss:$8 sps:$4 sm:$0xff]   ;;  %v1182_v16 = vld [vmem:[%s1792_s1 + $0x44] ss:$8 sps:$4 sm:$0xff]  }
   0x6   :  { %v1178_v13 = vld [vmem:[%s1792_s1 + $0x234] ss:$8 sps:$4 sm:$0xff]   ;;  %v1181_v15 = vld [vmem:[%s1792_s1 + $0x230] ss:$8 sps:$4 sm:$0xff]   ;;  %v1184_v17 = vld [vmem:[%s1792_s1 + $0x244] ss:$8 sps:$4 sm:$0xff]  }
   0x7   :  { %829 = vmatpush1.bf16.msra.mxu1 %v1168_v6  ;;  %v1186_v18 = vld [vmem:[%s1792_s1 + $0x40] ss:$8 sps:$4 sm:$0xff]   ;;  %v1188_v20 = vld [vmem:[%s1792_s1 + $0x54] ss:$8 sps:$4 sm:$0xff]   ;;  %v1192_v22 = vld [vmem:[%s1792_s1 + $0x50] ss:$8 sps:$4 sm:$0xff]  }
   0x8   :  { %911 = vmatpush1.bf16.msra.mxu0 %v1169_v7  ;;  %830 = vmatprep.subr.bf16.mxu1 %v1170_v8  ;;  %v1187_v19 = vld [vmem:[%s1792_s1 + $0x240] ss:$8 sps:$4 sm:$0xff]   ;;  %v1190_v21 = vld [vmem:[%s1792_s1 + $0x254] ss:$8 sps:$4 sm:$0xff]   ;;  %v1193_v23 = vld [vmem:[%s1792_s1 + $0x250] ss:$8 sps:$4 sm:$0xff]  }
   0x9   :  { %912 = vmatprep.subr.bf16.mxu0 %v1172_v9  ;;  %v1194_v24 = vld [vmem:[%s1792_s1 + $0x64] ss:$8 sps:$4 sm:$0xff]   ;;  %v1198_v26 = vld [vmem:[%s1792_s1 + $0x60] ss:$8 sps:$4 sm:$0xff]   ;;  %v1200_v28 = vld [vmem:[%s1792_s1 + $0x74] ss:$8 sps:$4 sm:$0xff]  }
   0xa   :  { %v1196_v25 = vld [vmem:[%s1792_s1 + $0x264] ss:$8 sps:$4 sm:$0xff]   ;;  %v1199_v27 = vld [vmem:[%s1792_s1 + $0x260] ss:$8 sps:$4 sm:$0xff]   ;;  %v1202_v29 = vld [vmem:[%s1792_s1 + $0x274] ss:$8 sps:$4 sm:$0xff]  }
   0xb   :  { %831 = vmatpush1.bf16.msra.mxu1 %v1174_v10  ;;  %v1204_v30 = vld [vmem:[%s1792_s1 + $0x70] ss:$8 sps:$4 sm:$0xff]   ;;  %v1206_v32 = vld [vmem:[%s1792_s1 + $0x84] ss:$8 sps:$4 sm:$0xff]   ;;  %v1210_v34 = vld [vmem:[%s1792_s1 + $0x80] ss:$8 sps:$4 sm:$0xff]  }
   0xc   :  { %913 = vmatpush1.bf16.msra.mxu0 %v1175_v11  ;;  %832 = vmatprep.subr.bf16.mxu1 %v1176_v12  ;;  %v1205_v31 = vld [vmem:[%s1792_s1 + $0x270] ss:$8 sps:$4 sm:$0xff]   ;;  %v1208_v33 = vld [vmem:[%s1792_s1 + $0x284] ss:$8 sps:$4 sm:$0xff]   ;;  %v1211_v35 = vld [vmem:[%s1792_s1 + $0x280] ss:$8 sps:$4 sm:$0xff]  }
   0xd   :  { %914 = vmatprep.subr.bf16.mxu0 %v1178_v13  ;;  %v1212_v36 = vld [vmem:[%s1792_s1 + $0x94] ss:$8 sps:$4 sm:$0xff]   ;;  %v1216_v38 = vld [vmem:[%s1792_s1 + $0x90] ss:$8 sps:$4 sm:$0xff]   ;;  %v1218_v40 = vld [vmem:[%s1792_s1 + $0xa4] ss:$8 sps:$4 sm:$0xff]  }
   0xe   :  { %v1214_v37 = vld [vmem:[%s1792_s1 + $0x294] ss:$8 sps:$4 sm:$0xff]   ;;  %v1217_v39 = vld [vmem:[%s1792_s1 + $0x290] ss:$8 sps:$4 sm:$0xff]   ;;  %v1220_v41 = vld [vmem:[%s1792_s1 + $0x2a4] ss:$8 sps:$4 sm:$0xff]  }
   0xf   :  { %833 = vmatpush1.bf16.msra.mxu1 %v1180_v14  ;;  %v1222_v42 = vld [vmem:[%s1792_s1 + $0xa0] ss:$8 sps:$4 sm:$0xff]   ;;  %v1224_v44 = vld [vmem:[%s1792_s1 + $0xb4] ss:$8 sps:$4 sm:$0xff]   ;;  %v1228_v47 = vld [vmem:[%s1792_s1 + $0xb0] ss:$8 sps:$4 sm:$0xff]  }
  0x10   :  { %915 = vmatpush1.bf16.msra.mxu0 %v1181_v15  ;;  %834 = vmatprep.subr.bf16.mxu1 %v1182_v16  ;;  %v1223_v43 = vld [vmem:[%s1792_s1 + $0x2a0] ss:$8 sps:$4 sm:$0xff]   ;;  %v1226_v45 = vld [vmem:[%s1792_s1 + $0x2b4] ss:$8 sps:$4 sm:$0xff]   ;;  %v1229_v49 = vld [vmem:[%s1792_s1 + $0x2b0] ss:$8 sps:$4 sm:$0xff]  }
  0x11   :  { %916 = vmatprep.subr.bf16.mxu0 %v1184_v17  ;;  %v14_v46 = vld [vmem:[%s1793_s0] sm:$0xff]  ;;  %v16_v50 = vld [vmem:[%s1793_s0 + $0x10] sm:$0xff]  ;;  %vm1002_vm2 = vmor %vm1001_vm1, %vm1000_vm0 }
  0x12   :  { %v1009_v48 = vcombine.high %v14_v46, %v14_v46  ;;  %v1230_v51 = vld [vmem:[%s1792_s1 + $0xc4] ss:$8 sps:$4 sm:$0xff]   ;;  %v1013_v53 = vcombine.high %v16_v50, %v16_v50  ;;  %v1234_v54 = vld [vmem:[%s1792_s1 + $0xc0] ss:$8 sps:$4 sm:$0xff]   ;;  %v1236_v56 = vld [vmem:[%s1792_s1 + $0xd4] ss:$8 sps:$4 sm:$0xff]   ;;  %v1008_v6 = vcombine.low %v14_v46, %v14_v46  ;;  %v1012_v7 = vcombine.low %v16_v50, %v16_v50 }
  0x13   :  { %835 = vmatpush1.bf16.msra.mxu1 %v1186_v18  ;;  %v1232_v52 = vld [vmem:[%s1792_s1 + $0x2c4] ss:$8 sps:$4 sm:$0xff]   ;;  %v1235_v55 = vld [vmem:[%s1792_s1 + $0x2c0] ss:$8 sps:$4 sm:$0xff]   ;;  %v1238_v57 = vld [vmem:[%s1792_s1 + $0x2d4] ss:$8 sps:$4 sm:$0xff]  }
  0x14   :  { %917 = vmatpush1.bf16.msra.mxu0 %v1187_v19  ;;  %836 = vmatprep.subr.bf16.mxu1 %v1188_v20  ;;  %v1240_v58 = vld [vmem:[%s1792_s1 + $0xd0] ss:$8 sps:$4 sm:$0xff]   ;;  %v1242_v60 = vld [vmem:[%s1792_s1 + $0xe4] ss:$8 sps:$4 sm:$0xff]   ;;  %v1246_v62 = vld [vmem:[%s1792_s1 + $0xe0] ss:$8 sps:$4 sm:$0xff]  }
  0x15   :  { %918 = vmatprep.subr.bf16.mxu0 %v1190_v21  ;;  %858 = vmatprep.mubr.bf16.mxu1 %v1009_v48  ;;  %v1241_v59 = vld [vmem:[%s1792_s1 + $0x2d0] ss:$8 sps:$4 sm:$0xff]   ;;  %v1244_v61 = vld [vmem:[%s1792_s1 + $0x2e4] ss:$8 sps:$4 sm:$0xff]   ;;  %v1247_v63 = vld [vmem:[%s1792_s1 + $0x2e0] ss:$8 sps:$4 sm:$0xff]  }
  0x16   :  { %940 = vmatprep.mubr.bf16.mxu0 %v1013_v53  ;;  %v1248_v0 = vld [vmem:[%s1792_s1 + $0xf4] ss:$8 sps:$4 sm:$0xff]   ;;  %v1252_v2 = vld [vmem:[%s1792_s1 + $0xf0] ss:$8 sps:$4 sm:$0xff]   ;;  %v1258_v4 = vld [vmem:[%s1792_s1 + $0x104] ss:$8 sps:$4 sm:$0xff]  }
  0x17   :  { %837 = vmatpush1.bf16.msra.mxu1 %v1192_v22  ;;  %v1250_v1 = vld [vmem:[%s1792_s1 + $0x2f4] ss:$8 sps:$4 sm:$0xff]   ;;  %v1253_v3 = vld [vmem:[%s1792_s1 + $0x2f0] ss:$8 sps:$4 sm:$0xff]   ;;  %v1263_v5 = vld [vmem:[%s1792_s1 + $0x304] ss:$8 sps:$4 sm:$0xff]  }
  0x18   :  { %919 = vmatpush1.bf16.msra.mxu0 %v1193_v23  ;;  %838 = vmatprep.subr.bf16.mxu1 %v1194_v24  ;;  %v1256_v8 = vld [vmem:[%s1792_s1 + $0x100] ss:$8 sps:$4 sm:$0xff]   ;;  %v1266_v10 = vld [vmem:[%s1792_s1 + $0x114] ss:$8 sps:$4 sm:$0xff]   ;;  %v1264_v12 = vld [vmem:[%s1792_s1 + $0x110] ss:$8 sps:$4 sm:$0xff]  }
  0x19   :  { %920 = vmatprep.subr.bf16.mxu0 %v1196_v25  ;;  %v1261_v9 = vld [vmem:[%s1792_s1 + $0x300] ss:$8 sps:$4 sm:$0xff]   ;;  %v1269_v11 = vld [vmem:[%s1792_s1 + $0x314] ss:$8 sps:$4 sm:$0xff]   ;;  %v1267_v13 = vld [vmem:[%s1792_s1 + $0x310] ss:$8 sps:$4 sm:$0xff]  }
  0x1a   :  { %v1272_v14 = vld [vmem:[%s1792_s1 + $0x124] ss:$8 sps:$4 sm:$0xff]   ;;  %v1270_v16 = vld [vmem:[%s1792_s1 + $0x120] ss:$8 sps:$4 sm:$0xff]   ;;  %v1278_v18 = vld [vmem:[%s1792_s1 + $0x134] ss:$8 sps:$4 sm:$0xff]  }
  0x1b   :  { %839 = vmatpush1.bf16.msra.mxu1 %v1198_v26  ;;  %v1275_v15 = vld [vmem:[%s1792_s1 + $0x324] ss:$8 sps:$4 sm:$0xff]   ;;  %v1273_v17 = vld [vmem:[%s1792_s1 + $0x320] ss:$8 sps:$4 sm:$0xff]   ;;  %v1281_v19 = vld [vmem:[%s1792_s1 + $0x334] ss:$8 sps:$4 sm:$0xff]  }
  0x1c   :  { %921 = vmatpush1.bf16.msra.mxu0 %v1199_v27  ;;  %840 = vmatprep.subr.bf16.mxu1 %v1200_v28  ;;  %v1276_v20 = vld [vmem:[%s1792_s1 + $0x130] ss:$8 sps:$4 sm:$0xff]   ;;  %v1284_v22 = vld [vmem:[%s1792_s1 + $0x144] ss:$8 sps:$4 sm:$0xff]   ;;  %v1282_v24 = vld [vmem:[%s1792_s1 + $0x140] ss:$8 sps:$4 sm:$0xff]  }
  0x1d   :  { %922 = vmatprep.subr.bf16.mxu0 %v1202_v29  ;;  %v1279_v21 = vld [vmem:[%s1792_s1 + $0x330] ss:$8 sps:$4 sm:$0xff]   ;;  %v1287_v23 = vld [vmem:[%s1792_s1 + $0x344] ss:$8 sps:$4 sm:$0xff]   ;;  %v1285_v25 = vld [vmem:[%s1792_s1 + $0x340] ss:$8 sps:$4 sm:$0xff]  }
  0x1e   :  { %v1290_v26 = vld [vmem:[%s1792_s1 + $0x154] ss:$8 sps:$4 sm:$0xff]   ;;  %v1288_v28 = vld [vmem:[%s1792_s1 + $0x150] ss:$8 sps:$4 sm:$0xff]   ;;  %v1320_v50 = vld [vmem:[%s1792_s1 + $0x1a4] ss:$8 sps:$4 sm:$0xff]  }
  0x1f   :  { %841 = vmatpush1.bf16.msra.mxu1 %v1204_v30  ;;  %v1293_v27 = vld [vmem:[%s1792_s1 + $0x354] ss:$8 sps:$4 sm:$0xff]   ;;  %v1291_v29 = vld [vmem:[%s1792_s1 + $0x350] ss:$8 sps:$4 sm:$0xff]   ;;  %v1296_v30 = vld [vmem:[%s1792_s1 + $0x164] ss:$8 sps:$4 sm:$0xff]  }
  0x20   :  { %923 = vmatpush1.bf16.msra.mxu0 %v1205_v31  ;;  %842 = vmatprep.subr.bf16.mxu1 %v1206_v32  ;;  %v1299_v31 = vld [vmem:[%s1792_s1 + $0x364] ss:$8 sps:$4 sm:$0xff]   ;;  %v1314_v46 = vld [vmem:[%s1792_s1 + $0x194] ss:$8 sps:$4 sm:$0xff]   ;;  %v1312_v48 = vld [vmem:[%s1792_s1 + $0x190] ss:$8 sps:$4 sm:$0xff]  }
  0x21   :  { %924 = vmatprep.subr.bf16.mxu0 %v1208_v33  ;;  %v1657_v32 = vld [vmem:[%s1793_s0 + $0x8] sm:$0xff]  ;;  %v1662_v33 = vld [vmem:[%s1793_s0 + $0x18] sm:$0xff] }
  0x22   :  { %v1321_v53 = vld [vmem:[%s1792_s1 + $0x3a0] ss:$8 sps:$4 sm:$0xff]  }
  0x23   :  { %843 = vmatpush1.bf16.msra.mxu1 %v1210_v34  ;;  %v1011_v34 = vcombine.high %v1657_v32, %v1657_v32 }
  0x24   :  { %925 = vmatpush1.bf16.msra.mxu0 %v1211_v35  ;;  %844 = vmatprep.subr.bf16.mxu1 %v1212_v36  ;;  %v1015_v35 = vcombine.high %v1662_v33, %v1662_v33  ;;  %v1294_v36 = vld [vmem:[%s1792_s1 + $0x160] ss:$8 sps:$4 sm:$0xff]  }
  0x25   :  { %926 = vmatprep.subr.bf16.mxu0 %v1214_v37  ;;  %v1297_v37 = vld [vmem:[%s1792_s1 + $0x360] ss:$8 sps:$4 sm:$0xff]  }
  0x27   :  { %845 = vmatpush1.bf16.msra.mxu1 %v1216_v38  ;;  %v1302_v38 = vld [vmem:[%s1792_s1 + $0x174] ss:$8 sps:$4 sm:$0xff]  }
  0x28   :  { %927 = vmatpush1.bf16.msra.mxu0 %v1217_v39  ;;  %846 = vmatprep.subr.bf16.mxu1 %v1218_v40  ;;  %v1305_v39 = vld [vmem:[%s1792_s1 + $0x374] ss:$8 sps:$4 sm:$0xff]   ;;  %v1300_v40 = vld [vmem:[%s1792_s1 + $0x170] ss:$8 sps:$4 sm:$0xff]  }
  0x29   :  { %928 = vmatprep.subr.bf16.mxu0 %v1220_v41  ;;  %v1303_v41 = vld [vmem:[%s1792_s1 + $0x370] ss:$8 sps:$4 sm:$0xff]  }
  0x2b   :  { %847 = vmatpush1.bf16.msra.mxu1 %v1222_v42  ;;  %v1308_v42 = vld [vmem:[%s1792_s1 + $0x184] ss:$8 sps:$4 sm:$0xff]  }
  0x2c   :  { %929 = vmatpush1.bf16.msra.mxu0 %v1223_v43  ;;  %848 = vmatprep.subr.bf16.mxu1 %v1224_v44  ;;  %v1311_v43 = vld [vmem:[%s1792_s1 + $0x384] ss:$8 sps:$4 sm:$0xff]   ;;  %v1306_v44 = vld [vmem:[%s1792_s1 + $0x180] ss:$8 sps:$4 sm:$0xff]  }
  0x2d   :  { %930 = vmatprep.subr.bf16.mxu0 %v1226_v45  ;;  %v1309_v45 = vld [vmem:[%s1792_s1 + $0x380] ss:$8 sps:$4 sm:$0xff]  }
  0x2f   :  { %849 = vmatpush1.bf16.msra.mxu1 %v1228_v47  ;;  %v1317_v47 = vld [vmem:[%s1792_s1 + $0x394] ss:$8 sps:$4 sm:$0xff]  }
  0x30   :  { %931 = vmatpush1.bf16.msra.mxu0 %v1229_v49  ;;  %850 = vmatprep.subr.bf16.mxu1 %v1230_v51  ;;  %v1315_v49 = vld [vmem:[%s1792_s1 + $0x390] ss:$8 sps:$4 sm:$0xff]   ;;  %v1323_v51 = vld [vmem:[%s1792_s1 + $0x3a4] ss:$8 sps:$4 sm:$0xff]  }
  0x31   :  { %932 = vmatprep.subr.bf16.mxu0 %v1232_v52  ;;  %v1318_v52 = vld [vmem:[%s1792_s1 + $0x1a0] ss:$8 sps:$4 sm:$0xff]  }
  0x33   :  { %851 = vmatpush1.bf16.msra.mxu1 %v1234_v54  ;;  %v1326_v54 = vld [vmem:[%s1792_s1 + $0x1b4] ss:$8 sps:$4 sm:$0xff]  }
  0x34   :  { %933 = vmatpush1.bf16.msra.mxu0 %v1235_v55  ;;  %852 = vmatprep.subr.bf16.mxu1 %v1236_v56  ;;  %v1329_v55 = vld [vmem:[%s1792_s1 + $0x3b4] ss:$8 sps:$4 sm:$0xff]   ;;  %v1324_v56 = vld [vmem:[%s1792_s1 + $0x1b0] ss:$8 sps:$4 sm:$0xff]  }
  0x35   :  { %934 = vmatprep.subr.bf16.mxu0 %v1238_v57  ;;  %v1327_v57 = vld [vmem:[%s1792_s1 + $0x3b0] ss:$8 sps:$4 sm:$0xff]  }
  0x37   :  { %853 = vmatpush1.bf16.msra.mxu1 %v1240_v58  ;;  %v1332_v58 = vld [vmem:[%s1792_s1 + $0x1c4] ss:$8 sps:$4 sm:$0xff]  }
  0x38   :  { %935 = vmatpush1.bf16.msra.mxu0 %v1241_v59  ;;  %854 = vmatprep.subr.bf16.mxu1 %v1242_v60  ;;  %v1335_v59 = vld [vmem:[%s1792_s1 + $0x3c4] ss:$8 sps:$4 sm:$0xff]   ;;  %v1330_v60 = vld [vmem:[%s1792_s1 + $0x1c0] ss:$8 sps:$4 sm:$0xff]  }
  0x39   :  { %936 = vmatprep.subr.bf16.mxu0 %v1244_v61  ;;  %v1333_v61 = vld [vmem:[%s1792_s1 + $0x3c0] ss:$8 sps:$4 sm:$0xff]  }
  0x3b   :  { %855 = vmatpush1.bf16.msra.mxu1 %v1246_v62  ;;  %v1338_v62 = vld [vmem:[%s1792_s1 + $0x1d4] ss:$8 sps:$4 sm:$0xff]  }
  0x3c   :  { %937 = vmatpush1.bf16.msra.mxu0 %v1247_v63  ;;  %856 = vmatprep.subr.bf16.mxu1 %v1248_v0  ;;  %v1341_v63 = vld [vmem:[%s1792_s1 + $0x3d4] ss:$8 sps:$4 sm:$0xff]   ;;  %v1336_v0 = vld [vmem:[%s1792_s1 + $0x1d0] ss:$8 sps:$4 sm:$0xff]  }
  0x3d   :  { %938 = vmatprep.subr.bf16.mxu0 %v1250_v1  ;;  %v1339_v1 = vld [vmem:[%s1792_s1 + $0x3d0] ss:$8 sps:$4 sm:$0xff]  }
  0x3f   :  { %857 = vmatpush1.bf16.msra.mxu1 %v1252_v2  ;;  %v1344_v2 = vld [vmem:[%s1792_s1 + $0x1e4] ss:$8 sps:$4 sm:$0xff]  }
  0x40   :  { %939 = vmatpush1.bf16.msra.mxu0 %v1253_v3  ;;  %867 = vmatprep.subr.bf16.mxu1 %v1258_v4  ;;  %v1347_v3 = vld [vmem:[%s1792_s1 + $0x3e4] ss:$8 sps:$4 sm:$0xff]   ;;  %v1342_v4 = vld [vmem:[%s1792_s1 + $0x1e0] ss:$8 sps:$4 sm:$0xff]  }
  0x41   :  { %949 = vmatprep.subr.bf16.mxu0 %v1263_v5  ;;  %v1345_v5 = vld [vmem:[%s1792_s1 + $0x3e0] ss:$8 sps:$4 sm:$0xff]  }
  0x42   :  { %859 = vmatmul.mubr.bf16.vlgmr.msra.gmra.mrb[0].mxu1 %v1008_v6  ;;  %v1350_v6 = vld [vmem:[%s1792_s1 + $0x1f4] ss:$8 sps:$4 sm:$0xff]  }
  0x43   :  { %941 = vmatmul.mubr.bf16.vlgmr.msra.gmra.mrb[0].mxu0 %v1012_v7  ;;  %868 = vmatpush1.bf16.msra.mxu1 %v1256_v8  ;;  %v1353_v7 = vld [vmem:[%s1792_s1 + $0x3f4] ss:$8 sps:$4 sm:$0xff]   ;;  %v1348_v8 = vld [vmem:[%s1792_s1 + $0x1f0] ss:$8 sps:$4 sm:$0xff]  }
  0x44   :  { %950 = vmatpush1.bf16.msra.mxu0 %v1261_v9  ;;  %869 = vmatprep.subr.bf16.mxu1 %v1266_v10  ;;  %v1351_v9 = vld [vmem:[%s1792_s1 + $0x3f0] ss:$8 sps:$4 sm:$0xff]   ;;  %v1010_v10 = vcombine.low %v1657_v32, %v1657_v32 }
  0x45   :  { %951 = vmatprep.subr.bf16.mxu0 %v1269_v11  ;;  %899 = vmatprep.mubr.bf16.mxu1 %v1011_v34  ;;  %v1014_v11 = vcombine.low %v1662_v33, %v1662_v33 }
  0x46   :  { %981 = vmatprep.mubr.bf16.mxu0 %v1015_v35 }
  0x47   :  { %870 = vmatpush1.bf16.msra.mxu1 %v1264_v12  ;;  %v148_v12 = vlaneseq }
  0x48   :  { %952 = vmatpush1.bf16.msra.mxu0 %v1267_v13  ;;  %871 = vmatprep.subr.bf16.mxu1 %v1272_v14 }
  0x49   :  { %953 = vmatprep.subr.bf16.mxu0 %v1275_v15  ;;  %v149_v13 = vshrl.u32 %v148_v12, 7  ;;  %v146_v15 = vld [vmem:[%s1794_s2] sm:$0x3] }
  0x4b   :  { %872 = vmatpush1.bf16.msra.mxu1 %v1270_v16  ;;  %v150_v14 = vsub.s32 0, %v149_v13  ;;  %v154_v16 = vsub.s32 1, %v149_v13 }
  0x4c   :  { %954 = vmatpush1.bf16.msra.mxu0 %v1273_v17  ;;  %873 = vmatprep.subr.bf16.mxu1 %v1278_v18 }
  0x4d   :  { %955 = vmatprep.subr.bf16.mxu0 %v1281_v19  ;;  %v151_v17 = vrot.slane %v146_v15, %v150_v14  ;;  %v155_v18 = vrot.slane %v146_v15, %v154_v16 }
  0x4f   :  { %874 = vmatpush1.bf16.msra.mxu1 %v1276_v20 }
  0x50   :  { %956 = vmatpush1.bf16.msra.mxu0 %v1279_v21  ;;  %875 = vmatprep.subr.bf16.mxu1 %v1284_v22 }
  0x51   :  { %957 = vmatprep.subr.bf16.mxu0 %v1287_v23 }
  0x53   :  { %876 = vmatpush1.bf16.msra.mxu1 %v1282_v24 }
  0x54   :  { %958 = vmatpush1.bf16.msra.mxu0 %v1285_v25  ;;  %877 = vmatprep.subr.bf16.mxu1 %v1290_v26 }
  0x55   :  { %959 = vmatprep.subr.bf16.mxu0 %v1293_v27 }
  0x57   :  { %878 = vmatpush1.bf16.msra.mxu1 %v1288_v28 }
  0x58   :  { %960 = vmatpush1.bf16.msra.mxu0 %v1291_v29  ;;  %879 = vmatprep.subr.bf16.mxu1 %v1296_v30 }
  0x59   :  { %961 = vmatprep.subr.bf16.mxu0 %v1299_v31 }
  0x5b   :  { %880 = vmatpush1.bf16.msra.mxu1 %v1294_v36 }
  0x5c   :  { %962 = vmatpush1.bf16.msra.mxu0 %v1297_v37  ;;  %881 = vmatprep.subr.bf16.mxu1 %v1302_v38 }
  0x5d   :  { %963 = vmatprep.subr.bf16.mxu0 %v1305_v39 }
  0x5f   :  { %882 = vmatpush1.bf16.msra.mxu1 %v1300_v40 }
  0x60   :  { %964 = vmatpush1.bf16.msra.mxu0 %v1303_v41  ;;  %883 = vmatprep.subr.bf16.mxu1 %v1308_v42 }
  0x61   :  { %965 = vmatprep.subr.bf16.mxu0 %v1311_v43 }
  0x63   :  { %884 = vmatpush1.bf16.msra.mxu1 %v1306_v44 }
  0x64   :  { %966 = vmatpush1.bf16.msra.mxu0 %v1309_v45  ;;  %885 = vmatprep.subr.bf16.mxu1 %v1314_v46 }
  0x65   :  { %967 = vmatprep.subr.bf16.mxu0 %v1317_v47 }
  0x67   :  { %886 = vmatpush1.bf16.msra.mxu1 %v1312_v48 }
  0x68   :  { %968 = vmatpush1.bf16.msra.mxu0 %v1315_v49  ;;  %887 = vmatprep.subr.bf16.mxu1 %v1320_v50 }
  0x69   :  { %969 = vmatprep.subr.bf16.mxu0 %v1323_v51 }
  0x6b   :  { %888 = vmatpush1.bf16.msra.mxu1 %v1318_v52 }
  0x6c   :  { %970 = vmatpush1.bf16.msra.mxu0 %v1321_v53  ;;  %889 = vmatprep.subr.bf16.mxu1 %v1326_v54 }
  0x6d   :  { %971 = vmatprep.subr.bf16.mxu0 %v1329_v55 }
  0x6f   :  { %890 = vmatpush1.bf16.msra.mxu1 %v1324_v56 }
  0x70   :  { %972 = vmatpush1.bf16.msra.mxu0 %v1327_v57  ;;  %891 = vmatprep.subr.bf16.mxu1 %v1332_v58 }
  0x71   :  { %973 = vmatprep.subr.bf16.mxu0 %v1335_v59 }
  0x73   :  { %892 = vmatpush1.bf16.msra.mxu1 %v1330_v60 }
  0x74   :  { %974 = vmatpush1.bf16.msra.mxu0 %v1333_v61  ;;  %893 = vmatprep.subr.bf16.mxu1 %v1338_v62 }
  0x75   :  { %975 = vmatprep.subr.bf16.mxu0 %v1341_v63 }
  0x77   :  { %894 = vmatpush1.bf16.msra.mxu1 %v1336_v0 }
  0x78   :  { %976 = vmatpush1.bf16.msra.mxu0 %v1339_v1  ;;  %895 = vmatprep.subr.bf16.mxu1 %v1344_v2 }
  0x79   :  { %977 = vmatprep.subr.bf16.mxu0 %v1347_v3 }
  0x7b   :  { %896 = vmatpush1.bf16.msra.mxu1 %v1342_v4 }
  0x7c   :  { %978 = vmatpush1.bf16.msra.mxu0 %v1345_v5  ;;  %897 = vmatprep.subr.bf16.mxu1 %v1350_v6 }
  0x7d   :  { %979 = vmatprep.subr.bf16.mxu0 %v1353_v7 }
  0x7f   :  { %898 = vmatpush1.bf16.msra.mxu1 %v1348_v8 }
  0x80   :  { %980 = vmatpush1.bf16.msra.mxu0 %v1351_v9 }
  0x82   :  { %900 = vmatmul.mubr.bf16.vlgmr.msra.gmra.mrb[0].mxu1 %v1010_v10 }
  0x83   :  { %982 = vmatmul.mubr.bf16.vlgmr.msra.gmra.mrb[0].mxu0 %v1014_v11 }
 0x155   :  { %v901_v19 = vpop.f32.mrb[0].mxu1 }
 0x156   :  { %v983_v20 = vpop.f32.mrb[0].mxu0  ;;  %v1146_v21 = vadd.f32 %v901_v19, %v151_v17  ;;  %v903_v22 = vpop.f32.mrb[1].mxu1 }
 0x157   :  { %v985_v23 = vpop.f32.mrb[1].mxu0  ;;  %v1148_v24 = vadd.f32 %v903_v22, %v155_v18  ;;  %v905_v25 = vpop.f32.mrb[2].mxu1 }
 0x158   :  { %v987_v26 = vpop.f32.mrb[2].mxu0  ;;  %v1147_v27 = vadd.f32 %v1146_v21, %v983_v20  ;;  %v906_v28 = vpop.f32.mrb[3].mxu1 }
 0x159   :  { %v988_v29 = vpop.f32.mrb[3].mxu0  ;;  %v1149_v30 = vadd.f32 %v1148_v24, %v985_v23 }
 0x15a   :  { %v990_v31 = vmax.f32 %v1147_v27, 0.0 }
 0x15b   :  { %v991_v32 = vmax.f32 %v1149_v30, 0.0 }
 0x15d   :  { %v1145_v33 = vpack.c.bf16 %v991_v32, %v990_v31 }
 0x15f   :  { %1003 = vst.msk [vmem:[%s1795_s3] sm:$0xff] %vm1002_vm2, %v1145_v33 }

// kernel: agent_forward.20
= control target key start
LH: loop header
LB: loop body
LE: loop exit
PB: predicated region body
PF: predicated region fallthrough
CT: control target
= control target key end

     0   :  { %vm158_vm0 = vcmask 523264   ;;  %s4798_s1 = inlined_call_operand.vmem [shape: bf16[2,576,64], index: 1, kind: input, shape index: {}]   ;;  %s4799_s0 = inlined_call_operand.vmem [shape: f32[2,10,10,64], index: 0, kind: input, shape index: {}]   ;;  %s4800_s2 = inlined_call_operand.vmem [shape: f32[1,64], index: 2, kind: input, shape index: {}]   ;;  %s4801_s3 = inlined_call_operand.vmem [shape: f32[1,64], index: 3, kind: input, shape index: {}]   ;;  %s4802_s4 = inlined_call_operand.vmem [shape: f32[2,64,64], index: 4, kind: output, shape index: {}]  }
   0x1   :  { %v3819_v0 = vld [vmem:[%s4798_s1 + $0x20] sm:$0xff]   ;;  %v3821_v2 = vld [vmem:[%s4798_s1 + $0x28] sm:$0xff]   ;;  %v3823_v4 = vld [vmem:[%s4798_s1 + $0x30] sm:$0xff]  }
   0x2   :  { %v3820_v1 = vld [vmem:[%s4798_s1 + $0x140] sm:$0xff]   ;;  %3403 = vmatprep.subr.bf16.mxu0 %v3819_v0  ;;  %v3822_v3 = vld [vmem:[%s4798_s1 + $0x148] sm:$0xff]   ;;  %v3824_v5 = vld [vmem:[%s4798_s1 + $0x150] sm:$0xff]  }
   0x3   :  { %3419 = vmatprep.subr.bf16.mxu1 %v3820_v1  ;;  %3404 = vmatpush3.bf16.msra.mxu0 %v3819_v0  ;;  %v3825_v6 = vld [vmem:[%s4798_s1 + $0x38] sm:$0xff]   ;;  %v66_v7 = vld [vmem:[%s4799_s0 + $0x1] sm:$0xff]  ;;  %v3831_v34 = vld [vmem:[%s4798_s1 + $0x10] sm:$0xff]  }
   0x4   :  { %3420 = vmatpush3.bf16.msra.mxu1 %v3820_v1  ;;  %3405 = vmatprep.subr.bf16.mxu0 %v3821_v2  ;;  %v3943_v8 = vld [vmem:[%s4799_s0 + $0x11] sm:$0xff]  ;;  %v74_v9 = vld [vmem:[%s4799_s0 + $0xa1] sm:$0xff] }
   0x5   :  { %3421 = vmatprep.subr.bf16.mxu1 %v3822_v3  ;;  %v3826_v10 = vld [vmem:[%s4798_s1 + $0x158] sm:$0xff]   ;;  %v3187_v11 = vpack.c.bf16 %v3943_v8, %v66_v7  ;;  %v3960_v13 = vld [vmem:[%s4799_s0 + $0x21] sm:$0xff]  ;;  %v3832_v35 = vld [vmem:[%s4798_s1 + $0x130] sm:$0xff]  }
   0x6   :  { %v3955_v12 = vld [vmem:[%s4799_s0 + $0xb1] sm:$0xff]  ;;  %v3971_v16 = vld [vmem:[%s4799_s0 + $0xc1] sm:$0xff] }
   0x7   :  { %3406 = vmatpush3.bf16.msra.mxu0 %v3821_v2  ;;  %v3191_v14 = vpack.c.bf16 %v3955_v12, %v74_v9  ;;  %v3966_v15 = vld [vmem:[%s4799_s0 + $0x31] sm:$0xff]  ;;  %3411 = vmatprep.mubr.msk.bf16.mxu0 %vm158_vm0, %v3187_v11  ;;  %v3827_v18 = vld [vmem:[%s4798_s1] sm:$0xff]   ;;  %v3829_v26 = vld [vmem:[%s4798_s1 + $0x8] sm:$0xff]  }
   0x8   :  { %3422 = vmatpush3.bf16.msra.mxu1 %v3822_v3  ;;  %3407 = vmatprep.subr.bf16.mxu0 %v3823_v4  ;;  %v3977_v17 = vld [vmem:[%s4799_s0 + $0xd1] sm:$0xff]  ;;  %v3828_v19 = vld [vmem:[%s4798_s1 + $0x120] sm:$0xff]   ;;  %v3988_v20 = vpack.c.bf16 %v3966_v15, %v3960_v13  ;;  %v3830_v27 = vld [vmem:[%s4798_s1 + $0x128] sm:$0xff]  }
   0x9   :  { %3423 = vmatprep.subr.bf16.mxu1 %v3824_v5  ;;  %3427 = vmatprep.mubr.msk.bf16.mxu1 %vm158_vm0, %v3191_v14  ;;  %v3993_v21 = vld [vmem:[%s4799_s0 + $0x41] sm:$0xff]  ;;  %v3997_v22 = vpack.c.bf16 %v3977_v17, %v3971_v16  ;;  %v4002_v23 = vld [vmem:[%s4799_s0 + $0x51] sm:$0xff] }
   0xa   :  { %v4007_v24 = vld [vmem:[%s4799_s0 + $0xe1] sm:$0xff]  ;;  %v4012_v25 = vld [vmem:[%s4799_s0 + $0xf1] sm:$0xff]  ;;  %v4022_v28 = vpack.c.bf16 %v4002_v23, %v3993_v21 }
   0xb   :  { %3408 = vmatpush3.bf16.msra.mxu0 %v3823_v4  ;;  %v4027_v29 = vld [vmem:[%s4799_s0 + $0x61] sm:$0xff]  ;;  %v4032_v30 = vld [vmem:[%s4799_s0 + $0x71] sm:$0xff]  ;;  %v4038_v31 = vpack.c.bf16 %v4012_v25, %v4007_v24 }
   0xc   :  { %3424 = vmatpush3.bf16.msra.mxu1 %v3824_v5  ;;  %3409 = vmatprep.subr.bf16.mxu0 %v3825_v6  ;;  %v4043_v32 = vld [vmem:[%s4799_s0 + $0x101] sm:$0xff]  ;;  %v4050_v33 = vld [vmem:[%s4799_s0 + $0x111] sm:$0xff]  ;;  %v4064_v36 = vpack.c.bf16 %v4032_v30, %v4027_v29 }
   0xd   :  { %3425 = vmatprep.subr.bf16.mxu1 %v3826_v10  ;;  %v18_v37 = vld [vmem:[%s4799_s0] sm:$0xff]  ;;  %v4072_v38 = vld [vmem:[%s4799_s0 + $0x10] sm:$0xff]  ;;  %v4076_v39 = vpack.c.bf16 %v4050_v33, %v4043_v32  ;;  %v3833_v42 = vld [vmem:[%s4798_s1 + $0x18] sm:$0xff]  }
   0xe   :  { %v26_v40 = vld [vmem:[%s4799_s0 + $0xa0] sm:$0xff]  ;;  %v4084_v41 = vld [vmem:[%s4799_s0 + $0xb0] sm:$0xff]  ;;  %v3834_v43 = vld [vmem:[%s4798_s1 + $0x138] sm:$0xff]   ;;  %v3195_v44 = vpack.c.bf16 %v4072_v38, %v18_v37 }
   0xf   :  { %3410 = vmatpush3.bf16.msra.mxu0 %v3825_v6  ;;  %v3199_v45 = vpack.c.bf16 %v4084_v41, %v26_v40  ;;  %v4099_v46 = vld [vmem:[%s4799_s0 + $0x20] sm:$0xff]  ;;  %v4106_v47 = vld [vmem:[%s4799_s0 + $0x30] sm:$0xff]  ;;  %v3837_v58 = vld [vmem:[%s4798_s1 + $0x48] sm:$0xff]  }
  0x10   :  { %3426 = vmatpush3.bf16.msra.mxu1 %v3826_v10  ;;  %3435 = vmatprep.subr.bf16.mxu0 %v3827_v18  ;;  %v4111_v48 = vld [vmem:[%s4799_s0 + $0xc0] sm:$0xff]  ;;  %v4116_v49 = vld [vmem:[%s4799_s0 + $0xd0] sm:$0xff]  ;;  %v4133_v53 = vpack.c.bf16 %v4106_v47, %v4099_v46  ;;  %v3838_v59 = vld [vmem:[%s4798_s1 + $0x168] sm:$0xff]  }
  0x11   :  { %3451 = vmatprep.subr.bf16.mxu1 %v3828_v19  ;;  %v3835_v50 = vld [vmem:[%s4798_s1 + $0x40] sm:$0xff]   ;;  %v4138_v54 = vld [vmem:[%s4799_s0 + $0x50] sm:$0xff]  ;;  %v4147_v56 = vpack.c.bf16 %v4116_v49, %v4111_v48  ;;  %v3841_v11 = vld [vmem:[%s4798_s1 + $0x58] sm:$0xff]  }
  0x12   :  { %3412 = vmatmul.mubr.msk.bf16.vlgmr.msra.gmra.mrb[0].mxu0 %vm158_vm0, %v3988_v20  ;;  %v3836_v51 = vld [vmem:[%s4798_s1 + $0x160] sm:$0xff]   ;;  %v4152_v57 = vld [vmem:[%s4799_s0 + $0xf0] sm:$0xff]  ;;  %v3842_v14 = vld [vmem:[%s4798_s1 + $0x178] sm:$0xff]  }
  0x13   :  { %3428 = vmatmul.mubr.msk.bf16.vlgmr.msra.gmra.mrb[0].mxu1 %vm158_vm0, %v3997_v22  ;;  %3436 = vmatpush3.bf16.msra.mxu0 %v3827_v18  ;;  %v4128_v52 = vld [vmem:[%s4799_s0 + $0x40] sm:$0xff]  ;;  %v4180_v63 = vld [vmem:[%s4799_s0 + $0x70] sm:$0xff] }
  0x14   :  { %3452 = vmatpush3.bf16.msra.mxu1 %v3828_v19  ;;  %3437 = vmatprep.subr.bf16.mxu0 %v3829_v26  ;;  %v4143_v55 = vld [vmem:[%s4799_s0 + $0xe0] sm:$0xff]  ;;  %v4162_v60 = vpack.c.bf16 %v4138_v54, %v4128_v52  ;;  %v4190_v1 = vld [vmem:[%s4799_s0 + $0x110] sm:$0xff] }
  0x15   :  { %3453 = vmatprep.subr.bf16.mxu1 %v3830_v27  ;;  %3415 = vmatprep.mubr.msk.bf16.mxu0 %vm158_vm0, %v4022_v28  ;;  %v4168_v61 = vpack.c.bf16 %v4152_v57, %v4143_v55  ;;  %v4173_v62 = vld [vmem:[%s4799_s0 + $0x60] sm:$0xff]  ;;  %v3839_v2 = vld [vmem:[%s4798_s1 + $0x50] sm:$0xff]  }
  0x16   :  { %3431 = vmatprep.mubr.msk.bf16.mxu1 %vm158_vm0, %v4038_v31  ;;  %v4185_v0 = vld [vmem:[%s4799_s0 + $0x100] sm:$0xff]  ;;  %v3840_v3 = vld [vmem:[%s4798_s1 + $0x170] sm:$0xff]   ;;  %v4212_v6 = vpack.c.bf16 %v4180_v63, %v4173_v62 }
  0x17   :  { %3438 = vmatpush3.bf16.msra.mxu0 %v3829_v26  ;;  %v599_v4 = vld [vmem:[%s4799_s0 + $0x2] sm:$0xff]  ;;  %v4206_v5 = vld [vmem:[%s4799_s0 + $0x12] sm:$0xff]  ;;  %v4219_v9 = vpack.c.bf16 %v4190_v1, %v4185_v0 }
  0x18   :  { %3454 = vmatpush3.bf16.msra.mxu1 %v3830_v27  ;;  %3439 = vmatprep.subr.bf16.mxu0 %v3831_v34  ;;  %v607_v7 = vld [vmem:[%s4799_s0 + $0xa2] sm:$0xff]  ;;  %v4224_v10 = vld [vmem:[%s4799_s0 + $0xb2] sm:$0xff]  ;;  %v3203_v18 = vpack.c.bf16 %v4206_v5, %v599_v4 }
  0x19   :  { %3455 = vmatprep.subr.bf16.mxu1 %v3832_v35  ;;  %v3207_v19 = vpack.c.bf16 %v4224_v10, %v607_v7  ;;  %v4239_v26 = vld [vmem:[%s4799_s0 + $0x22] sm:$0xff]  ;;  %v4244_v27 = vld [vmem:[%s4799_s0 + $0x32] sm:$0xff] }
  0x1a   :  { %3416 = vmatmul.mubr.msk.bf16.gmra.mrb[4].mxu0 %vm158_vm0, %v4064_v36  ;;  %v3843_v37 = vld [vmem:[%s4798_s1 + $0x60] sm:$0xff]   ;;  %v4318_v7 = vld [vmem:[%s4799_s0 + $0x72] sm:$0xff] }
  0x1b   :  { %3432 = vmatmul.mubr.msk.bf16.gmra.mrb[4].mxu1 %vm158_vm0, %v4076_v39  ;;  %3440 = vmatpush3.bf16.msra.mxu0 %v3831_v34  ;;  %v4249_v34 = vld [vmem:[%s4799_s0 + $0xc2] sm:$0xff] }
  0x1c   :  { %3456 = vmatpush3.bf16.msra.mxu1 %v3832_v35  ;;  %3441 = vmatprep.subr.bf16.mxu0 %v3833_v42  ;;  %v4256_v35 = vld [vmem:[%s4799_s0 + $0xd2] sm:$0xff]  ;;  %v3844_v40 = vld [vmem:[%s4798_s1 + $0x180] sm:$0xff]  }
  0x1d   :  { %3457 = vmatprep.subr.bf16.mxu1 %v3834_v43  ;;  %3443 = vmatprep.mubr.msk.bf16.mxu0 %vm158_vm0, %v3195_v44  ;;  %v4278_v44 = vpack.c.bf16 %v4244_v27, %v4239_v26 }
  0x1e   :  { %3459 = vmatprep.mubr.msk.bf16.mxu1 %vm158_vm0, %v3199_v45  ;;  %v3845_v45 = vld [vmem:[%s4798_s1 + $0x68] sm:$0xff]  }
  0x1f   :  { %3442 = vmatpush3.bf16.msra.mxu0 %v3833_v42  ;;  %v4267_v42 = vld [vmem:[%s4799_s0 + $0x42] sm:$0xff] }
  0x20   :  { %3458 = vmatpush3.bf16.msra.mxu1 %v3834_v43  ;;  %3467 = vmatprep.subr.bf16.mxu0 %v3835_v50  ;;  %v4273_v43 = vld [vmem:[%s4799_s0 + $0x52] sm:$0xff] }
  0x21   :  { %3483 = vmatprep.subr.bf16.mxu1 %v3836_v51 }
  0x22   :  { %3444 = vmatmul.mubr.msk.bf16.vlgmr.msra.gmra.mrb[0].mxu0 %vm158_vm0, %v4133_v53 }
  0x23   :  { %3460 = vmatmul.mubr.msk.bf16.vlgmr.msra.gmra.mrb[0].mxu1 %vm158_vm0, %v4147_v56  ;;  %3468 = vmatpush3.bf16.msra.mxu0 %v3835_v50  ;;  %v4286_v50 = vld [vmem:[%s4799_s0 + $0xe2] sm:$0xff] }
  0x24   :  { %3484 = vmatpush3.bf16.msra.mxu1 %v3836_v51  ;;  %3469 = vmatprep.subr.bf16.mxu0 %v3837_v58  ;;  %v4290_v51 = vpack.c.bf16 %v4256_v35, %v4249_v34 }
  0x25   :  { %3485 = vmatprep.subr.bf16.mxu1 %v3838_v59  ;;  %3447 = vmatprep.mubr.msk.bf16.mxu0 %vm158_vm0, %v4162_v60 }
  0x26   :  { %3463 = vmatprep.mubr.msk.bf16.mxu1 %vm158_vm0, %v4168_v61  ;;  %4806 = vst [vmem:[#allocation2_spill] sm:$0xff] %v4290_v51 }
  0x27   :  { %3470 = vmatpush3.bf16.msra.mxu0 %v3837_v58  ;;  %v4295_v58 = vld [vmem:[%s4799_s0 + $0xf2] sm:$0xff] }
  0x28   :  { %3486 = vmatpush3.bf16.msra.mxu1 %v3838_v59  ;;  %3471 = vmatprep.subr.bf16.mxu0 %v3839_v2  ;;  %v3846_v59 = vld [vmem:[%s4798_s1 + $0x188] sm:$0xff]   ;;  %v4313_v4 = vpack.c.bf16 %v4295_v58, %v4286_v50 }
  0x29   :  { %3487 = vmatprep.subr.bf16.mxu1 %v3840_v3 }
  0x2a   :  { %3448 = vmatmul.mubr.msk.bf16.gmra.mrb[4].mxu0 %vm158_vm0, %v4212_v6  ;;  %4808 = vst [vmem:[#allocation4_spill] sm:$0xff] %v4313_v4 }
  0x2b   :  { %3464 = vmatmul.mubr.msk.bf16.gmra.mrb[4].mxu1 %vm158_vm0, %v4219_v9  ;;  %3472 = vmatpush3.bf16.msra.mxu0 %v3839_v2  ;;  %v4302_v2 = vpack.c.bf16 %v4273_v43, %v4267_v42 }
  0x2c   :  { %3488 = vmatpush3.bf16.msra.mxu1 %v3840_v3  ;;  %3473 = vmatprep.subr.bf16.mxu0 %v3841_v11  ;;  %v4307_v3 = vld [vmem:[%s4799_s0 + $0x62] sm:$0xff] }
  0x2d   :  { %3489 = vmatprep.subr.bf16.mxu1 %v3842_v14  ;;  %3475 = vmatprep.mubr.msk.bf16.mxu0 %vm158_vm0, %v3203_v18  ;;  %4807 = vst [vmem:[#allocation3_spill] sm:$0xff] %v4302_v2  ;;  %v3847_v18 = vld [vmem:[%s4798_s1 + $0x70] sm:$0xff]  }
  0x2e   :  { %3491 = vmatprep.mubr.msk.bf16.mxu1 %vm158_vm0, %v3207_v19  ;;  %v3848_v19 = vld [vmem:[%s4798_s1 + $0x190] sm:$0xff]  }
  0x2f   :  { %3474 = vmatpush3.bf16.msra.mxu0 %v3841_v11  ;;  %v4325_v11 = vld [vmem:[%s4799_s0 + $0x102] sm:$0xff] }
  0x30   :  { %3490 = vmatpush3.bf16.msra.mxu1 %v3842_v14  ;;  %3499 = vmatprep.subr.bf16.mxu0 %v3843_v37  ;;  %v4330_v14 = vld [vmem:[%s4799_s0 + $0x112] sm:$0xff] }
  0x31   :  { %3515 = vmatprep.subr.bf16.mxu1 %v3844_v40 }
  0x32   :  { %3476 = vmatmul.mubr.msk.bf16.vlgmr.msra.gmra.mrb[0].mxu0 %vm158_vm0, %v4278_v44 }
  0x33   :  { %3492 = vmatmul.mubr.msk.bf16.vlgmr.msra.gmra.mrb[0].mxu1 %vm158_vm0, %v4290_v51  ;;  %3500 = vmatpush3.bf16.msra.mxu0 %v3843_v37  ;;  %v4344_v37 = vpack.c.bf16 %v4318_v7, %v4307_v3  ;;  %v3211_v51 = vpack.c.bf16 %v4099_v46, %v4072_v38  ;;  %v3852_v38 = vld [vmem:[%s4798_s1 + $0x1a0] sm:$0xff]   ;;  %v3216_v46 = vpack.c.bf16 %v4143_v55, %v4116_v49  ;;  %v3856_v55 = vld [vmem:[%s4798_s1 + $0x1b0] sm:$0xff]  }
  0x34   :  { %3516 = vmatpush3.bf16.msra.mxu1 %v3844_v40  ;;  %3501 = vmatprep.subr.bf16.mxu0 %v3845_v45  ;;  %v4348_v40 = vpack.c.bf16 %v4330_v14, %v4325_v11  ;;  %v4390_v49 = vld [vmem:[%s4799_s0 + $0x80] sm:$0xff] }
  0x35   :  { %3517 = vmatprep.subr.bf16.mxu1 %v3846_v59  ;;  %3479 = vmatprep.mubr.msk.bf16.mxu0 %vm158_vm0, %v4302_v2  ;;  %v3849_v2 = vld [vmem:[%s4798_s1 + $0x78] sm:$0xff]  }
  0x36   :  { %3495 = vmatprep.mubr.msk.bf16.mxu1 %vm158_vm0, %v4313_v4  ;;  %v3850_v4 = vld [vmem:[%s4798_s1 + $0x198] sm:$0xff]  }
  0x37   :  { %3502 = vmatpush3.bf16.msra.mxu0 %v3845_v45  ;;  %v3215_v45 = vpack.c.bf16 %v4111_v48, %v4084_v41  ;;  %v3212_v41 = vpack.c.bf16 %v4128_v52, %v4106_v47  ;;  %v3853_v48 = vld [vmem:[%s4798_s1 + $0x88] sm:$0xff]   ;;  %v3217_v47 = vpack.c.bf16 %v4185_v0, %v4152_v57  ;;  %v4396_v52 = vld [vmem:[%s4799_s0 + $0x120] sm:$0xff]  ;;  %v3214_v57 = vpack.c.bf16 %v4390_v49, %v4180_v63  ;;  %v3857_v0 = vld [vmem:[%s4798_s1 + $0x98] sm:$0xff]  }
  0x38   :  { %3518 = vmatpush3.bf16.msra.mxu1 %v3846_v59  ;;  %3503 = vmatprep.subr.bf16.mxu0 %v3847_v18  ;;  %v3851_v59 = vld [vmem:[%s4798_s1 + $0x80] sm:$0xff]   ;;  %v3223_v63 = vpack.c.bf16 %v3971_v16, %v3955_v12  ;;  %v3220_v12 = vpack.c.bf16 %v3993_v21, %v3966_v15  ;;  %v3861_v16 = vld [vmem:[%s4798_s1 + $0xa8] sm:$0xff]   ;;  %v3225_v15 = vpack.c.bf16 %v4043_v32, %v4012_v25  ;;  %v3865_v32 = vld [vmem:[%s4798_s1 + $0xb8] sm:$0xff]  }
  0x39   :  { %3519 = vmatprep.subr.bf16.mxu1 %v3848_v19  ;;  %v4454_v21 = vld [vmem:[%s4799_s0 + $0x121] sm:$0xff] }
  0x3a   :  { %3480 = vmatmul.mubr.msk.bf16.gmra.mrb[4].mxu0 %vm158_vm0, %v4344_v37 }
  0x3b   :  { %3496 = vmatmul.mubr.msk.bf16.gmra.mrb[4].mxu1 %vm158_vm0, %v4348_v40  ;;  %3504 = vmatpush3.bf16.msra.mxu0 %v3847_v18  ;;  %v3213_v18 = vpack.c.bf16 %v4173_v62, %v4138_v54  ;;  %v3855_v54 = vld [vmem:[%s4798_s1 + $0x90] sm:$0xff]   ;;  %v3218_v62 = vpack.c.bf16 %v4396_v52, %v4190_v1  ;;  %v3859_v1 = vld [vmem:[%s4798_s1 + $0xa0] sm:$0xff]  }
  0x3c   :  { %3520 = vmatpush3.bf16.msra.mxu1 %v3848_v19  ;;  %3505 = vmatprep.subr.bf16.mxu0 %v3849_v2  ;;  %v3862_v19 = vld [vmem:[%s4798_s1 + $0x1c8] sm:$0xff]  }
  0x3d   :  { %3521 = vmatprep.subr.bf16.mxu1 %v3850_v4  ;;  %3507 = vmatprep.mubr.msk.bf16.mxu0 %vm158_vm0, %v3211_v51  ;;  %v3854_v51 = vld [vmem:[%s4798_s1 + $0x1a8] sm:$0xff]  }
  0x3e   :  { %3523 = vmatprep.mubr.msk.bf16.mxu1 %vm158_vm0, %v3215_v45  ;;  %v3221_v45 = vpack.c.bf16 %v4027_v29, %v4002_v23  ;;  %v3863_v23 = vld [vmem:[%s4798_s1 + $0xb0] sm:$0xff]   ;;  %v3226_v29 = vpack.c.bf16 %v4454_v21, %v4050_v33  ;;  %v3867_v33 = vld [vmem:[%s4798_s1 + $0xc0] sm:$0xff]  }
  0x3f   :  { %3506 = vmatpush3.bf16.msra.mxu0 %v3849_v2  ;;  %v3858_v2 = vld [vmem:[%s4798_s1 + $0x1b8] sm:$0xff]  }
  0x40   :  { %3522 = vmatpush3.bf16.msra.mxu1 %v3850_v4  ;;  %3531 = vmatprep.subr.bf16.mxu0 %v3851_v59  ;;  %v3219_v4 = vpack.c.bf16 %v3960_v13, %v3943_v8  ;;  %v3860_v8 = vld [vmem:[%s4798_s1 + $0x1c0] sm:$0xff]   ;;  %v3224_v13 = vpack.c.bf16 %v4007_v24, %v3977_v17  ;;  %v3864_v24 = vld [vmem:[%s4798_s1 + $0x1d0] sm:$0xff]  }
  0x41   :  { %3547 = vmatprep.subr.bf16.mxu1 %v3852_v38  ;;  %v4448_v17 = vld [vmem:[%s4799_s0 + $0x81] sm:$0xff] }
  0x42   :  { %3508 = vmatmul.mubr.msk.bf16.vlgmr.msra.gmra.mrb[0].mxu0 %vm158_vm0, %v3212_v41  ;;  %v3222_v25 = vpack.c.bf16 %v4448_v17, %v4032_v30  ;;  %v3231_v30 = vpack.c.bf16 %v4249_v34, %v4224_v10  ;;  %v3228_v10 = vpack.c.bf16 %v4267_v42, %v4244_v27  ;;  %v3869_v34 = vld [vmem:[%s4798_s1 + $0xc8] sm:$0xff]   ;;  %v3233_v27 = vpack.c.bf16 %v4325_v11, %v4295_v58  ;;  %v3873_v11 = vld [vmem:[%s4798_s1 + $0xd8] sm:$0xff]  }
  0x43   :  { %3524 = vmatmul.mubr.msk.bf16.vlgmr.msra.gmra.mrb[0].mxu1 %vm158_vm0, %v3216_v46  ;;  %3532 = vmatpush3.bf16.msra.mxu0 %v3851_v59  ;;  %v3866_v59 = vld [vmem:[%s4798_s1 + $0x1d8] sm:$0xff]   ;;  %v3870_v41 = vld [vmem:[%s4798_s1 + $0x1e8] sm:$0xff]   ;;  %v3229_v46 = vpack.c.bf16 %v4307_v3, %v4273_v43  ;;  %v3871_v43 = vld [vmem:[%s4798_s1 + $0xd0] sm:$0xff]  }
  0x44   :  { %3548 = vmatpush3.bf16.msra.mxu1 %v3852_v38  ;;  %3533 = vmatprep.subr.bf16.mxu0 %v3853_v48  ;;  %v3227_v38 = vpack.c.bf16 %v4239_v26, %v4206_v5  ;;  %v3868_v5 = vld [vmem:[%s4798_s1 + $0x1e0] sm:$0xff]   ;;  %v3232_v26 = vpack.c.bf16 %v4286_v50, %v4256_v35  ;;  %v3872_v50 = vld [vmem:[%s4798_s1 + $0x1f0] sm:$0xff]  }
  0x45   :  { %3549 = vmatprep.subr.bf16.mxu1 %v3854_v51  ;;  %3511 = vmatprep.mubr.msk.bf16.mxu0 %vm158_vm0, %v3213_v18  ;;  %v4507_v35 = vld [vmem:[%s4799_s0 + $0x82] sm:$0xff] }
  0x46   :  { %3527 = vmatprep.mubr.msk.bf16.mxu1 %vm158_vm0, %v3217_v47  ;;  %v4512_v42 = vld [vmem:[%s4799_s0 + $0x122] sm:$0xff]  ;;  %v3230_v58 = vpack.c.bf16 %v4507_v35, %v4318_v7  ;;  %v3879_v47 = vld [vmem:[%s4798_s1 + $0xf0] sm:$0xff]  }
  0x47   :  { %3534 = vmatpush3.bf16.msra.mxu0 %v3853_v48  ;;  %v3234_v3 = vpack.c.bf16 %v4512_v42, %v4330_v14  ;;  %v3874_v48 = vld [vmem:[%s4798_s1 + $0x1f8] sm:$0xff]   ;;  %v3875_v7 = vld [vmem:[%s4798_s1 + $0xe0] sm:$0xff]   ;;  %v3878_v18 = vld [vmem:[%s4798_s1 + $0x208] sm:$0xff]  }
  0x48   :  { %3550 = vmatpush3.bf16.msra.mxu1 %v3854_v51  ;;  %3535 = vmatprep.subr.bf16.mxu0 %v3855_v54  ;;  %v3876_v14 = vld [vmem:[%s4798_s1 + $0x200] sm:$0xff]   ;;  %v3877_v51 = vld [vmem:[%s4798_s1 + $0xe8] sm:$0xff]  }
  0x49   :  { %3551 = vmatprep.subr.bf16.mxu1 %v3856_v55 }
  0x4a   :  { %3512 = vmatmul.mubr.msk.bf16.gmra.mrb[4].mxu0 %vm158_vm0, %v3214_v57  ;;  %v3886_v57 = vld [vmem:[%s4798_s1 + $0x228] sm:$0xff]  }
  0x4b   :  { %3528 = vmatmul.mubr.msk.bf16.gmra.mrb[4].mxu1 %vm158_vm0, %v3218_v62  ;;  %3536 = vmatpush3.bf16.msra.mxu0 %v3855_v54  ;;  %v3887_v62 = vld [vmem:[%s4798_s1 + $0x110] sm:$0xff]  }
  0x4c   :  { %3552 = vmatpush3.bf16.msra.mxu1 %v3856_v55  ;;  %3537 = vmatprep.subr.bf16.mxu0 %v3857_v0  ;;  %v3881_v55 = vld [vmem:[%s4798_s1 + $0xf8] sm:$0xff]  }
  0x4d   :  { %3553 = vmatprep.subr.bf16.mxu1 %v3858_v2  ;;  %3539 = vmatprep.mubr.msk.bf16.mxu0 %vm158_vm0, %v3219_v4  ;;  %v4810_v4 = vld [vmem:[#allocation3_spill] sm:$0xff] }
  0x4e   :  { %3555 = vmatprep.mubr.msk.bf16.mxu1 %vm158_vm0, %v3223_v63  ;;  %v4811_v63 = vld [vmem:[#allocation4_spill] sm:$0xff] }
  0x4f   :  { %3538 = vmatpush3.bf16.msra.mxu0 %v3857_v0 }
  0x50   :  { %3554 = vmatpush3.bf16.msra.mxu1 %v3858_v2  ;;  %3563 = vmatprep.subr.bf16.mxu0 %v3859_v1  ;;  %v3889_v2 = vld [vmem:[%s4798_s1 + $0x118] sm:$0xff]  }
  0x51   :  { %3579 = vmatprep.subr.bf16.mxu1 %v3860_v8 }
  0x52   :  { %3540 = vmatmul.mubr.msk.bf16.vlgmr.msra.gmra.mrb[0].mxu0 %vm158_vm0, %v3220_v12 }
  0x53   :  { %3556 = vmatmul.mubr.msk.bf16.vlgmr.msra.gmra.mrb[0].mxu1 %vm158_vm0, %v3224_v13  ;;  %3564 = vmatpush3.bf16.msra.mxu0 %v3859_v1  ;;  %v3136_v1 = vld [vmem:[%s4799_s0 + $0x92] sm:$0xff] }
  0x54   :  { %3580 = vmatpush3.bf16.msra.mxu1 %v3860_v8  ;;  %3565 = vmatprep.subr.bf16.mxu0 %v3861_v16  ;;  %v3254_v8 = vpack.c.bf16 %v3136_v1, %v4507_v35  ;;  %v3171_v35 = vld [vmem:[%s4799_s0 + $0x11] sm:$0xff] }
  0x55   :  { %3581 = vmatprep.subr.bf16.mxu1 %v3862_v19  ;;  %3543 = vmatprep.mubr.msk.bf16.mxu0 %vm158_vm0, %v3221_v45 }
  0x56   :  { %3559 = vmatprep.mubr.msk.bf16.mxu1 %vm158_vm0, %v3225_v15 }
  0x57   :  { %3566 = vmatpush3.bf16.msra.mxu0 %v3861_v16 }
  0x58   :  { %3582 = vmatpush3.bf16.msra.mxu1 %v3862_v19  ;;  %3567 = vmatprep.subr.bf16.mxu0 %v3863_v23 }
  0x59   :  { %3583 = vmatprep.subr.bf16.mxu1 %v3864_v24 }
  0x5a   :  { %3544 = vmatmul.mubr.msk.bf16.gmra.mrb[4].mxu0 %vm158_vm0, %v3222_v25 }
  0x5b   :  { %3560 = vmatmul.mubr.msk.bf16.gmra.mrb[4].mxu1 %vm158_vm0, %v3226_v29  ;;  %3568 = vmatpush3.bf16.msra.mxu0 %v3863_v23 }
  0x5c   :  { %3584 = vmatpush3.bf16.msra.mxu1 %v3864_v24  ;;  %3569 = vmatprep.subr.bf16.mxu0 %v3865_v32 }
  0x5d   :  { %3585 = vmatprep.subr.bf16.mxu1 %v3866_v59  ;;  %3571 = vmatprep.mubr.msk.bf16.mxu0 %vm158_vm0, %v3227_v38 }
  0x5e   :  { %3587 = vmatprep.mubr.msk.bf16.mxu1 %vm158_vm0, %v3231_v30 }
  0x5f   :  { %3570 = vmatpush3.bf16.msra.mxu0 %v3865_v32 }
  0x60   :  { %3586 = vmatpush3.bf16.msra.mxu1 %v3866_v59  ;;  %3595 = vmatprep.subr.bf16.mxu0 %v3867_v33 }
  0x61   :  { %3611 = vmatprep.subr.bf16.mxu1 %v3868_v5 }
  0x62   :  { %3572 = vmatmul.mubr.msk.bf16.vlgmr.msra.gmra.mrb[0].mxu0 %vm158_vm0, %v3228_v10 }
  0x63   :  { %3588 = vmatmul.mubr.msk.bf16.vlgmr.msra.gmra.mrb[0].mxu1 %vm158_vm0, %v3232_v26  ;;  %3596 = vmatpush3.bf16.msra.mxu0 %v3867_v33  ;;  %v3173_v33 = vld [vmem:[%s4799_s0 + $0x31] sm:$0xff] }
  0x64   :  { %3612 = vmatpush3.bf16.msra.mxu1 %v3868_v5  ;;  %3597 = vmatprep.subr.bf16.mxu0 %v3869_v34 }
  0x65   :  { %3613 = vmatprep.subr.bf16.mxu1 %v3870_v41  ;;  %3575 = vmatprep.mubr.msk.bf16.mxu0 %vm158_vm0, %v3229_v46 }
  0x66   :  { %3591 = vmatprep.mubr.msk.bf16.mxu1 %vm158_vm0, %v3233_v27  ;;  %v3181_v27 = vld [vmem:[%s4799_s0 + $0xd1] sm:$0xff] }
  0x67   :  { %3598 = vmatpush3.bf16.msra.mxu0 %v3869_v34 }
  0x68   :  { %3614 = vmatpush3.bf16.msra.mxu1 %v3870_v41  ;;  %3599 = vmatprep.subr.bf16.mxu0 %v3871_v43 }
  0x69   :  { %3615 = vmatprep.subr.bf16.mxu1 %v3872_v50 }
  0x6a   :  { %3576 = vmatmul.mubr.msk.bf16.gmra.mrb[4].mxu0 %vm158_vm0, %v3230_v58 }
  0x6b   :  { %3592 = vmatmul.mubr.msk.bf16.gmra.mrb[4].mxu1 %vm158_vm0, %v3234_v3  ;;  %3600 = vmatpush3.bf16.msra.mxu0 %v3871_v43 }
  0x6c   :  { %3616 = vmatpush3.bf16.msra.mxu1 %v3872_v50  ;;  %3601 = vmatprep.subr.bf16.mxu0 %v3873_v11 }
  0x6d   :  { %3617 = vmatprep.subr.bf16.mxu1 %v3874_v48  ;;  %3603 = vmatprep.mubr.msk.bf16.mxu0 %vm158_vm0, %v4133_v53  ;;  %v3056_v53 = vld [vmem:[%s4799_s0 + $0x90] sm:$0xff] }
  0x6e   :  { %3619 = vmatprep.mubr.msk.bf16.mxu1 %vm158_vm0, %v4147_v56  ;;  %v3064_v56 = vld [vmem:[%s4799_s0 + $0x130] sm:$0xff] }
  0x6f   :  { %3602 = vmatpush3.bf16.msra.mxu0 %v3873_v11  ;;  %v3242_v54 = vpack.c.bf16 %v3064_v56, %v4396_v52  ;;  %v3885_v52 = vld [vmem:[%s4798_s1 + $0x108] sm:$0xff]   ;;  %v3179_v11 = vld [vmem:[%s4799_s0 + $0xb1] sm:$0xff] }
  0x70   :  { %3618 = vmatpush3.bf16.msra.mxu1 %v3874_v48  ;;  %3627 = vmatprep.subr.bf16.mxu0 %v3875_v7  ;;  %v3174_v48 = vld [vmem:[%s4799_s0 + $0x41] sm:$0xff] }
  0x71   :  { %3643 = vmatprep.subr.bf16.mxu1 %v3876_v14  ;;  %v3182_v56 = vld [vmem:[%s4799_s0 + $0xe1] sm:$0xff] }
  0x72   :  { %3604 = vmatmul.mubr.msk.bf16.vlgmr.msra.gmra.mrb[0].mxu0 %vm158_vm0, %v4162_v60  ;;  %v3880_v60 = vld [vmem:[%s4798_s1 + $0x210] sm:$0xff]  }
  0x73   :  { %3620 = vmatmul.mubr.msk.bf16.vlgmr.msra.gmra.mrb[0].mxu1 %vm158_vm0, %v4168_v61  ;;  %3628 = vmatpush3.bf16.msra.mxu0 %v3875_v7  ;;  %v3238_v61 = vpack.c.bf16 %v3056_v53, %v4390_v49  ;;  %v3884_v49 = vld [vmem:[%s4798_s1 + $0x220] sm:$0xff]  }
  0x74   :  { %3644 = vmatpush3.bf16.msra.mxu1 %v3876_v14  ;;  %3629 = vmatprep.subr.bf16.mxu0 %v3877_v51 }
  0x75   :  { %3645 = vmatprep.subr.bf16.mxu1 %v3878_v18  ;;  %3607 = vmatprep.mubr.msk.bf16.mxu0 %vm158_vm0, %v4212_v6  ;;  %v3882_v6 = vld [vmem:[%s4798_s1 + $0x218] sm:$0xff]  }
  0x76   :  { %3623 = vmatprep.mubr.msk.bf16.mxu1 %vm158_vm0, %v4219_v9  ;;  %v3883_v9 = vld [vmem:[%s4798_s1 + $0x100] sm:$0xff]  }
  0x77   :  { %3630 = vmatpush3.bf16.msra.mxu0 %v3877_v51 }
  0x78   :  { %3646 = vmatpush3.bf16.msra.mxu1 %v3878_v18  ;;  %3631 = vmatprep.subr.bf16.mxu0 %v3879_v47 }
  0x79   :  { %3647 = vmatprep.subr.bf16.mxu1 %v3880_v60 }
  0x7a   :  { %3608 = vmatmul.mubr.msk.bf16.gmra.mrb[4].mxu0 %vm158_vm0, %v3238_v61 }
  0x7b   :  { %3624 = vmatmul.mubr.msk.bf16.gmra.mrb[4].mxu1 %vm158_vm0, %v3242_v54  ;;  %3632 = vmatpush3.bf16.msra.mxu0 %v3879_v47  ;;  %v3172_v47 = vld [vmem:[%s4799_s0 + $0x21] sm:$0xff] }
  0x7c   :  { %3648 = vmatpush3.bf16.msra.mxu1 %v3880_v60  ;;  %3633 = vmatprep.subr.bf16.mxu0 %v3881_v55 }
  0x7d   :  { %3649 = vmatprep.subr.bf16.mxu1 %v3882_v6  ;;  %3635 = vmatprep.mubr.msk.bf16.mxu0 %vm158_vm0, %v3988_v20  ;;  %v3096_v20 = vld [vmem:[%s4799_s0 + $0x91] sm:$0xff] }
  0x7e   :  { %3651 = vmatprep.mubr.msk.bf16.mxu1 %vm158_vm0, %v3997_v22  ;;  %v3104_v22 = vld [vmem:[%s4799_s0 + $0x131] sm:$0xff] }
  0x7f   :  { %3634 = vmatpush3.bf16.msra.mxu0 %v3881_v55  ;;  %v3250_v0 = vpack.c.bf16 %v3104_v22, %v4454_v21 }
  0x80   :  { %3650 = vmatpush3.bf16.msra.mxu1 %v3882_v6  ;;  %3659 = vmatprep.subr.bf16.mxu0 %v3883_v9 }
  0x81   :  { %3675 = vmatprep.subr.bf16.mxu1 %v3884_v49 }
  0x82   :  { %3636 = vmatmul.mubr.msk.bf16.vlgmr.msra.gmra.mrb[0].mxu0 %vm158_vm0, %v4022_v28  ;;  %v3888_v28 = vld [vmem:[%s4798_s1 + $0x230] sm:$0xff]  }
  0x83   :  { %3652 = vmatmul.mubr.msk.bf16.vlgmr.msra.gmra.mrb[0].mxu1 %vm158_vm0, %v4038_v31  ;;  %3660 = vmatpush3.bf16.msra.mxu0 %v3883_v9  ;;  %v3246_v31 = vpack.c.bf16 %v3096_v20, %v4448_v17  ;;  %v3180_v9 = vld [vmem:[%s4799_s0 + $0xc1] sm:$0xff] }
  0x84   :  { %3676 = vmatpush3.bf16.msra.mxu1 %v3884_v49  ;;  %3661 = vmatprep.subr.bf16.mxu0 %v3885_v52 }
  0x85   :  { %3677 = vmatprep.subr.bf16.mxu1 %v3886_v57  ;;  %3639 = vmatprep.mubr.msk.bf16.mxu0 %vm158_vm0, %v4064_v36  ;;  %v3890_v36 = vld [vmem:[%s4798_s1 + $0x238] sm:$0xff]  }
  0x86   :  { %3655 = vmatprep.mubr.msk.bf16.mxu1 %vm158_vm0, %v4076_v39  ;;  %v4809_v39 = vld [vmem:[#allocation2_spill] sm:$0xff] }
  0x87   :  { %3662 = vmatpush3.bf16.msra.mxu0 %v3885_v52 }
  0x88   :  { %3678 = vmatpush3.bf16.msra.mxu1 %v3886_v57  ;;  %3663 = vmatprep.subr.bf16.mxu0 %v3887_v62 }
  0x89   :  { %3679 = vmatprep.subr.bf16.mxu1 %v3888_v28 }
  0x8a   :  { %3640 = vmatmul.mubr.msk.bf16.gmra.mrb[4].mxu0 %vm158_vm0, %v3246_v31 }
  0x8b   :  { %3656 = vmatmul.mubr.msk.bf16.gmra.mrb[4].mxu1 %vm158_vm0, %v3250_v0  ;;  %3664 = vmatpush3.bf16.msra.mxu0 %v3887_v62 }
  0x8c   :  { %3680 = vmatpush3.bf16.msra.mxu1 %v3888_v28  ;;  %3665 = vmatprep.subr.bf16.mxu0 %v3889_v2 }
  0x8d   :  { %3681 = vmatprep.subr.bf16.mxu1 %v3890_v36  ;;  %3667 = vmatprep.mubr.msk.bf16.mxu0 %vm158_vm0, %v4278_v44  ;;  %v3144_v44 = vld [vmem:[%s4799_s0 + $0x132] sm:$0xff] }
  0x8e   :  { %3683 = vmatprep.mubr.msk.bf16.mxu1 %vm158_vm0, %v4809_v39  ;;  %v3258_v12 = vpack.c.bf16 %v3144_v44, %v4512_v42 }
  0x8f   :  { %3666 = vmatpush3.bf16.msra.mxu0 %v3889_v2 }
  0x90   :  { %3682 = vmatpush3.bf16.msra.mxu1 %v3890_v36 }
  0x92   :  { %3668 = vmatmul.mubr.msk.bf16.vlgmr.msra.gmra.mrb[0].mxu0 %vm158_vm0, %v4810_v4 }
  0x93   :  { %3684 = vmatmul.mubr.msk.bf16.vlgmr.msra.gmra.mrb[0].mxu1 %vm158_vm0, %v4811_v63  ;;  %3671 = vmatprep.mubr.msk.bf16.mxu0 %vm158_vm0, %v4344_v37  ;;  %v4651_v37 = vld [vmem:[%s4800_s2] ss:$0 sm:$0xff] }
  0x94   :  { %3687 = vmatprep.mubr.msk.bf16.mxu1 %vm158_vm0, %v4348_v40  ;;  %v4656_v40 = vld [vmem:[%s4801_s3] ss:$0 sm:$0xff] }
  0x9a   :  { %3672 = vmatmul.mubr.msk.bf16.gmra.mrb[4].mxu0 %vm158_vm0, %v3254_v8 }
  0x9b   :  { %3688 = vmatmul.mubr.msk.bf16.gmra.mrb[4].mxu1 %vm158_vm0, %v3258_v12 }
 0x165   :  { %v3669_v13 = vpop.f32.mrb[0].mxu0 }
 0x166   :  { %v2752_v16 = vmul.f32 %v3669_v13, %v4651_v37  ;;  %v3685_v19 = vpop.f32.mrb[0].mxu1  ;;  %v2575_v45 = vpop.f32.mrb[1].mxu0 }
 0x167   :  { %v2760_v15 = vmul.f32 %v3685_v19, %v4651_v37  ;;  %v2750_v23 = vmul.f32 %v4651_v37, %v2575_v45  ;;  %v2696_v24 = vpop.f32.mrb[1].mxu1  ;;  %v3670_v25 = vpop.f32.mrb[2].mxu0 }
 0x168   :  { %v2775_v29 = vadd.f32 %v4656_v40, %v2752_v16  ;;  %v2758_v32 = vmul.f32 %v4651_v37, %v2696_v24  ;;  %v2753_v59 = vmul.f32 %v3670_v25, %v4651_v37  ;;  %v3686_v38 = vpop.f32.mrb[2].mxu1  ;;  %v2578_v30 = vpop.f32.mrb[3].mxu0  ;;  %v3177_v16 = vld [vmem:[%s4799_s0 + $0x71] sm:$0xff] }
 0x169   :  { %v2783_v5 = vadd.f32 %v4656_v40, %v2760_v15  ;;  %v2773_v10 = vadd.f32 %v4656_v40, %v2750_v23  ;;  %v2761_v26 = vmul.f32 %v3686_v38, %v4651_v37  ;;  %v2751_v34 = vmul.f32 %v4651_v37, %v2578_v30  ;;  %v2699_v41 = vpop.f32.mrb[3].mxu1 }
 0x16a   :  { %v2791_v46 = vmax.f32 %v2775_v29, 0.0  ;;  %v2781_v42 = vadd.f32 %v4656_v40, %v2758_v32  ;;  %v2776_v43 = vadd.f32 %v4656_v40, %v2753_v59  ;;  %v2759_v50 = vmul.f32 %v4651_v37, %v2699_v41  ;;  %v3185_v29 = vld [vmem:[%s4799_s0 + $0x111] sm:$0xff] }
 0x16b   :  { %v2799_v58 = vmax.f32 %v2783_v5, 0.0  ;;  %v2789_v3 = vmax.f32 %v2773_v10, 0.0  ;;  %v2784_v7 = vadd.f32 %v4656_v40, %v2761_v26  ;;  %v2774_v14 = vadd.f32 %v4656_v40, %v2751_v34  ;;  %v3175_v32 = vld [vmem:[%s4799_s0 + $0x51] sm:$0xff] }
 0x16c   :  { %v2823_v51 = vadd.f32 %v3173_v33, %v2791_v46  ;;  %v2797_v18 = vmax.f32 %v2781_v42, 0.0  ;;  %v2792_v53 = vmax.f32 %v2776_v43, 0.0  ;;  %v2782_v60 = vadd.f32 %v4656_v40, %v2759_v50  ;;  %v3183_v10 = vld [vmem:[%s4799_s0 + $0xf1] sm:$0xff] }
 0x16d   :  { %v2831_v61 = vadd.f32 %v3181_v27, %v2799_v58  ;;  %v2821_v54 = vadd.f32 %v3171_v35, %v2789_v3  ;;  %v2800_v55 = vmax.f32 %v2784_v7, 0.0  ;;  %v2790_v6 = vmax.f32 %v2774_v14, 0.0  ;;  %v3673_v49 = vpop.f32.mrb[4].mxu0  ;;  %v3176_v35 = vld [vmem:[%s4799_s0 + $0x61] sm:$0xff] }
 0x16e   :  { %2839 = vst.msk [vmem:[%s4802_s4 + $0x10] sm:$0xff] %vm158_vm0, %v2823_v51  ;;  %v2829_v52 = vadd.f32 %v3179_v11, %v2797_v18  ;;  %v2824_v57 = vadd.f32 %v3174_v48, %v2792_v53  ;;  %v2798_v20 = vmax.f32 %v2782_v60, 0.0  ;;  %v2756_v22 = vmul.f32 %v3673_v49, %v4651_v37  ;;  %v3689_v62 = vpop.f32.mrb[4].mxu1  ;;  %v2591_v28 = vpop.f32.mrb[5].mxu0  ;;  %v3184_v3 = vld [vmem:[%s4799_s0 + $0x101] sm:$0xff] }
 0x16f   :  { %2847 = vst.msk [vmem:[%s4802_s4 + $0x50] sm:$0xff] %vm158_vm0, %v2831_v61  ;;  %2837 = vst.msk [vmem:[%s4802_s4] sm:$0xff] %vm158_vm0, %v2821_v54  ;;  %v2832_v31 = vadd.f32 %v3182_v56, %v2800_v55  ;;  %v2822_v0 = vadd.f32 %v3172_v47, %v2790_v6  ;;  %v2764_v2 = vmul.f32 %v3689_v62, %v4651_v37  ;;  %v2712_v39 = vpop.f32.mrb[5].mxu1  ;;  %v3674_v4 = vpop.f32.mrb[6].mxu0 }
 0x170   :  { %v2754_v36 = vmul.f32 %v4651_v37, %v2591_v28  ;;  %2845 = vst.msk [vmem:[%s4802_s4 + $0x40] sm:$0xff] %vm158_vm0, %v2829_v52  ;;  %2840 = vst.msk [vmem:[%s4802_s4 + $0x18] sm:$0xff] %vm158_vm0, %v2824_v57  ;;  %v2830_v63 = vadd.f32 %v3180_v9, %v2798_v20  ;;  %v2779_v1 = vadd.f32 %v4656_v40, %v2756_v22  ;;  %v3690_v12 = vpop.f32.mrb[6].mxu1  ;;  %v2594_v13 = vpop.f32.mrb[7].mxu0 }
 0x171   :  { %v2762_v44 = vmul.f32 %v4651_v37, %v2712_v39  ;;  %v2757_v8 = vmul.f32 %v3674_v4, %v4651_v37  ;;  %2848 = vst.msk [vmem:[%s4802_s4 + $0x58] sm:$0xff] %vm158_vm0, %v2832_v31  ;;  %2838 = vst.msk [vmem:[%s4802_s4 + $0x8] sm:$0xff] %vm158_vm0, %v2822_v0  ;;  %v2787_v19 = vadd.f32 %v4656_v40, %v2764_v2  ;;  %v2715_v24 = vpop.f32.mrb[7].mxu1 }
 0x172   :  { %v2777_v45 = vadd.f32 %v4656_v40, %v2754_v36  ;;  %v2765_v15 = vmul.f32 %v3690_v12, %v4651_v37  ;;  %v2755_v23 = vmul.f32 %v4651_v37, %v2594_v13  ;;  %2846 = vst.msk [vmem:[%s4802_s4 + $0x48] sm:$0xff] %vm158_vm0, %v2830_v63  ;;  %v2795_v25 = vmax.f32 %v2779_v1, 0.0 }
 0x173   :  { %v2785_v59 = vadd.f32 %v4656_v40, %v2762_v44  ;;  %v2780_v38 = vadd.f32 %v4656_v40, %v2757_v8  ;;  %v2763_v30 = vmul.f32 %v4651_v37, %v2715_v24  ;;  %v2803_v33 = vmax.f32 %v2787_v19, 0.0 }
 0x174   :  { %v2793_v5 = vmax.f32 %v2777_v45, 0.0  ;;  %v2788_v26 = vadd.f32 %v4656_v40, %v2765_v15  ;;  %v2778_v34 = vadd.f32 %v4656_v40, %v2755_v23  ;;  %v2827_v41 = vadd.f32 %v3177_v16, %v2795_v25 }
 0x175   :  { %v2801_v46 = vmax.f32 %v2785_v59, 0.0  ;;  %v2796_v27 = vmax.f32 %v2780_v38, 0.0  ;;  %v2786_v42 = vadd.f32 %v4656_v40, %v2763_v30  ;;  %v2835_v37 = vadd.f32 %v3185_v29, %v2803_v33 }
 0x176   :  { %v2825_v43 = vadd.f32 %v3175_v32, %v2793_v5  ;;  %v2804_v50 = vmax.f32 %v2788_v26, 0.0  ;;  %v2794_v58 = vmax.f32 %v2778_v34, 0.0  ;;  %2843 = vst.msk [vmem:[%s4802_s4 + $0x30] sm:$0xff] %vm158_vm0, %v2827_v41 }
 0x177   :  { %v2833_v11 = vadd.f32 %v3183_v10, %v2801_v46  ;;  %v2828_v48 = vadd.f32 %v4448_v17, %v2796_v27  ;;  %v2802_v7 = vmax.f32 %v2786_v42, 0.0  ;;  %2851 = vst.msk [vmem:[%s4802_s4 + $0x70] sm:$0xff] %vm158_vm0, %v2835_v37 }
 0x178   :  { %2841 = vst.msk [vmem:[%s4802_s4 + $0x20] sm:$0xff] %vm158_vm0, %v2825_v43  ;;  %v2836_v40 = vadd.f32 %v4454_v21, %v2804_v50  ;;  %v2826_v14 = vadd.f32 %v3176_v35, %v2794_v58 }
 0x179   :  { %2849 = vst.msk [vmem:[%s4802_s4 + $0x60] sm:$0xff] %vm158_vm0, %v2833_v11  ;;  %2844 = vst.msk [vmem:[%s4802_s4 + $0x38] sm:$0xff] %vm158_vm0, %v2828_v48  ;;  %v2834_v17 = vadd.f32 %v3184_v3, %v2802_v7 }
 0x17a   :  { %2852 = vst.msk [vmem:[%s4802_s4 + $0x78] sm:$0xff] %vm158_vm0, %v2836_v40  ;;  %2842 = vst.msk [vmem:[%s4802_s4 + $0x28] sm:$0xff] %vm158_vm0, %v2826_v14 }
 0x17b   :  { %2850 = vst.msk [vmem:[%s4802_s4 + $0x68] sm:$0xff] %vm158_vm0, %v2834_v17 }

// kernel: agent_forward.19
= control target key start
LH: loop header
LB: loop body
LE: loop exit
PB: predicated region body
PF: predicated region fallthrough
CT: control target
= control target key end

     0   :  { %8 = vsyncpa [#allocation3], 0  ;;  %s10494_s0 = inlined_call_operand.vmem [shape: bf16[8,768], index: 0, kind: input, shape index: {}]   ;;  %s10495_s1 = inlined_call_operand.hbm [shape: bf16[768,36864], index: 1, kind: input, shape index: {}]   ;;  %s10496_s2 = inlined_call_operand.vmem [shape: f32[1,36864], index: 2, kind: input, shape index: {}]   ;;  %s10497_s3 = inlined_call_operand.vmem [shape: bf16[8,36864], index: 3, kind: output, shape index: {}]  }
   0x1   :  { %10 = vsyncpa [#allocation3 + $0x1], 0  ;;  %s9336_s12 = smov 0   ;;  %s9338_s13 = smov 0  }
   0x2   :  { %s9340_s14 = smov 0   ;;  %s9342_s15 = smov 0  }
   0x3   :  { %s9344_s16 = smov 0   ;;  %s9346_s17 = smov 0  }
   0x4 LB: > { %s6880_s18 = sadd.s32 4294967295, %s9310_s17   ;;  %s25_s19 = sadd.s32 1, %s9306_s16  ;;  %s9310_s17 = sphi %s9346_s17, %s16_s17   ;;  %s9306_s16 = sphi %s9344_s16, %s10505_s16   ;;  %s9302_s15 = sphi %s9342_s15, %s10504_s15   ;;  %s9298_s14 = sphi %s9340_s14, %s10503_s14   ;;  %s9294_s13 = sphi %s9338_s13, %s10502_s13   ;;  %s9290_s12 = sphi %s9336_s12, %s10501_s12  }
   0x5   : > { %p26_p0 = scmp.ge.s32.totalorder %s25_s19, 16  ;;  %s61_s20 = sadd.s32 1, %s9298_s14 }
   0x6   : > { %p68_p1 = scmp.ne.s32.totalorder %s9298_s14, %s9294_s13  ;;  %p69_p2 = scmp.eq.s32.totalorder %s9310_s17, 0 }
   0x7   : > { %s10507_s19 = smov (%p26_p0, %s25_s19), 0  ;;  %p74_p4 = scmp.ne.s32.totalorder %s9294_s13, %s9290_s12 }
   0x8   : > { %p70_p3 = por %p69_p2, %p68_p1  ;;  %s58_s21 = ssub.s32 %s9306_s16, %s10507_s19 }
   0x9   : > { %p75_p5 = scmp.eq.s32.totalorder %s6880_s18, 0  ;;  %p59_p6 = scmp.eq.s32.totalorder %s58_s21, 0 }
   0xa   : > { %p7875_p8 = scmp.lt.s32.totalorder %s9310_s17, 16  ;;  %s160_s24 = sand.u32 1, %s9298_s14  }
   0xb   : > { %p9375_p7 = por %p75_p5, %p74_p4  ;;  %s7769_s25 = smul.u32 1152, %s9306_s16 }
   0xc   : > { %s9381_s23 = scalar_select %p59_p6, %s9298_s14, %s61_s20  }
   0xd   : > { %s7867_s26 = smul.u32 6912, %s160_s24  ;;  %s9388_s29 = scalar_lea.hbm %s10495_s1, %s7769_s25 }
   0xe   : > { %p9390_p9 = pnand %p7875_p8, %p70_p3  ;;  %s9397_s6 = scalar_lea.sflag [#allocation3], %s160_s24 }
   0xf   : > { %s164_s4 = scalar_lea.vmem [#allocation2], %s7867_s26  ;;  %s9230_s7 = scalar_lea.hbm %s9388_s29, 110592 }
  0x10   : > { %s171_s5 = sshll.u32 %s164_s4, 4  ;;  %p9231_p11 = scmp.ne.s32.totalorder %s9388_s29, %s9230_s7  ;;  %s9394_s5 = int_to_ptr.vmem [resolvable:$true] %s171_s5 }
  0x11   : > { %p9232_p12 = pneg %p9390_p9  ;;  %s9235_s10 = scalar_lea.hbm %s10495_s1, 1769472 }
  0x12   : > { %p9236_p1 = scmp.lt.u32.totalorder %s9388_s29, %s10495_s1  ;;  %p9237_p2 = scmp.lt.u32.totalorder %s9235_s10, %s9230_s7 }
  0x13   : > { %p9233_p13 = pnand %p9232_p12, %p9231_p11  ;;  %p9239_p4 = scmp.lt.u32.totalorder %s9230_s7, %s9388_s29 }
  0x14   : > { %p9238_p3 = por %p9237_p2, %p9236_p1 }
  0x15   : > { %p9234_p0 = pneg %p9233_p13 }
  0x16   : > { %p9240_p5 = por %p9239_p4, %p9238_p3 }
  0x18   : > { %p9241_p6 = pnand %p9240_p5, %p9234_p0 }
  0x1a   : > { %9244 = shalt.err (!%p9241_p6)
}
  0x1b   : > { %s9245_s18 = scalar_lea.vmem %s9394_s5, 110592  ;;  %s9312_s20 = smov [#allocation2]  }
  0x1c   : > { %p9246_p8 = scmp.ne.s32.totalorder %s9394_s5, %s9245_s18  ;;  %s9250_s21 = sshll.u32 %s9312_s20, 4  ;;  %s9251_s21 = int_to_ptr.vmem [resolvable:$false] %s9250_s21 }
  0x1d   : > { %s9252_s24 = scalar_lea.vmem %s9251_s21, 221184  ;;  %p9253_p10 = scmp.lt.s32.totalorder %s9394_s5, %s9251_s21 }
  0x1e   : > { %p9248_p11 = pnand %p9246_p8, %p9232_p12  ;;  %p9254_p1 = scmp.lt.s32.totalorder %s9252_s24, %s9245_s18 }
  0x20   : > { %p9249_p13 = pneg %p9248_p11  ;;  %p9255_p2 = por %p9254_p1, %p9253_p10 }
  0x22   : > { %p9256_p3 = pnand %p9255_p2, %p9249_p13 }
  0x24   : > { %9259 = shalt.err (!%p9256_p3)
}
  0x25   : > { %s9313_s25 = smov 18432   ;;  %s9314_s26 = smov 1152  }
  0x26   : > { %s9315_s27 = smov 72   ;;  %p187_p12 = scmp.lt.s32.totalorder %s9310_s17, 17 }
  0x27   : > { %7874 = dma.hbm_to_vmem [thread:$0]  (!%p9390_p9), %s9388_s29, 110592, %s9394_s5, %s9397_s6, %s9313_s25, %s9314_s26, %s9315_s27  }
  0x28   : > { %p10500_p0 = scmp.ge.s32.totalorder %s9310_s17, 1 }
  0x2a   : > { %p188_p4 = pnand %p10500_p0, %p187_p12 }
  0x2b   : > { %s193_s28 = sand.u32 (!%p188_p4), 1, %s9294_s13  }
  0x2c   : > { %191 = sbr.rel (%p188_p4) target bundleno = 1170 (0x492), region = 32  ;;  %s194_s7 = scalar_lea.sflag (!%p188_p4), [#allocation3], %s193_s28 }
  0x2d   : > { %s7868_s4 = smul.u32 (!%p188_p4), 6912, %s193_s28 }
  0x2f   : > { %s9429_s8 = scalar_lea.vmem (!%p188_p4), [#allocation2], %s7868_s4 }
  0x33   : > { %9285 = dma.done.wait (%p9375_p7), %s194_s7, 110592  }
  0x34   : > { %9287 = vsyncadd (%p9375_p7), %s194_s7, 4294856704  ;;  %v7927_v0 = vld [vmem:[%s9429_s8 + $0x4] ss:$72 sps:$4 sm:$0xff]   ;;  %v7931_v2 = vld [vmem:[%s9429_s8] ss:$72 sps:$4 sm:$0xff]   ;;  %s239_s10 = smul.u32 18, %s9302_s15 }
  0x35   : > { %v7929_v1 = vld [vmem:[%s9429_s8 + $0x904] ss:$72 sps:$4 sm:$0xff]   ;;  %5558 = vmatprep.subr.bf16.mxu1 %v7927_v0  ;;  %v7932_v3 = vld [vmem:[%s9429_s8 + $0x900] ss:$72 sps:$4 sm:$0xff]   ;;  %v7933_v4 = vld [vmem:[%s9429_s8 + $0x94] ss:$72 sps:$4 sm:$0xff]  }
  0x36   : > { %5599 = vmatprep.subr.bf16.mxu0 %v7929_v1  ;;  %5559 = vmatpush1.bf16.msra.mxu1 %v7931_v2  ;;  %v7935_v5 = vld [vmem:[%s9429_s8 + $0x994] ss:$72 sps:$4 sm:$0xff]   ;;  %v7937_v6 = vld [vmem:[%s9429_s8 + $0x90] ss:$72 sps:$4 sm:$0xff]   ;;  %v7939_v8 = vld [vmem:[%s9429_s8 + $0x124] ss:$72 sps:$4 sm:$0xff]  }
  0x37   : > { %5600 = vmatpush1.bf16.msra.mxu0 %v7932_v3  ;;  %5560 = vmatprep.subr.bf16.mxu1 %v7933_v4  ;;  %v7938_v7 = vld [vmem:[%s9429_s8 + $0x990] ss:$72 sps:$4 sm:$0xff]   ;;  %v7941_v9 = vld [vmem:[%s9429_s8 + $0xa24] ss:$72 sps:$4 sm:$0xff]   ;;  %v7943_v10 = vld [vmem:[%s9429_s8 + $0x120] ss:$72 sps:$4 sm:$0xff]  }
  0x38   : > { %5601 = vmatprep.subr.bf16.mxu0 %v7935_v5  ;;  %v7944_v11 = vld [vmem:[%s9429_s8 + $0xa20] ss:$72 sps:$4 sm:$0xff]   ;;  %v7945_v12 = vld [vmem:[%s9429_s8 + $0x1b4] ss:$72 sps:$4 sm:$0xff]   ;;  %v7949_v14 = vld [vmem:[%s9429_s8 + $0x1b0] ss:$72 sps:$4 sm:$0xff]  }
  0x39   : > { %v7947_v13 = vld [vmem:[%s9429_s8 + $0xab4] ss:$72 sps:$4 sm:$0xff]   ;;  %v7950_v15 = vld [vmem:[%s9429_s8 + $0xab0] ss:$72 sps:$4 sm:$0xff]   ;;  %v7951_v16 = vld [vmem:[%s9429_s8 + $0x244] ss:$72 sps:$4 sm:$0xff]  }
  0x3a   : > { %5561 = vmatpush1.bf16.msra.mxu1 %v7937_v6  ;;  %v7953_v17 = vld [vmem:[%s9429_s8 + $0xb44] ss:$72 sps:$4 sm:$0xff]   ;;  %v7955_v18 = vld [vmem:[%s9429_s8 + $0x240] ss:$72 sps:$4 sm:$0xff]   ;;  %v7957_v20 = vld [vmem:[%s9429_s8 + $0x2d4] ss:$72 sps:$4 sm:$0xff]  }
  0x3b   : > { %5602 = vmatpush1.bf16.msra.mxu0 %v7938_v7  ;;  %5562 = vmatprep.subr.bf16.mxu1 %v7939_v8  ;;  %v7956_v19 = vld [vmem:[%s9429_s8 + $0xb40] ss:$72 sps:$4 sm:$0xff]   ;;  %v7959_v21 = vld [vmem:[%s9429_s8 + $0xbd4] ss:$72 sps:$4 sm:$0xff]   ;;  %v7961_v22 = vld [vmem:[%s9429_s8 + $0x2d0] ss:$72 sps:$4 sm:$0xff]  }
  0x3c   : > { %5603 = vmatprep.subr.bf16.mxu0 %v7941_v9  ;;  %v7962_v23 = vld [vmem:[%s9429_s8 + $0xbd0] ss:$72 sps:$4 sm:$0xff]   ;;  %v7963_v24 = vld [vmem:[%s9429_s8 + $0x364] ss:$72 sps:$4 sm:$0xff]   ;;  %v7967_v26 = vld [vmem:[%s9429_s8 + $0x360] ss:$72 sps:$4 sm:$0xff]  }
  0x3d   : > { %v7965_v25 = vld [vmem:[%s9429_s8 + $0xc64] ss:$72 sps:$4 sm:$0xff]   ;;  %v7968_v27 = vld [vmem:[%s9429_s8 + $0xc60] ss:$72 sps:$4 sm:$0xff]   ;;  %v7969_v28 = vld [vmem:[%s9429_s8 + $0x3f4] ss:$72 sps:$4 sm:$0xff]  }
  0x3e   : > { %5563 = vmatpush1.bf16.msra.mxu1 %v7943_v10  ;;  %v7971_v29 = vld [vmem:[%s9429_s8 + $0xcf4] ss:$72 sps:$4 sm:$0xff]   ;;  %v7973_v30 = vld [vmem:[%s9429_s8 + $0x3f0] ss:$72 sps:$4 sm:$0xff]   ;;  %v7975_v32 = vld [vmem:[%s9429_s8 + $0x484] ss:$72 sps:$4 sm:$0xff]  }
  0x3f   : > { %5604 = vmatpush1.bf16.msra.mxu0 %v7944_v11  ;;  %5564 = vmatprep.subr.bf16.mxu1 %v7945_v12  ;;  %v7974_v31 = vld [vmem:[%s9429_s8 + $0xcf0] ss:$72 sps:$4 sm:$0xff]   ;;  %v7977_v33 = vld [vmem:[%s9429_s8 + $0xd84] ss:$72 sps:$4 sm:$0xff]   ;;  %v7979_v34 = vld [vmem:[%s9429_s8 + $0x480] ss:$72 sps:$4 sm:$0xff]  }
  0x40   : > { %5605 = vmatprep.subr.bf16.mxu0 %v7947_v13  ;;  %v7980_v35 = vld [vmem:[%s9429_s8 + $0xd80] ss:$72 sps:$4 sm:$0xff]   ;;  %v7981_v36 = vld [vmem:[%s9429_s8 + $0x514] ss:$72 sps:$4 sm:$0xff]   ;;  %v7985_v38 = vld [vmem:[%s9429_s8 + $0x510] ss:$72 sps:$4 sm:$0xff]  }
  0x41   : > { %v7983_v37 = vld [vmem:[%s9429_s8 + $0xe14] ss:$72 sps:$4 sm:$0xff]   ;;  %v7986_v39 = vld [vmem:[%s9429_s8 + $0xe10] ss:$72 sps:$4 sm:$0xff]   ;;  %v7987_v40 = vld [vmem:[%s9429_s8 + $0x5a4] ss:$72 sps:$4 sm:$0xff]  }
  0x42   : > { %5565 = vmatpush1.bf16.msra.mxu1 %v7949_v14  ;;  %v7989_v41 = vld [vmem:[%s9429_s8 + $0xea4] ss:$72 sps:$4 sm:$0xff]   ;;  %v7991_v42 = vld [vmem:[%s9429_s8 + $0x5a0] ss:$72 sps:$4 sm:$0xff]   ;;  %v7993_v44 = vld [vmem:[%s9429_s8 + $0x634] ss:$72 sps:$4 sm:$0xff]  }
  0x43   : > { %5606 = vmatpush1.bf16.msra.mxu0 %v7950_v15  ;;  %5566 = vmatprep.subr.bf16.mxu1 %v7951_v16  ;;  %v7992_v43 = vld [vmem:[%s9429_s8 + $0xea0] ss:$72 sps:$4 sm:$0xff]   ;;  %v7995_v45 = vld [vmem:[%s9429_s8 + $0xf34] ss:$72 sps:$4 sm:$0xff]   ;;  %v7997_v49 = vld [vmem:[%s9429_s8 + $0x630] ss:$72 sps:$4 sm:$0xff]  }
  0x44   : > { %5607 = vmatprep.subr.bf16.mxu0 %v7953_v17  ;;  %v254_v46 = vld [vmem:[%s10494_s0] sm:$0xff]  ;;  %v255_v48 = vld [vmem:[%s10494_s0 + $0x8] sm:$0xff]  ;;  %v7998_v50 = vld [vmem:[%s9429_s8 + $0xf30] ss:$72 sps:$4 sm:$0xff]   ;;  %p240_p7 = scmp.lt.s32.totalorder %s239_s10, 287 }
  0x45   : > { %v9484_v47 = vcombine.high %v254_v46, %v254_v46  ;;  %v9491_v51 = vcombine.high %v255_v48, %v255_v48  ;;  %v7999_v52 = vld [vmem:[%s9429_s8 + $0x6c4] ss:$72 sps:$4 sm:$0xff]   ;;  %v8003_v54 = vld [vmem:[%s9429_s8 + $0x6c0] ss:$72 sps:$4 sm:$0xff]   ;;  %v8005_v56 = vld [vmem:[%s9429_s8 + $0x754] ss:$72 sps:$4 sm:$0xff]   ;;  %v9513_v6 = vcombine.low %v254_v46, %v254_v46  ;;  %v9515_v7 = vcombine.low %v255_v48, %v255_v48 }
  0x46   : > { %5567 = vmatpush1.bf16.msra.mxu1 %v7955_v18  ;;  %v8001_v53 = vld [vmem:[%s9429_s8 + $0xfc4] ss:$72 sps:$4 sm:$0xff]   ;;  %v8004_v55 = vld [vmem:[%s9429_s8 + $0xfc0] ss:$72 sps:$4 sm:$0xff]   ;;  %v8007_v57 = vld [vmem:[%s9429_s8 + $0x1054] ss:$72 sps:$4 sm:$0xff]  }
  0x47   : > { %5608 = vmatpush1.bf16.msra.mxu0 %v7956_v19  ;;  %5568 = vmatprep.subr.bf16.mxu1 %v7957_v20  ;;  %v8009_v58 = vld [vmem:[%s9429_s8 + $0x750] ss:$72 sps:$4 sm:$0xff]   ;;  %v8011_v60 = vld [vmem:[%s9429_s8 + $0x7e4] ss:$72 sps:$4 sm:$0xff]   ;;  %v8015_v62 = vld [vmem:[%s9429_s8 + $0x7e0] ss:$72 sps:$4 sm:$0xff]  }
  0x48   : > { %5609 = vmatprep.subr.bf16.mxu0 %v7959_v21  ;;  %5590 = vmatprep.mubr.bf16.mxu1 %v9484_v47  ;;  %v8010_v59 = vld [vmem:[%s9429_s8 + $0x1050] ss:$72 sps:$4 sm:$0xff]   ;;  %v8013_v61 = vld [vmem:[%s9429_s8 + $0x10e4] ss:$72 sps:$4 sm:$0xff]   ;;  %v8016_v63 = vld [vmem:[%s9429_s8 + $0x10e0] ss:$72 sps:$4 sm:$0xff]  }
  0x49   : > { %5631 = vmatprep.mubr.bf16.mxu0 %v9491_v51  ;;  %v8017_v0 = vld [vmem:[%s9429_s8 + $0x874] ss:$72 sps:$4 sm:$0xff]   ;;  %v8021_v2 = vld [vmem:[%s9429_s8 + $0x870] ss:$72 sps:$4 sm:$0xff]   ;;  %v8027_v4 = vld [vmem:[%s9429_s8 + $0x1204] ss:$72 sps:$4 sm:$0xff]  }
  0x4a   : > { %5569 = vmatpush1.bf16.msra.mxu1 %v7961_v22  ;;  %v8019_v1 = vld [vmem:[%s9429_s8 + $0x1174] ss:$72 sps:$4 sm:$0xff]   ;;  %v8022_v3 = vld [vmem:[%s9429_s8 + $0x1170] ss:$72 sps:$4 sm:$0xff]   ;;  %v8025_v8 = vld [vmem:[%s9429_s8 + $0x1200] ss:$72 sps:$4 sm:$0xff]  }
  0x4b   : > { %5610 = vmatpush1.bf16.msra.mxu0 %v7962_v23  ;;  %5570 = vmatprep.subr.bf16.mxu1 %v7963_v24  ;;  %v8030_v5 = vld [vmem:[%s9429_s8 + $0xc] ss:$72 sps:$4 sm:$0xff]   ;;  %v8028_v9 = vld [vmem:[%s9429_s8 + $0x8] ss:$72 sps:$4 sm:$0xff]   ;;  %v8038_v11 = vld [vmem:[%s9429_s8 + $0x9c] ss:$72 sps:$4 sm:$0xff]  }
  0x4c   : > { %5611 = vmatprep.subr.bf16.mxu0 %v7965_v25  ;;  %v8035_v10 = vld [vmem:[%s9429_s8 + $0x1294] ss:$72 sps:$4 sm:$0xff]   ;;  %v8033_v12 = vld [vmem:[%s9429_s8 + $0x1290] ss:$72 sps:$4 sm:$0xff]   ;;  %v8041_v14 = vld [vmem:[%s9429_s8 + $0x1324] ss:$72 sps:$4 sm:$0xff]  }
  0x4d   : > { %v8036_v13 = vld [vmem:[%s9429_s8 + $0x98] ss:$72 sps:$4 sm:$0xff]   ;;  %v8044_v15 = vld [vmem:[%s9429_s8 + $0x12c] ss:$72 sps:$4 sm:$0xff]   ;;  %v8042_v17 = vld [vmem:[%s9429_s8 + $0x128] ss:$72 sps:$4 sm:$0xff]  }
  0x4e   : > { %5571 = vmatpush1.bf16.msra.mxu1 %v7967_v26  ;;  %v8039_v16 = vld [vmem:[%s9429_s8 + $0x1320] ss:$72 sps:$4 sm:$0xff]   ;;  %v8047_v18 = vld [vmem:[%s9429_s8 + $0x13b4] ss:$72 sps:$4 sm:$0xff]   ;;  %v8045_v20 = vld [vmem:[%s9429_s8 + $0x13b0] ss:$72 sps:$4 sm:$0xff]  }
  0x4f   : > { %5612 = vmatpush1.bf16.msra.mxu0 %v7968_v27  ;;  %5572 = vmatprep.subr.bf16.mxu1 %v7969_v28  ;;  %v8050_v19 = vld [vmem:[%s9429_s8 + $0x1bc] ss:$72 sps:$4 sm:$0xff]   ;;  %v8048_v21 = vld [vmem:[%s9429_s8 + $0x1b8] ss:$72 sps:$4 sm:$0xff]   ;;  %v8056_v23 = vld [vmem:[%s9429_s8 + $0x24c] ss:$72 sps:$4 sm:$0xff]  }
  0x50   : > { %5613 = vmatprep.subr.bf16.mxu0 %v7971_v29  ;;  %v8053_v22 = vld [vmem:[%s9429_s8 + $0x1444] ss:$72 sps:$4 sm:$0xff]   ;;  %v8051_v24 = vld [vmem:[%s9429_s8 + $0x1440] ss:$72 sps:$4 sm:$0xff]   ;;  %v8059_v26 = vld [vmem:[%s9429_s8 + $0x14d4] ss:$72 sps:$4 sm:$0xff]  }
  0x51   : > { %v8054_v25 = vld [vmem:[%s9429_s8 + $0x248] ss:$72 sps:$4 sm:$0xff]   ;;  %v8062_v27 = vld [vmem:[%s9429_s8 + $0x2dc] ss:$72 sps:$4 sm:$0xff]   ;;  %v8060_v29 = vld [vmem:[%s9429_s8 + $0x2d8] ss:$72 sps:$4 sm:$0xff]  }
  0x52   : > { %5573 = vmatpush1.bf16.msra.mxu1 %v7973_v30  ;;  %v8057_v28 = vld [vmem:[%s9429_s8 + $0x14d0] ss:$72 sps:$4 sm:$0xff]   ;;  %v8065_v30 = vld [vmem:[%s9429_s8 + $0x1564] ss:$72 sps:$4 sm:$0xff]   ;;  %s10509_s10 = smov (!%p240_p7, %s239_s10), 287 }
  0x53   : > { %5614 = vmatpush1.bf16.msra.mxu0 %v7974_v31  ;;  %5574 = vmatprep.subr.bf16.mxu1 %v7975_v32  ;;  %v8068_v31 = vld [vmem:[%s9429_s8 + $0x36c] ss:$72 sps:$4 sm:$0xff]   ;;  %v8081_v46 = vld [vmem:[%s9429_s8 + $0x1710] ss:$72 sps:$4 sm:$0xff]   ;;  %s9831_s12 = scalar_lea.vmem %s10496_s2, %s10509_s10  ;;  %s6887_s18 = sshll.u32 %s10509_s10, 2 }
  0x54   : > { %5615 = vmatprep.subr.bf16.mxu0 %v7977_v33  ;;  %v9547_v32 = vld [vmem:[%s10494_s0 + $0x10] sm:$0xff]  ;;  %v8063_v33 = vld [vmem:[%s9429_s8 + $0x1560] ss:$72 sps:$4 sm:$0xff]   ;;  %s9866_s24 = scalar_lea.vmem %s10497_s3, %s6887_s18 }
  0x55   : > { %v8084_v48 = vld [vmem:[%s9429_s8 + $0x518] ss:$72 sps:$4 sm:$0xff]  }
  0x56   : > { %5575 = vmatpush1.bf16.msra.mxu1 %v7979_v34  ;;  %v9552_v34 = vcombine.high %v9547_v32, %v9547_v32 }
  0x57   : > { %5616 = vmatpush1.bf16.msra.mxu0 %v7980_v35  ;;  %5576 = vmatprep.subr.bf16.mxu1 %v7981_v36  ;;  %v8066_v35 = vld [vmem:[%s9429_s8 + $0x368] ss:$72 sps:$4 sm:$0xff]   ;;  %v8071_v36 = vld [vmem:[%s9429_s8 + $0x15f4] ss:$72 sps:$4 sm:$0xff]  }
  0x58   : > { %5617 = vmatprep.subr.bf16.mxu0 %v7983_v37  ;;  %v8074_v37 = vld [vmem:[%s9429_s8 + $0x3fc] ss:$72 sps:$4 sm:$0xff]  }
  0x5a   : > { %5577 = vmatpush1.bf16.msra.mxu1 %v7985_v38  ;;  %v8069_v38 = vld [vmem:[%s9429_s8 + $0x15f0] ss:$72 sps:$4 sm:$0xff]  }
  0x5b   : > { %5618 = vmatpush1.bf16.msra.mxu0 %v7986_v39  ;;  %5578 = vmatprep.subr.bf16.mxu1 %v7987_v40  ;;  %v8072_v39 = vld [vmem:[%s9429_s8 + $0x3f8] ss:$72 sps:$4 sm:$0xff]   ;;  %v8077_v40 = vld [vmem:[%s9429_s8 + $0x1684] ss:$72 sps:$4 sm:$0xff]  }
  0x5c   : > { %5619 = vmatprep.subr.bf16.mxu0 %v7989_v41  ;;  %v8080_v41 = vld [vmem:[%s9429_s8 + $0x48c] ss:$72 sps:$4 sm:$0xff]  }
  0x5e   : > { %5579 = vmatpush1.bf16.msra.mxu1 %v7991_v42  ;;  %v8075_v42 = vld [vmem:[%s9429_s8 + $0x1680] ss:$72 sps:$4 sm:$0xff]  }
  0x5f   : > { %5620 = vmatpush1.bf16.msra.mxu0 %v7992_v43  ;;  %5580 = vmatprep.subr.bf16.mxu1 %v7993_v44  ;;  %v8078_v43 = vld [vmem:[%s9429_s8 + $0x488] ss:$72 sps:$4 sm:$0xff]   ;;  %v8083_v44 = vld [vmem:[%s9429_s8 + $0x1714] ss:$72 sps:$4 sm:$0xff]  }
  0x60   : > { %5621 = vmatprep.subr.bf16.mxu0 %v7995_v45  ;;  %v8086_v45 = vld [vmem:[%s9429_s8 + $0x51c] ss:$72 sps:$4 sm:$0xff]  }
  0x62   : > { %5581 = vmatpush1.bf16.msra.mxu1 %v7997_v49  ;;  %v8089_v49 = vld [vmem:[%s9429_s8 + $0x17a4] ss:$72 sps:$4 sm:$0xff]  }
  0x63   : > { %5622 = vmatpush1.bf16.msra.mxu0 %v7998_v50  ;;  %5582 = vmatprep.subr.bf16.mxu1 %v7999_v52  ;;  %v8092_v50 = vld [vmem:[%s9429_s8 + $0x5ac] ss:$72 sps:$4 sm:$0xff]   ;;  %v8087_v52 = vld [vmem:[%s9429_s8 + $0x17a0] ss:$72 sps:$4 sm:$0xff]  }
  0x64   : > { %5623 = vmatprep.subr.bf16.mxu0 %v8001_v53  ;;  %v8090_v53 = vld [vmem:[%s9429_s8 + $0x5a8] ss:$72 sps:$4 sm:$0xff]  }
  0x66   : > { %5583 = vmatpush1.bf16.msra.mxu1 %v8003_v54  ;;  %v8095_v54 = vld [vmem:[%s9429_s8 + $0x1834] ss:$72 sps:$4 sm:$0xff]  }
  0x67   : > { %5624 = vmatpush1.bf16.msra.mxu0 %v8004_v55  ;;  %5584 = vmatprep.subr.bf16.mxu1 %v8005_v56  ;;  %v8098_v55 = vld [vmem:[%s9429_s8 + $0x63c] ss:$72 sps:$4 sm:$0xff]   ;;  %v8093_v56 = vld [vmem:[%s9429_s8 + $0x1830] ss:$72 sps:$4 sm:$0xff]  }
  0x68   : > { %5625 = vmatprep.subr.bf16.mxu0 %v8007_v57  ;;  %v8096_v57 = vld [vmem:[%s9429_s8 + $0x638] ss:$72 sps:$4 sm:$0xff]  }
  0x6a   : > { %5585 = vmatpush1.bf16.msra.mxu1 %v8009_v58  ;;  %v8101_v58 = vld [vmem:[%s9429_s8 + $0x18c4] ss:$72 sps:$4 sm:$0xff]  }
  0x6b   : > { %5626 = vmatpush1.bf16.msra.mxu0 %v8010_v59  ;;  %5586 = vmatprep.subr.bf16.mxu1 %v8011_v60  ;;  %v8104_v59 = vld [vmem:[%s9429_s8 + $0x6cc] ss:$72 sps:$4 sm:$0xff]   ;;  %v8099_v60 = vld [vmem:[%s9429_s8 + $0x18c0] ss:$72 sps:$4 sm:$0xff]  }
  0x6c   : > { %5627 = vmatprep.subr.bf16.mxu0 %v8013_v61  ;;  %v8102_v61 = vld [vmem:[%s9429_s8 + $0x6c8] ss:$72 sps:$4 sm:$0xff]  }
  0x6e   : > { %5587 = vmatpush1.bf16.msra.mxu1 %v8015_v62  ;;  %v8107_v62 = vld [vmem:[%s9429_s8 + $0x1954] ss:$72 sps:$4 sm:$0xff]  }
  0x6f   : > { %5628 = vmatpush1.bf16.msra.mxu0 %v8016_v63  ;;  %5588 = vmatprep.subr.bf16.mxu1 %v8017_v0  ;;  %v8110_v63 = vld [vmem:[%s9429_s8 + $0x75c] ss:$72 sps:$4 sm:$0xff]   ;;  %v8105_v0 = vld [vmem:[%s9429_s8 + $0x1950] ss:$72 sps:$4 sm:$0xff]  }
  0x70   : > { %5629 = vmatprep.subr.bf16.mxu0 %v8019_v1  ;;  %v8108_v1 = vld [vmem:[%s9429_s8 + $0x758] ss:$72 sps:$4 sm:$0xff]  }
  0x72   : > { %5589 = vmatpush1.bf16.msra.mxu1 %v8021_v2  ;;  %v8113_v2 = vld [vmem:[%s9429_s8 + $0x19e4] ss:$72 sps:$4 sm:$0xff]  }
  0x73   : > { %5630 = vmatpush1.bf16.msra.mxu0 %v8022_v3  ;;  %5681 = vmatprep.subr.bf16.mxu1 %v8030_v5  ;;  %v8116_v3 = vld [vmem:[%s9429_s8 + $0x7ec] ss:$72 sps:$4 sm:$0xff]   ;;  %v8114_v5 = vld [vmem:[%s9429_s8 + $0x7e8] ss:$72 sps:$4 sm:$0xff]  }
  0x74   : > { %5640 = vmatprep.subr.bf16.mxu0 %v8027_v4  ;;  %v8111_v4 = vld [vmem:[%s9429_s8 + $0x19e0] ss:$72 sps:$4 sm:$0xff]  }
  0x75   : > { %5591 = vmatmul.mubr.bf16.vlgmr.msra.gmra.mrb[0].mxu1 %v9513_v6 }
  0x76   : > { %5632 = vmatmul.mubr.bf16.vlgmr.msra.gmra.mrb[0].mxu0 %v9515_v7  ;;  %5682 = vmatpush1.bf16.msra.mxu1 %v8028_v9  ;;  %v8122_v9 = vld [vmem:[%s9429_s8 + $0x87c] ss:$72 sps:$4 sm:$0xff]  }
  0x77   : > { %5641 = vmatpush1.bf16.msra.mxu0 %v8025_v8  ;;  %5683 = vmatprep.subr.bf16.mxu1 %v8038_v11  ;;  %v8119_v8 = vld [vmem:[%s9429_s8 + $0x1a74] ss:$72 sps:$4 sm:$0xff]   ;;  %v8120_v11 = vld [vmem:[%s9429_s8 + $0x878] ss:$72 sps:$4 sm:$0xff]  }
  0x78   : > { %5642 = vmatprep.subr.bf16.mxu0 %v8035_v10  ;;  %5713 = vmatprep.mubr.bf16.mxu1 %v9484_v47  ;;  %v8117_v10 = vld [vmem:[%s9429_s8 + $0x1a70] ss:$72 sps:$4 sm:$0xff]  }
  0x79   : > { %5672 = vmatprep.mubr.bf16.mxu0 %v9552_v34 }
  0x7a   : > { %5684 = vmatpush1.bf16.msra.mxu1 %v8036_v13  ;;  %v8130_v13 = vld [vmem:[%s9429_s8 + $0x14] ss:$72 sps:$4 sm:$0xff]  }
  0x7b   : > { %5643 = vmatpush1.bf16.msra.mxu0 %v8033_v12  ;;  %5685 = vmatprep.subr.bf16.mxu1 %v8044_v15  ;;  %v8127_v12 = vld [vmem:[%s9429_s8 + $0x90c] ss:$72 sps:$4 sm:$0xff]   ;;  %v8125_v15 = vld [vmem:[%s9429_s8 + $0x908] ss:$72 sps:$4 sm:$0xff]  }
  0x7c   : > { %5644 = vmatprep.subr.bf16.mxu0 %v8041_v14  ;;  %v9596_v14 = vcombine.low %v9547_v32, %v9547_v32  ;;  %v8152_v32 = vld [vmem:[%s9429_s8 + $0x250] ss:$72 sps:$4 sm:$0xff]  }
  0x7e   : > { %5686 = vmatpush1.bf16.msra.mxu1 %v8042_v17  ;;  %v8133_v17 = vld [vmem:[%s9429_s8 + $0x99c] ss:$72 sps:$4 sm:$0xff]  }
  0x7f   : > { %5645 = vmatpush1.bf16.msra.mxu0 %v8039_v16  ;;  %5687 = vmatprep.subr.bf16.mxu1 %v8050_v19  ;;  %v8128_v16 = vld [vmem:[%s9429_s8 + $0x10] ss:$72 sps:$4 sm:$0xff]  }
  0x80   : > { %5646 = vmatprep.subr.bf16.mxu0 %v8047_v18  ;;  %v8136_v18 = vld [vmem:[%s9429_s8 + $0xa4] ss:$72 sps:$4 sm:$0xff]   ;;  %v8131_v19 = vld [vmem:[%s9429_s8 + $0x998] ss:$72 sps:$4 sm:$0xff]  }
  0x82   : > { %5688 = vmatpush1.bf16.msra.mxu1 %v8048_v21  ;;  %v8139_v21 = vld [vmem:[%s9429_s8 + $0xa2c] ss:$72 sps:$4 sm:$0xff]  }
  0x83   : > { %5647 = vmatpush1.bf16.msra.mxu0 %v8045_v20  ;;  %5689 = vmatprep.subr.bf16.mxu1 %v8056_v23  ;;  %v8134_v20 = vld [vmem:[%s9429_s8 + $0xa0] ss:$72 sps:$4 sm:$0xff]  }
  0x84   : > { %5648 = vmatprep.subr.bf16.mxu0 %v8053_v22  ;;  %v8142_v22 = vld [vmem:[%s9429_s8 + $0x134] ss:$72 sps:$4 sm:$0xff]   ;;  %v8137_v23 = vld [vmem:[%s9429_s8 + $0xa28] ss:$72 sps:$4 sm:$0xff]  }
  0x86   : > { %5690 = vmatpush1.bf16.msra.mxu1 %v8054_v25  ;;  %v8145_v25 = vld [vmem:[%s9429_s8 + $0xabc] ss:$72 sps:$4 sm:$0xff]  }
  0x87   : > { %5649 = vmatpush1.bf16.msra.mxu0 %v8051_v24  ;;  %5691 = vmatprep.subr.bf16.mxu1 %v8062_v27  ;;  %v8140_v24 = vld [vmem:[%s9429_s8 + $0x130] ss:$72 sps:$4 sm:$0xff]  }
  0x88   : > { %5650 = vmatprep.subr.bf16.mxu0 %v8059_v26  ;;  %v8148_v26 = vld [vmem:[%s9429_s8 + $0x1c4] ss:$72 sps:$4 sm:$0xff]   ;;  %v8143_v27 = vld [vmem:[%s9429_s8 + $0xab8] ss:$72 sps:$4 sm:$0xff]  }
  0x8a   : > { %5692 = vmatpush1.bf16.msra.mxu1 %v8060_v29  ;;  %v8151_v29 = vld [vmem:[%s9429_s8 + $0xb4c] ss:$72 sps:$4 sm:$0xff]  }
  0x8b   : > { %5651 = vmatpush1.bf16.msra.mxu0 %v8057_v28  ;;  %5693 = vmatprep.subr.bf16.mxu1 %v8068_v31  ;;  %v8146_v28 = vld [vmem:[%s9429_s8 + $0x1c0] ss:$72 sps:$4 sm:$0xff]  }
  0x8c   : > { %5652 = vmatprep.subr.bf16.mxu0 %v8065_v30  ;;  %v8154_v30 = vld [vmem:[%s9429_s8 + $0x254] ss:$72 sps:$4 sm:$0xff]   ;;  %v8149_v31 = vld [vmem:[%s9429_s8 + $0xb48] ss:$72 sps:$4 sm:$0xff]  }
  0x8e   : > { %5694 = vmatpush1.bf16.msra.mxu1 %v8066_v35  ;;  %v8160_v35 = vld [vmem:[%s9429_s8 + $0x2e4] ss:$72 sps:$4 sm:$0xff]  }
  0x8f   : > { %5653 = vmatpush1.bf16.msra.mxu0 %v8063_v33  ;;  %5695 = vmatprep.subr.bf16.mxu1 %v8074_v37  ;;  %v8157_v33 = vld [vmem:[%s9429_s8 + $0xbdc] ss:$72 sps:$4 sm:$0xff]   ;;  %v8158_v37 = vld [vmem:[%s9429_s8 + $0x2e0] ss:$72 sps:$4 sm:$0xff]  }
  0x90   : > { %5654 = vmatprep.subr.bf16.mxu0 %v8071_v36  ;;  %v8155_v36 = vld [vmem:[%s9429_s8 + $0xbd8] ss:$72 sps:$4 sm:$0xff]  }
  0x92   : > { %5696 = vmatpush1.bf16.msra.mxu1 %v8072_v39  ;;  %v8166_v39 = vld [vmem:[%s9429_s8 + $0x374] ss:$72 sps:$4 sm:$0xff]  }
  0x93   : > { %5655 = vmatpush1.bf16.msra.mxu0 %v8069_v38  ;;  %5697 = vmatprep.subr.bf16.mxu1 %v8080_v41  ;;  %v8163_v38 = vld [vmem:[%s9429_s8 + $0xc6c] ss:$72 sps:$4 sm:$0xff]   ;;  %v8164_v41 = vld [vmem:[%s9429_s8 + $0x370] ss:$72 sps:$4 sm:$0xff]  }
  0x94   : > { %5656 = vmatprep.subr.bf16.mxu0 %v8077_v40  ;;  %v8161_v40 = vld [vmem:[%s9429_s8 + $0xc68] ss:$72 sps:$4 sm:$0xff]  }
  0x96   : > { %5698 = vmatpush1.bf16.msra.mxu1 %v8078_v43  ;;  %v8172_v43 = vld [vmem:[%s9429_s8 + $0x404] ss:$72 sps:$4 sm:$0xff]  }
  0x97   : > { %5657 = vmatpush1.bf16.msra.mxu0 %v8075_v42  ;;  %5699 = vmatprep.subr.bf16.mxu1 %v8086_v45  ;;  %v8169_v42 = vld [vmem:[%s9429_s8 + $0xcfc] ss:$72 sps:$4 sm:$0xff]   ;;  %v8170_v45 = vld [vmem:[%s9429_s8 + $0x400] ss:$72 sps:$4 sm:$0xff]  }
  0x98   : > { %5658 = vmatprep.subr.bf16.mxu0 %v8083_v44  ;;  %v8167_v44 = vld [vmem:[%s9429_s8 + $0xcf8] ss:$72 sps:$4 sm:$0xff]  }
  0x9a   : > { %5700 = vmatpush1.bf16.msra.mxu1 %v8084_v48  ;;  %v8178_v48 = vld [vmem:[%s9429_s8 + $0x494] ss:$72 sps:$4 sm:$0xff]  }
  0x9b   : > { %5659 = vmatpush1.bf16.msra.mxu0 %v8081_v46  ;;  %5701 = vmatprep.subr.bf16.mxu1 %v8092_v50  ;;  %v8175_v46 = vld [vmem:[%s9429_s8 + $0xd8c] ss:$72 sps:$4 sm:$0xff]   ;;  %v8176_v50 = vld [vmem:[%s9429_s8 + $0x490] ss:$72 sps:$4 sm:$0xff]  }
  0x9c   : > { %5660 = vmatprep.subr.bf16.mxu0 %v8089_v49  ;;  %v8173_v49 = vld [vmem:[%s9429_s8 + $0xd88] ss:$72 sps:$4 sm:$0xff]  }
  0x9e   : > { %5702 = vmatpush1.bf16.msra.mxu1 %v8090_v53  ;;  %v8184_v53 = vld [vmem:[%s9429_s8 + $0x524] ss:$72 sps:$4 sm:$0xff]  }
  0x9f   : > { %5661 = vmatpush1.bf16.msra.mxu0 %v8087_v52  ;;  %5703 = vmatprep.subr.bf16.mxu1 %v8098_v55  ;;  %v8181_v52 = vld [vmem:[%s9429_s8 + $0xe1c] ss:$72 sps:$4 sm:$0xff]   ;;  %v8182_v55 = vld [vmem:[%s9429_s8 + $0x520] ss:$72 sps:$4 sm:$0xff]  }
  0xa0   : > { %5662 = vmatprep.subr.bf16.mxu0 %v8095_v54  ;;  %v8179_v54 = vld [vmem:[%s9429_s8 + $0xe18] ss:$72 sps:$4 sm:$0xff]  }
  0xa2   : > { %5704 = vmatpush1.bf16.msra.mxu1 %v8096_v57  ;;  %v8190_v57 = vld [vmem:[%s9429_s8 + $0x5b4] ss:$72 sps:$4 sm:$0xff]  }
  0xa3   : > { %5663 = vmatpush1.bf16.msra.mxu0 %v8093_v56  ;;  %5705 = vmatprep.subr.bf16.mxu1 %v8104_v59  ;;  %v8187_v56 = vld [vmem:[%s9429_s8 + $0xeac] ss:$72 sps:$4 sm:$0xff]   ;;  %v8188_v59 = vld [vmem:[%s9429_s8 + $0x5b0] ss:$72 sps:$4 sm:$0xff]  }
  0xa4   : > { %5664 = vmatprep.subr.bf16.mxu0 %v8101_v58  ;;  %v8185_v58 = vld [vmem:[%s9429_s8 + $0xea8] ss:$72 sps:$4 sm:$0xff]  }
  0xa6   : > { %5706 = vmatpush1.bf16.msra.mxu1 %v8102_v61  ;;  %v8196_v61 = vld [vmem:[%s9429_s8 + $0x644] ss:$72 sps:$4 sm:$0xff]  }
  0xa7   : > { %5665 = vmatpush1.bf16.msra.mxu0 %v8099_v60  ;;  %5707 = vmatprep.subr.bf16.mxu1 %v8110_v63  ;;  %v8193_v60 = vld [vmem:[%s9429_s8 + $0xf3c] ss:$72 sps:$4 sm:$0xff]   ;;  %v8194_v63 = vld [vmem:[%s9429_s8 + $0x640] ss:$72 sps:$4 sm:$0xff]  }
  0xa8   : > { %5666 = vmatprep.subr.bf16.mxu0 %v8107_v62  ;;  %v8191_v62 = vld [vmem:[%s9429_s8 + $0xf38] ss:$72 sps:$4 sm:$0xff]  }
  0xaa   : > { %5708 = vmatpush1.bf16.msra.mxu1 %v8108_v1  ;;  %v8202_v1 = vld [vmem:[%s9429_s8 + $0x6d4] ss:$72 sps:$4 sm:$0xff]  }
  0xab   : > { %5667 = vmatpush1.bf16.msra.mxu0 %v8105_v0  ;;  %5709 = vmatprep.subr.bf16.mxu1 %v8116_v3  ;;  %v8199_v0 = vld [vmem:[%s9429_s8 + $0xfcc] ss:$72 sps:$4 sm:$0xff]   ;;  %v8200_v3 = vld [vmem:[%s9429_s8 + $0x6d0] ss:$72 sps:$4 sm:$0xff]  }
  0xac   : > { %5668 = vmatprep.subr.bf16.mxu0 %v8113_v2  ;;  %v8197_v2 = vld [vmem:[%s9429_s8 + $0xfc8] ss:$72 sps:$4 sm:$0xff]  }
  0xae   : > { %5710 = vmatpush1.bf16.msra.mxu1 %v8114_v5  ;;  %v8208_v5 = vld [vmem:[%s9429_s8 + $0x764] ss:$72 sps:$4 sm:$0xff]  }
  0xaf   : > { %5669 = vmatpush1.bf16.msra.mxu0 %v8111_v4  ;;  %5711 = vmatprep.subr.bf16.mxu1 %v8122_v9  ;;  %v8205_v4 = vld [vmem:[%s9429_s8 + $0x105c] ss:$72 sps:$4 sm:$0xff]   ;;  %v8206_v9 = vld [vmem:[%s9429_s8 + $0x760] ss:$72 sps:$4 sm:$0xff]  }
  0xb0   : > { %5670 = vmatprep.subr.bf16.mxu0 %v8119_v8  ;;  %v8203_v8 = vld [vmem:[%s9429_s8 + $0x1058] ss:$72 sps:$4 sm:$0xff]  }
  0xb2   : > { %5712 = vmatpush1.bf16.msra.mxu1 %v8120_v11  ;;  %v8214_v11 = vld [vmem:[%s9429_s8 + $0x7f4] ss:$72 sps:$4 sm:$0xff]  }
  0xb3   : > { %5671 = vmatpush1.bf16.msra.mxu0 %v8117_v10  ;;  %5722 = vmatprep.subr.bf16.mxu1 %v8127_v12  ;;  %v8211_v10 = vld [vmem:[%s9429_s8 + $0x10ec] ss:$72 sps:$4 sm:$0xff]   ;;  %v8209_v12 = vld [vmem:[%s9429_s8 + $0x10e8] ss:$72 sps:$4 sm:$0xff]  }
  0xb4   : > { %5804 = vmatprep.subr.bf16.mxu0 %v8130_v13  ;;  %v8212_v13 = vld [vmem:[%s9429_s8 + $0x7f0] ss:$72 sps:$4 sm:$0xff]  }
  0xb5   : > { %5714 = vmatmul.mubr.bf16.vlgmr.msra.gmra.mrb[4].mxu1 %v9513_v6 }
  0xb6   : > { %5673 = vmatmul.mubr.bf16.vlgmr.msra.gmra.mrb[0].mxu0 %v9596_v14  ;;  %5723 = vmatpush1.bf16.msra.mxu1 %v8125_v15  ;;  %v8217_v15 = vld [vmem:[%s9429_s8 + $0x117c] ss:$72 sps:$4 sm:$0xff]  }
  0xb7   : > { %5805 = vmatpush1.bf16.msra.mxu0 %v8128_v16  ;;  %5724 = vmatprep.subr.bf16.mxu1 %v8133_v17  ;;  %v8220_v16 = vld [vmem:[%s9429_s8 + $0x884] ss:$72 sps:$4 sm:$0xff]   ;;  %v8215_v17 = vld [vmem:[%s9429_s8 + $0x1178] ss:$72 sps:$4 sm:$0xff]  }
  0xb8   : > { %5806 = vmatprep.subr.bf16.mxu0 %v8136_v18  ;;  %5754 = vmatprep.mubr.bf16.mxu1 %v9491_v51  ;;  %v8218_v18 = vld [vmem:[%s9429_s8 + $0x880] ss:$72 sps:$4 sm:$0xff]  }
  0xb9   : > { %5836 = vmatprep.mubr.bf16.mxu0 %v9484_v47 }
  0xba   : > { %5725 = vmatpush1.bf16.msra.mxu1 %v8131_v19  ;;  %v8223_v19 = vld [vmem:[%s9429_s8 + $0x120c] ss:$72 sps:$4 sm:$0xff]  }
  0xbb   : > { %5807 = vmatpush1.bf16.msra.mxu0 %v8134_v20  ;;  %5726 = vmatprep.subr.bf16.mxu1 %v8139_v21  ;;  %v8226_v20 = vld [vmem:[%s9429_s8 + $0x914] ss:$72 sps:$4 sm:$0xff]   ;;  %v8221_v21 = vld [vmem:[%s9429_s8 + $0x1208] ss:$72 sps:$4 sm:$0xff]  }
  0xbc   : > { %5808 = vmatprep.subr.bf16.mxu0 %v8142_v22  ;;  %v8224_v22 = vld [vmem:[%s9429_s8 + $0x910] ss:$72 sps:$4 sm:$0xff]  }
  0xbe   : > { %5727 = vmatpush1.bf16.msra.mxu1 %v8137_v23  ;;  %v8229_v23 = vld [vmem:[%s9429_s8 + $0x129c] ss:$72 sps:$4 sm:$0xff]  }
  0xbf   : > { %5809 = vmatpush1.bf16.msra.mxu0 %v8140_v24  ;;  %5728 = vmatprep.subr.bf16.mxu1 %v8145_v25  ;;  %v8232_v24 = vld [vmem:[%s9429_s8 + $0x9a4] ss:$72 sps:$4 sm:$0xff]   ;;  %v8227_v25 = vld [vmem:[%s9429_s8 + $0x1298] ss:$72 sps:$4 sm:$0xff]  }
  0xc0   : > { %5810 = vmatprep.subr.bf16.mxu0 %v8148_v26  ;;  %v8230_v26 = vld [vmem:[%s9429_s8 + $0x9a0] ss:$72 sps:$4 sm:$0xff]  }
  0xc2   : > { %5729 = vmatpush1.bf16.msra.mxu1 %v8143_v27  ;;  %v8235_v27 = vld [vmem:[%s9429_s8 + $0x132c] ss:$72 sps:$4 sm:$0xff]  }
  0xc3   : > { %5811 = vmatpush1.bf16.msra.mxu0 %v8146_v28  ;;  %5730 = vmatprep.subr.bf16.mxu1 %v8151_v29  ;;  %v8238_v28 = vld [vmem:[%s9429_s8 + $0xa34] ss:$72 sps:$4 sm:$0xff]   ;;  %v8233_v29 = vld [vmem:[%s9429_s8 + $0x1328] ss:$72 sps:$4 sm:$0xff]  }
  0xc4   : > { %5812 = vmatprep.subr.bf16.mxu0 %v8154_v30  ;;  %v8236_v30 = vld [vmem:[%s9429_s8 + $0xa30] ss:$72 sps:$4 sm:$0xff]  }
  0xc6   : > { %5731 = vmatpush1.bf16.msra.mxu1 %v8149_v31  ;;  %v8241_v31 = vld [vmem:[%s9429_s8 + $0x13bc] ss:$72 sps:$4 sm:$0xff]  }
  0xc7   : > { %5813 = vmatpush1.bf16.msra.mxu0 %v8152_v32  ;;  %5732 = vmatprep.subr.bf16.mxu1 %v8157_v33  ;;  %v8244_v32 = vld [vmem:[%s9429_s8 + $0xac4] ss:$72 sps:$4 sm:$0xff]   ;;  %v8239_v33 = vld [vmem:[%s9429_s8 + $0x13b8] ss:$72 sps:$4 sm:$0xff]  }
  0xc8   : > { %5814 = vmatprep.subr.bf16.mxu0 %v8160_v35  ;;  %v8242_v35 = vld [vmem:[%s9429_s8 + $0xac0] ss:$72 sps:$4 sm:$0xff]  }
  0xca   : > { %5733 = vmatpush1.bf16.msra.mxu1 %v8155_v36  ;;  %v8247_v36 = vld [vmem:[%s9429_s8 + $0x144c] ss:$72 sps:$4 sm:$0xff]  }
  0xcb   : > { %5815 = vmatpush1.bf16.msra.mxu0 %v8158_v37  ;;  %5734 = vmatprep.subr.bf16.mxu1 %v8163_v38  ;;  %v8250_v37 = vld [vmem:[%s9429_s8 + $0xb54] ss:$72 sps:$4 sm:$0xff]   ;;  %v8245_v38 = vld [vmem:[%s9429_s8 + $0x1448] ss:$72 sps:$4 sm:$0xff]  }
  0xcc   : > { %5816 = vmatprep.subr.bf16.mxu0 %v8166_v39  ;;  %v8248_v39 = vld [vmem:[%s9429_s8 + $0xb50] ss:$72 sps:$4 sm:$0xff]  }
  0xce   : > { %5735 = vmatpush1.bf16.msra.mxu1 %v8161_v40  ;;  %v8253_v40 = vld [vmem:[%s9429_s8 + $0x14dc] ss:$72 sps:$4 sm:$0xff]  }
  0xcf   : > { %5817 = vmatpush1.bf16.msra.mxu0 %v8164_v41  ;;  %5736 = vmatprep.subr.bf16.mxu1 %v8169_v42  ;;  %v8256_v41 = vld [vmem:[%s9429_s8 + $0xbe4] ss:$72 sps:$4 sm:$0xff]   ;;  %v8251_v42 = vld [vmem:[%s9429_s8 + $0x14d8] ss:$72 sps:$4 sm:$0xff]  }
  0xd0   : > { %5818 = vmatprep.subr.bf16.mxu0 %v8172_v43  ;;  %v8254_v43 = vld [vmem:[%s9429_s8 + $0xbe0] ss:$72 sps:$4 sm:$0xff]  }
  0xd2   : > { %5737 = vmatpush1.bf16.msra.mxu1 %v8167_v44  ;;  %v8259_v44 = vld [vmem:[%s9429_s8 + $0x156c] ss:$72 sps:$4 sm:$0xff]  }
  0xd3   : > { %5819 = vmatpush1.bf16.msra.mxu0 %v8170_v45  ;;  %5738 = vmatprep.subr.bf16.mxu1 %v8175_v46  ;;  %v8262_v45 = vld [vmem:[%s9429_s8 + $0xc74] ss:$72 sps:$4 sm:$0xff]   ;;  %v8257_v46 = vld [vmem:[%s9429_s8 + $0x1568] ss:$72 sps:$4 sm:$0xff]  }
  0xd4   : > { %5820 = vmatprep.subr.bf16.mxu0 %v8178_v48  ;;  %v8260_v48 = vld [vmem:[%s9429_s8 + $0xc70] ss:$72 sps:$4 sm:$0xff]  }
  0xd6   : > { %5739 = vmatpush1.bf16.msra.mxu1 %v8173_v49  ;;  %v8265_v49 = vld [vmem:[%s9429_s8 + $0x15fc] ss:$72 sps:$4 sm:$0xff]  }
  0xd7   : > { %5821 = vmatpush1.bf16.msra.mxu0 %v8176_v50  ;;  %5740 = vmatprep.subr.bf16.mxu1 %v8181_v52  ;;  %v8268_v50 = vld [vmem:[%s9429_s8 + $0xd04] ss:$72 sps:$4 sm:$0xff]   ;;  %v8263_v52 = vld [vmem:[%s9429_s8 + $0x15f8] ss:$72 sps:$4 sm:$0xff]  }
  0xd8   : > { %5822 = vmatprep.subr.bf16.mxu0 %v8184_v53  ;;  %v8266_v53 = vld [vmem:[%s9429_s8 + $0xd00] ss:$72 sps:$4 sm:$0xff]  }
  0xda   : > { %5741 = vmatpush1.bf16.msra.mxu1 %v8179_v54  ;;  %v8271_v54 = vld [vmem:[%s9429_s8 + $0x168c] ss:$72 sps:$4 sm:$0xff]  }
  0xdb   : > { %5823 = vmatpush1.bf16.msra.mxu0 %v8182_v55  ;;  %5742 = vmatprep.subr.bf16.mxu1 %v8187_v56  ;;  %v8274_v55 = vld [vmem:[%s9429_s8 + $0xd94] ss:$72 sps:$4 sm:$0xff]   ;;  %v8269_v56 = vld [vmem:[%s9429_s8 + $0x1688] ss:$72 sps:$4 sm:$0xff]  }
  0xdc   : > { %5824 = vmatprep.subr.bf16.mxu0 %v8190_v57  ;;  %v8272_v57 = vld [vmem:[%s9429_s8 + $0xd90] ss:$72 sps:$4 sm:$0xff]  }
  0xde   : > { %5743 = vmatpush1.bf16.msra.mxu1 %v8185_v58  ;;  %v8277_v58 = vld [vmem:[%s9429_s8 + $0x171c] ss:$72 sps:$4 sm:$0xff]  }
  0xdf   : > { %5825 = vmatpush1.bf16.msra.mxu0 %v8188_v59  ;;  %5744 = vmatprep.subr.bf16.mxu1 %v8193_v60  ;;  %v8280_v59 = vld [vmem:[%s9429_s8 + $0xe24] ss:$72 sps:$4 sm:$0xff]   ;;  %v8275_v60 = vld [vmem:[%s9429_s8 + $0x1718] ss:$72 sps:$4 sm:$0xff]  }
  0xe0   : > { %5826 = vmatprep.subr.bf16.mxu0 %v8196_v61  ;;  %v8278_v61 = vld [vmem:[%s9429_s8 + $0xe20] ss:$72 sps:$4 sm:$0xff]  }
  0xe2   : > { %5745 = vmatpush1.bf16.msra.mxu1 %v8191_v62  ;;  %v8283_v62 = vld [vmem:[%s9429_s8 + $0x17ac] ss:$72 sps:$4 sm:$0xff]  }
  0xe3   : > { %5827 = vmatpush1.bf16.msra.mxu0 %v8194_v63  ;;  %5746 = vmatprep.subr.bf16.mxu1 %v8199_v0  ;;  %v8286_v63 = vld [vmem:[%s9429_s8 + $0xeb4] ss:$72 sps:$4 sm:$0xff]   ;;  %v8281_v0 = vld [vmem:[%s9429_s8 + $0x17a8] ss:$72 sps:$4 sm:$0xff]  }
  0xe4   : > { %5828 = vmatprep.subr.bf16.mxu0 %v8202_v1  ;;  %v8284_v1 = vld [vmem:[%s9429_s8 + $0xeb0] ss:$72 sps:$4 sm:$0xff]  }
  0xe6   : > { %5747 = vmatpush1.bf16.msra.mxu1 %v8197_v2  ;;  %v8289_v2 = vld [vmem:[%s9429_s8 + $0x183c] ss:$72 sps:$4 sm:$0xff]  }
  0xe7   : > { %5829 = vmatpush1.bf16.msra.mxu0 %v8200_v3  ;;  %5748 = vmatprep.subr.bf16.mxu1 %v8205_v4  ;;  %v8292_v3 = vld [vmem:[%s9429_s8 + $0xf44] ss:$72 sps:$4 sm:$0xff]   ;;  %v8287_v4 = vld [vmem:[%s9429_s8 + $0x1838] ss:$72 sps:$4 sm:$0xff]  }
  0xe8   : > { %5830 = vmatprep.subr.bf16.mxu0 %v8208_v5  ;;  %v8290_v5 = vld [vmem:[%s9429_s8 + $0xf40] ss:$72 sps:$4 sm:$0xff]  }
  0xea   : > { %5749 = vmatpush1.bf16.msra.mxu1 %v8203_v8  ;;  %v8295_v8 = vld [vmem:[%s9429_s8 + $0x18cc] ss:$72 sps:$4 sm:$0xff]  }
  0xeb   : > { %5831 = vmatpush1.bf16.msra.mxu0 %v8206_v9  ;;  %5750 = vmatprep.subr.bf16.mxu1 %v8211_v10  ;;  %v8298_v9 = vld [vmem:[%s9429_s8 + $0xfd4] ss:$72 sps:$4 sm:$0xff]   ;;  %v8293_v10 = vld [vmem:[%s9429_s8 + $0x18c8] ss:$72 sps:$4 sm:$0xff]  }
  0xec   : > { %5832 = vmatprep.subr.bf16.mxu0 %v8214_v11  ;;  %v8296_v11 = vld [vmem:[%s9429_s8 + $0xfd0] ss:$72 sps:$4 sm:$0xff]  }
  0xee   : > { %5751 = vmatpush1.bf16.msra.mxu1 %v8209_v12  ;;  %v8301_v12 = vld [vmem:[%s9429_s8 + $0x195c] ss:$72 sps:$4 sm:$0xff]  }
  0xef   : > { %5833 = vmatpush1.bf16.msra.mxu0 %v8212_v13  ;;  %5752 = vmatprep.subr.bf16.mxu1 %v8217_v15  ;;  %v8304_v13 = vld [vmem:[%s9429_s8 + $0x1064] ss:$72 sps:$4 sm:$0xff]   ;;  %v8299_v15 = vld [vmem:[%s9429_s8 + $0x1958] ss:$72 sps:$4 sm:$0xff]  }
  0xf0   : > { %5834 = vmatprep.subr.bf16.mxu0 %v8220_v16  ;;  %v8302_v16 = vld [vmem:[%s9429_s8 + $0x1060] ss:$72 sps:$4 sm:$0xff]  }
  0xf2   : > { %5753 = vmatpush1.bf16.msra.mxu1 %v8215_v17  ;;  %v8307_v17 = vld [vmem:[%s9429_s8 + $0x19ec] ss:$72 sps:$4 sm:$0xff]  }
  0xf3   : > { %5835 = vmatpush1.bf16.msra.mxu0 %v8218_v18  ;;  %5763 = vmatprep.subr.bf16.mxu1 %v8223_v19  ;;  %v8310_v18 = vld [vmem:[%s9429_s8 + $0x10f4] ss:$72 sps:$4 sm:$0xff]   ;;  %v8305_v19 = vld [vmem:[%s9429_s8 + $0x19e8] ss:$72 sps:$4 sm:$0xff]  }
  0xf4   : > { %5845 = vmatprep.subr.bf16.mxu0 %v8226_v20  ;;  %v8308_v20 = vld [vmem:[%s9429_s8 + $0x10f0] ss:$72 sps:$4 sm:$0xff]  }
  0xf5   : > { %5755 = vmatmul.mubr.bf16.vlgmr.msra.gmra.mrb[4].mxu1 %v9515_v7 }
  0xf6   : > { %5837 = vmatmul.mubr.bf16.vlgmr.msra.gmra.mrb[4].mxu0 %v9513_v6  ;;  %5764 = vmatpush1.bf16.msra.mxu1 %v8221_v21  ;;  %v8313_v21 = vld [vmem:[%s9429_s8 + $0x1a7c] ss:$72 sps:$4 sm:$0xff]  }
  0xf7   : > { %5846 = vmatpush1.bf16.msra.mxu0 %v8224_v22  ;;  %5765 = vmatprep.subr.bf16.mxu1 %v8229_v23  ;;  %v8316_v22 = vld [vmem:[%s9429_s8 + $0x1184] ss:$72 sps:$4 sm:$0xff]   ;;  %v8311_v23 = vld [vmem:[%s9429_s8 + $0x1a78] ss:$72 sps:$4 sm:$0xff]  }
  0xf8   : > { %5847 = vmatprep.subr.bf16.mxu0 %v8232_v24  ;;  %5795 = vmatprep.mubr.bf16.mxu1 %v9552_v34  ;;  %v8314_v24 = vld [vmem:[%s9429_s8 + $0x1180] ss:$72 sps:$4 sm:$0xff]  }
  0xf9   : > { %5877 = vmatprep.mubr.bf16.mxu0 %v9491_v51 }
  0xfa   : > { %5766 = vmatpush1.bf16.msra.mxu1 %v8227_v25  ;;  %v8319_v25 = vld [vmem:[%s9429_s8 + $0x1214] ss:$72 sps:$4 sm:$0xff]  }
  0xfb   : > { %5848 = vmatpush1.bf16.msra.mxu0 %v8230_v26  ;;  %5767 = vmatprep.subr.bf16.mxu1 %v8235_v27  ;;  %v8322_v26 = vld [vmem:[%s9429_s8 + $0x1c] ss:$72 sps:$4 sm:$0xff]   ;;  %v8317_v27 = vld [vmem:[%s9429_s8 + $0x1210] ss:$72 sps:$4 sm:$0xff]  }
  0xfc   : > { %5849 = vmatprep.subr.bf16.mxu0 %v8238_v28  ;;  %v8320_v28 = vld [vmem:[%s9429_s8 + $0x18] ss:$72 sps:$4 sm:$0xff]  }
  0xfe   : > { %5768 = vmatpush1.bf16.msra.mxu1 %v8233_v29  ;;  %v8325_v29 = vld [vmem:[%s9429_s8 + $0x12a4] ss:$72 sps:$4 sm:$0xff]  }
  0xff   : > { %5850 = vmatpush1.bf16.msra.mxu0 %v8236_v30  ;;  %5769 = vmatprep.subr.bf16.mxu1 %v8241_v31  ;;  %v8328_v30 = vld [vmem:[%s9429_s8 + $0xac] ss:$72 sps:$4 sm:$0xff]   ;;  %v8323_v31 = vld [vmem:[%s9429_s8 + $0x12a0] ss:$72 sps:$4 sm:$0xff]  }
 0x100   : > { %5851 = vmatprep.subr.bf16.mxu0 %v8244_v32  ;;  %v8326_v32 = vld [vmem:[%s9429_s8 + $0xa8] ss:$72 sps:$4 sm:$0xff]  }
 0x102   : > { %5770 = vmatpush1.bf16.msra.mxu1 %v8239_v33  ;;  %v8331_v33 = vld [vmem:[%s9429_s8 + $0x1334] ss:$72 sps:$4 sm:$0xff]  }
 0x103   : > { %5852 = vmatpush1.bf16.msra.mxu0 %v8242_v35  ;;  %5771 = vmatprep.subr.bf16.mxu1 %v8247_v36  ;;  %v8334_v35 = vld [vmem:[%s9429_s8 + $0x13c] ss:$72 sps:$4 sm:$0xff]   ;;  %v8329_v36 = vld [vmem:[%s9429_s8 + $0x1330] ss:$72 sps:$4 sm:$0xff]  }
 0x104   : > { %5853 = vmatprep.subr.bf16.mxu0 %v8250_v37  ;;  %v8332_v37 = vld [vmem:[%s9429_s8 + $0x138] ss:$72 sps:$4 sm:$0xff]  }
 0x106   : > { %5772 = vmatpush1.bf16.msra.mxu1 %v8245_v38  ;;  %v8337_v38 = vld [vmem:[%s9429_s8 + $0x13c4] ss:$72 sps:$4 sm:$0xff]  }
 0x107   : > { %5854 = vmatpush1.bf16.msra.mxu0 %v8248_v39  ;;  %5773 = vmatprep.subr.bf16.mxu1 %v8253_v40  ;;  %v8340_v39 = vld [vmem:[%s9429_s8 + $0x1cc] ss:$72 sps:$4 sm:$0xff]   ;;  %v8335_v40 = vld [vmem:[%s9429_s8 + $0x13c0] ss:$72 sps:$4 sm:$0xff]  }
 0x108   : > { %5855 = vmatprep.subr.bf16.mxu0 %v8256_v41  ;;  %v8338_v41 = vld [vmem:[%s9429_s8 + $0x1c8] ss:$72 sps:$4 sm:$0xff]  }
 0x10a   : > { %5774 = vmatpush1.bf16.msra.mxu1 %v8251_v42  ;;  %v8343_v42 = vld [vmem:[%s9429_s8 + $0x1454] ss:$72 sps:$4 sm:$0xff]  }
 0x10b   : > { %5856 = vmatpush1.bf16.msra.mxu0 %v8254_v43  ;;  %5775 = vmatprep.subr.bf16.mxu1 %v8259_v44  ;;  %v8346_v43 = vld [vmem:[%s9429_s8 + $0x25c] ss:$72 sps:$4 sm:$0xff]   ;;  %v8341_v44 = vld [vmem:[%s9429_s8 + $0x1450] ss:$72 sps:$4 sm:$0xff]  }
 0x10c   : > { %5857 = vmatprep.subr.bf16.mxu0 %v8262_v45  ;;  %v8344_v45 = vld [vmem:[%s9429_s8 + $0x258] ss:$72 sps:$4 sm:$0xff]  }
 0x10e   : > { %5776 = vmatpush1.bf16.msra.mxu1 %v8257_v46  ;;  %v8349_v46 = vld [vmem:[%s9429_s8 + $0x14e4] ss:$72 sps:$4 sm:$0xff]  }
 0x10f   : > { %5858 = vmatpush1.bf16.msra.mxu0 %v8260_v48  ;;  %5777 = vmatprep.subr.bf16.mxu1 %v8265_v49  ;;  %v8352_v48 = vld [vmem:[%s9429_s8 + $0x2ec] ss:$72 sps:$4 sm:$0xff]   ;;  %v8347_v49 = vld [vmem:[%s9429_s8 + $0x14e0] ss:$72 sps:$4 sm:$0xff]  }
 0x110   : > { %5859 = vmatprep.subr.bf16.mxu0 %v8268_v50  ;;  %v8350_v50 = vld [vmem:[%s9429_s8 + $0x2e8] ss:$72 sps:$4 sm:$0xff]  }
 0x112   : > { %5778 = vmatpush1.bf16.msra.mxu1 %v8263_v52  ;;  %v8355_v52 = vld [vmem:[%s9429_s8 + $0x1574] ss:$72 sps:$4 sm:$0xff]  }
 0x113   : > { %5860 = vmatpush1.bf16.msra.mxu0 %v8266_v53  ;;  %5779 = vmatprep.subr.bf16.mxu1 %v8271_v54  ;;  %v8358_v53 = vld [vmem:[%s9429_s8 + $0x37c] ss:$72 sps:$4 sm:$0xff]  }
 0x114   : > { %5861 = vmatprep.subr.bf16.mxu0 %v8274_v55 }
 0x116   : > { %5780 = vmatpush1.bf16.msra.mxu1 %v8269_v56  ;;  %v8353_v56 = vld [vmem:[%s9429_s8 + $0x1570] ss:$72 sps:$4 sm:$0xff]  }
 0x117   : > { %5862 = vmatpush1.bf16.msra.mxu0 %v8272_v57  ;;  %5781 = vmatprep.subr.bf16.mxu1 %v8277_v58  ;;  %v8356_v57 = vld [vmem:[%s9429_s8 + $0x378] ss:$72 sps:$4 sm:$0xff]  }
 0x118   : > { %5863 = vmatprep.subr.bf16.mxu0 %v8280_v59  ;;  %v8361_v59 = vld [vmem:[%s9429_s8 + $0x1604] ss:$72 sps:$4 sm:$0xff]  }
 0x11a   : > { %5782 = vmatpush1.bf16.msra.mxu1 %v8275_v60  ;;  %v8364_v60 = vld [vmem:[%s9429_s8 + $0x40c] ss:$72 sps:$4 sm:$0xff]  }
 0x11b   : > { %5864 = vmatpush1.bf16.msra.mxu0 %v8278_v61  ;;  %5783 = vmatprep.subr.bf16.mxu1 %v8283_v62  ;;  %v8359_v62 = vld [vmem:[%s9429_s8 + $0x1600] ss:$72 sps:$4 sm:$0xff]  }
 0x11c   : > { %5865 = vmatprep.subr.bf16.mxu0 %v8286_v63  ;;  %v8362_v63 = vld [vmem:[%s9429_s8 + $0x408] ss:$72 sps:$4 sm:$0xff]  }
 0x11e   : > { %5784 = vmatpush1.bf16.msra.mxu1 %v8281_v0  ;;  %v8367_v0 = vld [vmem:[%s9429_s8 + $0x1694] ss:$72 sps:$4 sm:$0xff]  }
 0x11f   : > { %5866 = vmatpush1.bf16.msra.mxu0 %v8284_v1  ;;  %5785 = vmatprep.subr.bf16.mxu1 %v8289_v2  ;;  %v8370_v1 = vld [vmem:[%s9429_s8 + $0x49c] ss:$72 sps:$4 sm:$0xff]   ;;  %v8365_v2 = vld [vmem:[%s9429_s8 + $0x1690] ss:$72 sps:$4 sm:$0xff]  }
 0x120   : > { %5867 = vmatprep.subr.bf16.mxu0 %v8292_v3  ;;  %v8368_v3 = vld [vmem:[%s9429_s8 + $0x498] ss:$72 sps:$4 sm:$0xff]  }
 0x122   : > { %5786 = vmatpush1.bf16.msra.mxu1 %v8287_v4  ;;  %v8373_v4 = vld [vmem:[%s9429_s8 + $0x1724] ss:$72 sps:$4 sm:$0xff]  }
 0x123   : > { %5868 = vmatpush1.bf16.msra.mxu0 %v8290_v5  ;;  %5787 = vmatprep.subr.bf16.mxu1 %v8295_v8  ;;  %v8376_v5 = vld [vmem:[%s9429_s8 + $0x52c] ss:$72 sps:$4 sm:$0xff]   ;;  %v8371_v8 = vld [vmem:[%s9429_s8 + $0x1720] ss:$72 sps:$4 sm:$0xff]  }
 0x124   : > { %5869 = vmatprep.subr.bf16.mxu0 %v8298_v9  ;;  %v8374_v9 = vld [vmem:[%s9429_s8 + $0x528] ss:$72 sps:$4 sm:$0xff]  }
 0x126   : > { %5788 = vmatpush1.bf16.msra.mxu1 %v8293_v10  ;;  %v8379_v10 = vld [vmem:[%s9429_s8 + $0x17b4] ss:$72 sps:$4 sm:$0xff]  }
 0x127   : > { %5870 = vmatpush1.bf16.msra.mxu0 %v8296_v11  ;;  %5789 = vmatprep.subr.bf16.mxu1 %v8301_v12  ;;  %v8382_v11 = vld [vmem:[%s9429_s8 + $0x5bc] ss:$72 sps:$4 sm:$0xff]   ;;  %v8377_v12 = vld [vmem:[%s9429_s8 + $0x17b0] ss:$72 sps:$4 sm:$0xff]  }
 0x128   : > { %5871 = vmatprep.subr.bf16.mxu0 %v8304_v13  ;;  %v8380_v13 = vld [vmem:[%s9429_s8 + $0x5b8] ss:$72 sps:$4 sm:$0xff]  }
 0x12a   : > { %5790 = vmatpush1.bf16.msra.mxu1 %v8299_v15  ;;  %v8385_v15 = vld [vmem:[%s9429_s8 + $0x1844] ss:$72 sps:$4 sm:$0xff]  }
 0x12b   : > { %5872 = vmatpush1.bf16.msra.mxu0 %v8302_v16  ;;  %5791 = vmatprep.subr.bf16.mxu1 %v8307_v17  ;;  %v8388_v16 = vld [vmem:[%s9429_s8 + $0x64c] ss:$72 sps:$4 sm:$0xff]   ;;  %v8383_v17 = vld [vmem:[%s9429_s8 + $0x1840] ss:$72 sps:$4 sm:$0xff]  }
 0x12c   : > { %5873 = vmatprep.subr.bf16.mxu0 %v8310_v18  ;;  %v8386_v18 = vld [vmem:[%s9429_s8 + $0x648] ss:$72 sps:$4 sm:$0xff]  }
 0x12e   : > { %5792 = vmatpush1.bf16.msra.mxu1 %v8305_v19  ;;  %v8391_v19 = vld [vmem:[%s9429_s8 + $0x18d4] ss:$72 sps:$4 sm:$0xff]  }
 0x12f   : > { %5874 = vmatpush1.bf16.msra.mxu0 %v8308_v20  ;;  %5793 = vmatprep.subr.bf16.mxu1 %v8313_v21  ;;  %v8394_v20 = vld [vmem:[%s9429_s8 + $0x6dc] ss:$72 sps:$4 sm:$0xff]   ;;  %v8389_v21 = vld [vmem:[%s9429_s8 + $0x18d0] ss:$72 sps:$4 sm:$0xff]  }
 0x130   : > { %5875 = vmatprep.subr.bf16.mxu0 %v8316_v22  ;;  %v8392_v22 = vld [vmem:[%s9429_s8 + $0x6d8] ss:$72 sps:$4 sm:$0xff]  }
 0x132   : > { %5794 = vmatpush1.bf16.msra.mxu1 %v8311_v23  ;;  %v8397_v23 = vld [vmem:[%s9429_s8 + $0x1964] ss:$72 sps:$4 sm:$0xff]  }
 0x133   : > { %5876 = vmatpush1.bf16.msra.mxu0 %v8314_v24  ;;  %5927 = vmatprep.subr.bf16.mxu1 %v8322_v26  ;;  %v8400_v24 = vld [vmem:[%s9429_s8 + $0x76c] ss:$72 sps:$4 sm:$0xff]   ;;  %v8398_v26 = vld [vmem:[%s9429_s8 + $0x768] ss:$72 sps:$4 sm:$0xff]  }
 0x134   : > { %5886 = vmatprep.subr.bf16.mxu0 %v8319_v25  ;;  %v8395_v25 = vld [vmem:[%s9429_s8 + $0x1960] ss:$72 sps:$4 sm:$0xff]  }
 0x135   : > { %5796 = vmatmul.mubr.bf16.vlgmr.msra.gmra.mrb[4].mxu1 %v9596_v14 }
 0x136   : > { %5878 = vmatmul.mubr.bf16.vlgmr.msra.gmra.mrb[4].mxu0 %v9515_v7  ;;  %5928 = vmatpush1.bf16.msra.mxu1 %v8320_v28  ;;  %v8406_v28 = vld [vmem:[%s9429_s8 + $0x7fc] ss:$72 sps:$4 sm:$0xff]  }
 0x137   : > { %5887 = vmatpush1.bf16.msra.mxu0 %v8317_v27  ;;  %5929 = vmatprep.subr.bf16.mxu1 %v8328_v30  ;;  %v8403_v27 = vld [vmem:[%s9429_s8 + $0x19f4] ss:$72 sps:$4 sm:$0xff]   ;;  %v8404_v30 = vld [vmem:[%s9429_s8 + $0x7f8] ss:$72 sps:$4 sm:$0xff]  }
 0x138   : > { %5888 = vmatprep.subr.bf16.mxu0 %v8325_v29  ;;  %5918 = vmatprep.mubr.bf16.mxu0 %v9552_v34  ;;  %v8401_v29 = vld [vmem:[%s9429_s8 + $0x19f0] ss:$72 sps:$4 sm:$0xff]  }
 0x139   : > { %5959 = vmatprep.mubr.bf16.mxu1 %v9484_v47 }
 0x13a   : > { %5930 = vmatpush1.bf16.msra.mxu1 %v8326_v32  ;;  %v8412_v32 = vld [vmem:[%s9429_s8 + $0x88c] ss:$72 sps:$4 sm:$0xff]  }
 0x13b   : > { %5889 = vmatpush1.bf16.msra.mxu0 %v8323_v31  ;;  %5931 = vmatprep.subr.bf16.mxu1 %v8334_v35  ;;  %v8409_v31 = vld [vmem:[%s9429_s8 + $0x1a84] ss:$72 sps:$4 sm:$0xff]   ;;  %v8410_v35 = vld [vmem:[%s9429_s8 + $0x888] ss:$72 sps:$4 sm:$0xff]  }
 0x13c   : > { %5890 = vmatprep.subr.bf16.mxu0 %v8331_v33  ;;  %v8407_v33 = vld [vmem:[%s9429_s8 + $0x1a80] ss:$72 sps:$4 sm:$0xff]  }
 0x13e   : > { %5932 = vmatpush1.bf16.msra.mxu1 %v8332_v37  ;;  %v8418_v37 = vld [vmem:[%s9429_s8 + $0x24] ss:$72 sps:$4 sm:$0xff]  }
 0x13f   : > { %5891 = vmatpush1.bf16.msra.mxu0 %v8329_v36  ;;  %5933 = vmatprep.subr.bf16.mxu1 %v8340_v39  ;;  %v8415_v36 = vld [vmem:[%s9429_s8 + $0x91c] ss:$72 sps:$4 sm:$0xff]   ;;  %v8416_v39 = vld [vmem:[%s9429_s8 + $0x20] ss:$72 sps:$4 sm:$0xff]  }
 0x140   : > { %5892 = vmatprep.subr.bf16.mxu0 %v8337_v38  ;;  %v8413_v38 = vld [vmem:[%s9429_s8 + $0x918] ss:$72 sps:$4 sm:$0xff]  }
 0x142   : > { %5934 = vmatpush1.bf16.msra.mxu1 %v8338_v41  ;;  %v8424_v41 = vld [vmem:[%s9429_s8 + $0xb4] ss:$72 sps:$4 sm:$0xff]  }
 0x143   : > { %5893 = vmatpush1.bf16.msra.mxu0 %v8335_v40  ;;  %5935 = vmatprep.subr.bf16.mxu1 %v8346_v43  ;;  %v8421_v40 = vld [vmem:[%s9429_s8 + $0x9ac] ss:$72 sps:$4 sm:$0xff]   ;;  %v8419_v43 = vld [vmem:[%s9429_s8 + $0x9a8] ss:$72 sps:$4 sm:$0xff]  }
 0x144   : > { %5894 = vmatprep.subr.bf16.mxu0 %v8343_v42  ;;  %v1127_v42 = vlaneseq }
 0x146   : > { %5936 = vmatpush1.bf16.msra.mxu1 %v8344_v45  ;;  %v8427_v45 = vld [vmem:[%s9429_s8 + $0xa3c] ss:$72 sps:$4 sm:$0xff]  }
 0x147   : > { %5895 = vmatpush1.bf16.msra.mxu0 %v8341_v44  ;;  %5937 = vmatprep.subr.bf16.mxu1 %v8352_v48  ;;  %v8422_v44 = vld [vmem:[%s9429_s8 + $0xb0] ss:$72 sps:$4 sm:$0xff]   ;;  %v9821_v48 = vshrl.u32 %v1127_v42, 7 }
 0x148   : > { %5896 = vmatprep.subr.bf16.mxu0 %v8349_v46  ;;  %v9762_v54 = vpop.f32.mrb[0].mxu1  ;;  %v8430_v46 = vld [vmem:[%s9429_s8 + $0x144] ss:$72 sps:$4 sm:$0xff]   ;;  %v8479_v42 = vld [vmem:[%s9429_s8 + $0xf48] ss:$72 sps:$4 sm:$0xff]  }
 0x149   : > { %v9764_v55 = vpop.f32.mrb[1].mxu1 }
 0x14a   : > { %5938 = vmatpush1.bf16.msra.mxu1 %v8350_v50  ;;  %v5596_v58 = vpop.f32.mrb[2].mxu1  ;;  %v8428_v50 = vld [vmem:[%s9429_s8 + $0x140] ss:$72 sps:$4 sm:$0xff]  }
 0x14b   : > { %5897 = vmatpush1.bf16.msra.mxu0 %v8347_v49  ;;  %5939 = vmatprep.subr.bf16.mxu1 %v8358_v53  ;;  %v5597_v61 = vpop.f32.mrb[3].mxu1  ;;  %v8425_v49 = vld [vmem:[%s9429_s8 + $0xa38] ss:$72 sps:$4 sm:$0xff]   ;;  %v8436_v53 = vld [vmem:[%s9429_s8 + $0x1d4] ss:$72 sps:$4 sm:$0xff]  }
 0x14c   : > { %5898 = vmatprep.subr.bf16.mxu0 %v8355_v52  ;;  %v8433_v52 = vld [vmem:[%s9429_s8 + $0xacc] ss:$72 sps:$4 sm:$0xff]   ;;  %v8434_v58 = vld [vmem:[%s9429_s8 + $0x1d0] ss:$72 sps:$4 sm:$0xff]   ;;  %v8439_v61 = vld [vmem:[%s9429_s8 + $0xb5c] ss:$72 sps:$4 sm:$0xff]  }
 0x14e   : > { %5940 = vmatpush1.bf16.msra.mxu1 %v8356_v57  ;;  %v9835_v57 = vsub.s32 0, %v9821_v48 }
 0x14f   : > { %5899 = vmatpush1.bf16.msra.mxu0 %v8353_v56  ;;  %5941 = vmatprep.subr.bf16.mxu1 %v8364_v60  ;;  %v8431_v56 = vld [vmem:[%s9429_s8 + $0xac8] ss:$72 sps:$4 sm:$0xff]   ;;  %v9840_v60 = vsub.s32 1, %v9821_v48 }
 0x150   : > { %5900 = vmatprep.subr.bf16.mxu0 %v8361_v59  ;;  %v1121_v59 = vld [vmem:[%s9831_s12] sm:$0xff] }
 0x152   : > { %5942 = vmatpush1.bf16.msra.mxu1 %v8362_v63  ;;  %v1130_v63 = vrot.slane %v1121_v59, %v9835_v57 }
 0x153   : > { %5901 = vmatpush1.bf16.msra.mxu0 %v8359_v62  ;;  %5943 = vmatprep.subr.bf16.mxu1 %v8370_v1  ;;  %v8442_v62 = vld [vmem:[%s9429_s8 + $0x264] ss:$72 sps:$4 sm:$0xff]   ;;  %v8440_v1 = vld [vmem:[%s9429_s8 + $0x260] ss:$72 sps:$4 sm:$0xff]  }
 0x154   : > { %5902 = vmatprep.subr.bf16.mxu0 %v8367_v0  ;;  %v8437_v0 = vld [vmem:[%s9429_s8 + $0xb58] ss:$72 sps:$4 sm:$0xff]  }
 0x156   : > { %5944 = vmatpush1.bf16.msra.mxu1 %v8368_v3  ;;  %v8445_v3 = vld [vmem:[%s9429_s8 + $0xbec] ss:$72 sps:$4 sm:$0xff]  }
 0x157   : > { %5903 = vmatpush1.bf16.msra.mxu0 %v8365_v2  ;;  %5945 = vmatprep.subr.bf16.mxu1 %v8376_v5  ;;  %v1134_v2 = vrot.slane %v1121_v59, %v9840_v60  ;;  %v8443_v5 = vld [vmem:[%s9429_s8 + $0xbe8] ss:$72 sps:$4 sm:$0xff]   ;;  %v8502_v59 = vld [vmem:[%s9429_s8 + $0x804] ss:$72 sps:$4 sm:$0xff]  }
 0x158   : > { %5904 = vmatprep.subr.bf16.mxu0 %v8373_v4  ;;  %v8448_v4 = vld [vmem:[%s9429_s8 + $0x2f4] ss:$72 sps:$4 sm:$0xff]  }
 0x15a   : > { %5946 = vmatpush1.bf16.msra.mxu1 %v8374_v9  ;;  %v5593_v9 = vadd.f32 %v9762_v54, %v1130_v63  ;;  %v8505_v63 = vld [vmem:[%s9429_s8 + $0x118c] ss:$72 sps:$4 sm:$0xff]  }
 0x15b   : > { %5905 = vmatpush1.bf16.msra.mxu0 %v8371_v8  ;;  %5947 = vmatprep.subr.bf16.mxu1 %v8382_v11  ;;  %v8446_v8 = vld [vmem:[%s9429_s8 + $0x2f0] ss:$72 sps:$4 sm:$0xff]   ;;  %v8451_v11 = vld [vmem:[%s9429_s8 + $0xc7c] ss:$72 sps:$4 sm:$0xff]  }
 0x15c   : > { %5906 = vmatprep.subr.bf16.mxu0 %v8379_v10  ;;  %v5595_v10 = vadd.f32 %v9764_v55, %v1134_v2  ;;  %v8506_v2 = vld [vmem:[%s9429_s8 + $0x890] ss:$72 sps:$4 sm:$0xff]  }
 0x15e   : > { %5948 = vmatpush1.bf16.msra.mxu1 %v8380_v13 }
 0x15f   : > { %5907 = vmatpush1.bf16.msra.mxu0 %v8377_v12  ;;  %5949 = vmatprep.subr.bf16.mxu1 %v8388_v16  ;;  %v8454_v12 = vld [vmem:[%s9429_s8 + $0x384] ss:$72 sps:$4 sm:$0xff]   ;;  %v8452_v16 = vld [vmem:[%s9429_s8 + $0x380] ss:$72 sps:$4 sm:$0xff]  }
 0x160   : > { %5908 = vmatprep.subr.bf16.mxu0 %v8385_v15  ;;  %v8449_v15 = vld [vmem:[%s9429_s8 + $0xc78] ss:$72 sps:$4 sm:$0xff]  }
 0x162   : > { %5950 = vmatpush1.bf16.msra.mxu1 %v8386_v18 }
 0x163   : > { %5909 = vmatpush1.bf16.msra.mxu0 %v8383_v17  ;;  %5951 = vmatprep.subr.bf16.mxu1 %v8394_v20 }
 0x164   : > { %5910 = vmatprep.subr.bf16.mxu0 %v8391_v19 }
 0x166   : > { %5952 = vmatpush1.bf16.msra.mxu1 %v8392_v22  ;;  %v8460_v22 = vld [vmem:[%s9429_s8 + $0x414] ss:$72 sps:$4 sm:$0xff]  }
 0x167   : > { %5911 = vmatpush1.bf16.msra.mxu0 %v8389_v21  ;;  %5953 = vmatprep.subr.bf16.mxu1 %v8400_v24  ;;  %v8457_v21 = vld [vmem:[%s9429_s8 + $0xd0c] ss:$72 sps:$4 sm:$0xff]   ;;  %v8455_v24 = vld [vmem:[%s9429_s8 + $0xd08] ss:$72 sps:$4 sm:$0xff]  }
 0x168   : > { %5912 = vmatprep.subr.bf16.mxu0 %v8397_v23 }
 0x16a   : > { %5954 = vmatpush1.bf16.msra.mxu1 %v8398_v26 }
 0x16b   : > { %5913 = vmatpush1.bf16.msra.mxu0 %v8395_v25  ;;  %5955 = vmatprep.subr.bf16.mxu1 %v8406_v28  ;;  %v8458_v25 = vld [vmem:[%s9429_s8 + $0x410] ss:$72 sps:$4 sm:$0xff]   ;;  %v8466_v28 = vld [vmem:[%s9429_s8 + $0x4a4] ss:$72 sps:$4 sm:$0xff]  }
 0x16c   : > { %5914 = vmatprep.subr.bf16.mxu0 %v8403_v27  ;;  %v8463_v27 = vld [vmem:[%s9429_s8 + $0xd9c] ss:$72 sps:$4 sm:$0xff]  }
 0x16e   : > { %5956 = vmatpush1.bf16.msra.mxu1 %v8404_v30  ;;  %v8464_v30 = vld [vmem:[%s9429_s8 + $0x4a0] ss:$72 sps:$4 sm:$0xff]  }
 0x16f   : > { %5915 = vmatpush1.bf16.msra.mxu0 %v8401_v29  ;;  %5957 = vmatprep.subr.bf16.mxu1 %v8412_v32  ;;  %v8461_v29 = vld [vmem:[%s9429_s8 + $0xd98] ss:$72 sps:$4 sm:$0xff]   ;;  %v8472_v32 = vld [vmem:[%s9429_s8 + $0x534] ss:$72 sps:$4 sm:$0xff]  }
 0x170   : > { %5916 = vmatprep.subr.bf16.mxu0 %v8409_v31  ;;  %v8469_v31 = vld [vmem:[%s9429_s8 + $0xe2c] ss:$72 sps:$4 sm:$0xff]  }
 0x172   : > { %5958 = vmatpush1.bf16.msra.mxu1 %v8410_v35  ;;  %v8470_v35 = vld [vmem:[%s9429_s8 + $0x530] ss:$72 sps:$4 sm:$0xff]  }
 0x173   : > { %5917 = vmatpush1.bf16.msra.mxu0 %v8407_v33  ;;  %5968 = vmatprep.subr.bf16.mxu1 %v8415_v36  ;;  %v8467_v33 = vld [vmem:[%s9429_s8 + $0xe28] ss:$72 sps:$4 sm:$0xff]   ;;  %v8475_v36 = vld [vmem:[%s9429_s8 + $0xebc] ss:$72 sps:$4 sm:$0xff]  }
 0x174   : > { %6050 = vmatprep.subr.bf16.mxu0 %v8418_v37  ;;  %v8478_v37 = vld [vmem:[%s9429_s8 + $0x5c4] ss:$72 sps:$4 sm:$0xff]  }
 0x175   : > { %5960 = vmatmul.mubr.bf16.vlgmr.msra.gmra.mrb[8].mxu1 %v9513_v6 }
 0x176   : > { %5919 = vmatmul.mubr.bf16.vlgmr.msra.gmra.mrb[4].mxu0 %v9596_v14  ;;  %5969 = vmatpush1.bf16.msra.mxu1 %v8413_v38  ;;  %v8473_v38 = vld [vmem:[%s9429_s8 + $0xeb8] ss:$72 sps:$4 sm:$0xff]  }
 0x177   : > { %6051 = vmatpush1.bf16.msra.mxu0 %v8416_v39  ;;  %5970 = vmatprep.subr.bf16.mxu1 %v8421_v40  ;;  %v8476_v39 = vld [vmem:[%s9429_s8 + $0x5c0] ss:$72 sps:$4 sm:$0xff]   ;;  %v8481_v40 = vld [vmem:[%s9429_s8 + $0xf4c] ss:$72 sps:$4 sm:$0xff]  }
 0x178   : > { %6052 = vmatprep.subr.bf16.mxu0 %v8424_v41  ;;  %6000 = vmatprep.mubr.bf16.mxu1 %v9491_v51  ;;  %v8484_v41 = vld [vmem:[%s9429_s8 + $0x654] ss:$72 sps:$4 sm:$0xff]  }
 0x179   : > { %6082 = vmatprep.mubr.bf16.mxu0 %v9484_v47 }
 0x17a   : > { %5971 = vmatpush1.bf16.msra.mxu1 %v8419_v43  ;;  %v8482_v43 = vld [vmem:[%s9429_s8 + $0x650] ss:$72 sps:$4 sm:$0xff]  }
 0x17b   : > { %6053 = vmatpush1.bf16.msra.mxu0 %v8422_v44  ;;  %5972 = vmatprep.subr.bf16.mxu1 %v8427_v45  ;;  %v8487_v44 = vld [vmem:[%s9429_s8 + $0xfdc] ss:$72 sps:$4 sm:$0xff]  }
 0x17c   : > { %6054 = vmatprep.subr.bf16.mxu0 %v8430_v46  ;;  %v8490_v45 = vld [vmem:[%s9429_s8 + $0x6e4] ss:$72 sps:$4 sm:$0xff]   ;;  %v8485_v46 = vld [vmem:[%s9429_s8 + $0xfd8] ss:$72 sps:$4 sm:$0xff]  }
 0x17e   : > { %5973 = vmatpush1.bf16.msra.mxu1 %v8425_v49  ;;  %v8488_v49 = vld [vmem:[%s9429_s8 + $0x6e0] ss:$72 sps:$4 sm:$0xff]  }
 0x17f   : > { %6055 = vmatpush1.bf16.msra.mxu0 %v8428_v50  ;;  %5974 = vmatprep.subr.bf16.mxu1 %v8433_v52  ;;  %v8493_v50 = vld [vmem:[%s9429_s8 + $0x106c] ss:$72 sps:$4 sm:$0xff]  }
 0x180   : > { %6056 = vmatprep.subr.bf16.mxu0 %v8436_v53  ;;  %v8496_v52 = vld [vmem:[%s9429_s8 + $0x774] ss:$72 sps:$4 sm:$0xff]   ;;  %v8491_v53 = vld [vmem:[%s9429_s8 + $0x1068] ss:$72 sps:$4 sm:$0xff]  }
 0x182   : > { %5975 = vmatpush1.bf16.msra.mxu1 %v8431_v56  ;;  %v8494_v56 = vld [vmem:[%s9429_s8 + $0x770] ss:$72 sps:$4 sm:$0xff]  }
 0x183   : > { %6057 = vmatpush1.bf16.msra.mxu0 %v8434_v58  ;;  %5976 = vmatprep.subr.bf16.mxu1 %v8439_v61  ;;  %v8499_v58 = vld [vmem:[%s9429_s8 + $0x10fc] ss:$72 sps:$4 sm:$0xff]   ;;  %v8497_v61 = vld [vmem:[%s9429_s8 + $0x10f8] ss:$72 sps:$4 sm:$0xff]  }
 0x184   : > { %6058 = vmatprep.subr.bf16.mxu0 %v8442_v62  ;;  %v8500_v62 = vld [vmem:[%s9429_s8 + $0x800] ss:$72 sps:$4 sm:$0xff]  }
 0x186   : > { %5977 = vmatpush1.bf16.msra.mxu1 %v8437_v0  ;;  %v8508_v0 = vld [vmem:[%s9429_s8 + $0x894] ss:$72 sps:$4 sm:$0xff]  }
 0x187   : > { %6059 = vmatpush1.bf16.msra.mxu0 %v8440_v1  ;;  %5978 = vmatprep.subr.bf16.mxu1 %v8445_v3  ;;  %v8503_v1 = vld [vmem:[%s9429_s8 + $0x1188] ss:$72 sps:$4 sm:$0xff]   ;;  %v8511_v3 = vld [vmem:[%s9429_s8 + $0x121c] ss:$72 sps:$4 sm:$0xff]  }
 0x188   : > { %6060 = vmatprep.subr.bf16.mxu0 %v8448_v4  ;;  %v8514_v4 = vld [vmem:[%s9429_s8 + $0x924] ss:$72 sps:$4 sm:$0xff]  }
 0x189   : > { %v5674_v13 = vpop.f32.mrb[0].mxu0 }
 0x18a   : > { %v7780_v17 = vadd.f32 %v5674_v13, %v5593_v9  ;;  %v5676_v18 = vpop.f32.mrb[1].mxu0  ;;  %5979 = vmatpush1.bf16.msra.mxu1 %v8443_v5  ;;  %v8509_v5 = vld [vmem:[%s9429_s8 + $0x1218] ss:$72 sps:$4 sm:$0xff]   ;;  %v8517_v9 = vld [vmem:[%s9429_s8 + $0x12ac] ss:$72 sps:$4 sm:$0xff]  }
 0x18b   : > { %v7782_v19 = vadd.f32 %v5676_v18, %v5595_v10  ;;  %v5678_v54 = vpop.f32.mrb[2].mxu0  ;;  %6061 = vmatpush1.bf16.msra.mxu0 %v8446_v8  ;;  %5980 = vmatprep.subr.bf16.mxu1 %v8451_v11  ;;  %v8512_v8 = vld [vmem:[%s9429_s8 + $0x920] ss:$72 sps:$4 sm:$0xff]   ;;  %v8520_v10 = vld [vmem:[%s9429_s8 + $0x9b4] ss:$72 sps:$4 sm:$0xff]  }
 0x18c   : > { %v6665_v55 = vmax.f32 %v7780_v17, 0.0  ;;  %v5679_v20 = vpop.f32.mrb[3].mxu0  ;;  %6062 = vmatprep.subr.bf16.mxu0 %v8454_v12  ;;  %v8515_v11 = vld [vmem:[%s9429_s8 + $0x12a8] ss:$72 sps:$4 sm:$0xff]   ;;  %v8523_v13 = vld [vmem:[%s9429_s8 + $0x133c] ss:$72 sps:$4 sm:$0xff]  }
 0x18d   : > { %v6666_v23 = vmax.f32 %v7782_v19, 0.0  ;;  %v8518_v12 = vld [vmem:[%s9429_s8 + $0x9b0] ss:$72 sps:$4 sm:$0xff]   ;;  %v8524_v17 = vld [vmem:[%s9429_s8 + $0xa40] ss:$72 sps:$4 sm:$0xff]  }
 0x18e   : > { %5981 = vmatpush1.bf16.msra.mxu1 %v8449_v15  ;;  %v8526_v15 = vld [vmem:[%s9429_s8 + $0xa44] ss:$72 sps:$4 sm:$0xff]   ;;  %v8532_v19 = vld [vmem:[%s9429_s8 + $0xad4] ss:$72 sps:$4 sm:$0xff]   ;;  %v8527_v54 = vld [vmem:[%s9429_s8 + $0x13c8] ss:$72 sps:$4 sm:$0xff]  }
 0x18f   : > { %v7770_v26 = vpack.c.bf16 %v6666_v23, %v6665_v55  ;;  %6063 = vmatpush1.bf16.msra.mxu0 %v8452_v16  ;;  %5982 = vmatprep.subr.bf16.mxu1 %v8457_v21  ;;  %v8521_v16 = vld [vmem:[%s9429_s8 + $0x1338] ss:$72 sps:$4 sm:$0xff]   ;;  %v8529_v18 = vld [vmem:[%s9429_s8 + $0x13cc] ss:$72 sps:$4 sm:$0xff]   ;;  %v8535_v20 = vld [vmem:[%s9429_s8 + $0x145c] ss:$72 sps:$4 sm:$0xff]  }
 0x190   : > { %6064 = vmatprep.subr.bf16.mxu0 %v8460_v22  ;;  %v8530_v55 = vld [vmem:[%s9429_s8 + $0xad0] ss:$72 sps:$4 sm:$0xff]   ;;  %v8538_v21 = vld [vmem:[%s9429_s8 + $0xb64] ss:$72 sps:$4 sm:$0xff]   ;;  %v8536_v23 = vld [vmem:[%s9429_s8 + $0xb60] ss:$72 sps:$4 sm:$0xff]  }
 0x191   : > { %6755 = vst [vmem:[%s9866_s24] sm:$0xff] %v7770_v26  ;;  %v8533_v22 = vld [vmem:[%s9429_s8 + $0x1458] ss:$72 sps:$4 sm:$0xff]   ;;  %v8539_v26 = vld [vmem:[%s9429_s8 + $0x14e8] ss:$72 sps:$4 sm:$0xff]  }
 0x192   : > { %5983 = vmatpush1.bf16.msra.mxu1 %v8455_v24  ;;  %v8541_v24 = vld [vmem:[%s9429_s8 + $0x14ec] ss:$72 sps:$4 sm:$0xff]  }
 0x193   : > { %6065 = vmatpush1.bf16.msra.mxu0 %v8458_v25  ;;  %5984 = vmatprep.subr.bf16.mxu1 %v8463_v27  ;;  %v8544_v25 = vld [vmem:[%s9429_s8 + $0xbf4] ss:$72 sps:$4 sm:$0xff]   ;;  %v8542_v27 = vld [vmem:[%s9429_s8 + $0xbf0] ss:$72 sps:$4 sm:$0xff]  }
 0x194   : > { %6066 = vmatprep.subr.bf16.mxu0 %v8466_v28  ;;  %v8547_v28 = vld [vmem:[%s9429_s8 + $0x157c] ss:$72 sps:$4 sm:$0xff]  }
 0x196   : > { %5985 = vmatpush1.bf16.msra.mxu1 %v8461_v29  ;;  %v8550_v29 = vld [vmem:[%s9429_s8 + $0xc84] ss:$72 sps:$4 sm:$0xff]  }
 0x197   : > { %6067 = vmatpush1.bf16.msra.mxu0 %v8464_v30  ;;  %5986 = vmatprep.subr.bf16.mxu1 %v8469_v31  ;;  %v8545_v30 = vld [vmem:[%s9429_s8 + $0x1578] ss:$72 sps:$4 sm:$0xff]  }
 0x198   : > { %6068 = vmatprep.subr.bf16.mxu0 %v8472_v32  ;;  %v8548_v31 = vld [vmem:[%s9429_s8 + $0xc80] ss:$72 sps:$4 sm:$0xff]   ;;  %v8553_v32 = vld [vmem:[%s9429_s8 + $0x160c] ss:$72 sps:$4 sm:$0xff]  }
 0x19a   : > { %5987 = vmatpush1.bf16.msra.mxu1 %v8467_v33  ;;  %v8556_v33 = vld [vmem:[%s9429_s8 + $0xd14] ss:$72 sps:$4 sm:$0xff]  }
 0x19b   : > { %6069 = vmatpush1.bf16.msra.mxu0 %v8470_v35  ;;  %5988 = vmatprep.subr.bf16.mxu1 %v8475_v36  ;;  %v8551_v35 = vld [vmem:[%s9429_s8 + $0x1608] ss:$72 sps:$4 sm:$0xff]  }
 0x19c   : > { %6070 = vmatprep.subr.bf16.mxu0 %v8478_v37  ;;  %v8554_v36 = vld [vmem:[%s9429_s8 + $0xd10] ss:$72 sps:$4 sm:$0xff]   ;;  %v8559_v37 = vld [vmem:[%s9429_s8 + $0x169c] ss:$72 sps:$4 sm:$0xff]  }
 0x19e   : > { %5989 = vmatpush1.bf16.msra.mxu1 %v8473_v38  ;;  %v8562_v38 = vld [vmem:[%s9429_s8 + $0xda4] ss:$72 sps:$4 sm:$0xff]  }
 0x19f   : > { %6071 = vmatpush1.bf16.msra.mxu0 %v8476_v39  ;;  %5990 = vmatprep.subr.bf16.mxu1 %v8481_v40  ;;  %v8557_v39 = vld [vmem:[%s9429_s8 + $0x1698] ss:$72 sps:$4 sm:$0xff]  }
 0x1a0   : > { %6072 = vmatprep.subr.bf16.mxu0 %v8484_v41  ;;  %v8560_v40 = vld [vmem:[%s9429_s8 + $0xda0] ss:$72 sps:$4 sm:$0xff]   ;;  %v8565_v41 = vld [vmem:[%s9429_s8 + $0x172c] ss:$72 sps:$4 sm:$0xff]  }
 0x1a2   : > { %5991 = vmatpush1.bf16.msra.mxu1 %v8479_v42  ;;  %v8568_v42 = vld [vmem:[%s9429_s8 + $0xe34] ss:$72 sps:$4 sm:$0xff]  }
 0x1a3   : > { %6073 = vmatpush1.bf16.msra.mxu0 %v8482_v43  ;;  %5992 = vmatprep.subr.bf16.mxu1 %v8487_v44  ;;  %v8563_v43 = vld [vmem:[%s9429_s8 + $0x1728] ss:$72 sps:$4 sm:$0xff]  }
 0x1a4   : > { %6074 = vmatprep.subr.bf16.mxu0 %v8490_v45  ;;  %v8566_v44 = vld [vmem:[%s9429_s8 + $0xe30] ss:$72 sps:$4 sm:$0xff]   ;;  %v8571_v45 = vld [vmem:[%s9429_s8 + $0x17bc] ss:$72 sps:$4 sm:$0xff]  }
 0x1a6   : > { %5993 = vmatpush1.bf16.msra.mxu1 %v8485_v46  ;;  %v8574_v46 = vld [vmem:[%s9429_s8 + $0xec4] ss:$72 sps:$4 sm:$0xff]  }
 0x1a7   : > { %6075 = vmatpush1.bf16.msra.mxu0 %v8488_v49  ;;  %5994 = vmatprep.subr.bf16.mxu1 %v8493_v50  ;;  %v8569_v49 = vld [vmem:[%s9429_s8 + $0x17b8] ss:$72 sps:$4 sm:$0xff]  }
 0x1a8   : > { %6076 = vmatprep.subr.bf16.mxu0 %v8496_v52  ;;  %v8572_v50 = vld [vmem:[%s9429_s8 + $0xec0] ss:$72 sps:$4 sm:$0xff]   ;;  %v8577_v52 = vld [vmem:[%s9429_s8 + $0x184c] ss:$72 sps:$4 sm:$0xff]  }
 0x1aa   : > { %5995 = vmatpush1.bf16.msra.mxu1 %v8491_v53  ;;  %v8580_v53 = vld [vmem:[%s9429_s8 + $0xf54] ss:$72 sps:$4 sm:$0xff]  }
 0x1ab   : > { %6077 = vmatpush1.bf16.msra.mxu0 %v8494_v56  ;;  %5996 = vmatprep.subr.bf16.mxu1 %v8499_v58  ;;  %v8575_v56 = vld [vmem:[%s9429_s8 + $0x1848] ss:$72 sps:$4 sm:$0xff]  }
 0x1ac   : > { %6078 = vmatprep.subr.bf16.mxu0 %v8502_v59  ;;  %v8578_v58 = vld [vmem:[%s9429_s8 + $0xf50] ss:$72 sps:$4 sm:$0xff]   ;;  %v8583_v59 = vld [vmem:[%s9429_s8 + $0x18dc] ss:$72 sps:$4 sm:$0xff]  }
 0x1ae   : > { %5997 = vmatpush1.bf16.msra.mxu1 %v8497_v61  ;;  %v8586_v61 = vld [vmem:[%s9429_s8 + $0xfe4] ss:$72 sps:$4 sm:$0xff]  }
 0x1af   : > { %6079 = vmatpush1.bf16.msra.mxu0 %v8500_v62  ;;  %5998 = vmatprep.subr.bf16.mxu1 %v8505_v63  ;;  %v8581_v62 = vld [vmem:[%s9429_s8 + $0x18d8] ss:$72 sps:$4 sm:$0xff]  }
 0x1b0   : > { %6080 = vmatprep.subr.bf16.mxu0 %v8508_v0  ;;  %v8584_v63 = vld [vmem:[%s9429_s8 + $0xfe0] ss:$72 sps:$4 sm:$0xff]   ;;  %v8589_v0 = vld [vmem:[%s9429_s8 + $0x196c] ss:$72 sps:$4 sm:$0xff]  }
 0x1b2   : > { %5999 = vmatpush1.bf16.msra.mxu1 %v8503_v1  ;;  %v8592_v1 = vld [vmem:[%s9429_s8 + $0x1074] ss:$72 sps:$4 sm:$0xff]  }
 0x1b3   : > { %6081 = vmatpush1.bf16.msra.mxu0 %v8506_v2  ;;  %6009 = vmatprep.subr.bf16.mxu1 %v8511_v3  ;;  %v8587_v2 = vld [vmem:[%s9429_s8 + $0x1968] ss:$72 sps:$4 sm:$0xff]  }
 0x1b4   : > { %6091 = vmatprep.subr.bf16.mxu0 %v8514_v4  ;;  %v8590_v3 = vld [vmem:[%s9429_s8 + $0x1070] ss:$72 sps:$4 sm:$0xff]   ;;  %v8595_v4 = vld [vmem:[%s9429_s8 + $0x19fc] ss:$72 sps:$4 sm:$0xff]  }
 0x1b5   : > { %6001 = vmatmul.mubr.bf16.vlgmr.msra.gmra.mrb[8].mxu1 %v9515_v7 }
 0x1b6   : > { %6083 = vmatmul.mubr.bf16.vlgmr.msra.gmra.mrb[8].mxu0 %v9513_v6  ;;  %6010 = vmatpush1.bf16.msra.mxu1 %v8509_v5  ;;  %v8598_v5 = vld [vmem:[%s9429_s8 + $0x1104] ss:$72 sps:$4 sm:$0xff]  }
 0x1b7   : > { %6092 = vmatpush1.bf16.msra.mxu0 %v8512_v8  ;;  %6011 = vmatprep.subr.bf16.mxu1 %v8517_v9  ;;  %v8593_v8 = vld [vmem:[%s9429_s8 + $0x19f8] ss:$72 sps:$4 sm:$0xff]  }
 0x1b8   : > { %6093 = vmatprep.subr.bf16.mxu0 %v8520_v10  ;;  %6041 = vmatprep.mubr.bf16.mxu1 %v9552_v34  ;;  %v8596_v9 = vld [vmem:[%s9429_s8 + $0x1100] ss:$72 sps:$4 sm:$0xff]   ;;  %v8601_v10 = vld [vmem:[%s9429_s8 + $0x1a8c] ss:$72 sps:$4 sm:$0xff]  }
 0x1b9   : > { %6123 = vmatprep.mubr.bf16.mxu0 %v9491_v51 }
 0x1ba   : > { %6012 = vmatpush1.bf16.msra.mxu1 %v8515_v11  ;;  %v8604_v11 = vld [vmem:[%s9429_s8 + $0x1194] ss:$72 sps:$4 sm:$0xff]  }
 0x1bb   : > { %6094 = vmatpush1.bf16.msra.mxu0 %v8518_v12  ;;  %6013 = vmatprep.subr.bf16.mxu1 %v8523_v13  ;;  %v8599_v12 = vld [vmem:[%s9429_s8 + $0x1a88] ss:$72 sps:$4 sm:$0xff]  }
 0x1bc   : > { %6095 = vmatprep.subr.bf16.mxu0 %v8526_v15  ;;  %v8602_v13 = vld [vmem:[%s9429_s8 + $0x1190] ss:$72 sps:$4 sm:$0xff]   ;;  %v8607_v15 = vld [vmem:[%s9429_s8 + $0x1224] ss:$72 sps:$4 sm:$0xff]  }
 0x1be   : > { %6014 = vmatpush1.bf16.msra.mxu1 %v8521_v16  ;;  %v8610_v16 = vld [vmem:[%s9429_s8 + $0x2c] ss:$72 sps:$4 sm:$0xff]  }
 0x1bf   : > { %6096 = vmatpush1.bf16.msra.mxu0 %v8524_v17  ;;  %6015 = vmatprep.subr.bf16.mxu1 %v8529_v18  ;;  %v8605_v17 = vld [vmem:[%s9429_s8 + $0x1220] ss:$72 sps:$4 sm:$0xff]  }
 0x1c0   : > { %6097 = vmatprep.subr.bf16.mxu0 %v8532_v19  ;;  %v8608_v18 = vld [vmem:[%s9429_s8 + $0x28] ss:$72 sps:$4 sm:$0xff]   ;;  %v8613_v19 = vld [vmem:[%s9429_s8 + $0x12b4] ss:$72 sps:$4 sm:$0xff]  }
 0x1c2   : > { %6016 = vmatpush1.bf16.msra.mxu1 %v8527_v54  ;;  %v8616_v54 = vld [vmem:[%s9429_s8 + $0xbc] ss:$72 sps:$4 sm:$0xff]  }
 0x1c3   : > { %6098 = vmatpush1.bf16.msra.mxu0 %v8530_v55  ;;  %6017 = vmatprep.subr.bf16.mxu1 %v8535_v20  ;;  %v8611_v55 = vld [vmem:[%s9429_s8 + $0x12b0] ss:$72 sps:$4 sm:$0xff]  }
 0x1c4   : > { %6099 = vmatprep.subr.bf16.mxu0 %v8538_v21  ;;  %v8614_v20 = vld [vmem:[%s9429_s8 + $0xb8] ss:$72 sps:$4 sm:$0xff]   ;;  %v8619_v21 = vld [vmem:[%s9429_s8 + $0x1344] ss:$72 sps:$4 sm:$0xff]  }
 0x1c6   : > { %6018 = vmatpush1.bf16.msra.mxu1 %v8533_v22  ;;  %v8622_v22 = vld [vmem:[%s9429_s8 + $0x14c] ss:$72 sps:$4 sm:$0xff]  }
 0x1c7   : > { %6100 = vmatpush1.bf16.msra.mxu0 %v8536_v23  ;;  %6019 = vmatprep.subr.bf16.mxu1 %v8541_v24  ;;  %v8617_v23 = vld [vmem:[%s9429_s8 + $0x1340] ss:$72 sps:$4 sm:$0xff]  }
 0x1c8   : > { %6101 = vmatprep.subr.bf16.mxu0 %v8544_v25  ;;  %v8620_v24 = vld [vmem:[%s9429_s8 + $0x148] ss:$72 sps:$4 sm:$0xff]   ;;  %v8625_v25 = vld [vmem:[%s9429_s8 + $0x13d4] ss:$72 sps:$4 sm:$0xff]  }
 0x1ca   : > { %6020 = vmatpush1.bf16.msra.mxu1 %v8539_v26  ;;  %v8628_v26 = vld [vmem:[%s9429_s8 + $0x1dc] ss:$72 sps:$4 sm:$0xff]  }
 0x1cb   : > { %6102 = vmatpush1.bf16.msra.mxu0 %v8542_v27  ;;  %6021 = vmatprep.subr.bf16.mxu1 %v8547_v28  ;;  %v8623_v27 = vld [vmem:[%s9429_s8 + $0x13d0] ss:$72 sps:$4 sm:$0xff]  }
 0x1cc   : > { %6103 = vmatprep.subr.bf16.mxu0 %v8550_v29  ;;  %v8626_v28 = vld [vmem:[%s9429_s8 + $0x1d8] ss:$72 sps:$4 sm:$0xff]   ;;  %v8631_v29 = vld [vmem:[%s9429_s8 + $0x1464] ss:$72 sps:$4 sm:$0xff]  }
 0x1ce   : > { %6022 = vmatpush1.bf16.msra.mxu1 %v8545_v30  ;;  %v8634_v30 = vld [vmem:[%s9429_s8 + $0x26c] ss:$72 sps:$4 sm:$0xff]  }
 0x1cf   : > { %6104 = vmatpush1.bf16.msra.mxu0 %v8548_v31  ;;  %6023 = vmatprep.subr.bf16.mxu1 %v8553_v32  ;;  %v1137_v31 = vsub.s32 2, %v9821_v48  ;;  %v8629_v32 = vld [vmem:[%s9429_s8 + $0x1460] ss:$72 sps:$4 sm:$0xff]  }
 0x1d0   : > { %6105 = vmatprep.subr.bf16.mxu0 %v8556_v33  ;;  %v8632_v33 = vld [vmem:[%s9429_s8 + $0x268] ss:$72 sps:$4 sm:$0xff]  }
 0x1d2   : > { %6024 = vmatpush1.bf16.msra.mxu1 %v8551_v35  ;;  %v1141_v35 = vsub.s32 3, %v9821_v48 }
 0x1d3   : > { %6106 = vmatpush1.bf16.msra.mxu0 %v8554_v36  ;;  %6025 = vmatprep.subr.bf16.mxu1 %v8559_v37  ;;  %v8637_v36 = vld [vmem:[%s9429_s8 + $0x14f4] ss:$72 sps:$4 sm:$0xff]  }
 0x1d4   : > { %6107 = vmatprep.subr.bf16.mxu0 %v8562_v38  ;;  %v8640_v37 = vld [vmem:[%s9429_s8 + $0x2fc] ss:$72 sps:$4 sm:$0xff]  }
 0x1d5   : > { %v9998_v38 = vld [vmem:[%s9831_s12] sm:$0xff] }
 0x1d6   : > { %6026 = vmatpush1.bf16.msra.mxu1 %v8557_v39  ;;  %v1138_v39 = vrot.slane %v9998_v38, %v1137_v31 }
 0x1d7   : > { %6108 = vmatpush1.bf16.msra.mxu0 %v8560_v40  ;;  %6027 = vmatprep.subr.bf16.mxu1 %v8565_v41  ;;  %v1142_v40 = vrot.slane %v9998_v38, %v1141_v35  ;;  %v8635_v41 = vld [vmem:[%s9429_s8 + $0x14f0] ss:$72 sps:$4 sm:$0xff]  }
 0x1d8   : > { %6109 = vmatprep.subr.bf16.mxu0 %v8568_v42  ;;  %v8638_v42 = vld [vmem:[%s9429_s8 + $0x2f8] ss:$72 sps:$4 sm:$0xff]  }
 0x1da   : > { %6028 = vmatpush1.bf16.msra.mxu1 %v8563_v43  ;;  %v8643_v43 = vld [vmem:[%s9429_s8 + $0x1584] ss:$72 sps:$4 sm:$0xff]  }
 0x1db   : > { %6110 = vmatpush1.bf16.msra.mxu0 %v8566_v44  ;;  %6029 = vmatprep.subr.bf16.mxu1 %v8571_v45  ;;  %v8646_v44 = vld [vmem:[%s9429_s8 + $0x38c] ss:$72 sps:$4 sm:$0xff]  }
 0x1dc   : > { %6111 = vmatprep.subr.bf16.mxu0 %v8574_v46 }
 0x1de   : > { %6030 = vmatpush1.bf16.msra.mxu1 %v8569_v49 }
 0x1df   : > { %6112 = vmatpush1.bf16.msra.mxu0 %v8572_v50  ;;  %6031 = vmatprep.subr.bf16.mxu1 %v8577_v52 }
 0x1e0   : > { %6113 = vmatprep.subr.bf16.mxu0 %v8580_v53  ;;  %v8641_v53 = vld [vmem:[%s9429_s8 + $0x1580] ss:$72 sps:$4 sm:$0xff]  }
 0x1e2   : > { %6032 = vmatpush1.bf16.msra.mxu1 %v8575_v56  ;;  %v8644_v56 = vld [vmem:[%s9429_s8 + $0x388] ss:$72 sps:$4 sm:$0xff]  }
 0x1e3   : > { %6114 = vmatpush1.bf16.msra.mxu0 %v8578_v58  ;;  %6033 = vmatprep.subr.bf16.mxu1 %v8583_v59 }
 0x1e4   : > { %6115 = vmatprep.subr.bf16.mxu0 %v8586_v61  ;;  %v8649_v61 = vld [vmem:[%s9429_s8 + $0x1614] ss:$72 sps:$4 sm:$0xff]  }
 0x1e6   : > { %6034 = vmatpush1.bf16.msra.mxu1 %v8581_v62  ;;  %v8652_v62 = vld [vmem:[%s9429_s8 + $0x41c] ss:$72 sps:$4 sm:$0xff]  }
 0x1e7   : > { %6116 = vmatpush1.bf16.msra.mxu0 %v8584_v63  ;;  %6035 = vmatprep.subr.bf16.mxu1 %v8589_v0 }
 0x1e8   : > { %6117 = vmatprep.subr.bf16.mxu0 %v8592_v1  ;;  %v8647_v1 = vld [vmem:[%s9429_s8 + $0x1610] ss:$72 sps:$4 sm:$0xff]  }
 0x1ea   : > { %6036 = vmatpush1.bf16.msra.mxu1 %v8587_v2  ;;  %v8650_v2 = vld [vmem:[%s9429_s8 + $0x418] ss:$72 sps:$4 sm:$0xff]  }
 0x1eb   : > { %6118 = vmatpush1.bf16.msra.mxu0 %v8590_v3  ;;  %6037 = vmatprep.subr.bf16.mxu1 %v8595_v4  ;;  %v8655_v3 = vld [vmem:[%s9429_s8 + $0x16a4] ss:$72 sps:$4 sm:$0xff]  }
 0x1ec   : > { %6119 = vmatprep.subr.bf16.mxu0 %v8598_v5  ;;  %v8658_v4 = vld [vmem:[%s9429_s8 + $0x4ac] ss:$72 sps:$4 sm:$0xff]   ;;  %v8653_v5 = vld [vmem:[%s9429_s8 + $0x16a0] ss:$72 sps:$4 sm:$0xff]  }
 0x1ee   : > { %6038 = vmatpush1.bf16.msra.mxu1 %v8593_v8  ;;  %v8656_v8 = vld [vmem:[%s9429_s8 + $0x4a8] ss:$72 sps:$4 sm:$0xff]  }
 0x1ef   : > { %6120 = vmatpush1.bf16.msra.mxu0 %v8596_v9  ;;  %6039 = vmatprep.subr.bf16.mxu1 %v8601_v10  ;;  %v8661_v9 = vld [vmem:[%s9429_s8 + $0x1734] ss:$72 sps:$4 sm:$0xff]  }
 0x1f0   : > { %6121 = vmatprep.subr.bf16.mxu0 %v8604_v11  ;;  %v8664_v10 = vld [vmem:[%s9429_s8 + $0x53c] ss:$72 sps:$4 sm:$0xff]   ;;  %v8659_v11 = vld [vmem:[%s9429_s8 + $0x1730] ss:$72 sps:$4 sm:$0xff]  }
 0x1f2   : > { %6040 = vmatpush1.bf16.msra.mxu1 %v8599_v12  ;;  %v8662_v12 = vld [vmem:[%s9429_s8 + $0x538] ss:$72 sps:$4 sm:$0xff]  }
 0x1f3   : > { %6122 = vmatpush1.bf16.msra.mxu0 %v8602_v13  ;;  %6173 = vmatprep.subr.bf16.mxu1 %v8610_v16  ;;  %v8667_v13 = vld [vmem:[%s9429_s8 + $0x17c4] ss:$72 sps:$4 sm:$0xff]   ;;  %v8665_v16 = vld [vmem:[%s9429_s8 + $0x17c0] ss:$72 sps:$4 sm:$0xff]  }
 0x1f4   : > { %6132 = vmatprep.subr.bf16.mxu0 %v8607_v15  ;;  %v8670_v15 = vld [vmem:[%s9429_s8 + $0x5cc] ss:$72 sps:$4 sm:$0xff]  }
 0x1f5   : > { %6042 = vmatmul.mubr.bf16.vlgmr.msra.gmra.mrb[8].mxu1 %v9596_v14 }
 0x1f6   : > { %6124 = vmatmul.mubr.bf16.vlgmr.msra.gmra.mrb[8].mxu0 %v9515_v7  ;;  %6174 = vmatpush1.bf16.msra.mxu1 %v8608_v18  ;;  %v8673_v18 = vld [vmem:[%s9429_s8 + $0x1854] ss:$72 sps:$4 sm:$0xff]  }
 0x1f7   : > { %6133 = vmatpush1.bf16.msra.mxu0 %v8605_v17  ;;  %6175 = vmatprep.subr.bf16.mxu1 %v8616_v54  ;;  %v8668_v17 = vld [vmem:[%s9429_s8 + $0x5c8] ss:$72 sps:$4 sm:$0xff]  }
 0x1f8   : > { %6134 = vmatprep.subr.bf16.mxu0 %v8613_v19  ;;  %6164 = vmatprep.mubr.bf16.mxu0 %v9552_v34  ;;  %v8676_v19 = vld [vmem:[%s9429_s8 + $0x65c] ss:$72 sps:$4 sm:$0xff]   ;;  %v8671_v54 = vld [vmem:[%s9429_s8 + $0x1850] ss:$72 sps:$4 sm:$0xff]  }
 0x1f9   : > { %6205 = vmatprep.mubr.bf16.mxu1 %v9484_v47 }
 0x1fa   : > { %6176 = vmatpush1.bf16.msra.mxu1 %v8614_v20  ;;  %v8679_v20 = vld [vmem:[%s9429_s8 + $0x18e4] ss:$72 sps:$4 sm:$0xff]  }
 0x1fb   : > { %6135 = vmatpush1.bf16.msra.mxu0 %v8611_v55  ;;  %6177 = vmatprep.subr.bf16.mxu1 %v8622_v22  ;;  %v8674_v55 = vld [vmem:[%s9429_s8 + $0x658] ss:$72 sps:$4 sm:$0xff]  }
 0x1fc   : > { %6136 = vmatprep.subr.bf16.mxu0 %v8619_v21  ;;  %v8682_v21 = vld [vmem:[%s9429_s8 + $0x6ec] ss:$72 sps:$4 sm:$0xff]   ;;  %v8677_v22 = vld [vmem:[%s9429_s8 + $0x18e0] ss:$72 sps:$4 sm:$0xff]  }
 0x1fe   : > { %6178 = vmatpush1.bf16.msra.mxu1 %v8620_v24  ;;  %v8685_v24 = vld [vmem:[%s9429_s8 + $0x1974] ss:$72 sps:$4 sm:$0xff]  }
 0x1ff   : > { %6137 = vmatpush1.bf16.msra.mxu0 %v8617_v23  ;;  %6179 = vmatprep.subr.bf16.mxu1 %v8628_v26  ;;  %v8680_v23 = vld [vmem:[%s9429_s8 + $0x6e8] ss:$72 sps:$4 sm:$0xff]  }
 0x200   : > { %6138 = vmatprep.subr.bf16.mxu0 %v8625_v25  ;;  %v8688_v25 = vld [vmem:[%s9429_s8 + $0x77c] ss:$72 sps:$4 sm:$0xff]   ;;  %v8683_v26 = vld [vmem:[%s9429_s8 + $0x1970] ss:$72 sps:$4 sm:$0xff]  }
 0x202   : > { %6180 = vmatpush1.bf16.msra.mxu1 %v8626_v28  ;;  %v8691_v28 = vld [vmem:[%s9429_s8 + $0x1a04] ss:$72 sps:$4 sm:$0xff]  }
 0x203   : > { %6139 = vmatpush1.bf16.msra.mxu0 %v8623_v27  ;;  %6181 = vmatprep.subr.bf16.mxu1 %v8634_v30  ;;  %v8686_v27 = vld [vmem:[%s9429_s8 + $0x778] ss:$72 sps:$4 sm:$0xff]  }
 0x204   : > { %6140 = vmatprep.subr.bf16.mxu0 %v8631_v29  ;;  %v8694_v29 = vld [vmem:[%s9429_s8 + $0x80c] ss:$72 sps:$4 sm:$0xff]   ;;  %v8689_v30 = vld [vmem:[%s9429_s8 + $0x1a00] ss:$72 sps:$4 sm:$0xff]  }
 0x206   : > { %6182 = vmatpush1.bf16.msra.mxu1 %v8632_v33  ;;  %v8697_v33 = vld [vmem:[%s9429_s8 + $0x1a94] ss:$72 sps:$4 sm:$0xff]  }
 0x207   : > { %6141 = vmatpush1.bf16.msra.mxu0 %v8629_v32  ;;  %6183 = vmatprep.subr.bf16.mxu1 %v8640_v37  ;;  %v8692_v32 = vld [vmem:[%s9429_s8 + $0x808] ss:$72 sps:$4 sm:$0xff]  }
 0x208   : > { %6142 = vmatprep.subr.bf16.mxu0 %v8637_v36  ;;  %v5797_v45 = vpop.f32.mrb[4].mxu1  ;;  %v8700_v36 = vld [vmem:[%s9429_s8 + $0x89c] ss:$72 sps:$4 sm:$0xff]   ;;  %v8695_v37 = vld [vmem:[%s9429_s8 + $0x1a90] ss:$72 sps:$4 sm:$0xff]  }
 0x209   : > { %v7783_v46 = vadd.f32 %v5797_v45, %v1138_v39  ;;  %v5799_v49 = vpop.f32.mrb[5].mxu1  ;;  %v8698_v39 = vld [vmem:[%s9429_s8 + $0x898] ss:$72 sps:$4 sm:$0xff]   ;;  %v8712_v45 = vld [vmem:[%s9429_s8 + $0xc4] ss:$72 sps:$4 sm:$0xff]  }
 0x20a   : > { %v7784_v50 = vadd.f32 %v5799_v49, %v1142_v40  ;;  %v5801_v52 = vpop.f32.mrb[6].mxu1  ;;  %6184 = vmatpush1.bf16.msra.mxu1 %v8638_v42  ;;  %v8703_v40 = vld [vmem:[%s9429_s8 + $0x92c] ss:$72 sps:$4 sm:$0xff]   ;;  %v8701_v42 = vld [vmem:[%s9429_s8 + $0x928] ss:$72 sps:$4 sm:$0xff]  }
 0x20b   : > { %6143 = vmatpush1.bf16.msra.mxu0 %v8635_v41  ;;  %v6667_v58 = vmax.f32 %v7783_v46, 0.0  ;;  %v5802_v59 = vpop.f32.mrb[7].mxu1  ;;  %6185 = vmatprep.subr.bf16.mxu1 %v8646_v44  ;;  %v8706_v41 = vld [vmem:[%s9429_s8 + $0x34] ss:$72 sps:$4 sm:$0xff]   ;;  %v8707_v46 = vld [vmem:[%s9429_s8 + $0x9b8] ss:$72 sps:$4 sm:$0xff]  }
 0x20c   : > { %6144 = vmatprep.subr.bf16.mxu0 %v8643_v43  ;;  %v6668_v63 = vmax.f32 %v7784_v50, 0.0  ;;  %v8704_v43 = vld [vmem:[%s9429_s8 + $0x30] ss:$72 sps:$4 sm:$0xff]   ;;  %v8709_v44 = vld [vmem:[%s9429_s8 + $0x9bc] ss:$72 sps:$4 sm:$0xff]  }
 0x20d   : > { %v8710_v49 = vld [vmem:[%s9429_s8 + $0xc0] ss:$72 sps:$4 sm:$0xff]   ;;  %v8715_v50 = vld [vmem:[%s9429_s8 + $0xa4c] ss:$72 sps:$4 sm:$0xff]  }
 0x20e   : > { %v7771_v0 = vpack.c.bf16 %v6668_v63, %v6667_v58  ;;  %6186 = vmatpush1.bf16.msra.mxu1 %v8644_v56  ;;  %v8718_v52 = vld [vmem:[%s9429_s8 + $0x154] ss:$72 sps:$4 sm:$0xff]   ;;  %v8716_v56 = vld [vmem:[%s9429_s8 + $0x150] ss:$72 sps:$4 sm:$0xff]   ;;  %v8724_v59 = vld [vmem:[%s9429_s8 + $0x1e4] ss:$72 sps:$4 sm:$0xff]  }
 0x20f   : > { %6145 = vmatpush1.bf16.msra.mxu0 %v8641_v53  ;;  %6187 = vmatprep.subr.bf16.mxu1 %v8652_v62  ;;  %v8713_v53 = vld [vmem:[%s9429_s8 + $0xa48] ss:$72 sps:$4 sm:$0xff]   ;;  %v8721_v58 = vld [vmem:[%s9429_s8 + $0xadc] ss:$72 sps:$4 sm:$0xff]   ;;  %v8727_v63 = vld [vmem:[%s9429_s8 + $0xb6c] ss:$72 sps:$4 sm:$0xff]  }
 0x210   : > { %6146 = vmatprep.subr.bf16.mxu0 %v8649_v61  ;;  %6756 = vst [vmem:[%s9866_s24 + $0x8] sm:$0xff] %v7771_v0  ;;  %v8719_v61 = vld [vmem:[%s9429_s8 + $0xad8] ss:$72 sps:$4 sm:$0xff]   ;;  %v8730_v0 = vld [vmem:[%s9429_s8 + $0x274] ss:$72 sps:$4 sm:$0xff]  }
 0x211   : > { %v8722_v62 = vld [vmem:[%s9429_s8 + $0x1e0] ss:$72 sps:$4 sm:$0xff]  }
 0x212   : > { %6188 = vmatpush1.bf16.msra.mxu1 %v8650_v2  ;;  %v8725_v2 = vld [vmem:[%s9429_s8 + $0xb68] ss:$72 sps:$4 sm:$0xff]  }
 0x213   : > { %6147 = vmatpush1.bf16.msra.mxu0 %v8647_v1  ;;  %6189 = vmatprep.subr.bf16.mxu1 %v8658_v4  ;;  %v1145_v1 = vsub.s32 4, %v9821_v48  ;;  %v1149_v4 = vsub.s32 5, %v9821_v48 }
 0x214   : > { %6148 = vmatprep.subr.bf16.mxu0 %v8655_v3  ;;  %v8728_v3 = vld [vmem:[%s9429_s8 + $0x270] ss:$72 sps:$4 sm:$0xff]  }
 0x216   : > { %6190 = vmatpush1.bf16.msra.mxu1 %v8656_v8  ;;  %v8736_v8 = vld [vmem:[%s9429_s8 + $0x304] ss:$72 sps:$4 sm:$0xff]  }
 0x217   : > { %6149 = vmatpush1.bf16.msra.mxu0 %v8653_v5  ;;  %6191 = vmatprep.subr.bf16.mxu1 %v8664_v10  ;;  %v8733_v5 = vld [vmem:[%s9429_s8 + $0xbfc] ss:$72 sps:$4 sm:$0xff]   ;;  %v1150_v10 = vrot.slane %v9998_v38, %v1149_v4 }
 0x218   : > { %6150 = vmatprep.subr.bf16.mxu0 %v8661_v9  ;;  %v1146_v9 = vrot.slane %v9998_v38, %v1145_v1 }
 0x21a   : > { %6192 = vmatpush1.bf16.msra.mxu1 %v8662_v12  ;;  %v8734_v12 = vld [vmem:[%s9429_s8 + $0x300] ss:$72 sps:$4 sm:$0xff]  }
 0x21b   : > { %6151 = vmatpush1.bf16.msra.mxu0 %v8659_v11  ;;  %6193 = vmatprep.subr.bf16.mxu1 %v8670_v15  ;;  %v8731_v11 = vld [vmem:[%s9429_s8 + $0xbf8] ss:$72 sps:$4 sm:$0xff]   ;;  %v8742_v15 = vld [vmem:[%s9429_s8 + $0x394] ss:$72 sps:$4 sm:$0xff]  }
 0x21c   : > { %6152 = vmatprep.subr.bf16.mxu0 %v8667_v13  ;;  %v8739_v13 = vld [vmem:[%s9429_s8 + $0xc8c] ss:$72 sps:$4 sm:$0xff]  }
 0x21e   : > { %6194 = vmatpush1.bf16.msra.mxu1 %v8668_v17 }
 0x21f   : > { %6153 = vmatpush1.bf16.msra.mxu0 %v8665_v16  ;;  %6195 = vmatprep.subr.bf16.mxu1 %v8676_v19 }
 0x220   : > { %6154 = vmatprep.subr.bf16.mxu0 %v8673_v18 }
 0x222   : > { %6196 = vmatpush1.bf16.msra.mxu1 %v8674_v55  ;;  %v8737_v55 = vld [vmem:[%s9429_s8 + $0xc88] ss:$72 sps:$4 sm:$0xff]  }
 0x223   : > { %6155 = vmatpush1.bf16.msra.mxu0 %v8671_v54  ;;  %6197 = vmatprep.subr.bf16.mxu1 %v8682_v21 }
 0x224   : > { %6156 = vmatprep.subr.bf16.mxu0 %v8679_v20  ;;  %v8740_v20 = vld [vmem:[%s9429_s8 + $0x390] ss:$72 sps:$4 sm:$0xff]  }
 0x226   : > { %6198 = vmatpush1.bf16.msra.mxu1 %v8680_v23  ;;  %v8745_v23 = vld [vmem:[%s9429_s8 + $0xd1c] ss:$72 sps:$4 sm:$0xff]  }
 0x227   : > { %6157 = vmatpush1.bf16.msra.mxu0 %v8677_v22  ;;  %6199 = vmatprep.subr.bf16.mxu1 %v8688_v25 }
 0x228   : > { %6158 = vmatprep.subr.bf16.mxu0 %v8685_v24  ;;  %v8748_v24 = vld [vmem:[%s9429_s8 + $0x424] ss:$72 sps:$4 sm:$0xff]  }
 0x22a   : > { %6200 = vmatpush1.bf16.msra.mxu1 %v8686_v27  ;;  %v8743_v27 = vld [vmem:[%s9429_s8 + $0xd18] ss:$72 sps:$4 sm:$0xff]  }
 0x22b   : > { %6159 = vmatpush1.bf16.msra.mxu0 %v8683_v26  ;;  %6201 = vmatprep.subr.bf16.mxu1 %v8694_v29  ;;  %v8751_v29 = vld [vmem:[%s9429_s8 + $0xdac] ss:$72 sps:$4 sm:$0xff]  }
 0x22c   : > { %6160 = vmatprep.subr.bf16.mxu0 %v8691_v28  ;;  %v8746_v28 = vld [vmem:[%s9429_s8 + $0x420] ss:$72 sps:$4 sm:$0xff]  }
 0x22e   : > { %6202 = vmatpush1.bf16.msra.mxu1 %v8692_v32  ;;  %v8749_v32 = vld [vmem:[%s9429_s8 + $0xda8] ss:$72 sps:$4 sm:$0xff]  }
 0x22f   : > { %6161 = vmatpush1.bf16.msra.mxu0 %v8689_v30  ;;  %6203 = vmatprep.subr.bf16.mxu1 %v8700_v36  ;;  %v8754_v30 = vld [vmem:[%s9429_s8 + $0x4b4] ss:$72 sps:$4 sm:$0xff]  }
 0x230   : > { %6162 = vmatprep.subr.bf16.mxu0 %v8697_v33  ;;  %v8752_v33 = vld [vmem:[%s9429_s8 + $0x4b0] ss:$72 sps:$4 sm:$0xff]   ;;  %v8757_v36 = vld [vmem:[%s9429_s8 + $0xe3c] ss:$72 sps:$4 sm:$0xff]  }
 0x232   : > { %6204 = vmatpush1.bf16.msra.mxu1 %v8698_v39  ;;  %v8755_v39 = vld [vmem:[%s9429_s8 + $0xe38] ss:$72 sps:$4 sm:$0xff]  }
 0x233   : > { %6163 = vmatpush1.bf16.msra.mxu0 %v8695_v37  ;;  %6214 = vmatprep.subr.bf16.mxu1 %v8703_v40  ;;  %v8760_v37 = vld [vmem:[%s9429_s8 + $0x544] ss:$72 sps:$4 sm:$0xff]   ;;  %v8758_v40 = vld [vmem:[%s9429_s8 + $0x540] ss:$72 sps:$4 sm:$0xff]  }
 0x234   : > { %6296 = vmatprep.subr.bf16.mxu0 %v8706_v41  ;;  %v8763_v41 = vld [vmem:[%s9429_s8 + $0xecc] ss:$72 sps:$4 sm:$0xff]  }
 0x235   : > { %6206 = vmatmul.mubr.bf16.vlgmr.msra.gmra.mrb[12].mxu1 %v9513_v6 }
 0x236   : > { %6165 = vmatmul.mubr.bf16.vlgmr.msra.gmra.mrb[8].mxu0 %v9596_v14  ;;  %6215 = vmatpush1.bf16.msra.mxu1 %v8701_v42  ;;  %v8766_v42 = vld [vmem:[%s9429_s8 + $0x5d4] ss:$72 sps:$4 sm:$0xff]  }
 0x237   : > { %6297 = vmatpush1.bf16.msra.mxu0 %v8704_v43  ;;  %6216 = vmatprep.subr.bf16.mxu1 %v8709_v44  ;;  %v8761_v43 = vld [vmem:[%s9429_s8 + $0xec8] ss:$72 sps:$4 sm:$0xff]  }
 0x238   : > { %6298 = vmatprep.subr.bf16.mxu0 %v8712_v45  ;;  %6246 = vmatprep.mubr.bf16.mxu1 %v9491_v51  ;;  %v8764_v44 = vld [vmem:[%s9429_s8 + $0x5d0] ss:$72 sps:$4 sm:$0xff]   ;;  %v8769_v45 = vld [vmem:[%s9429_s8 + $0xf5c] ss:$72 sps:$4 sm:$0xff]  }
 0x239   : > { %6328 = vmatprep.mubr.bf16.mxu0 %v9484_v47 }
 0x23a   : > { %6217 = vmatpush1.bf16.msra.mxu1 %v8707_v46  ;;  %v8772_v46 = vld [vmem:[%s9429_s8 + $0x664] ss:$72 sps:$4 sm:$0xff]  }
 0x23b   : > { %6299 = vmatpush1.bf16.msra.mxu0 %v8710_v49  ;;  %6218 = vmatprep.subr.bf16.mxu1 %v8715_v50  ;;  %v8767_v49 = vld [vmem:[%s9429_s8 + $0xf58] ss:$72 sps:$4 sm:$0xff]  }
 0x23c   : > { %6300 = vmatprep.subr.bf16.mxu0 %v8718_v52  ;;  %v8770_v50 = vld [vmem:[%s9429_s8 + $0x660] ss:$72 sps:$4 sm:$0xff]   ;;  %v8775_v52 = vld [vmem:[%s9429_s8 + $0xfec] ss:$72 sps:$4 sm:$0xff]  }
 0x23e   : > { %6219 = vmatpush1.bf16.msra.mxu1 %v8713_v53  ;;  %v8778_v53 = vld [vmem:[%s9429_s8 + $0x6f4] ss:$72 sps:$4 sm:$0xff]  }
 0x23f   : > { %6301 = vmatpush1.bf16.msra.mxu0 %v8716_v56  ;;  %6220 = vmatprep.subr.bf16.mxu1 %v8721_v58  ;;  %v8773_v56 = vld [vmem:[%s9429_s8 + $0xfe8] ss:$72 sps:$4 sm:$0xff]  }
 0x240   : > { %6302 = vmatprep.subr.bf16.mxu0 %v8724_v59  ;;  %v8776_v58 = vld [vmem:[%s9429_s8 + $0x6f0] ss:$72 sps:$4 sm:$0xff]   ;;  %v8781_v59 = vld [vmem:[%s9429_s8 + $0x107c] ss:$72 sps:$4 sm:$0xff]  }
 0x242   : > { %6221 = vmatpush1.bf16.msra.mxu1 %v8719_v61  ;;  %v8784_v61 = vld [vmem:[%s9429_s8 + $0x784] ss:$72 sps:$4 sm:$0xff]  }
 0x243   : > { %6303 = vmatpush1.bf16.msra.mxu0 %v8722_v62  ;;  %6222 = vmatprep.subr.bf16.mxu1 %v8727_v63  ;;  %v8779_v62 = vld [vmem:[%s9429_s8 + $0x1078] ss:$72 sps:$4 sm:$0xff]  }
 0x244   : > { %6304 = vmatprep.subr.bf16.mxu0 %v8730_v0  ;;  %v8782_v63 = vld [vmem:[%s9429_s8 + $0x780] ss:$72 sps:$4 sm:$0xff]   ;;  %v8787_v0 = vld [vmem:[%s9429_s8 + $0x110c] ss:$72 sps:$4 sm:$0xff]  }
 0x246   : > { %6223 = vmatpush1.bf16.msra.mxu1 %v8725_v2  ;;  %v8790_v2 = vld [vmem:[%s9429_s8 + $0x814] ss:$72 sps:$4 sm:$0xff]  }
 0x247   : > { %6305 = vmatpush1.bf16.msra.mxu0 %v8728_v3  ;;  %6224 = vmatprep.subr.bf16.mxu1 %v8733_v5  ;;  %v8785_v3 = vld [vmem:[%s9429_s8 + $0x1108] ss:$72 sps:$4 sm:$0xff]  }
 0x248   : > { %6306 = vmatprep.subr.bf16.mxu0 %v8736_v8  ;;  %v8788_v5 = vld [vmem:[%s9429_s8 + $0x810] ss:$72 sps:$4 sm:$0xff]   ;;  %v8793_v8 = vld [vmem:[%s9429_s8 + $0x119c] ss:$72 sps:$4 sm:$0xff]  }
 0x249   : > { %v5920_v16 = vpop.f32.mrb[4].mxu0 }
 0x24a   : > { %v7785_v17 = vadd.f32 %v5920_v16, %v1146_v9  ;;  %v5922_v18 = vpop.f32.mrb[5].mxu0  ;;  %6225 = vmatpush1.bf16.msra.mxu1 %v8731_v11  ;;  %v8796_v9 = vld [vmem:[%s9429_s8 + $0x8a4] ss:$72 sps:$4 sm:$0xff]   ;;  %v8794_v11 = vld [vmem:[%s9429_s8 + $0x8a0] ss:$72 sps:$4 sm:$0xff]  }
 0x24b   : > { %v7786_v19 = vadd.f32 %v5922_v18, %v1150_v10  ;;  %v5924_v54 = vpop.f32.mrb[6].mxu0  ;;  %6307 = vmatpush1.bf16.msra.mxu0 %v8734_v12  ;;  %6226 = vmatprep.subr.bf16.mxu1 %v8739_v13  ;;  %v8791_v10 = vld [vmem:[%s9429_s8 + $0x1198] ss:$72 sps:$4 sm:$0xff]   ;;  %v8799_v12 = vld [vmem:[%s9429_s8 + $0x122c] ss:$72 sps:$4 sm:$0xff]  }
 0x24c   : > { %v6669_v21 = vmax.f32 %v7785_v17, 0.0  ;;  %v5925_v22 = vpop.f32.mrb[7].mxu0  ;;  %6308 = vmatprep.subr.bf16.mxu0 %v8742_v15  ;;  %v8802_v13 = vld [vmem:[%s9429_s8 + $0x934] ss:$72 sps:$4 sm:$0xff]   ;;  %v8797_v15 = vld [vmem:[%s9429_s8 + $0x1228] ss:$72 sps:$4 sm:$0xff]  }
 0x24d   : > { %v6670_v25 = vmax.f32 %v7786_v19, 0.0  ;;  %v8800_v16 = vld [vmem:[%s9429_s8 + $0x930] ss:$72 sps:$4 sm:$0xff]   ;;  %v8805_v17 = vld [vmem:[%s9429_s8 + $0x12bc] ss:$72 sps:$4 sm:$0xff]  }
 0x24e   : > { %6227 = vmatpush1.bf16.msra.mxu1 %v8737_v55  ;;  %v8808_v18 = vld [vmem:[%s9429_s8 + $0x9c4] ss:$72 sps:$4 sm:$0xff]   ;;  %v8803_v19 = vld [vmem:[%s9429_s8 + $0x12b8] ss:$72 sps:$4 sm:$0xff]  }
 0x24f   : > { %v7772_v26 = vpack.c.bf16 %v6670_v25, %v6669_v21  ;;  %6309 = vmatpush1.bf16.msra.mxu0 %v8740_v20  ;;  %6228 = vmatprep.subr.bf16.mxu1 %v8745_v23  ;;  %v8806_v54 = vld [vmem:[%s9429_s8 + $0x9c0] ss:$72 sps:$4 sm:$0xff]   ;;  %v8811_v55 = vld [vmem:[%s9429_s8 + $0x134c] ss:$72 sps:$4 sm:$0xff]   ;;  %v8812_v22 = vld [vmem:[%s9429_s8 + $0xa50] ss:$72 sps:$4 sm:$0xff]  }
 0x250   : > { %6310 = vmatprep.subr.bf16.mxu0 %v8748_v24  ;;  %v8814_v20 = vld [vmem:[%s9429_s8 + $0xa54] ss:$72 sps:$4 sm:$0xff]   ;;  %v8809_v21 = vld [vmem:[%s9429_s8 + $0x1348] ss:$72 sps:$4 sm:$0xff]   ;;  %v8820_v24 = vld [vmem:[%s9429_s8 + $0xae4] ss:$72 sps:$4 sm:$0xff]  }
 0x251   : > { %6757 = vst [vmem:[%s9866_s24 + $0x10] sm:$0xff] %v7772_v26  ;;  %v8817_v23 = vld [vmem:[%s9429_s8 + $0x13dc] ss:$72 sps:$4 sm:$0xff]   ;;  %v8815_v25 = vld [vmem:[%s9429_s8 + $0x13d8] ss:$72 sps:$4 sm:$0xff]  }
 0x252   : > { %6229 = vmatpush1.bf16.msra.mxu1 %v8743_v27  ;;  %v8818_v26 = vld [vmem:[%s9429_s8 + $0xae0] ss:$72 sps:$4 sm:$0xff]   ;;  %v8823_v27 = vld [vmem:[%s9429_s8 + $0x146c] ss:$72 sps:$4 sm:$0xff]  }
 0x253   : > { %6311 = vmatpush1.bf16.msra.mxu0 %v8746_v28  ;;  %6230 = vmatprep.subr.bf16.mxu1 %v8751_v29  ;;  %v8826_v28 = vld [vmem:[%s9429_s8 + $0xb74] ss:$72 sps:$4 sm:$0xff]   ;;  %v8821_v29 = vld [vmem:[%s9429_s8 + $0x1468] ss:$72 sps:$4 sm:$0xff]  }
 0x254   : > { %6312 = vmatprep.subr.bf16.mxu0 %v8754_v30  ;;  %v8824_v30 = vld [vmem:[%s9429_s8 + $0xb70] ss:$72 sps:$4 sm:$0xff]  }
 0x256   : > { %6231 = vmatpush1.bf16.msra.mxu1 %v8749_v32  ;;  %v8829_v32 = vld [vmem:[%s9429_s8 + $0x14fc] ss:$72 sps:$4 sm:$0xff]  }
 0x257   : > { %6313 = vmatpush1.bf16.msra.mxu0 %v8752_v33  ;;  %6232 = vmatprep.subr.bf16.mxu1 %v8757_v36  ;;  %v8832_v33 = vld [vmem:[%s9429_s8 + $0xc04] ss:$72 sps:$4 sm:$0xff]   ;;  %v8827_v36 = vld [vmem:[%s9429_s8 + $0x14f8] ss:$72 sps:$4 sm:$0xff]  }
 0x258   : > { %6314 = vmatprep.subr.bf16.mxu0 %v8760_v37  ;;  %v8830_v37 = vld [vmem:[%s9429_s8 + $0xc00] ss:$72 sps:$4 sm:$0xff]  }
 0x25a   : > { %6233 = vmatpush1.bf16.msra.mxu1 %v8755_v39  ;;  %v8835_v39 = vld [vmem:[%s9429_s8 + $0x158c] ss:$72 sps:$4 sm:$0xff]  }
 0x25b   : > { %6315 = vmatpush1.bf16.msra.mxu0 %v8758_v40  ;;  %6234 = vmatprep.subr.bf16.mxu1 %v8763_v41  ;;  %v8838_v40 = vld [vmem:[%s9429_s8 + $0xc94] ss:$72 sps:$4 sm:$0xff]   ;;  %v8833_v41 = vld [vmem:[%s9429_s8 + $0x1588] ss:$72 sps:$4 sm:$0xff]  }
 0x25c   : > { %6316 = vmatprep.subr.bf16.mxu0 %v8766_v42  ;;  %v8836_v42 = vld [vmem:[%s9429_s8 + $0xc90] ss:$72 sps:$4 sm:$0xff]  }
 0x25e   : > { %6235 = vmatpush1.bf16.msra.mxu1 %v8761_v43  ;;  %v8841_v43 = vld [vmem:[%s9429_s8 + $0x161c] ss:$72 sps:$4 sm:$0xff]  }
 0x25f   : > { %6317 = vmatpush1.bf16.msra.mxu0 %v8764_v44  ;;  %6236 = vmatprep.subr.bf16.mxu1 %v8769_v45  ;;  %v8844_v44 = vld [vmem:[%s9429_s8 + $0xd24] ss:$72 sps:$4 sm:$0xff]   ;;  %v8839_v45 = vld [vmem:[%s9429_s8 + $0x1618] ss:$72 sps:$4 sm:$0xff]  }
 0x260   : > { %6318 = vmatprep.subr.bf16.mxu0 %v8772_v46  ;;  %v8842_v46 = vld [vmem:[%s9429_s8 + $0xd20] ss:$72 sps:$4 sm:$0xff]  }
 0x262   : > { %6237 = vmatpush1.bf16.msra.mxu1 %v8767_v49  ;;  %v8847_v49 = vld [vmem:[%s9429_s8 + $0x16ac] ss:$72 sps:$4 sm:$0xff]  }
 0x263   : > { %6319 = vmatpush1.bf16.msra.mxu0 %v8770_v50  ;;  %6238 = vmatprep.subr.bf16.mxu1 %v8775_v52  ;;  %v8850_v50 = vld [vmem:[%s9429_s8 + $0xdb4] ss:$72 sps:$4 sm:$0xff]   ;;  %v8845_v52 = vld [vmem:[%s9429_s8 + $0x16a8] ss:$72 sps:$4 sm:$0xff]  }
 0x264   : > { %6320 = vmatprep.subr.bf16.mxu0 %v8778_v53  ;;  %v8848_v53 = vld [vmem:[%s9429_s8 + $0xdb0] ss:$72 sps:$4 sm:$0xff]  }
 0x266   : > { %6239 = vmatpush1.bf16.msra.mxu1 %v8773_v56  ;;  %v8853_v56 = vld [vmem:[%s9429_s8 + $0x173c] ss:$72 sps:$4 sm:$0xff]  }
 0x267   : > { %6321 = vmatpush1.bf16.msra.mxu0 %v8776_v58  ;;  %6240 = vmatprep.subr.bf16.mxu1 %v8781_v59  ;;  %v8856_v58 = vld [vmem:[%s9429_s8 + $0xe44] ss:$72 sps:$4 sm:$0xff]   ;;  %v8851_v59 = vld [vmem:[%s9429_s8 + $0x1738] ss:$72 sps:$4 sm:$0xff]  }
 0x268   : > { %6322 = vmatprep.subr.bf16.mxu0 %v8784_v61  ;;  %v8854_v61 = vld [vmem:[%s9429_s8 + $0xe40] ss:$72 sps:$4 sm:$0xff]  }
 0x26a   : > { %6241 = vmatpush1.bf16.msra.mxu1 %v8779_v62  ;;  %v8859_v62 = vld [vmem:[%s9429_s8 + $0x17cc] ss:$72 sps:$4 sm:$0xff]  }
 0x26b   : > { %6323 = vmatpush1.bf16.msra.mxu0 %v8782_v63  ;;  %6242 = vmatprep.subr.bf16.mxu1 %v8787_v0  ;;  %v8862_v63 = vld [vmem:[%s9429_s8 + $0xed4] ss:$72 sps:$4 sm:$0xff]   ;;  %v8857_v0 = vld [vmem:[%s9429_s8 + $0x17c8] ss:$72 sps:$4 sm:$0xff]  }
 0x26c   : > { %6324 = vmatprep.subr.bf16.mxu0 %v8790_v2  ;;  %v8860_v2 = vld [vmem:[%s9429_s8 + $0xed0] ss:$72 sps:$4 sm:$0xff]  }
 0x26e   : > { %6243 = vmatpush1.bf16.msra.mxu1 %v8785_v3  ;;  %v8865_v3 = vld [vmem:[%s9429_s8 + $0x185c] ss:$72 sps:$4 sm:$0xff]  }
 0x26f   : > { %6325 = vmatpush1.bf16.msra.mxu0 %v8788_v5  ;;  %6244 = vmatprep.subr.bf16.mxu1 %v8793_v8  ;;  %v8868_v5 = vld [vmem:[%s9429_s8 + $0xf64] ss:$72 sps:$4 sm:$0xff]   ;;  %v8863_v8 = vld [vmem:[%s9429_s8 + $0x1858] ss:$72 sps:$4 sm:$0xff]  }
 0x270   : > { %6326 = vmatprep.subr.bf16.mxu0 %v8796_v9  ;;  %v8866_v9 = vld [vmem:[%s9429_s8 + $0xf60] ss:$72 sps:$4 sm:$0xff]  }
 0x272   : > { %6245 = vmatpush1.bf16.msra.mxu1 %v8791_v10  ;;  %v8871_v10 = vld [vmem:[%s9429_s8 + $0x18ec] ss:$72 sps:$4 sm:$0xff]  }
 0x273   : > { %6327 = vmatpush1.bf16.msra.mxu0 %v8794_v11  ;;  %6255 = vmatprep.subr.bf16.mxu1 %v8799_v12  ;;  %v8874_v11 = vld [vmem:[%s9429_s8 + $0xff4] ss:$72 sps:$4 sm:$0xff]   ;;  %v8869_v12 = vld [vmem:[%s9429_s8 + $0x18e8] ss:$72 sps:$4 sm:$0xff]  }
 0x274   : > { %6337 = vmatprep.subr.bf16.mxu0 %v8802_v13  ;;  %v8872_v13 = vld [vmem:[%s9429_s8 + $0xff0] ss:$72 sps:$4 sm:$0xff]  }
 0x275   : > { %6247 = vmatmul.mubr.bf16.vlgmr.msra.gmra.mrb[12].mxu1 %v9515_v7 }
 0x276   : > { %6329 = vmatmul.mubr.bf16.vlgmr.msra.gmra.mrb[12].mxu0 %v9513_v6  ;;  %6256 = vmatpush1.bf16.msra.mxu1 %v8797_v15  ;;  %v8877_v15 = vld [vmem:[%s9429_s8 + $0x197c] ss:$72 sps:$4 sm:$0xff]  }
 0x277   : > { %6338 = vmatpush1.bf16.msra.mxu0 %v8800_v16  ;;  %6257 = vmatprep.subr.bf16.mxu1 %v8805_v17  ;;  %v8880_v16 = vld [vmem:[%s9429_s8 + $0x1084] ss:$72 sps:$4 sm:$0xff]   ;;  %v8875_v17 = vld [vmem:[%s9429_s8 + $0x1978] ss:$72 sps:$4 sm:$0xff]  }
 0x278   : > { %6339 = vmatprep.subr.bf16.mxu0 %v8808_v18  ;;  %6287 = vmatprep.mubr.bf16.mxu1 %v9552_v34  ;;  %v8878_v18 = vld [vmem:[%s9429_s8 + $0x1080] ss:$72 sps:$4 sm:$0xff]  }
 0x279   : > { %6369 = vmatprep.mubr.bf16.mxu0 %v9491_v51 }
 0x27a   : > { %6258 = vmatpush1.bf16.msra.mxu1 %v8803_v19  ;;  %v8883_v19 = vld [vmem:[%s9429_s8 + $0x1a0c] ss:$72 sps:$4 sm:$0xff]  }
 0x27b   : > { %6340 = vmatpush1.bf16.msra.mxu0 %v8806_v54  ;;  %6259 = vmatprep.subr.bf16.mxu1 %v8811_v55  ;;  %v8886_v54 = vld [vmem:[%s9429_s8 + $0x1114] ss:$72 sps:$4 sm:$0xff]   ;;  %v8881_v55 = vld [vmem:[%s9429_s8 + $0x1a08] ss:$72 sps:$4 sm:$0xff]  }
 0x27c   : > { %6341 = vmatprep.subr.bf16.mxu0 %v8814_v20  ;;  %v8884_v20 = vld [vmem:[%s9429_s8 + $0x1110] ss:$72 sps:$4 sm:$0xff]  }
 0x27e   : > { %6260 = vmatpush1.bf16.msra.mxu1 %v8809_v21  ;;  %v8889_v21 = vld [vmem:[%s9429_s8 + $0x1a9c] ss:$72 sps:$4 sm:$0xff]  }
 0x27f   : > { %6342 = vmatpush1.bf16.msra.mxu0 %v8812_v22  ;;  %6261 = vmatprep.subr.bf16.mxu1 %v8817_v23  ;;  %v8892_v22 = vld [vmem:[%s9429_s8 + $0x11a4] ss:$72 sps:$4 sm:$0xff]   ;;  %v8887_v23 = vld [vmem:[%s9429_s8 + $0x1a98] ss:$72 sps:$4 sm:$0xff]  }
 0x280   : > { %6343 = vmatprep.subr.bf16.mxu0 %v8820_v24  ;;  %v8890_v24 = vld [vmem:[%s9429_s8 + $0x11a0] ss:$72 sps:$4 sm:$0xff]  }
 0x282   : > { %6262 = vmatpush1.bf16.msra.mxu1 %v8815_v25  ;;  %v8895_v25 = vld [vmem:[%s9429_s8 + $0x1234] ss:$72 sps:$4 sm:$0xff]  }
 0x283   : > { %6344 = vmatpush1.bf16.msra.mxu0 %v8818_v26  ;;  %6263 = vmatprep.subr.bf16.mxu1 %v8823_v27  ;;  %v8898_v26 = vld [vmem:[%s9429_s8 + $0x3c] ss:$72 sps:$4 sm:$0xff]   ;;  %v8893_v27 = vld [vmem:[%s9429_s8 + $0x1230] ss:$72 sps:$4 sm:$0xff]  }
 0x284   : > { %6345 = vmatprep.subr.bf16.mxu0 %v8826_v28  ;;  %v8896_v28 = vld [vmem:[%s9429_s8 + $0x38] ss:$72 sps:$4 sm:$0xff]  }
 0x286   : > { %6264 = vmatpush1.bf16.msra.mxu1 %v8821_v29  ;;  %v8901_v29 = vld [vmem:[%s9429_s8 + $0x12c4] ss:$72 sps:$4 sm:$0xff]  }
 0x287   : > { %6346 = vmatpush1.bf16.msra.mxu0 %v8824_v30  ;;  %6265 = vmatprep.subr.bf16.mxu1 %v8829_v32  ;;  %v8904_v30 = vld [vmem:[%s9429_s8 + $0xcc] ss:$72 sps:$4 sm:$0xff]   ;;  %v8899_v32 = vld [vmem:[%s9429_s8 + $0x12c0] ss:$72 sps:$4 sm:$0xff]  }
 0x288   : > { %6347 = vmatprep.subr.bf16.mxu0 %v8832_v33  ;;  %v8902_v33 = vld [vmem:[%s9429_s8 + $0xc8] ss:$72 sps:$4 sm:$0xff]  }
 0x28a   : > { %6266 = vmatpush1.bf16.msra.mxu1 %v8827_v36  ;;  %v8907_v36 = vld [vmem:[%s9429_s8 + $0x1354] ss:$72 sps:$4 sm:$0xff]  }
 0x28b   : > { %6348 = vmatpush1.bf16.msra.mxu0 %v8830_v37  ;;  %6267 = vmatprep.subr.bf16.mxu1 %v8835_v39  ;;  %v8910_v37 = vld [vmem:[%s9429_s8 + $0x15c] ss:$72 sps:$4 sm:$0xff]   ;;  %v8905_v39 = vld [vmem:[%s9429_s8 + $0x1350] ss:$72 sps:$4 sm:$0xff]  }
 0x28c   : > { %6349 = vmatprep.subr.bf16.mxu0 %v8838_v40  ;;  %v8908_v40 = vld [vmem:[%s9429_s8 + $0x158] ss:$72 sps:$4 sm:$0xff]  }
 0x28e   : > { %6268 = vmatpush1.bf16.msra.mxu1 %v8833_v41  ;;  %v8913_v41 = vld [vmem:[%s9429_s8 + $0x13e4] ss:$72 sps:$4 sm:$0xff]  }
 0x28f   : > { %6350 = vmatpush1.bf16.msra.mxu0 %v8836_v42  ;;  %6269 = vmatprep.subr.bf16.mxu1 %v8841_v43  ;;  %v8916_v42 = vld [vmem:[%s9429_s8 + $0x1ec] ss:$72 sps:$4 sm:$0xff]   ;;  %v8911_v43 = vld [vmem:[%s9429_s8 + $0x13e0] ss:$72 sps:$4 sm:$0xff]  }
 0x290   : > { %6351 = vmatprep.subr.bf16.mxu0 %v8844_v44  ;;  %v8914_v44 = vld [vmem:[%s9429_s8 + $0x1e8] ss:$72 sps:$4 sm:$0xff]  }
 0x292   : > { %6270 = vmatpush1.bf16.msra.mxu1 %v8839_v45  ;;  %v8919_v45 = vld [vmem:[%s9429_s8 + $0x1474] ss:$72 sps:$4 sm:$0xff]  }
 0x293   : > { %6352 = vmatpush1.bf16.msra.mxu0 %v8842_v46  ;;  %6271 = vmatprep.subr.bf16.mxu1 %v8847_v49  ;;  %v8922_v46 = vld [vmem:[%s9429_s8 + $0x27c] ss:$72 sps:$4 sm:$0xff]   ;;  %v1153_v49 = vsub.s32 6, %v9821_v48 }
 0x294   : > { %6353 = vmatprep.subr.bf16.mxu0 %v8850_v50  ;;  %v8917_v50 = vld [vmem:[%s9429_s8 + $0x1470] ss:$72 sps:$4 sm:$0xff]  }
 0x296   : > { %6272 = vmatpush1.bf16.msra.mxu1 %v8845_v52  ;;  %v8920_v52 = vld [vmem:[%s9429_s8 + $0x278] ss:$72 sps:$4 sm:$0xff]  }
 0x297   : > { %6354 = vmatpush1.bf16.msra.mxu0 %v8848_v53  ;;  %6273 = vmatprep.subr.bf16.mxu1 %v8853_v56  ;;  %v1157_v53 = vsub.s32 7, %v9821_v48  ;;  %v8925_v56 = vld [vmem:[%s9429_s8 + $0x1504] ss:$72 sps:$4 sm:$0xff]  }
 0x298   : > { %6355 = vmatprep.subr.bf16.mxu0 %v8856_v58  ;;  %v8928_v58 = vld [vmem:[%s9429_s8 + $0x30c] ss:$72 sps:$4 sm:$0xff]  }
 0x29a   : > { %6274 = vmatpush1.bf16.msra.mxu1 %v8851_v59  ;;  %v1154_v59 = vrot.slane %v9998_v38, %v1153_v49 }
 0x29b   : > { %6356 = vmatpush1.bf16.msra.mxu0 %v8854_v61  ;;  %6275 = vmatprep.subr.bf16.mxu1 %v8859_v62  ;;  %v1158_v61 = vrot.slane %v9998_v38, %v1157_v53  ;;  %v8923_v62 = vld [vmem:[%s9429_s8 + $0x1500] ss:$72 sps:$4 sm:$0xff]  }
 0x29c   : > { %6357 = vmatprep.subr.bf16.mxu0 %v8862_v63  ;;  %v8926_v63 = vld [vmem:[%s9429_s8 + $0x308] ss:$72 sps:$4 sm:$0xff]   ;;  %v8932_v38 = vld [vmem:[%s9429_s8 + $0x398] ss:$72 sps:$4 sm:$0xff]  }
 0x29e   : > { %6276 = vmatpush1.bf16.msra.mxu1 %v8857_v0  ;;  %v8931_v0 = vld [vmem:[%s9429_s8 + $0x1594] ss:$72 sps:$4 sm:$0xff]  }
 0x29f   : > { %6358 = vmatpush1.bf16.msra.mxu0 %v8860_v2  ;;  %6277 = vmatprep.subr.bf16.mxu1 %v8865_v3  ;;  %v8934_v2 = vld [vmem:[%s9429_s8 + $0x39c] ss:$72 sps:$4 sm:$0xff]  }
 0x2a0   : > { %6359 = vmatprep.subr.bf16.mxu0 %v8868_v5 }
 0x2a2   : > { %6278 = vmatpush1.bf16.msra.mxu1 %v8863_v8 }
 0x2a3   : > { %6360 = vmatpush1.bf16.msra.mxu0 %v8866_v9  ;;  %6279 = vmatprep.subr.bf16.mxu1 %v8871_v10 }
 0x2a4   : > { %6361 = vmatprep.subr.bf16.mxu0 %v8874_v11  ;;  %v8929_v11 = vld [vmem:[%s9429_s8 + $0x1590] ss:$72 sps:$4 sm:$0xff]  }
 0x2a6   : > { %6280 = vmatpush1.bf16.msra.mxu1 %v8869_v12 }
 0x2a7   : > { %6362 = vmatpush1.bf16.msra.mxu0 %v8872_v13  ;;  %6281 = vmatprep.subr.bf16.mxu1 %v8877_v15  ;;  %v8937_v15 = vld [vmem:[%s9429_s8 + $0x1624] ss:$72 sps:$4 sm:$0xff]  }
 0x2a8   : > { %6363 = vmatprep.subr.bf16.mxu0 %v8880_v16  ;;  %v8940_v16 = vld [vmem:[%s9429_s8 + $0x42c] ss:$72 sps:$4 sm:$0xff]  }
 0x2aa   : > { %6282 = vmatpush1.bf16.msra.mxu1 %v8875_v17 }
 0x2ab   : > { %6364 = vmatpush1.bf16.msra.mxu0 %v8878_v18  ;;  %6283 = vmatprep.subr.bf16.mxu1 %v8883_v19  ;;  %v8935_v19 = vld [vmem:[%s9429_s8 + $0x1620] ss:$72 sps:$4 sm:$0xff]  }
 0x2ac   : > { %6365 = vmatprep.subr.bf16.mxu0 %v8886_v54  ;;  %v8938_v54 = vld [vmem:[%s9429_s8 + $0x428] ss:$72 sps:$4 sm:$0xff]  }
 0x2ae   : > { %6284 = vmatpush1.bf16.msra.mxu1 %v8881_v55  ;;  %v8943_v55 = vld [vmem:[%s9429_s8 + $0x16b4] ss:$72 sps:$4 sm:$0xff]  }
 0x2af   : > { %6366 = vmatpush1.bf16.msra.mxu0 %v8884_v20  ;;  %6285 = vmatprep.subr.bf16.mxu1 %v8889_v21  ;;  %v8946_v20 = vld [vmem:[%s9429_s8 + $0x4bc] ss:$72 sps:$4 sm:$0xff]   ;;  %v8941_v21 = vld [vmem:[%s9429_s8 + $0x16b0] ss:$72 sps:$4 sm:$0xff]  }
 0x2b0   : > { %6367 = vmatprep.subr.bf16.mxu0 %v8892_v22  ;;  %v8944_v22 = vld [vmem:[%s9429_s8 + $0x4b8] ss:$72 sps:$4 sm:$0xff]  }
 0x2b2   : > { %6286 = vmatpush1.bf16.msra.mxu1 %v8887_v23  ;;  %v8949_v23 = vld [vmem:[%s9429_s8 + $0x1744] ss:$72 sps:$4 sm:$0xff]  }
 0x2b3   : > { %6368 = vmatpush1.bf16.msra.mxu0 %v8890_v24  ;;  %6419 = vmatprep.subr.bf16.mxu1 %v8898_v26  ;;  %v8952_v24 = vld [vmem:[%s9429_s8 + $0x54c] ss:$72 sps:$4 sm:$0xff]   ;;  %v8950_v26 = vld [vmem:[%s9429_s8 + $0x548] ss:$72 sps:$4 sm:$0xff]  }
 0x2b4   : > { %6378 = vmatprep.subr.bf16.mxu0 %v8895_v25  ;;  %v8947_v25 = vld [vmem:[%s9429_s8 + $0x1740] ss:$72 sps:$4 sm:$0xff]  }
 0x2b5   : > { %6288 = vmatmul.mubr.bf16.vlgmr.msra.gmra.mrb[12].mxu1 %v9596_v14 }
 0x2b6   : > { %6370 = vmatmul.mubr.bf16.vlgmr.msra.gmra.mrb[12].mxu0 %v9515_v7  ;;  %6420 = vmatpush1.bf16.msra.mxu1 %v8896_v28  ;;  %v8958_v28 = vld [vmem:[%s9429_s8 + $0x5dc] ss:$72 sps:$4 sm:$0xff]  }
 0x2b7   : > { %6379 = vmatpush1.bf16.msra.mxu0 %v8893_v27  ;;  %6421 = vmatprep.subr.bf16.mxu1 %v8904_v30  ;;  %v8955_v27 = vld [vmem:[%s9429_s8 + $0x17d4] ss:$72 sps:$4 sm:$0xff]   ;;  %v8956_v30 = vld [vmem:[%s9429_s8 + $0x5d8] ss:$72 sps:$4 sm:$0xff]  }
 0x2b8   : > { %6380 = vmatprep.subr.bf16.mxu0 %v8901_v29  ;;  %6410 = vmatprep.mubr.bf16.mxu0 %v9552_v34  ;;  %v8953_v29 = vld [vmem:[%s9429_s8 + $0x17d0] ss:$72 sps:$4 sm:$0xff]  }
 0x2b9   : > { %6451 = vmatprep.mubr.bf16.mxu1 %v9484_v47 }
 0x2ba   : > { %6422 = vmatpush1.bf16.msra.mxu1 %v8902_v33  ;;  %v8964_v33 = vld [vmem:[%s9429_s8 + $0x66c] ss:$72 sps:$4 sm:$0xff]  }
 0x2bb   : > { %6381 = vmatpush1.bf16.msra.mxu0 %v8899_v32  ;;  %6423 = vmatprep.subr.bf16.mxu1 %v8910_v37  ;;  %v8961_v32 = vld [vmem:[%s9429_s8 + $0x1864] ss:$72 sps:$4 sm:$0xff]   ;;  %v8962_v37 = vld [vmem:[%s9429_s8 + $0x668] ss:$72 sps:$4 sm:$0xff]  }
 0x2bc   : > { %6382 = vmatprep.subr.bf16.mxu0 %v8907_v36  ;;  %v8959_v36 = vld [vmem:[%s9429_s8 + $0x1860] ss:$72 sps:$4 sm:$0xff]  }
 0x2be   : > { %6424 = vmatpush1.bf16.msra.mxu1 %v8908_v40  ;;  %v8970_v40 = vld [vmem:[%s9429_s8 + $0x6fc] ss:$72 sps:$4 sm:$0xff]  }
 0x2bf   : > { %6383 = vmatpush1.bf16.msra.mxu0 %v8905_v39  ;;  %6425 = vmatprep.subr.bf16.mxu1 %v8916_v42  ;;  %v8967_v39 = vld [vmem:[%s9429_s8 + $0x18f4] ss:$72 sps:$4 sm:$0xff]   ;;  %v8968_v42 = vld [vmem:[%s9429_s8 + $0x6f8] ss:$72 sps:$4 sm:$0xff]  }
 0x2c0   : > { %6384 = vmatprep.subr.bf16.mxu0 %v8913_v41  ;;  %v8965_v41 = vld [vmem:[%s9429_s8 + $0x18f0] ss:$72 sps:$4 sm:$0xff]  }
 0x2c2   : > { %6426 = vmatpush1.bf16.msra.mxu1 %v8914_v44  ;;  %v8976_v44 = vld [vmem:[%s9429_s8 + $0x78c] ss:$72 sps:$4 sm:$0xff]  }
 0x2c3   : > { %6385 = vmatpush1.bf16.msra.mxu0 %v8911_v43  ;;  %6427 = vmatprep.subr.bf16.mxu1 %v8922_v46  ;;  %v8973_v43 = vld [vmem:[%s9429_s8 + $0x1984] ss:$72 sps:$4 sm:$0xff]   ;;  %v8974_v46 = vld [vmem:[%s9429_s8 + $0x788] ss:$72 sps:$4 sm:$0xff]  }
 0x2c4   : > { %6386 = vmatprep.subr.bf16.mxu0 %v8919_v45  ;;  %v8971_v45 = vld [vmem:[%s9429_s8 + $0x1980] ss:$72 sps:$4 sm:$0xff]  }
 0x2c6   : > { %6428 = vmatpush1.bf16.msra.mxu1 %v8920_v52  ;;  %v8982_v52 = vld [vmem:[%s9429_s8 + $0x81c] ss:$72 sps:$4 sm:$0xff]  }
 0x2c7   : > { %6387 = vmatpush1.bf16.msra.mxu0 %v8917_v50  ;;  %6429 = vmatprep.subr.bf16.mxu1 %v8928_v58  ;;  %v8979_v50 = vld [vmem:[%s9429_s8 + $0x1a14] ss:$72 sps:$4 sm:$0xff]   ;;  %v8980_v58 = vld [vmem:[%s9429_s8 + $0x818] ss:$72 sps:$4 sm:$0xff]  }
 0x2c8   : > { %6388 = vmatprep.subr.bf16.mxu0 %v8925_v56  ;;  %v6043_v3 = vpop.f32.mrb[8].mxu1  ;;  %v8977_v56 = vld [vmem:[%s9429_s8 + $0x1a10] ss:$72 sps:$4 sm:$0xff]  }
 0x2c9   : > { %v7787_v5 = vadd.f32 %v6043_v3, %v1154_v59  ;;  %v6045_v8 = vpop.f32.mrb[9].mxu1  ;;  %v8985_v59 = vld [vmem:[%s9429_s8 + $0x1aa4] ss:$72 sps:$4 sm:$0xff]   ;;  %v8989_v3 = vld [vmem:[%s9429_s8 + $0x938] ss:$72 sps:$4 sm:$0xff]  }
 0x2ca   : > { %v7788_v9 = vadd.f32 %v6045_v8, %v1158_v61  ;;  %v6047_v10 = vpop.f32.mrb[10].mxu1  ;;  %6430 = vmatpush1.bf16.msra.mxu1 %v8926_v63  ;;  %v8988_v61 = vld [vmem:[%s9429_s8 + $0x8ac] ss:$72 sps:$4 sm:$0xff]   ;;  %v8986_v63 = vld [vmem:[%s9429_s8 + $0x8a8] ss:$72 sps:$4 sm:$0xff]  }
 0x2cb   : > { %6389 = vmatpush1.bf16.msra.mxu0 %v8923_v62  ;;  %v6671_v12 = vmax.f32 %v7787_v5, 0.0  ;;  %v6048_v13 = vpop.f32.mrb[11].mxu1  ;;  %6431 = vmatprep.subr.bf16.mxu1 %v8934_v2  ;;  %v8983_v62 = vld [vmem:[%s9429_s8 + $0x1aa0] ss:$72 sps:$4 sm:$0xff]   ;;  %v8994_v2 = vld [vmem:[%s9429_s8 + $0x44] ss:$72 sps:$4 sm:$0xff]  }
 0x2cc   : > { %6390 = vmatprep.subr.bf16.mxu0 %v8931_v0  ;;  %v6672_v17 = vmax.f32 %v7788_v9, 0.0  ;;  %v8991_v0 = vld [vmem:[%s9429_s8 + $0x93c] ss:$72 sps:$4 sm:$0xff]   ;;  %v8992_v5 = vld [vmem:[%s9429_s8 + $0x40] ss:$72 sps:$4 sm:$0xff]  }
 0x2cd   : > { %v8997_v8 = vld [vmem:[%s9429_s8 + $0x9cc] ss:$72 sps:$4 sm:$0xff]   ;;  %v8995_v10 = vld [vmem:[%s9429_s8 + $0x9c8] ss:$72 sps:$4 sm:$0xff]   ;;  %v9001_v13 = vld [vmem:[%s9429_s8 + $0xa58] ss:$72 sps:$4 sm:$0xff]  }
 0x2ce   : > { %v7773_v18 = vpack.c.bf16 %v6672_v17, %v6671_v12  ;;  %6432 = vmatpush1.bf16.msra.mxu1 %v8932_v38  ;;  %v9000_v9 = vld [vmem:[%s9429_s8 + $0xd4] ss:$72 sps:$4 sm:$0xff]   ;;  %v9006_v12 = vld [vmem:[%s9429_s8 + $0x164] ss:$72 sps:$4 sm:$0xff]  }
 0x2cf   : > { %6391 = vmatpush1.bf16.msra.mxu0 %v8929_v11  ;;  %6433 = vmatprep.subr.bf16.mxu1 %v8940_v16  ;;  %v8998_v11 = vld [vmem:[%s9429_s8 + $0xd0] ss:$72 sps:$4 sm:$0xff]   ;;  %v9003_v38 = vld [vmem:[%s9429_s8 + $0xa5c] ss:$72 sps:$4 sm:$0xff]   ;;  %v9009_v16 = vld [vmem:[%s9429_s8 + $0xaec] ss:$72 sps:$4 sm:$0xff]  }
 0x2d0   : > { %6392 = vmatprep.subr.bf16.mxu0 %v8937_v15  ;;  %6758 = vst [vmem:[%s9866_s24 + $0x18] sm:$0xff] %v7773_v18  ;;  %v9004_v15 = vld [vmem:[%s9429_s8 + $0x160] ss:$72 sps:$4 sm:$0xff]   ;;  %v9012_v17 = vld [vmem:[%s9429_s8 + $0x1f4] ss:$72 sps:$4 sm:$0xff]  }
 0x2d1   : > { %v9007_v18 = vld [vmem:[%s9429_s8 + $0xae8] ss:$72 sps:$4 sm:$0xff]  }
 0x2d2   : > { %6434 = vmatpush1.bf16.msra.mxu1 %v8938_v54  ;;  %v9018_v54 = vld [vmem:[%s9429_s8 + $0x284] ss:$72 sps:$4 sm:$0xff]  }
 0x2d3   : > { %6393 = vmatpush1.bf16.msra.mxu0 %v8935_v19  ;;  %6435 = vmatprep.subr.bf16.mxu1 %v8946_v20  ;;  %v9010_v19 = vld [vmem:[%s9429_s8 + $0x1f0] ss:$72 sps:$4 sm:$0xff]   ;;  %v9016_v20 = vld [vmem:[%s9429_s8 + $0x280] ss:$72 sps:$4 sm:$0xff]  }
 0x2d4   : > { %6394 = vmatprep.subr.bf16.mxu0 %v8943_v55  ;;  %v9013_v55 = vld [vmem:[%s9429_s8 + $0xb78] ss:$72 sps:$4 sm:$0xff]  }
 0x2d6   : > { %6436 = vmatpush1.bf16.msra.mxu1 %v8944_v22  ;;  %v9021_v22 = vld [vmem:[%s9429_s8 + $0xc0c] ss:$72 sps:$4 sm:$0xff]  }
 0x2d7   : > { %6395 = vmatpush1.bf16.msra.mxu0 %v8941_v21  ;;  %6437 = vmatprep.subr.bf16.mxu1 %v8952_v24  ;;  %v10296_v21 = vld [vmem:[%s9831_s12 + $0x8] sm:$0xff] }
 0x2d8   : > { %6396 = vmatprep.subr.bf16.mxu0 %v8949_v23  ;;  %v9024_v23 = vld [vmem:[%s9429_s8 + $0x314] ss:$72 sps:$4 sm:$0xff]   ;;  %v1162_v24 = vrot.slane %v10296_v21, %v9835_v57 }
 0x2da   : > { %6438 = vmatpush1.bf16.msra.mxu1 %v8950_v26  ;;  %v9019_v26 = vld [vmem:[%s9429_s8 + $0xc08] ss:$72 sps:$4 sm:$0xff]  }
 0x2db   : > { %6397 = vmatpush1.bf16.msra.mxu0 %v8947_v25  ;;  %6439 = vmatprep.subr.bf16.mxu1 %v8958_v28  ;;  %v1166_v25 = vrot.slane %v10296_v21, %v9840_v60  ;;  %v9027_v28 = vld [vmem:[%s9429_s8 + $0xc9c] ss:$72 sps:$4 sm:$0xff]  }
 0x2dc   : > { %6398 = vmatprep.subr.bf16.mxu0 %v8955_v27  ;;  %v9022_v27 = vld [vmem:[%s9429_s8 + $0x310] ss:$72 sps:$4 sm:$0xff]  }
 0x2de   : > { %6440 = vmatpush1.bf16.msra.mxu1 %v8956_v30 }
 0x2df   : > { %6399 = vmatpush1.bf16.msra.mxu0 %v8953_v29  ;;  %6441 = vmatprep.subr.bf16.mxu1 %v8964_v33  ;;  %v9030_v29 = vld [vmem:[%s9429_s8 + $0x3a4] ss:$72 sps:$4 sm:$0xff]  }
 0x2e0   : > { %6400 = vmatprep.subr.bf16.mxu0 %v8961_v32 }
 0x2e2   : > { %6442 = vmatpush1.bf16.msra.mxu1 %v8962_v37 }
 0x2e3   : > { %6401 = vmatpush1.bf16.msra.mxu0 %v8959_v36  ;;  %6443 = vmatprep.subr.bf16.mxu1 %v8970_v40  ;;  %v9028_v40 = vld [vmem:[%s9429_s8 + $0x3a0] ss:$72 sps:$4 sm:$0xff]  }
 0x2e4   : > { %6402 = vmatprep.subr.bf16.mxu0 %v8967_v39  ;;  %v9025_v39 = vld [vmem:[%s9429_s8 + $0xc98] ss:$72 sps:$4 sm:$0xff]  }
 0x2e6   : > { %6444 = vmatpush1.bf16.msra.mxu1 %v8968_v42 }
 0x2e7   : > { %6403 = vmatpush1.bf16.msra.mxu0 %v8965_v41  ;;  %6445 = vmatprep.subr.bf16.mxu1 %v8976_v44  ;;  %v9036_v44 = vld [vmem:[%s9429_s8 + $0x434] ss:$72 sps:$4 sm:$0xff]  }
 0x2e8   : > { %6404 = vmatprep.subr.bf16.mxu0 %v8973_v43  ;;  %v9033_v43 = vld [vmem:[%s9429_s8 + $0xd2c] ss:$72 sps:$4 sm:$0xff]  }
 0x2ea   : > { %6446 = vmatpush1.bf16.msra.mxu1 %v8974_v46 }
 0x2eb   : > { %6405 = vmatpush1.bf16.msra.mxu0 %v8971_v45  ;;  %6447 = vmatprep.subr.bf16.mxu1 %v8982_v52  ;;  %v9034_v52 = vld [vmem:[%s9429_s8 + $0x430] ss:$72 sps:$4 sm:$0xff]  }
 0x2ec   : > { %6406 = vmatprep.subr.bf16.mxu0 %v8979_v50  ;;  %v9031_v50 = vld [vmem:[%s9429_s8 + $0xd28] ss:$72 sps:$4 sm:$0xff]  }
 0x2ee   : > { %6448 = vmatpush1.bf16.msra.mxu1 %v8980_v58  ;;  %v9042_v58 = vld [vmem:[%s9429_s8 + $0x4c4] ss:$72 sps:$4 sm:$0xff]  }
 0x2ef   : > { %6407 = vmatpush1.bf16.msra.mxu0 %v8977_v56  ;;  %6449 = vmatprep.subr.bf16.mxu1 %v8988_v61  ;;  %v9039_v56 = vld [vmem:[%s9429_s8 + $0xdbc] ss:$72 sps:$4 sm:$0xff]   ;;  %v9040_v61 = vld [vmem:[%s9429_s8 + $0x4c0] ss:$72 sps:$4 sm:$0xff]  }
 0x2f0   : > { %6408 = vmatprep.subr.bf16.mxu0 %v8985_v59  ;;  %v9037_v59 = vld [vmem:[%s9429_s8 + $0xdb8] ss:$72 sps:$4 sm:$0xff]  }
 0x2f2   : > { %6450 = vmatpush1.bf16.msra.mxu1 %v8986_v63  ;;  %v9048_v63 = vld [vmem:[%s9429_s8 + $0x554] ss:$72 sps:$4 sm:$0xff]  }
 0x2f3   : > { %6409 = vmatpush1.bf16.msra.mxu0 %v8983_v62  ;;  %6460 = vmatprep.subr.bf16.mxu1 %v8991_v0  ;;  %v9045_v62 = vld [vmem:[%s9429_s8 + $0xe4c] ss:$72 sps:$4 sm:$0xff]   ;;  %v9043_v0 = vld [vmem:[%s9429_s8 + $0xe48] ss:$72 sps:$4 sm:$0xff]  }
 0x2f4   : > { %6542 = vmatprep.subr.bf16.mxu0 %v8994_v2  ;;  %v9046_v2 = vld [vmem:[%s9429_s8 + $0x550] ss:$72 sps:$4 sm:$0xff]  }
 0x2f5   : > { %6452 = vmatmul.mubr.bf16.vlgmr.msra.gmra.mrb[16].mxu1 %v9513_v6 }
 0x2f6   : > { %6411 = vmatmul.mubr.bf16.vlgmr.msra.gmra.mrb[12].mxu0 %v9596_v14  ;;  %6461 = vmatpush1.bf16.msra.mxu1 %v8989_v3  ;;  %v9051_v3 = vld [vmem:[%s9429_s8 + $0xedc] ss:$72 sps:$4 sm:$0xff]  }
 0x2f7   : > { %6543 = vmatpush1.bf16.msra.mxu0 %v8992_v5  ;;  %6462 = vmatprep.subr.bf16.mxu1 %v8997_v8  ;;  %v9054_v5 = vld [vmem:[%s9429_s8 + $0x5e4] ss:$72 sps:$4 sm:$0xff]   ;;  %v9049_v8 = vld [vmem:[%s9429_s8 + $0xed8] ss:$72 sps:$4 sm:$0xff]  }
 0x2f8   : > { %6544 = vmatprep.subr.bf16.mxu0 %v9000_v9  ;;  %6492 = vmatprep.mubr.bf16.mxu1 %v9491_v51  ;;  %v9052_v9 = vld [vmem:[%s9429_s8 + $0x5e0] ss:$72 sps:$4 sm:$0xff]  }
 0x2f9   : > { %6574 = vmatprep.mubr.bf16.mxu0 %v9484_v47  ;;  %v9015_v47 = vld [vmem:[%s9429_s8 + $0xb7c] ss:$72 sps:$4 sm:$0xff]  }
 0x2fa   : > { %6463 = vmatpush1.bf16.msra.mxu1 %v8995_v10  ;;  %v9057_v10 = vld [vmem:[%s9429_s8 + $0xf6c] ss:$72 sps:$4 sm:$0xff]  }
 0x2fb   : > { %6545 = vmatpush1.bf16.msra.mxu0 %v8998_v11  ;;  %6464 = vmatprep.subr.bf16.mxu1 %v9003_v38  ;;  %v9060_v11 = vld [vmem:[%s9429_s8 + $0x674] ss:$72 sps:$4 sm:$0xff]   ;;  %v9055_v38 = vld [vmem:[%s9429_s8 + $0xf68] ss:$72 sps:$4 sm:$0xff]  }
 0x2fc   : > { %6546 = vmatprep.subr.bf16.mxu0 %v9006_v12  ;;  %v9058_v12 = vld [vmem:[%s9429_s8 + $0x670] ss:$72 sps:$4 sm:$0xff]  }
 0x2fe   : > { %6465 = vmatpush1.bf16.msra.mxu1 %v9001_v13  ;;  %v9063_v13 = vld [vmem:[%s9429_s8 + $0xffc] ss:$72 sps:$4 sm:$0xff]  }
 0x2ff   : > { %6547 = vmatpush1.bf16.msra.mxu0 %v9004_v15  ;;  %6466 = vmatprep.subr.bf16.mxu1 %v9009_v16  ;;  %v9066_v15 = vld [vmem:[%s9429_s8 + $0x704] ss:$72 sps:$4 sm:$0xff]   ;;  %v9061_v16 = vld [vmem:[%s9429_s8 + $0xff8] ss:$72 sps:$4 sm:$0xff]  }
 0x300   : > { %6548 = vmatprep.subr.bf16.mxu0 %v9012_v17  ;;  %v9064_v17 = vld [vmem:[%s9429_s8 + $0x700] ss:$72 sps:$4 sm:$0xff]  }
 0x302   : > { %6467 = vmatpush1.bf16.msra.mxu1 %v9007_v18  ;;  %v9069_v18 = vld [vmem:[%s9429_s8 + $0x108c] ss:$72 sps:$4 sm:$0xff]  }
 0x303   : > { %6549 = vmatpush1.bf16.msra.mxu0 %v9010_v19  ;;  %6468 = vmatprep.subr.bf16.mxu1 %v9015_v47  ;;  %v9072_v19 = vld [vmem:[%s9429_s8 + $0x794] ss:$72 sps:$4 sm:$0xff]   ;;  %v9067_v47 = vld [vmem:[%s9429_s8 + $0x1088] ss:$72 sps:$4 sm:$0xff]  }
 0x304   : > { %6550 = vmatprep.subr.bf16.mxu0 %v9018_v54  ;;  %v9070_v54 = vld [vmem:[%s9429_s8 + $0x790] ss:$72 sps:$4 sm:$0xff]  }
 0x306   : > { %6469 = vmatpush1.bf16.msra.mxu1 %v9013_v55  ;;  %v9075_v55 = vld [vmem:[%s9429_s8 + $0x111c] ss:$72 sps:$4 sm:$0xff]  }
 0x307   : > { %6551 = vmatpush1.bf16.msra.mxu0 %v9016_v20  ;;  %6470 = vmatprep.subr.bf16.mxu1 %v9021_v22  ;;  %v9078_v20 = vld [vmem:[%s9429_s8 + $0x824] ss:$72 sps:$4 sm:$0xff]   ;;  %v9073_v22 = vld [vmem:[%s9429_s8 + $0x1118] ss:$72 sps:$4 sm:$0xff]  }
 0x308   : > { %6552 = vmatprep.subr.bf16.mxu0 %v9024_v23  ;;  %v9076_v23 = vld [vmem:[%s9429_s8 + $0x820] ss:$72 sps:$4 sm:$0xff]  }
 0x309   : > { %v6166_v30 = vpop.f32.mrb[8].mxu0 }
 0x30a   : > { %v7789_v32 = vadd.f32 %v6166_v30, %v1162_v24  ;;  %v6168_v33 = vpop.f32.mrb[9].mxu0  ;;  %6471 = vmatpush1.bf16.msra.mxu1 %v9019_v26  ;;  %v9081_v24 = vld [vmem:[%s9429_s8 + $0x11ac] ss:$72 sps:$4 sm:$0xff]   ;;  %v9079_v26 = vld [vmem:[%s9429_s8 + $0x11a8] ss:$72 sps:$4 sm:$0xff]  }
 0x30b   : > { %v7790_v36 = vadd.f32 %v6168_v33, %v1166_v25  ;;  %v6170_v37 = vpop.f32.mrb[10].mxu0  ;;  %6553 = vmatpush1.bf16.msra.mxu0 %v9022_v27  ;;  %6472 = vmatprep.subr.bf16.mxu1 %v9027_v28  ;;  %v9084_v25 = vld [vmem:[%s9429_s8 + $0x8b4] ss:$72 sps:$4 sm:$0xff]   ;;  %v9082_v27 = vld [vmem:[%s9429_s8 + $0x8b0] ss:$72 sps:$4 sm:$0xff]  }
 0x30c   : > { %v6673_v41 = vmax.f32 %v7789_v32, 0.0  ;;  %v6171_v42 = vpop.f32.mrb[11].mxu0  ;;  %6554 = vmatprep.subr.bf16.mxu0 %v9030_v29  ;;  %v9087_v28 = vld [vmem:[%s9429_s8 + $0x123c] ss:$72 sps:$4 sm:$0xff]   ;;  %v9085_v30 = vld [vmem:[%s9429_s8 + $0x1238] ss:$72 sps:$4 sm:$0xff]  }
 0x30d   : > { %v6674_v45 = vmax.f32 %v7790_v36, 0.0  ;;  %v9090_v29 = vld [vmem:[%s9429_s8 + $0x944] ss:$72 sps:$4 sm:$0xff]   ;;  %v9088_v32 = vld [vmem:[%s9429_s8 + $0x940] ss:$72 sps:$4 sm:$0xff]  }
 0x30e   : > { %6473 = vmatpush1.bf16.msra.mxu1 %v9025_v39  ;;  %v9093_v33 = vld [vmem:[%s9429_s8 + $0x12cc] ss:$72 sps:$4 sm:$0xff]   ;;  %v9091_v37 = vld [vmem:[%s9429_s8 + $0x12c8] ss:$72 sps:$4 sm:$0xff]  }
 0x30f   : > { %v7774_v46 = vpack.c.bf16 %v6674_v45, %v6673_v41  ;;  %6555 = vmatpush1.bf16.msra.mxu0 %v9028_v40  ;;  %6474 = vmatprep.subr.bf16.mxu1 %v9033_v43  ;;  %v9096_v36 = vld [vmem:[%s9429_s8 + $0x9d4] ss:$72 sps:$4 sm:$0xff]   ;;  %v9094_v39 = vld [vmem:[%s9429_s8 + $0x9d0] ss:$72 sps:$4 sm:$0xff]   ;;  %v9102_v41 = vld [vmem:[%s9429_s8 + $0xa64] ss:$72 sps:$4 sm:$0xff]  }
 0x310   : > { %6556 = vmatprep.subr.bf16.mxu0 %v9036_v44  ;;  %v9099_v40 = vld [vmem:[%s9429_s8 + $0x135c] ss:$72 sps:$4 sm:$0xff]   ;;  %v9100_v42 = vld [vmem:[%s9429_s8 + $0xa60] ss:$72 sps:$4 sm:$0xff]   ;;  %v9105_v43 = vld [vmem:[%s9429_s8 + $0x13ec] ss:$72 sps:$4 sm:$0xff]  }
 0x311   : > { %6759 = vst [vmem:[%s9866_s24 + $0x20] sm:$0xff] %v7774_v46  ;;  %v9108_v44 = vld [vmem:[%s9429_s8 + $0xaf4] ss:$72 sps:$4 sm:$0xff]   ;;  %v9103_v45 = vld [vmem:[%s9429_s8 + $0x13e8] ss:$72 sps:$4 sm:$0xff]  }
 0x312   : > { %6475 = vmatpush1.bf16.msra.mxu1 %v9031_v50  ;;  %v9106_v46 = vld [vmem:[%s9429_s8 + $0xaf0] ss:$72 sps:$4 sm:$0xff]   ;;  %v9114_v50 = vld [vmem:[%s9429_s8 + $0xb84] ss:$72 sps:$4 sm:$0xff]  }
 0x313   : > { %6557 = vmatpush1.bf16.msra.mxu0 %v9034_v52  ;;  %6476 = vmatprep.subr.bf16.mxu1 %v9039_v56  ;;  %v9109_v52 = vld [vmem:[%s9429_s8 + $0x1478] ss:$72 sps:$4 sm:$0xff]  }
 0x314   : > { %6558 = vmatprep.subr.bf16.mxu0 %v9042_v58  ;;  %v9112_v56 = vld [vmem:[%s9429_s8 + $0xb80] ss:$72 sps:$4 sm:$0xff]   ;;  %v9117_v58 = vld [vmem:[%s9429_s8 + $0x150c] ss:$72 sps:$4 sm:$0xff]  }
 0x316   : > { %6477 = vmatpush1.bf16.msra.mxu1 %v9037_v59  ;;  %v9120_v59 = vld [vmem:[%s9429_s8 + $0xc14] ss:$72 sps:$4 sm:$0xff]  }
 0x317   : > { %6559 = vmatpush1.bf16.msra.mxu0 %v9040_v61  ;;  %6478 = vmatprep.subr.bf16.mxu1 %v9045_v62  ;;  %v9115_v61 = vld [vmem:[%s9429_s8 + $0x1508] ss:$72 sps:$4 sm:$0xff]  }
 0x318   : > { %6560 = vmatprep.subr.bf16.mxu0 %v9048_v63  ;;  %v9118_v62 = vld [vmem:[%s9429_s8 + $0xc10] ss:$72 sps:$4 sm:$0xff]   ;;  %v9123_v63 = vld [vmem:[%s9429_s8 + $0x159c] ss:$72 sps:$4 sm:$0xff]  }
 0x31a   : > { %6479 = vmatpush1.bf16.msra.mxu1 %v9043_v0  ;;  %v9126_v0 = vld [vmem:[%s9429_s8 + $0xca4] ss:$72 sps:$4 sm:$0xff]  }
 0x31b   : > { %6561 = vmatpush1.bf16.msra.mxu0 %v9046_v2  ;;  %6480 = vmatprep.subr.bf16.mxu1 %v9051_v3  ;;  %v9121_v2 = vld [vmem:[%s9429_s8 + $0x1598] ss:$72 sps:$4 sm:$0xff]  }
 0x31c   : > { %6562 = vmatprep.subr.bf16.mxu0 %v9054_v5  ;;  %v9124_v3 = vld [vmem:[%s9429_s8 + $0xca0] ss:$72 sps:$4 sm:$0xff]   ;;  %v9129_v5 = vld [vmem:[%s9429_s8 + $0x162c] ss:$72 sps:$4 sm:$0xff]  }
 0x31e   : > { %6481 = vmatpush1.bf16.msra.mxu1 %v9049_v8  ;;  %v9132_v8 = vld [vmem:[%s9429_s8 + $0xd34] ss:$72 sps:$4 sm:$0xff]  }
 0x31f   : > { %6563 = vmatpush1.bf16.msra.mxu0 %v9052_v9  ;;  %6482 = vmatprep.subr.bf16.mxu1 %v9057_v10  ;;  %v9127_v9 = vld [vmem:[%s9429_s8 + $0x1628] ss:$72 sps:$4 sm:$0xff]  }
 0x320   : > { %6564 = vmatprep.subr.bf16.mxu0 %v9060_v11  ;;  %v9130_v10 = vld [vmem:[%s9429_s8 + $0xd30] ss:$72 sps:$4 sm:$0xff]   ;;  %v9135_v11 = vld [vmem:[%s9429_s8 + $0x16bc] ss:$72 sps:$4 sm:$0xff]  }
 0x322   : > { %6483 = vmatpush1.bf16.msra.mxu1 %v9055_v38  ;;  %v9138_v38 = vld [vmem:[%s9429_s8 + $0xdc4] ss:$72 sps:$4 sm:$0xff]  }
 0x323   : > { %6565 = vmatpush1.bf16.msra.mxu0 %v9058_v12  ;;  %6484 = vmatprep.subr.bf16.mxu1 %v9063_v13  ;;  %v9133_v12 = vld [vmem:[%s9429_s8 + $0x16b8] ss:$72 sps:$4 sm:$0xff]  }
 0x324   : > { %6566 = vmatprep.subr.bf16.mxu0 %v9066_v15  ;;  %v9136_v13 = vld [vmem:[%s9429_s8 + $0xdc0] ss:$72 sps:$4 sm:$0xff]   ;;  %v9141_v15 = vld [vmem:[%s9429_s8 + $0x174c] ss:$72 sps:$4 sm:$0xff]  }
 0x326   : > { %6485 = vmatpush1.bf16.msra.mxu1 %v9061_v16  ;;  %v9144_v16 = vld [vmem:[%s9429_s8 + $0xe54] ss:$72 sps:$4 sm:$0xff]  }
 0x327   : > { %6567 = vmatpush1.bf16.msra.mxu0 %v9064_v17  ;;  %6486 = vmatprep.subr.bf16.mxu1 %v9069_v18  ;;  %v9139_v17 = vld [vmem:[%s9429_s8 + $0x1748] ss:$72 sps:$4 sm:$0xff]  }
 0x328   : > { %6568 = vmatprep.subr.bf16.mxu0 %v9072_v19  ;;  %v9142_v18 = vld [vmem:[%s9429_s8 + $0xe50] ss:$72 sps:$4 sm:$0xff]   ;;  %v9147_v19 = vld [vmem:[%s9429_s8 + $0x17dc] ss:$72 sps:$4 sm:$0xff]  }
 0x32a   : > { %6487 = vmatpush1.bf16.msra.mxu1 %v9067_v47  ;;  %v9150_v47 = vld [vmem:[%s9429_s8 + $0xee4] ss:$72 sps:$4 sm:$0xff]  }
 0x32b   : > { %6569 = vmatpush1.bf16.msra.mxu0 %v9070_v54  ;;  %6488 = vmatprep.subr.bf16.mxu1 %v9075_v55  ;;  %v9145_v54 = vld [vmem:[%s9429_s8 + $0x17d8] ss:$72 sps:$4 sm:$0xff]  }
 0x32c   : > { %6570 = vmatprep.subr.bf16.mxu0 %v9078_v20  ;;  %v9148_v55 = vld [vmem:[%s9429_s8 + $0xee0] ss:$72 sps:$4 sm:$0xff]   ;;  %v9153_v20 = vld [vmem:[%s9429_s8 + $0x186c] ss:$72 sps:$4 sm:$0xff]  }
 0x32e   : > { %6489 = vmatpush1.bf16.msra.mxu1 %v9073_v22  ;;  %v9156_v22 = vld [vmem:[%s9429_s8 + $0xf74] ss:$72 sps:$4 sm:$0xff]  }
 0x32f   : > { %6571 = vmatpush1.bf16.msra.mxu0 %v9076_v23  ;;  %6490 = vmatprep.subr.bf16.mxu1 %v9081_v24  ;;  %v9151_v23 = vld [vmem:[%s9429_s8 + $0x1868] ss:$72 sps:$4 sm:$0xff]  }
 0x330   : > { %6572 = vmatprep.subr.bf16.mxu0 %v9084_v25  ;;  %v9154_v24 = vld [vmem:[%s9429_s8 + $0xf70] ss:$72 sps:$4 sm:$0xff]   ;;  %v9159_v25 = vld [vmem:[%s9429_s8 + $0x18fc] ss:$72 sps:$4 sm:$0xff]  }
 0x332   : > { %6491 = vmatpush1.bf16.msra.mxu1 %v9079_v26  ;;  %v9162_v26 = vld [vmem:[%s9429_s8 + $0x1004] ss:$72 sps:$4 sm:$0xff]  }
 0x333   : > { %6573 = vmatpush1.bf16.msra.mxu0 %v9082_v27  ;;  %6501 = vmatprep.subr.bf16.mxu1 %v9087_v28  ;;  %v9157_v27 = vld [vmem:[%s9429_s8 + $0x18f8] ss:$72 sps:$4 sm:$0xff]  }
 0x334   : > { %6583 = vmatprep.subr.bf16.mxu0 %v9090_v29  ;;  %v9160_v28 = vld [vmem:[%s9429_s8 + $0x1000] ss:$72 sps:$4 sm:$0xff]   ;;  %v9165_v29 = vld [vmem:[%s9429_s8 + $0x198c] ss:$72 sps:$4 sm:$0xff]  }
 0x335   : > { %6493 = vmatmul.mubr.bf16.vlgmr.msra.gmra.mrb[16].mxu1 %v9515_v7 }
 0x336   : > { %6575 = vmatmul.mubr.bf16.vlgmr.msra.gmra.mrb[16].mxu0 %v9513_v6  ;;  %6502 = vmatpush1.bf16.msra.mxu1 %v9085_v30  ;;  %v9097_v6 = vld [vmem:[%s9429_s8 + $0x1358] ss:$72 sps:$4 sm:$0xff]   ;;  %v9168_v30 = vld [vmem:[%s9429_s8 + $0x1094] ss:$72 sps:$4 sm:$0xff]  }
 0x337   : > { %6584 = vmatpush1.bf16.msra.mxu0 %v9088_v32  ;;  %6503 = vmatprep.subr.bf16.mxu1 %v9093_v33  ;;  %v9163_v32 = vld [vmem:[%s9429_s8 + $0x1988] ss:$72 sps:$4 sm:$0xff]  }
 0x338   : > { %6585 = vmatprep.subr.bf16.mxu0 %v9096_v36  ;;  %6533 = vmatprep.mubr.bf16.mxu1 %v9552_v34  ;;  %v9166_v33 = vld [vmem:[%s9429_s8 + $0x1090] ss:$72 sps:$4 sm:$0xff]   ;;  %v9171_v36 = vld [vmem:[%s9429_s8 + $0x1a1c] ss:$72 sps:$4 sm:$0xff]  }
 0x339   : > { %6615 = vmatprep.mubr.bf16.mxu0 %v9491_v51  ;;  %v9111_v51 = vld [vmem:[%s9429_s8 + $0x147c] ss:$72 sps:$4 sm:$0xff]  }
 0x33a   : > { %6504 = vmatpush1.bf16.msra.mxu1 %v9091_v37  ;;  %v9174_v37 = vld [vmem:[%s9429_s8 + $0x1124] ss:$72 sps:$4 sm:$0xff]  }
 0x33b   : > { %6586 = vmatpush1.bf16.msra.mxu0 %v9094_v39  ;;  %6505 = vmatprep.subr.bf16.mxu1 %v9099_v40  ;;  %v9169_v39 = vld [vmem:[%s9429_s8 + $0x1a18] ss:$72 sps:$4 sm:$0xff]  }
 0x33c   : > { %6587 = vmatprep.subr.bf16.mxu0 %v9102_v41  ;;  %v9172_v40 = vld [vmem:[%s9429_s8 + $0x1120] ss:$72 sps:$4 sm:$0xff]   ;;  %v9177_v41 = vld [vmem:[%s9429_s8 + $0x1aac] ss:$72 sps:$4 sm:$0xff]  }
 0x33e   : > { %6506 = vmatpush1.bf16.msra.mxu1 %v9097_v6  ;;  %v9180_v6 = vld [vmem:[%s9429_s8 + $0x11b4] ss:$72 sps:$4 sm:$0xff]  }
 0x33f   : > { %6588 = vmatpush1.bf16.msra.mxu0 %v9100_v42  ;;  %6507 = vmatprep.subr.bf16.mxu1 %v9105_v43  ;;  %v9175_v42 = vld [vmem:[%s9429_s8 + $0x1aa8] ss:$72 sps:$4 sm:$0xff]  }
 0x340   : > { %6589 = vmatprep.subr.bf16.mxu0 %v9108_v44  ;;  %v9178_v43 = vld [vmem:[%s9429_s8 + $0x11b0] ss:$72 sps:$4 sm:$0xff]   ;;  %v9183_v44 = vld [vmem:[%s9429_s8 + $0x1244] ss:$72 sps:$4 sm:$0xff]  }
 0x342   : > { %6508 = vmatpush1.bf16.msra.mxu1 %v9103_v45  ;;  %v9181_v45 = vld [vmem:[%s9429_s8 + $0x1240] ss:$72 sps:$4 sm:$0xff]  }
 0x343   : > { %6590 = vmatpush1.bf16.msra.mxu0 %v9106_v46  ;;  %6509 = vmatprep.subr.bf16.mxu1 %v9111_v51  ;;  %v9186_v46 = vld [vmem:[%s9429_s8 + $0x12d4] ss:$72 sps:$4 sm:$0xff]   ;;  %v9184_v51 = vld [vmem:[%s9429_s8 + $0x12d0] ss:$72 sps:$4 sm:$0xff]  }
 0x344   : > { %6591 = vmatprep.subr.bf16.mxu0 %v9114_v50  ;;  %v9189_v50 = vld [vmem:[%s9429_s8 + $0x1364] ss:$72 sps:$4 sm:$0xff]  }
 0x346   : > { %6510 = vmatpush1.bf16.msra.mxu1 %v9109_v52  ;;  %v9187_v52 = vld [vmem:[%s9429_s8 + $0x1360] ss:$72 sps:$4 sm:$0xff]  }
 0x347   : > { %6592 = vmatpush1.bf16.msra.mxu0 %v9112_v56  ;;  %6511 = vmatprep.subr.bf16.mxu1 %v9117_v58  ;;  %v9192_v56 = vld [vmem:[%s9429_s8 + $0x13f4] ss:$72 sps:$4 sm:$0xff]   ;;  %v9190_v58 = vld [vmem:[%s9429_s8 + $0x13f0] ss:$72 sps:$4 sm:$0xff]  }
 0x348   : > { %6593 = vmatprep.subr.bf16.mxu0 %v9120_v59  ;;  %v9195_v59 = vld [vmem:[%s9429_s8 + $0x1484] ss:$72 sps:$4 sm:$0xff]  }
 0x34a   : > { %6512 = vmatpush1.bf16.msra.mxu1 %v9115_v61  ;;  %v9198_v61 = vld [vmem:[%s9429_s8 + $0x1514] ss:$72 sps:$4 sm:$0xff]  }
 0x34b   : > { %6594 = vmatpush1.bf16.msra.mxu0 %v9118_v62  ;;  %6513 = vmatprep.subr.bf16.mxu1 %v9123_v63  ;;  %v1174_v62 = vrot.slane %v10296_v21, %v1141_v35  ;;  %v9196_v63 = vld [vmem:[%s9429_s8 + $0x1510] ss:$72 sps:$4 sm:$0xff]   ;;  %v9204_v35 = vld [vmem:[%s9429_s8 + $0x1634] ss:$72 sps:$4 sm:$0xff]  }
 0x34c   : > { %6595 = vmatprep.subr.bf16.mxu0 %v9126_v0  ;;  %v9201_v0 = vld [vmem:[%s9429_s8 + $0x15a4] ss:$72 sps:$4 sm:$0xff]  }
 0x34e   : > { %6514 = vmatpush1.bf16.msra.mxu1 %v9121_v2 }
 0x34f   : > { %6596 = vmatpush1.bf16.msra.mxu0 %v9124_v3  ;;  %6515 = vmatprep.subr.bf16.mxu1 %v9129_v5 }
 0x350   : > { %6597 = vmatprep.subr.bf16.mxu0 %v9132_v8 }
 0x352   : > { %6516 = vmatpush1.bf16.msra.mxu1 %v9127_v9 }
 0x353   : > { %6598 = vmatpush1.bf16.msra.mxu0 %v9130_v10  ;;  %6517 = vmatprep.subr.bf16.mxu1 %v9135_v11 }
 0x354   : > { %6599 = vmatprep.subr.bf16.mxu0 %v9138_v38 }
 0x356   : > { %6518 = vmatpush1.bf16.msra.mxu1 %v9133_v12 }
 0x357   : > { %6600 = vmatpush1.bf16.msra.mxu0 %v9136_v13  ;;  %6519 = vmatprep.subr.bf16.mxu1 %v9141_v15  ;;  %v9202_v13 = vld [vmem:[%s9429_s8 + $0x1630] ss:$72 sps:$4 sm:$0xff]   ;;  %v9207_v15 = vld [vmem:[%s9429_s8 + $0x16c4] ss:$72 sps:$4 sm:$0xff]  }
 0x358   : > { %6601 = vmatprep.subr.bf16.mxu0 %v9144_v16  ;;  %v9205_v16 = vld [vmem:[%s9429_s8 + $0x16c0] ss:$72 sps:$4 sm:$0xff]  }
 0x35a   : > { %6520 = vmatpush1.bf16.msra.mxu1 %v9139_v17  ;;  %v9210_v17 = vld [vmem:[%s9429_s8 + $0x1754] ss:$72 sps:$4 sm:$0xff]  }
 0x35b   : > { %6602 = vmatpush1.bf16.msra.mxu0 %v9142_v18  ;;  %6521 = vmatprep.subr.bf16.mxu1 %v9147_v19  ;;  %v9208_v18 = vld [vmem:[%s9429_s8 + $0x1750] ss:$72 sps:$4 sm:$0xff]   ;;  %v9213_v19 = vld [vmem:[%s9429_s8 + $0x17e4] ss:$72 sps:$4 sm:$0xff]  }
 0x35c   : > { %6603 = vmatprep.subr.bf16.mxu0 %v9150_v47  ;;  %v9211_v47 = vld [vmem:[%s9429_s8 + $0x17e0] ss:$72 sps:$4 sm:$0xff]  }
 0x35e   : > { %6522 = vmatpush1.bf16.msra.mxu1 %v9145_v54  ;;  %v9216_v54 = vld [vmem:[%s9429_s8 + $0x1874] ss:$72 sps:$4 sm:$0xff]  }
 0x35f   : > { %6604 = vmatpush1.bf16.msra.mxu0 %v9148_v55  ;;  %6523 = vmatprep.subr.bf16.mxu1 %v9153_v20  ;;  %v9214_v55 = vld [vmem:[%s9429_s8 + $0x1870] ss:$72 sps:$4 sm:$0xff]   ;;  %v9219_v20 = vld [vmem:[%s9429_s8 + $0x1904] ss:$72 sps:$4 sm:$0xff]  }
 0x360   : > { %6605 = vmatprep.subr.bf16.mxu0 %v9156_v22  ;;  %v9217_v22 = vld [vmem:[%s9429_s8 + $0x1900] ss:$72 sps:$4 sm:$0xff]  }
 0x362   : > { %6524 = vmatpush1.bf16.msra.mxu1 %v9151_v23  ;;  %v9222_v23 = vld [vmem:[%s9429_s8 + $0x1994] ss:$72 sps:$4 sm:$0xff]  }
 0x363   : > { %6606 = vmatpush1.bf16.msra.mxu0 %v9154_v24  ;;  %6525 = vmatprep.subr.bf16.mxu1 %v9159_v25  ;;  %v9220_v24 = vld [vmem:[%s9429_s8 + $0x1990] ss:$72 sps:$4 sm:$0xff]   ;;  %v9225_v25 = vld [vmem:[%s9429_s8 + $0x1a24] ss:$72 sps:$4 sm:$0xff]  }
 0x364   : > { %6607 = vmatprep.subr.bf16.mxu0 %v9162_v26  ;;  %v9223_v26 = vld [vmem:[%s9429_s8 + $0x1a20] ss:$72 sps:$4 sm:$0xff]  }
 0x366   : > { %6526 = vmatpush1.bf16.msra.mxu1 %v9157_v27  ;;  %v9228_v27 = vld [vmem:[%s9429_s8 + $0x1ab4] ss:$72 sps:$4 sm:$0xff]  }
 0x367   : > { %6608 = vmatpush1.bf16.msra.mxu0 %v9160_v28  ;;  %6527 = vmatprep.subr.bf16.mxu1 %v9165_v29  ;;  %v9226_v28 = vld [vmem:[%s9429_s8 + $0x1ab0] ss:$72 sps:$4 sm:$0xff]   ;;  %v1178_v29 = vrot.slane %v10296_v21, %v1145_v1  ;;  %v1190_v1 = vrot.slane %v10296_v21, %v1157_v53 }
 0x368   : > { %6609 = vmatprep.subr.bf16.mxu0 %v9168_v30  ;;  %v1182_v30 = vrot.slane %v10296_v21, %v1149_v4 }
 0x36a   : > { %6528 = vmatpush1.bf16.msra.mxu1 %v9163_v32 }
 0x36b   : > { %6610 = vmatpush1.bf16.msra.mxu0 %v9166_v33  ;;  %6529 = vmatprep.subr.bf16.mxu1 %v9171_v36 }
 0x36c   : > { %6611 = vmatprep.subr.bf16.mxu0 %v9174_v37 }
 0x36e   : > { %6530 = vmatpush1.bf16.msra.mxu1 %v9169_v39 }
 0x36f   : > { %6612 = vmatpush1.bf16.msra.mxu0 %v9172_v40  ;;  %6531 = vmatprep.subr.bf16.mxu1 %v9177_v41 }
 0x370   : > { %6613 = vmatprep.subr.bf16.mxu0 %v9180_v6 }
 0x372   : > { %6532 = vmatpush1.bf16.msra.mxu1 %v9175_v42 }
 0x373   : > { %6614 = vmatpush1.bf16.msra.mxu0 %v9178_v43 }
 0x374   : > { %6624 = vmatprep.subr.bf16.mxu0 %v9183_v44 }
 0x375   : > { %6534 = vmatmul.mubr.bf16.vlgmr.msra.gmra.mrb[16].mxu1 %v9596_v14 }
 0x376   : > { %6616 = vmatmul.mubr.bf16.vlgmr.msra.gmra.mrb[16].mxu0 %v9515_v7  ;;  %v9193_v7 = vld [vmem:[%s9429_s8 + $0x1480] ss:$72 sps:$4 sm:$0xff]  }
 0x377   : > { %6625 = vmatpush1.bf16.msra.mxu0 %v9181_v45  ;;  %6656 = vmatprep.mubr.bf16.mxu0 %v9552_v34  ;;  %v1170_v34 = vrot.slane %v10296_v21, %v1137_v31  ;;  %v9199_v31 = vld [vmem:[%s9429_s8 + $0x15a0] ss:$72 sps:$4 sm:$0xff]  }
 0x378   : > { %6626 = vmatprep.subr.bf16.mxu0 %v9186_v46 }
 0x37b   : > { %6627 = vmatpush1.bf16.msra.mxu0 %v9184_v51 }
 0x37c   : > { %6628 = vmatprep.subr.bf16.mxu0 %v9189_v50 }
 0x37f   : > { %6629 = vmatpush1.bf16.msra.mxu0 %v9187_v52 }
 0x380   : > { %6630 = vmatprep.subr.bf16.mxu0 %v9192_v56 }
 0x383   : > { %6631 = vmatpush1.bf16.msra.mxu0 %v9190_v58  ;;  %v1123_v58 = vld [vmem:[%s9831_s12 + $0x10] sm:$0x3] }
 0x384   : > { %6632 = vmatprep.subr.bf16.mxu0 %v9195_v59  ;;  %v1194_v59 = vrot.slane %v1123_v58, %v9835_v57 }
 0x387   : > { %6633 = vmatpush1.bf16.msra.mxu0 %v9193_v7 }
 0x388   : > { %6634 = vmatprep.subr.bf16.mxu0 %v9198_v61  ;;  %v6289_v2 = vpop.f32.mrb[12].mxu1 }
 0x389   : > { %v7791_v3 = vadd.f32 %v6289_v2, %v1170_v34  ;;  %v6291_v5 = vpop.f32.mrb[13].mxu1 }
 0x38a   : > { %v7792_v8 = vadd.f32 %v6291_v5, %v1174_v62  ;;  %v6293_v9 = vpop.f32.mrb[14].mxu1 }
 0x38b   : > { %6635 = vmatpush1.bf16.msra.mxu0 %v9196_v63  ;;  %v6675_v10 = vmax.f32 %v7791_v3, 0.0  ;;  %v6294_v11 = vpop.f32.mrb[15].mxu1 }
 0x38c   : > { %6636 = vmatprep.subr.bf16.mxu0 %v9201_v0  ;;  %v6676_v38 = vmax.f32 %v7792_v8, 0.0 }
 0x38e   : > { %v7775_v12 = vpack.c.bf16 %v6676_v38, %v6675_v10 }
 0x38f   : > { %6637 = vmatpush1.bf16.msra.mxu0 %v9199_v31 }
 0x390   : > { %6638 = vmatprep.subr.bf16.mxu0 %v9204_v35  ;;  %6760 = vst [vmem:[%s9866_s24 + $0x28] sm:$0xff] %v7775_v12 }
 0x393   : > { %6639 = vmatpush1.bf16.msra.mxu0 %v9202_v13 }
 0x394   : > { %6640 = vmatprep.subr.bf16.mxu0 %v9207_v15 }
 0x397   : > { %6641 = vmatpush1.bf16.msra.mxu0 %v9205_v16 }
 0x398   : > { %6642 = vmatprep.subr.bf16.mxu0 %v9210_v17 }
 0x39b   : > { %6643 = vmatpush1.bf16.msra.mxu0 %v9208_v18 }
 0x39c   : > { %6644 = vmatprep.subr.bf16.mxu0 %v9213_v19 }
 0x39f   : > { %6645 = vmatpush1.bf16.msra.mxu0 %v9211_v47 }
 0x3a0   : > { %6646 = vmatprep.subr.bf16.mxu0 %v9216_v54 }
 0x3a3   : > { %6647 = vmatpush1.bf16.msra.mxu0 %v9214_v55 }
 0x3a4   : > { %6648 = vmatprep.subr.bf16.mxu0 %v9219_v20 }
 0x3a7   : > { %6649 = vmatpush1.bf16.msra.mxu0 %v9217_v22 }
 0x3a8   : > { %6650 = vmatprep.subr.bf16.mxu0 %v9222_v23 }
 0x3ab   : > { %6651 = vmatpush1.bf16.msra.mxu0 %v9220_v24 }
 0x3ac   : > { %6652 = vmatprep.subr.bf16.mxu0 %v9225_v25 }
 0x3af   : > { %6653 = vmatpush1.bf16.msra.mxu0 %v9223_v26 }
 0x3b0   : > { %6654 = vmatprep.subr.bf16.mxu0 %v9228_v27 }
 0x3b3   : > { %6655 = vmatpush1.bf16.msra.mxu0 %v9226_v28 }
 0x3b6   : > { %6657 = vmatmul.mubr.bf16.vlgmr.msra.gmra.mrb[16].mxu0 %v9596_v14  ;;  %v1186_v14 = vrot.slane %v10296_v21, %v1153_v49  ;;  %v1198_v49 = vrot.slane %v1123_v58, %v9840_v60 }
 0x3c9   : > { %v6412_v32 = vpop.f32.mrb[12].mxu0 }
 0x3ca   : > { %v7793_v33 = vadd.f32 %v6412_v32, %v1178_v29  ;;  %v6414_v36 = vpop.f32.mrb[13].mxu0 }
 0x3cb   : > { %v7794_v37 = vadd.f32 %v6414_v36, %v1182_v30  ;;  %v6416_v39 = vpop.f32.mrb[14].mxu0 }
 0x3cc   : > { %v6677_v40 = vmax.f32 %v7793_v33, 0.0  ;;  %v6417_v41 = vpop.f32.mrb[15].mxu0 }
 0x3cd   : > { %v6678_v6 = vmax.f32 %v7794_v37, 0.0 }
 0x3cf   : > { %v7776_v42 = vpack.c.bf16 %v6678_v6, %v6677_v40 }
 0x3d1   : > { %6761 = vst [vmem:[%s9866_s24 + $0x30] sm:$0xff] %v7776_v42 }
 0x448   : > { %v6535_v4 = vpop.f32.mrb[16].mxu1 }
 0x449   : > { %v7795_v43 = vadd.f32 %v6535_v4, %v1186_v14  ;;  %v6537_v44 = vpop.f32.mrb[17].mxu1 }
 0x44a   : > { %v7796_v45 = vadd.f32 %v6537_v44, %v1190_v1  ;;  %v6539_v46 = vpop.f32.mrb[18].mxu1 }
 0x44b   : > { %v6679_v51 = vmax.f32 %v7795_v43, 0.0  ;;  %v6540_v50 = vpop.f32.mrb[19].mxu1 }
 0x44c   : > { %v6680_v52 = vmax.f32 %v7796_v45, 0.0 }
 0x44e   : > { %v7777_v56 = vpack.c.bf16 %v6680_v52, %v6679_v51 }
 0x450   : > { %6762 = vst [vmem:[%s9866_s24 + $0x38] sm:$0xff] %v7777_v56 }
 0x489   : > { %v6658_v7 = vpop.f32.mrb[16].mxu0 }
 0x48a   : > { %v7797_v48 = vadd.f32 %v6658_v7, %v1194_v59  ;;  %v6660_v61 = vpop.f32.mrb[17].mxu0 }
 0x48b   : > { %v7798_v53 = vadd.f32 %v6660_v61, %v1198_v49  ;;  %v6662_v21 = vpop.f32.mrb[18].mxu0 }
 0x48c   : > { %v6681_v34 = vmax.f32 %v7797_v48, 0.0  ;;  %v6663_v62 = vpop.f32.mrb[19].mxu0 }
 0x48d   : > { %v6682_v63 = vmax.f32 %v7798_v53, 0.0 }
 0x48f   : > { %v7778_v0 = vpack.c.bf16 %v6682_v63, %v6681_v34 }
 0x491   : > { %6763 = vst [vmem:[%s9866_s24 + $0x40] sm:$0xff] %v7778_v0 }
 0x492 PF: > { %s16_s17 = sadd.s32 1, %s9310_s17   ;;  %s10501_s12 = smov %s9294_s13 }
 0x493   : > { %p13_p9 = scmp.ge.s32.totalorder %s16_s17, 18   ;;  %s10502_s13 = smov %s9298_s14 }
 0x494   : > { %s10503_s14 = smov %s9381_s23  ;;  %s10504_s15 = smov %s9306_s16 }
 0x495   : > { %s10505_s16 = smov %s10507_s19  ;;  %15 = sbr.rel (!%p13_p9) target bundleno = 4 (0x4), region = 78 }
 0x49c   :  { %6794 = vsyncpa [#allocation3], 1 }
 0x49d   :  { %6796 = vsyncpa [#allocation3 + $0x1], 1 }

// kernel: agent_forward.33
= control target key start
LH: loop header
LB: loop body
LE: loop exit
PB: predicated region body
PF: predicated region fallthrough
CT: control target
= control target key end

     0   :  { %v2977_v47 = vmov 1983009808   ;;  %v554_v49 = vlaneseq  ;;  %s4665_s0 = inlined_call_operand.vmem [shape: f32[2,4096], index: 0, kind: input, shape index: {}]   ;;  %s4666_s1 = inlined_call_operand.vmem [shape: f32[4096,10], index: 1, kind: input, shape index: {}]   ;;  %s4667_s2 = inlined_call_operand.vmem [shape: f32[1,10], index: 2, kind: input, shape index: {}]   ;;  %s4668_s3 = inlined_call_operand.hbm [shape: f32[2,10], index: 3, kind: output, shape index: {}]  }
   0x1   :  { %v39_v0 = vld [vmem:[%s4666_s1 + $0x80] sm:$0xff]  ;;  %v40_v1 = vld [vmem:[%s4666_s1 + $0x88] sm:$0xff]  ;;  %v41_v11 = vld [vmem:[%s4666_s1 + $0x90] sm:$0xff]  ;;  %v552_v48 = vunpack.c.l.s4 %v2977_v47 }
   0x2   :  { %v23_v2 = vld [vmem:[%s4666_s1] sm:$0xff]  ;;  %v2427_v3 = vpack.c.bf16 %v40_v1, %v39_v0  ;;  %v24_v4 = vld [vmem:[%s4666_s1 + $0x8] sm:$0xff]  ;;  %v42_v13 = vld [vmem:[%s4666_s1 + $0x98] sm:$0xff]  ;;  %v555_v0 = vshrl.u32 %v554_v49, 7 }
   0x3   :  { %v71_v5 = vld [vmem:[%s4666_s1 + $0x180] sm:$0xff]  ;;  %v72_v6 = vld [vmem:[%s4666_s1 + $0x188] sm:$0xff]  ;;  %v2429_v7 = vpack.c.bf16 %v24_v4, %v23_v2  ;;  %v25_v14 = vld [vmem:[%s4666_s1 + $0x10] sm:$0xff]  ;;  %v2431_v16 = vpack.c.bf16 %v42_v13, %v41_v11  ;;  %v553_v63 = vunpack.c.0.s8 %v552_v48 }
   0x4   :  { %v2459_v8 = vpack.c.bf16 %v72_v6, %v71_v5  ;;  %v55_v9 = vld [vmem:[%s4666_s1 + $0x100] sm:$0xff]  ;;  %v56_v10 = vld [vmem:[%s4666_s1 + $0x108] sm:$0xff]  ;;  %2428 = vmatprep.subr.bf16.mxu0 %v2427_v3  ;;  %v26_v15 = vld [vmem:[%s4666_s1 + $0x18] sm:$0xff] }
   0x5   :  { %v2461_v12 = vpack.c.bf16 %v56_v10, %v55_v9  ;;  %2430 = vmatpush3.bf16.msra.mxu0 %v2429_v7  ;;  %v2433_v17 = vpack.c.bf16 %v26_v15, %v25_v14  ;;  %v73_v18 = vld [vmem:[%s4666_s1 + $0x190] sm:$0xff]  ;;  %v74_v19 = vld [vmem:[%s4666_s1 + $0x198] sm:$0xff]  ;;  %v43_v23 = vld [vmem:[%s4666_s1 + $0xa0] sm:$0xff]  ;;  %v3149_v13 = vsub.s32 %v553_v63, %v555_v0 }
   0x6   :  { %2460 = vmatprep.subr.bf16.mxu1 %v2459_v8  ;;  %v57_v20 = vld [vmem:[%s4666_s1 + $0x110] sm:$0xff]  ;;  %v2463_v21 = vpack.c.bf16 %v74_v19, %v73_v18  ;;  %v58_v22 = vld [vmem:[%s4666_s1 + $0x118] sm:$0xff]  ;;  %v44_v24 = vld [vmem:[%s4666_s1 + $0xa8] sm:$0xff]  ;;  %2432 = vmatprep.subr.bf16.mxu0 %v2431_v16 }
   0x7   :  { %2462 = vmatpush3.bf16.msra.mxu1 %v2461_v12  ;;  %v2465_v25 = vpack.c.bf16 %v58_v22, %v57_v20  ;;  %v2435_v26 = vpack.c.bf16 %v44_v24, %v43_v23  ;;  %v27_v27 = vld [vmem:[%s4666_s1 + $0x20] sm:$0xff]  ;;  %v28_v28 = vld [vmem:[%s4666_s1 + $0x28] sm:$0xff]  ;;  %v45_v35 = vld [vmem:[%s4666_s1 + $0xb0] sm:$0xff] }
   0x8   :  { %v75_v29 = vld [vmem:[%s4666_s1 + $0x1a0] sm:$0xff]  ;;  %2464 = vmatprep.subr.bf16.mxu1 %v2463_v21  ;;  %v76_v30 = vld [vmem:[%s4666_s1 + $0x1a8] sm:$0xff]  ;;  %v2437_v33 = vpack.c.bf16 %v28_v28, %v27_v27  ;;  %v46_v36 = vld [vmem:[%s4666_s1 + $0xb8] sm:$0xff] }
   0x9   :  { %v59_v31 = vld [vmem:[%s4666_s1 + $0x120] sm:$0xff]  ;;  %v60_v32 = vld [vmem:[%s4666_s1 + $0x128] sm:$0xff]  ;;  %2434 = vmatpush3.bf16.msra.mxu0 %v2433_v17  ;;  %v2467_v34 = vpack.c.bf16 %v76_v30, %v75_v29  ;;  %v29_v37 = vld [vmem:[%s4666_s1 + $0x30] sm:$0xff]  ;;  %v2439_v39 = vpack.c.bf16 %v46_v36, %v45_v35 }
   0xa   :  { %2436 = vmatprep.subr.bf16.mxu0 %v2435_v26  ;;  %v2469_v38 = vpack.c.bf16 %v60_v32, %v59_v31  ;;  %v30_v40 = vld [vmem:[%s4666_s1 + $0x38] sm:$0xff]  ;;  %v77_v41 = vld [vmem:[%s4666_s1 + $0x1b0] sm:$0xff]  ;;  %v47_v46 = vld [vmem:[%s4666_s1 + $0xc0] sm:$0xff] }
   0xb   :  { %2466 = vmatpush3.bf16.msra.mxu1 %v2465_v25  ;;  %v78_v42 = vld [vmem:[%s4666_s1 + $0x1b8] sm:$0xff]  ;;  %v61_v44 = vld [vmem:[%s4666_s1 + $0x130] sm:$0xff]  ;;  %v48_v50 = vld [vmem:[%s4666_s1 + $0xc8] sm:$0xff]  ;;  %v2441_v51 = vpack.c.bf16 %v30_v40, %v29_v37 }
   0xc   :  { %2468 = vmatprep.subr.bf16.mxu1 %v2467_v34  ;;  %v2471_v43 = vpack.c.bf16 %v78_v42, %v77_v41  ;;  %v62_v45 = vld [vmem:[%s4666_s1 + $0x138] sm:$0xff]  ;;  %v79_v52 = vld [vmem:[%s4666_s1 + $0x1c0] sm:$0xff]  ;;  %v80_v53 = vld [vmem:[%s4666_s1 + $0x1c8] sm:$0xff]  ;;  %v2443_v55 = vpack.c.bf16 %v48_v50, %v47_v46 }
   0xd   :  { %2438 = vmatpush3.bf16.msra.mxu0 %v2437_v33  ;;  %v2473_v54 = vpack.c.bf16 %v62_v45, %v61_v44  ;;  %v31_v56 = vld [vmem:[%s4666_s1 + $0x40] sm:$0xff]  ;;  %v32_v57 = vld [vmem:[%s4666_s1 + $0x48] sm:$0xff]  ;;  %v2475_v59 = vpack.c.bf16 %v80_v53, %v79_v52  ;;  %v49_v61 = vld [vmem:[%s4666_s1 + $0xd0] sm:$0xff] }
   0xe   :  { %2440 = vmatprep.subr.bf16.mxu0 %v2439_v39  ;;  %v63_v58 = vld [vmem:[%s4666_s1 + $0x140] sm:$0xff]  ;;  %v64_v60 = vld [vmem:[%s4666_s1 + $0x148] sm:$0xff]  ;;  %v50_v62 = vld [vmem:[%s4666_s1 + $0xd8] sm:$0xff]  ;;  %v2445_v3 = vpack.c.bf16 %v32_v57, %v31_v56 }
   0xf   :  { %2470 = vmatpush3.bf16.msra.mxu1 %v2469_v38  ;;  %v81_v1 = vld [vmem:[%s4666_s1 + $0x1d0] sm:$0xff]  ;;  %v82_v2 = vld [vmem:[%s4666_s1 + $0x1d8] sm:$0xff]  ;;  %v2477_v4 = vpack.c.bf16 %v64_v60, %v63_v58  ;;  %v2447_v5 = vpack.c.bf16 %v50_v62, %v49_v61  ;;  %v51_v11 = vld [vmem:[%s4666_s1 + $0xe0] sm:$0xff] }
  0x10   :  { %2472 = vmatprep.subr.bf16.mxu1 %v2471_v43  ;;  %v33_v6 = vld [vmem:[%s4666_s1 + $0x50] sm:$0xff]  ;;  %v34_v7 = vld [vmem:[%s4666_s1 + $0x58] sm:$0xff]  ;;  %v2479_v9 = vpack.c.bf16 %v82_v2, %v81_v1  ;;  %v52_v12 = vld [vmem:[%s4666_s1 + $0xe8] sm:$0xff] }
  0x11   :  { %2442 = vmatpush3.bf16.msra.mxu0 %v2441_v51  ;;  %v65_v8 = vld [vmem:[%s4666_s1 + $0x150] sm:$0xff]  ;;  %v66_v10 = vld [vmem:[%s4666_s1 + $0x158] sm:$0xff]  ;;  %v83_v14 = vld [vmem:[%s4666_s1 + $0x1e0] sm:$0xff]  ;;  %v2449_v16 = vpack.c.bf16 %v34_v7, %v33_v6  ;;  %v2451_v19 = vpack.c.bf16 %v52_v12, %v51_v11 }
  0x12   :  { %2444 = vmatprep.subr.bf16.mxu0 %v2443_v55  ;;  %v84_v15 = vld [vmem:[%s4666_s1 + $0x1e8] sm:$0xff]  ;;  %v35_v17 = vld [vmem:[%s4666_s1 + $0x60] sm:$0xff]  ;;  %v2481_v18 = vpack.c.bf16 %v66_v10, %v65_v8  ;;  %v53_v25 = vld [vmem:[%s4666_s1 + $0xf0] sm:$0xff] }
  0x13   :  { %2474 = vmatpush3.bf16.msra.mxu1 %v2473_v54  ;;  %v36_v20 = vld [vmem:[%s4666_s1 + $0x68] sm:$0xff]  ;;  %v67_v21 = vld [vmem:[%s4666_s1 + $0x160] sm:$0xff]  ;;  %v2483_v23 = vpack.c.bf16 %v84_v15, %v83_v14  ;;  %v54_v26 = vld [vmem:[%s4666_s1 + $0xf8] sm:$0xff] }
  0x14   :  { %2476 = vmatprep.subr.bf16.mxu1 %v2475_v59  ;;  %v15_v22 = vld [vmem:[%s4665_s0] sm:$0xff]  ;;  %v68_v24 = vld [vmem:[%s4666_s1 + $0x168] sm:$0xff]  ;;  %v85_v29 = vld [vmem:[%s4666_s1 + $0x1f0] sm:$0xff]  ;;  %v2453_v31 = vpack.c.bf16 %v36_v20, %v35_v17  ;;  %v2455_v35 = vpack.c.bf16 %v54_v26, %v53_v25 }
  0x15   :  { %2446 = vmatpush3.bf16.msra.mxu0 %v2445_v3  ;;  %v557_v27 = vrot.slane %v15_v22, %v3149_v13  ;;  %v550_v28 = vcombine.high %v15_v22, %v15_v22  ;;  %v86_v30 = vld [vmem:[%s4666_s1 + $0x1f8] sm:$0xff]  ;;  %v2485_v34 = vpack.c.bf16 %v68_v24, %v67_v21  ;;  %v37_v36 = vld [vmem:[%s4666_s1 + $0x70] sm:$0xff]  ;;  %v103_v41 = vld [vmem:[%s4666_s1 + $0x280] sm:$0xff] }
  0x16   :  { %2448 = vmatprep.subr.bf16.mxu0 %v2447_v5  ;;  %v38_v37 = vld [vmem:[%s4666_s1 + $0x78] sm:$0xff]  ;;  %v69_v38 = vld [vmem:[%s4666_s1 + $0x170] sm:$0xff]  ;;  %v2487_v39 = vpack.c.bf16 %v86_v30, %v85_v29  ;;  %v104_v42 = vld [vmem:[%s4666_s1 + $0x288] sm:$0xff] }
  0x17   :  { %2478 = vmatpush3.bf16.msra.mxu1 %v2477_v4  ;;  %v565_v32 = vcombine.high %v557_v27, %v557_v27  ;;  %v564_v33 = vrot.slane %v550_v28, %v3149_v13  ;;  %v70_v40 = vld [vmem:[%s4666_s1 + $0x178] sm:$0xff]  ;;  %v135_v44 = vld [vmem:[%s4666_s1 + $0x380] sm:$0xff]  ;;  %v136_v45 = vld [vmem:[%s4666_s1 + $0x388] sm:$0xff]  ;;  %v2457_v46 = vpack.c.bf16 %v38_v37, %v37_v36  ;;  %v2491_v48 = vpack.c.bf16 %v104_v42, %v103_v41 }
  0x18   :  { %2480 = vmatprep.subr.bf16.mxu1 %v2479_v9  ;;  %v2489_v47 = vpack.c.bf16 %v70_v40, %v69_v38  ;;  %v87_v49 = vld [vmem:[%s4666_s1 + $0x200] sm:$0xff]  ;;  %v88_v50 = vld [vmem:[%s4666_s1 + $0x208] sm:$0xff]  ;;  %v2523_v52 = vpack.c.bf16 %v136_v45, %v135_v44  ;;  %v105_v54 = vld [vmem:[%s4666_s1 + $0x290] sm:$0xff] }
  0x19   :  { %2450 = vmatpush3.bf16.msra.mxu0 %v2449_v16  ;;  %782 = vmatprep.mubr.f32.mxu0 %v565_v32  ;;  %v566_v43 = vcombine.high %v564_v33, %v564_v33  ;;  %v119_v51 = vld [vmem:[%s4666_s1 + $0x300] sm:$0xff]  ;;  %v120_v53 = vld [vmem:[%s4666_s1 + $0x308] sm:$0xff]  ;;  %v106_v55 = vld [vmem:[%s4666_s1 + $0x298] sm:$0xff]  ;;  %v2493_v58 = vpack.c.bf16 %v88_v50, %v87_v49 }
  0x1a   :  { %2452 = vmatprep.subr.bf16.mxu0 %v2451_v19  ;;  %v137_v56 = vld [vmem:[%s4666_s1 + $0x390] sm:$0xff]  ;;  %v138_v57 = vld [vmem:[%s4666_s1 + $0x398] sm:$0xff]  ;;  %v2525_v59 = vpack.c.bf16 %v120_v53, %v119_v51  ;;  %v2495_v60 = vpack.c.bf16 %v106_v55, %v105_v54  ;;  %v107_v2 = vld [vmem:[%s4666_s1 + $0x2a0] sm:$0xff] }
  0x1b   :  { %2482 = vmatpush3.bf16.msra.mxu1 %v2481_v18  ;;  %852 = vmatprep.mubr.f32.mxu1 %v566_v43  ;;  %v89_v61 = vld [vmem:[%s4666_s1 + $0x210] sm:$0xff]  ;;  %v90_v62 = vld [vmem:[%s4666_s1 + $0x218] sm:$0xff]  ;;  %v2527_v0 = vpack.c.bf16 %v138_v57, %v137_v56  ;;  %v108_v3 = vld [vmem:[%s4666_s1 + $0x2a8] sm:$0xff] }
  0x1c   :  { %2484 = vmatprep.subr.bf16.mxu1 %v2483_v23  ;;  %v121_v63 = vld [vmem:[%s4666_s1 + $0x310] sm:$0xff]  ;;  %v122_v1 = vld [vmem:[%s4666_s1 + $0x318] sm:$0xff]  ;;  %v139_v4 = vld [vmem:[%s4666_s1 + $0x3a0] sm:$0xff]  ;;  %v2497_v6 = vpack.c.bf16 %v90_v62, %v89_v61  ;;  %v2499_v8 = vpack.c.bf16 %v108_v3, %v107_v2 }
  0x1d   :  { %2454 = vmatpush3.bf16.msra.mxu0 %v2453_v31  ;;  %v140_v5 = vld [vmem:[%s4666_s1 + $0x3a8] sm:$0xff]  ;;  %v2529_v7 = vpack.c.bf16 %v122_v1, %v121_v63  ;;  %v91_v9 = vld [vmem:[%s4666_s1 + $0x220] sm:$0xff]  ;;  %v109_v15 = vld [vmem:[%s4666_s1 + $0x2b0] sm:$0xff] }
  0x1e   :  { %2456 = vmatprep.subr.bf16.mxu0 %v2455_v35  ;;  %v92_v10 = vld [vmem:[%s4666_s1 + $0x228] sm:$0xff]  ;;  %v123_v11 = vld [vmem:[%s4666_s1 + $0x320] sm:$0xff]  ;;  %v2531_v12 = vpack.c.bf16 %v140_v5, %v139_v4  ;;  %v110_v16 = vld [vmem:[%s4666_s1 + $0x2b8] sm:$0xff] }
  0x1f   :  { %2486 = vmatpush3.bf16.msra.mxu1 %v2485_v34  ;;  %v124_v14 = vld [vmem:[%s4666_s1 + $0x328] sm:$0xff]  ;;  %v141_v17 = vld [vmem:[%s4666_s1 + $0x3b0] sm:$0xff]  ;;  %v142_v18 = vld [vmem:[%s4666_s1 + $0x3b8] sm:$0xff]  ;;  %v2501_v19 = vpack.c.bf16 %v92_v10, %v91_v9  ;;  %v2503_v21 = vpack.c.bf16 %v110_v16, %v109_v15 }
  0x20   :  { %2488 = vmatprep.subr.bf16.mxu1 %v2487_v39  ;;  %v2533_v20 = vpack.c.bf16 %v124_v14, %v123_v11  ;;  %v93_v22 = vld [vmem:[%s4666_s1 + $0x230] sm:$0xff]  ;;  %v94_v23 = vld [vmem:[%s4666_s1 + $0x238] sm:$0xff]  ;;  %v2535_v25 = vpack.c.bf16 %v142_v18, %v141_v17  ;;  %v112_v28 = vld [vmem:[%s4666_s1 + $0x2c8] sm:$0xff] }
  0x21   :  { %2458 = vmatpush3.bf16.msra.mxu0 %v2457_v46  ;;  %v125_v24 = vld [vmem:[%s4666_s1 + $0x330] sm:$0xff]  ;;  %v126_v26 = vld [vmem:[%s4666_s1 + $0x338] sm:$0xff]  ;;  %v143_v29 = vld [vmem:[%s4666_s1 + $0x3c0] sm:$0xff]  ;;  %v2505_v32 = vpack.c.bf16 %v94_v23, %v93_v22 }
  0x22   :  { %2492 = vmatprep.subr.bf16.mxu0 %v2491_v48  ;;  %v144_v30 = vld [vmem:[%s4666_s1 + $0x3c8] sm:$0xff]  ;;  %v2537_v35 = vpack.c.bf16 %v126_v26, %v125_v24  ;;  %v95_v37 = vld [vmem:[%s4666_s1 + $0x240] sm:$0xff]  ;;  %v113_v42 = vld [vmem:[%s4666_s1 + $0x2d0] sm:$0xff] }
  0x23   :  { %2490 = vmatpush3.bf16.msra.mxu1 %v2489_v47  ;;  %v16_v31 = vld [vmem:[%s4665_s0 + $0x8] sm:$0xff]  ;;  %v127_v39 = vld [vmem:[%s4666_s1 + $0x340] sm:$0xff]  ;;  %v2539_v40 = vpack.c.bf16 %v144_v30, %v143_v29  ;;  %v114_v43 = vld [vmem:[%s4666_s1 + $0x2d8] sm:$0xff] }
  0x24   :  { %2524 = vmatprep.subr.bf16.mxu1 %v2523_v52  ;;  %783 = vmatmul.mubr.f32.vlgmr.msra.gmra.mrb[0].mxu0 %v557_v27  ;;  %v111_v27 = vld [vmem:[%s4666_s1 + $0x2c0] sm:$0xff]  ;;  %v567_v34 = vcombine.high %v16_v31, %v16_v31  ;;  %v96_v38 = vld [vmem:[%s4666_s1 + $0x248] sm:$0xff]  ;;  %v145_v46 = vld [vmem:[%s4666_s1 + $0x3d0] sm:$0xff]  ;;  %v2511_v51 = vpack.c.bf16 %v114_v43, %v113_v42 }
  0x25   :  { %2494 = vmatpush3.bf16.msra.mxu0 %v2493_v58  ;;  %v2507_v36 = vpack.c.bf16 %v112_v28, %v111_v27  ;;  %v128_v41 = vld [vmem:[%s4666_s1 + $0x348] sm:$0xff]  ;;  %v146_v47 = vld [vmem:[%s4666_s1 + $0x3d8] sm:$0xff]  ;;  %v2509_v48 = vpack.c.bf16 %v96_v38, %v95_v37  ;;  %v97_v52 = vld [vmem:[%s4666_s1 + $0x250] sm:$0xff] }
  0x26   :  { %853 = vmatmul.mubr.f32.vlgmr.msra.gmra.mrb[0].mxu1 %v564_v33  ;;  %2496 = vmatprep.subr.bf16.mxu0 %v2495_v60  ;;  %v3310_v33 = vrot.slane %v16_v31, %v3149_v13  ;;  %v3333_v45 = vrot.slane %v567_v34, %v3149_v13  ;;  %v2541_v50 = vpack.c.bf16 %v128_v41, %v127_v39  ;;  %v98_v53 = vld [vmem:[%s4666_s1 + $0x258] sm:$0xff]  ;;  %v129_v54 = vld [vmem:[%s4666_s1 + $0x350] sm:$0xff]  ;;  %v115_v57 = vld [vmem:[%s4666_s1 + $0x2e0] sm:$0xff] }
  0x27   :  { %2526 = vmatpush3.bf16.msra.mxu1 %v2525_v59  ;;  %v2543_v55 = vpack.c.bf16 %v146_v47, %v145_v46  ;;  %v130_v56 = vld [vmem:[%s4666_s1 + $0x358] sm:$0xff]  ;;  %v116_v58 = vld [vmem:[%s4666_s1 + $0x2e8] sm:$0xff]  ;;  %v147_v59 = vld [vmem:[%s4666_s1 + $0x3e0] sm:$0xff]  ;;  %v2513_v61 = vpack.c.bf16 %v98_v53, %v97_v52 }
  0x28   :  { %2528 = vmatprep.subr.bf16.mxu1 %v2527_v0  ;;  %v582_v44 = vcombine.high %v3310_v33, %v3310_v33  ;;  %v583_v49 = vcombine.high %v3333_v45, %v3333_v45  ;;  %v148_v60 = vld [vmem:[%s4666_s1 + $0x3e8] sm:$0xff]  ;;  %v2545_v62 = vpack.c.bf16 %v130_v56, %v129_v54  ;;  %v2515_v63 = vpack.c.bf16 %v116_v58, %v115_v57  ;;  %v99_v0 = vld [vmem:[%s4666_s1 + $0x260] sm:$0xff]  ;;  %v117_v5 = vld [vmem:[%s4666_s1 + $0x2f0] sm:$0xff] }
  0x29   :  { %2498 = vmatpush3.bf16.msra.mxu0 %v2497_v6  ;;  %v100_v1 = vld [vmem:[%s4666_s1 + $0x268] sm:$0xff]  ;;  %v131_v2 = vld [vmem:[%s4666_s1 + $0x360] sm:$0xff]  ;;  %v2547_v3 = vpack.c.bf16 %v148_v60, %v147_v59  ;;  %v118_v6 = vld [vmem:[%s4666_s1 + $0x2f8] sm:$0xff] }
  0x2a   :  { %2500 = vmatprep.subr.bf16.mxu0 %v2499_v8  ;;  %922 = vmatprep.mubr.f32.mxu0 %v582_v44  ;;  %v132_v4 = vld [vmem:[%s4666_s1 + $0x368] sm:$0xff]  ;;  %v150_v8 = vld [vmem:[%s4666_s1 + $0x3f8] sm:$0xff]  ;;  %v2517_v9 = vpack.c.bf16 %v100_v1, %v99_v0  ;;  %v2519_v11 = vpack.c.bf16 %v118_v6, %v117_v5  ;;  %v133_v15 = vld [vmem:[%s4666_s1 + $0x370] sm:$0xff] }
  0x2b   :  { %2530 = vmatpush3.bf16.msra.mxu1 %v2529_v7  ;;  %992 = vmatprep.mubr.f32.mxu1 %v583_v49  ;;  %v149_v7 = vld [vmem:[%s4666_s1 + $0x3f0] sm:$0xff]  ;;  %v2549_v10 = vpack.c.bf16 %v132_v4, %v131_v2  ;;  %v102_v14 = vld [vmem:[%s4666_s1 + $0x278] sm:$0xff]  ;;  %v167_v18 = vld [vmem:[%s4666_s1 + $0x480] sm:$0xff] }
  0x2c   :  { %2532 = vmatprep.subr.bf16.mxu1 %v2531_v12  ;;  %v101_v12 = vld [vmem:[%s4666_s1 + $0x270] sm:$0xff]  ;;  %v2551_v16 = vpack.c.bf16 %v150_v8, %v149_v7  ;;  %v134_v17 = vld [vmem:[%s4666_s1 + $0x378] sm:$0xff]  ;;  %v151_v23 = vld [vmem:[%s4666_s1 + $0x400] sm:$0xff] }
  0x2d   :  { %2502 = vmatpush3.bf16.msra.mxu0 %v2501_v19  ;;  %v168_v19 = vld [vmem:[%s4666_s1 + $0x488] sm:$0xff]  ;;  %v2521_v22 = vpack.c.bf16 %v102_v14, %v101_v12  ;;  %v2553_v24 = vpack.c.bf16 %v134_v17, %v133_v15  ;;  %v183_v27 = vld [vmem:[%s4666_s1 + $0x500] sm:$0xff]  ;;  %v169_v30 = vld [vmem:[%s4666_s1 + $0x490] sm:$0xff] }
  0x2e   :  { %2504 = vmatprep.subr.bf16.mxu0 %v2503_v21  ;;  %v200_v21 = vld [vmem:[%s4666_s1 + $0x588] sm:$0xff]  ;;  %v170_v31 = vld [vmem:[%s4666_s1 + $0x498] sm:$0xff]  ;;  %v17_v37 = vld [vmem:[%s4665_s0 + $0x10] sm:$0xff] }
  0x2f   :  { %2534 = vmatpush3.bf16.msra.mxu1 %v2533_v20  ;;  %v199_v20 = vld [vmem:[%s4666_s1 + $0x580] sm:$0xff]  ;;  %v152_v26 = vld [vmem:[%s4666_s1 + $0x408] sm:$0xff]  ;;  %v202_v34 = vld [vmem:[%s4666_s1 + $0x598] sm:$0xff]  ;;  %v2559_v38 = vpack.c.bf16 %v170_v31, %v169_v30  ;;  %v3452_v42 = vrot.slane %v17_v37, %v3149_v13  ;;  %v584_v43 = vcombine.high %v17_v37, %v17_v37 }
  0x30   :  { %2536 = vmatprep.subr.bf16.mxu1 %v2535_v25  ;;  %v2555_v25 = vpack.c.bf16 %v168_v19, %v167_v18  ;;  %v184_v28 = vld [vmem:[%s4666_s1 + $0x508] sm:$0xff]  ;;  %v2587_v29 = vpack.c.bf16 %v200_v21, %v199_v20  ;;  %v153_v39 = vld [vmem:[%s4666_s1 + $0x410] sm:$0xff]  ;;  %v186_v46 = vld [vmem:[%s4666_s1 + $0x518] sm:$0xff] }
  0x31   :  { %2506 = vmatpush3.bf16.msra.mxu0 %v2505_v32  ;;  %v201_v32 = vld [vmem:[%s4666_s1 + $0x590] sm:$0xff]  ;;  %v171_v47 = vld [vmem:[%s4666_s1 + $0x4a0] sm:$0xff]  ;;  %v3473_v52 = vrot.slane %v584_v43, %v3149_v13  ;;  %v156_v56 = vld [vmem:[%s4666_s1 + $0x428] sm:$0xff] }
  0x32   :  { %2508 = vmatprep.subr.bf16.mxu0 %v2507_v36  ;;  %v2589_v36 = vpack.c.bf16 %v184_v28, %v183_v27  ;;  %v185_v41 = vld [vmem:[%s4666_s1 + $0x510] sm:$0xff]  ;;  %v2591_v44 = vpack.c.bf16 %v202_v34, %v201_v32  ;;  %v203_v49 = vld [vmem:[%s4666_s1 + $0x5a0] sm:$0xff]  ;;  %v188_v59 = vld [vmem:[%s4666_s1 + $0x528] sm:$0xff] }
  0x33   :  { %2538 = vmatpush3.bf16.msra.mxu1 %v2537_v35  ;;  %v2557_v35 = vpack.c.bf16 %v152_v26, %v151_v23  ;;  %v187_v57 = vld [vmem:[%s4666_s1 + $0x520] sm:$0xff]  ;;  %v173_v60 = vld [vmem:[%s4666_s1 + $0x4b0] sm:$0xff]  ;;  %v158_v4 = vld [vmem:[%s4666_s1 + $0x438] sm:$0xff] }
  0x34   :  { %2540 = vmatprep.subr.bf16.mxu1 %v2539_v40  ;;  %v154_v40 = vld [vmem:[%s4666_s1 + $0x418] sm:$0xff]  ;;  %v2597_v1 = vpack.c.bf16 %v188_v59, %v187_v57  ;;  %v189_v5 = vld [vmem:[%s4666_s1 + $0x530] sm:$0xff]  ;;  %v175_v8 = vld [vmem:[%s4666_s1 + $0x4c0] sm:$0xff] }
  0x35   :  { %2510 = vmatpush3.bf16.msra.mxu0 %v2509_v48  ;;  %v172_v48 = vld [vmem:[%s4666_s1 + $0x4a8] sm:$0xff]  ;;  %v2561_v53 = vpack.c.bf16 %v154_v40, %v153_v39  ;;  %v190_v7 = vld [vmem:[%s4666_s1 + $0x538] sm:$0xff]  ;;  %v191_v18 = vld [vmem:[%s4666_s1 + $0x540] sm:$0xff] }
  0x36   :  { %2512 = vmatprep.subr.bf16.mxu0 %v2511_v51  ;;  %v599_v51 = vcombine.high %v3452_v42, %v3452_v42  ;;  %v2563_v54 = vpack.c.bf16 %v172_v48, %v171_v47  ;;  %v2601_v14 = vpack.c.bf16 %v190_v7, %v189_v5  ;;  %v160_v17 = vld [vmem:[%s4666_s1 + $0x448] sm:$0xff]  ;;  %v177_v21 = vld [vmem:[%s4666_s1 + $0x4d0] sm:$0xff]  ;;  %v194_v32 = vld [vmem:[%s4666_s1 + $0x558] sm:$0xff] }
  0x37   :  { %2542 = vmatpush3.bf16.msra.mxu1 %v2541_v50  ;;  %v204_v50 = vld [vmem:[%s4666_s1 + $0x5a8] sm:$0xff]  ;;  %v209_v23 = vld [vmem:[%s4666_s1 + $0x5d0] sm:$0xff]  ;;  %v179_v34 = vld [vmem:[%s4666_s1 + $0x4e0] sm:$0xff] }
  0x38   :  { %2544 = vmatprep.subr.bf16.mxu1 %v2543_v55  ;;  %v155_v55 = vld [vmem:[%s4666_s1 + $0x420] sm:$0xff]  ;;  %v2595_v58 = vpack.c.bf16 %v204_v50, %v203_v49  ;;  %v192_v20 = vld [vmem:[%s4666_s1 + $0x548] sm:$0xff]  ;;  %v161_v28 = vld [vmem:[%s4666_s1 + $0x450] sm:$0xff] }
  0x39   :  { %2514 = vmatpush3.bf16.msra.mxu0 %v2513_v61  ;;  %v174_v61 = vld [vmem:[%s4666_s1 + $0x4b8] sm:$0xff]  ;;  %v2565_v0 = vpack.c.bf16 %v156_v56, %v155_v55  ;;  %v2605_v26 = vpack.c.bf16 %v192_v20, %v191_v18  ;;  %v193_v30 = vld [vmem:[%s4666_s1 + $0x550] sm:$0xff]  ;;  %v212_v37 = vld [vmem:[%s4666_s1 + $0x5e8] sm:$0xff] }
  0x3a   :  { %2516 = vmatprep.subr.bf16.mxu0 %v2515_v63  ;;  %v206_v63 = vld [vmem:[%s4666_s1 + $0x5b8] sm:$0xff]  ;;  %v2567_v2 = vpack.c.bf16 %v174_v61, %v173_v60  ;;  %v2609_v39 = vpack.c.bf16 %v194_v32, %v193_v30  ;;  %v164_v43 = vld [vmem:[%s4666_s1 + $0x468] sm:$0xff]  ;;  %v181_v48 = vld [vmem:[%s4666_s1 + $0x4f0] sm:$0xff] }
  0x3b   :  { %2546 = vmatpush3.bf16.msra.mxu1 %v2545_v62  ;;  %v205_v62 = vld [vmem:[%s4666_s1 + $0x5b0] sm:$0xff]  ;;  %v196_v47 = vld [vmem:[%s4666_s1 + $0x568] sm:$0xff]  ;;  %v182_v49 = vld [vmem:[%s4666_s1 + $0x4f8] sm:$0xff] }
  0x3c   :  { %2548 = vmatprep.subr.bf16.mxu1 %v2547_v3  ;;  %v157_v3 = vld [vmem:[%s4666_s1 + $0x430] sm:$0xff]  ;;  %v2599_v6 = vpack.c.bf16 %v206_v63, %v205_v62  ;;  %v2583_v55 = vpack.c.bf16 %v182_v49, %v181_v48  ;;  %v166_v57 = vld [vmem:[%s4666_s1 + $0x478] sm:$0xff]  ;;  %v231_v60 = vld [vmem:[%s4666_s1 + $0x680] sm:$0xff] }
  0x3d   :  { %2518 = vmatpush3.bf16.msra.mxu0 %v2517_v9  ;;  %v176_v9 = vld [vmem:[%s4666_s1 + $0x4c8] sm:$0xff]  ;;  %v2569_v12 = vpack.c.bf16 %v158_v4, %v157_v3  ;;  %v213_v50 = vld [vmem:[%s4666_s1 + $0x5f0] sm:$0xff]  ;;  %v198_v59 = vld [vmem:[%s4666_s1 + $0x578] sm:$0xff] }
  0x3e   :  { %2520 = vmatprep.subr.bf16.mxu0 %v2519_v11  ;;  %v208_v11 = vld [vmem:[%s4666_s1 + $0x5c8] sm:$0xff]  ;;  %v2571_v15 = vpack.c.bf16 %v176_v9, %v175_v8  ;;  %v165_v56 = vld [vmem:[%s4666_s1 + $0x470] sm:$0xff]  ;;  %v263_v62 = vld [vmem:[%s4666_s1 + $0x780] sm:$0xff] }
  0x3f   :  { %2550 = vmatpush3.bf16.msra.mxu1 %v2549_v10  ;;  %v207_v10 = vld [vmem:[%s4666_s1 + $0x5c0] sm:$0xff]  ;;  %v232_v61 = vld [vmem:[%s4666_s1 + $0x688] sm:$0xff]  ;;  %v233_v9 = vld [vmem:[%s4666_s1 + $0x690] sm:$0xff] }
  0x40   :  { %2552 = vmatprep.subr.bf16.mxu1 %v2551_v16  ;;  %v159_v16 = vld [vmem:[%s4666_s1 + $0x440] sm:$0xff]  ;;  %v2603_v19 = vpack.c.bf16 %v208_v11, %v207_v10  ;;  %v264_v63 = vld [vmem:[%s4666_s1 + $0x788] sm:$0xff]  ;;  %v2619_v3 = vpack.c.bf16 %v232_v61, %v231_v60  ;;  %v234_v10 = vld [vmem:[%s4666_s1 + $0x698] sm:$0xff] }
  0x41   :  { %2522 = vmatpush3.bf16.msra.mxu0 %v2521_v22  ;;  %v178_v22 = vld [vmem:[%s4666_s1 + $0x4d8] sm:$0xff]  ;;  %v215_v4 = vld [vmem:[%s4666_s1 + $0x600] sm:$0xff]  ;;  %v216_v5 = vld [vmem:[%s4666_s1 + $0x608] sm:$0xff]  ;;  %v2651_v7 = vpack.c.bf16 %v264_v63, %v263_v62  ;;  %v2623_v18 = vpack.c.bf16 %v234_v10, %v233_v9 }
  0x42   :  { %2556 = vmatprep.subr.bf16.mxu0 %v2555_v25  ;;  %v2573_v25 = vpack.c.bf16 %v160_v17, %v159_v16  ;;  %v2575_v27 = vpack.c.bf16 %v178_v22, %v177_v21  ;;  %v248_v8 = vld [vmem:[%s4666_s1 + $0x708] sm:$0xff]  ;;  %v2621_v16 = vpack.c.bf16 %v216_v5, %v215_v4  ;;  %v218_v20 = vld [vmem:[%s4666_s1 + $0x618] sm:$0xff]  ;;  %v249_v21 = vld [vmem:[%s4666_s1 + $0x710] sm:$0xff] }
  0x43   :  { %2554 = vmatpush3.bf16.msra.mxu1 %v2553_v24  ;;  %v210_v24 = vld [vmem:[%s4666_s1 + $0x5d8] sm:$0xff]  ;;  %v253_v48 = vld [vmem:[%s4666_s1 + $0x730] sm:$0xff]  ;;  %v256_v61 = vld [vmem:[%s4666_s1 + $0x748] sm:$0xff] }
  0x44   :  { %2588 = vmatprep.subr.bf16.mxu1 %v2587_v29  ;;  %923 = vmatmul.mubr.f32.vlgmr.msra.gmra.mrb[2].mxu0 %v3310_v33  ;;  %v2593_v33 = vpack.c.bf16 %v186_v46, %v185_v41  ;;  %v162_v29 = vld [vmem:[%s4666_s1 + $0x458] sm:$0xff]  ;;  %v2607_v31 = vpack.c.bf16 %v210_v24, %v209_v23  ;;  %v163_v41 = vld [vmem:[%s4666_s1 + $0x460] sm:$0xff]  ;;  %v241_v62 = vld [vmem:[%s4666_s1 + $0x6d0] sm:$0xff] }
  0x45   :  { %2558 = vmatpush3.bf16.msra.mxu0 %v2557_v35  ;;  %1062 = vmatprep.mubr.f32.mxu0 %v599_v51  ;;  %v180_v35 = vld [vmem:[%s4666_s1 + $0x4e8] sm:$0xff]  ;;  %v214_v51 = vld [vmem:[%s4666_s1 + $0x5f8] sm:$0xff]  ;;  %v235_v24 = vld [vmem:[%s4666_s1 + $0x6a0] sm:$0xff] }
  0x46   :  { %993 = vmatmul.mubr.f32.vlgmr.msra.gmra.mrb[2].mxu1 %v3333_v45  ;;  %2560 = vmatprep.subr.bf16.mxu0 %v2559_v38  ;;  %v600_v45 = vcombine.high %v3473_v52, %v3473_v52  ;;  %v2577_v38 = vpack.c.bf16 %v162_v29, %v161_v28  ;;  %v2579_v40 = vpack.c.bf16 %v180_v35, %v179_v34  ;;  %v250_v23 = vld [vmem:[%s4666_s1 + $0x718] sm:$0xff]  ;;  %v268_v28 = vld [vmem:[%s4666_s1 + $0x7a8] sm:$0xff]  ;;  %v251_v35 = vld [vmem:[%s4666_s1 + $0x720] sm:$0xff] }
  0x47   :  { %2590 = vmatpush3.bf16.msra.mxu1 %v2589_v36  ;;  %v211_v36 = vld [vmem:[%s4666_s1 + $0x5e0] sm:$0xff]  ;;  %v220_v34 = vld [vmem:[%s4666_s1 + $0x628] sm:$0xff]  ;;  %v242_v63 = vld [vmem:[%s4666_s1 + $0x6d8] sm:$0xff] }
  0x48   :  { %2592 = vmatprep.subr.bf16.mxu1 %v2591_v44  ;;  %1132 = vmatprep.mubr.f32.mxu1 %v600_v45  ;;  %v195_v44 = vld [vmem:[%s4666_s1 + $0x560] sm:$0xff]  ;;  %v2611_v46 = vpack.c.bf16 %v212_v37, %v211_v36  ;;  %v197_v45 = vld [vmem:[%s4666_s1 + $0x570] sm:$0xff]  ;;  %v2639_v4 = vpack.c.bf16 %v242_v63, %v241_v62  ;;  %v258_v9 = vld [vmem:[%s4666_s1 + $0x758] sm:$0xff] }
  0x49   :  { %2562 = vmatpush3.bf16.msra.mxu0 %v2561_v53  ;;  %v2581_v53 = vpack.c.bf16 %v164_v43, %v163_v41  ;;  %v237_v37 = vld [vmem:[%s4666_s1 + $0x6b0] sm:$0xff]  ;;  %v243_v10 = vld [vmem:[%s4666_s1 + $0x6e0] sm:$0xff] }
  0x4a   :  { %2564 = vmatprep.subr.bf16.mxu0 %v2563_v54  ;;  %v2613_v54 = vpack.c.bf16 %v196_v47, %v195_v44  ;;  %v222_v47 = vld [vmem:[%s4666_s1 + $0x638] sm:$0xff]  ;;  %v225_v5 = vld [vmem:[%s4666_s1 + $0x650] sm:$0xff] }
  0x4b   :  { %2594 = vmatpush3.bf16.msra.mxu1 %v2593_v33  ;;  %v18_v33 = vld [vmem:[%s4665_s0 + $0x18] sm:$0xff]  ;;  %v313_v62 = vld [vmem:[%s4666_s1 + $0x910] sm:$0xff] }
  0x4c   :  { %2596 = vmatprep.subr.bf16.mxu1 %v2595_v58  ;;  %v2615_v58 = vpack.c.bf16 %v214_v51, %v213_v50  ;;  %v3644_v11 = vrot.slane %v18_v33, %v3149_v13  ;;  %v254_v50 = vld [vmem:[%s4666_s1 + $0x738] sm:$0xff]  ;;  %v239_v51 = vld [vmem:[%s4666_s1 + $0x6c0] sm:$0xff] }
  0x4d   :  { %2566 = vmatpush3.bf16.msra.mxu0 %v2565_v0  ;;  %v601_v0 = vcombine.high %v18_v33, %v18_v33  ;;  %v271_v33 = vld [vmem:[%s4666_s1 + $0x7c0] sm:$0xff] }
  0x4e   :  { %2568 = vmatprep.subr.bf16.mxu0 %v2567_v2  ;;  %v2617_v2 = vpack.c.bf16 %v198_v59, %v197_v45  ;;  %v223_v45 = vld [vmem:[%s4666_s1 + $0x640] sm:$0xff] }
  0x4f   :  { %2598 = vmatpush3.bf16.msra.mxu1 %v2597_v1  ;;  %v2585_v1 = vpack.c.bf16 %v166_v57, %v165_v56  ;;  %v2665_v56 = vpack.c.bf16 %v254_v50, %v253_v48  ;;  %v255_v59 = vld [vmem:[%s4666_s1 + $0x740] sm:$0xff]  ;;  %v280_v48 = vld [vmem:[%s4666_s1 + $0x808] sm:$0xff] }
  0x50   :  { %2600 = vmatprep.subr.bf16.mxu1 %v2599_v6  ;;  %v247_v6 = vld [vmem:[%s4666_s1 + $0x700] sm:$0xff] }
  0x51   :  { %2570 = vmatpush3.bf16.msra.mxu0 %v2569_v12  ;;  %v265_v12 = vld [vmem:[%s4666_s1 + $0x790] sm:$0xff]  ;;  %v2653_v17 = vpack.c.bf16 %v248_v8, %v247_v6  ;;  %v226_v6 = vld [vmem:[%s4666_s1 + $0x658] sm:$0xff] }
  0x52   :  { %2572 = vmatprep.subr.bf16.mxu0 %v2571_v15  ;;  %v3653_v15 = vrot.slane %v601_v0, %v3149_v13  ;;  %v273_v0 = vld [vmem:[%s4666_s1 + $0x7d0] sm:$0xff] }
  0x53   :  { %2602 = vmatpush3.bf16.msra.mxu1 %v2601_v14  ;;  %v266_v14 = vld [vmem:[%s4666_s1 + $0x798] sm:$0xff] }
  0x54   :  { %2604 = vmatprep.subr.bf16.mxu1 %v2603_v19  ;;  %v217_v19 = vld [vmem:[%s4666_s1 + $0x610] sm:$0xff]  ;;  %v2655_v22 = vpack.c.bf16 %v266_v14, %v265_v12  ;;  %v617_v29 = vcombine.high %v3653_v15, %v3653_v15  ;;  %v244_v12 = vld [vmem:[%s4666_s1 + $0x6e8] sm:$0xff]  ;;  %v275_v14 = vld [vmem:[%s4666_s1 + $0x7e0] sm:$0xff] }
  0x55   :  { %2574 = vmatpush3.bf16.msra.mxu0 %v2573_v25  ;;  %v236_v25 = vld [vmem:[%s4666_s1 + $0x6a8] sm:$0xff]  ;;  %v2625_v30 = vpack.c.bf16 %v218_v20, %v217_v19  ;;  %v2643_v19 = vpack.c.bf16 %v244_v12, %v243_v10  ;;  %v227_v20 = vld [vmem:[%s4666_s1 + $0x660] sm:$0xff] }
  0x56   :  { %2576 = vmatprep.subr.bf16.mxu0 %v2575_v27  ;;  %v267_v27 = vld [vmem:[%s4666_s1 + $0x7a0] sm:$0xff]  ;;  %v2627_v32 = vpack.c.bf16 %v236_v25, %v235_v24  ;;  %v260_v24 = vld [vmem:[%s4666_s1 + $0x768] sm:$0xff]  ;;  %v245_v25 = vld [vmem:[%s4666_s1 + $0x6f0] sm:$0xff] }
  0x57   :  { %2606 = vmatpush3.bf16.msra.mxu1 %v2605_v26  ;;  %v616_v26 = vcombine.high %v3644_v11, %v3644_v11  ;;  %v2659_v36 = vpack.c.bf16 %v268_v28, %v267_v27  ;;  %v277_v27 = vld [vmem:[%s4666_s1 + $0x7f0] sm:$0xff]  ;;  %v278_v28 = vld [vmem:[%s4666_s1 + $0x7f8] sm:$0xff]  ;;  %v284_v10 = vld [vmem:[%s4666_s1 + $0x828] sm:$0xff] }
  0x58   :  { %2608 = vmatprep.subr.bf16.mxu1 %v2607_v31  ;;  %v2657_v31 = vpack.c.bf16 %v250_v23, %v249_v21  ;;  %v228_v21 = vld [vmem:[%s4666_s1 + $0x668] sm:$0xff]  ;;  %v315_v12 = vld [vmem:[%s4666_s1 + $0x920] sm:$0xff] }
  0x59   :  { %2578 = vmatpush3.bf16.msra.mxu0 %v2577_v38  ;;  %v238_v38 = vld [vmem:[%s4666_s1 + $0x6b8] sm:$0xff] }
  0x5a   :  { %2580 = vmatprep.subr.bf16.mxu0 %v2579_v40  ;;  %v270_v40 = vld [vmem:[%s4666_s1 + $0x7b8] sm:$0xff]  ;;  %v2631_v44 = vpack.c.bf16 %v238_v38, %v237_v37  ;;  %v295_v37 = vld [vmem:[%s4666_s1 + $0x880] sm:$0xff]  ;;  %v296_v38 = vld [vmem:[%s4666_s1 + $0x888] sm:$0xff] }
  0x5b   :  { %2610 = vmatpush3.bf16.msra.mxu1 %v2609_v39  ;;  %v269_v39 = vld [vmem:[%s4666_s1 + $0x7b0] sm:$0xff] }
  0x5c   :  { %2612 = vmatprep.subr.bf16.mxu1 %v2611_v46  ;;  %v221_v46 = vld [vmem:[%s4666_s1 + $0x630] sm:$0xff]  ;;  %v2663_v49 = vpack.c.bf16 %v270_v40, %v269_v39  ;;  %v327_v39 = vld [vmem:[%s4666_s1 + $0x980] sm:$0xff]  ;;  %v328_v40 = vld [vmem:[%s4666_s1 + $0x988] sm:$0xff] }
  0x5d   :  { %2582 = vmatpush3.bf16.msra.mxu0 %v2581_v53  ;;  %v240_v53 = vld [vmem:[%s4666_s1 + $0x6c8] sm:$0xff]  ;;  %v2715_v50 = vpack.c.bf16 %v328_v40, %v327_v39  ;;  %v305_v39 = vld [vmem:[%s4666_s1 + $0x8d0] sm:$0xff]  ;;  %v306_v40 = vld [vmem:[%s4666_s1 + $0x8d8] sm:$0xff] }
  0x5e   :  { %2584 = vmatprep.subr.bf16.mxu0 %v2583_v55  ;;  %v2633_v55 = vpack.c.bf16 %v222_v47, %v221_v46  ;;  %v2635_v57 = vpack.c.bf16 %v240_v53, %v239_v51  ;;  %v2683_v46 = vpack.c.bf16 %v296_v38, %v295_v37  ;;  %v279_v47 = vld [vmem:[%s4666_s1 + $0x800] sm:$0xff]  ;;  %v312_v51 = vld [vmem:[%s4666_s1 + $0x908] sm:$0xff]  ;;  %v297_v53 = vld [vmem:[%s4666_s1 + $0x890] sm:$0xff] }
  0x5f   :  { %2614 = vmatpush3.bf16.msra.mxu1 %v2613_v54  ;;  %v272_v54 = vld [vmem:[%s4666_s1 + $0x7c8] sm:$0xff] }
  0x60   :  { %2616 = vmatprep.subr.bf16.mxu1 %v2615_v58  ;;  %v224_v58 = vld [vmem:[%s4666_s1 + $0x648] sm:$0xff]  ;;  %v2667_v60 = vpack.c.bf16 %v272_v54, %v271_v33  ;;  %v298_v33 = vld [vmem:[%s4666_s1 + $0x898] sm:$0xff] }
  0x61   :  { %2586 = vmatpush3.bf16.msra.mxu0 %v2585_v1  ;;  %v274_v1 = vld [vmem:[%s4666_s1 + $0x7d8] sm:$0xff]  ;;  %v320_v38 = vld [vmem:[%s4666_s1 + $0x948] sm:$0xff] }
  0x62   :  { %2620 = vmatprep.subr.bf16.mxu0 %v2619_v3  ;;  %v2669_v3 = vpack.c.bf16 %v256_v61, %v255_v59  ;;  %v2671_v8 = vpack.c.bf16 %v274_v1, %v273_v0  ;;  %v2687_v59 = vpack.c.bf16 %v298_v33, %v297_v53  ;;  %v282_v61 = vld [vmem:[%s4666_s1 + $0x818] sm:$0xff]  ;;  %v299_v1 = vld [vmem:[%s4666_s1 + $0x8a0] sm:$0xff] }
  0x63   :  { %2618 = vmatpush3.bf16.msra.mxu1 %v2617_v2  ;;  %v2637_v2 = vpack.c.bf16 %v224_v58, %v223_v45  ;;  %v2685_v45 = vpack.c.bf16 %v280_v48, %v279_v47  ;;  %v314_v0 = vld [vmem:[%s4666_s1 + $0x918] sm:$0xff]  ;;  %v2703_v47 = vpack.c.bf16 %v306_v40, %v305_v39  ;;  %v289_v48 = vld [vmem:[%s4666_s1 + $0x850] sm:$0xff]  ;;  %v307_v33 = vld [vmem:[%s4666_s1 + $0x8e0] sm:$0xff] }
  0x64   :  { %2652 = vmatprep.subr.bf16.mxu1 %v2651_v7  ;;  %1063 = vmatmul.mubr.f32.vlgmr.msra.gmra.mrb[4].mxu0 %v3452_v42  ;;  %v219_v42 = vld [vmem:[%s4666_s1 + $0x620] sm:$0xff]  ;;  %v257_v7 = vld [vmem:[%s4666_s1 + $0x750] sm:$0xff]  ;;  %v322_v53 = vld [vmem:[%s4666_s1 + $0x958] sm:$0xff] }
  0x65   :  { %2622 = vmatpush3.bf16.msra.mxu0 %v2621_v16  ;;  %1202 = vmatprep.mubr.f32.mxu0 %v616_v26  ;;  %v2629_v41 = vpack.c.bf16 %v220_v34, %v219_v42  ;;  %v276_v16 = vld [vmem:[%s4666_s1 + $0x7e8] sm:$0xff]  ;;  %v246_v26 = vld [vmem:[%s4666_s1 + $0x6f8] sm:$0xff]  ;;  %v229_v42 = vld [vmem:[%s4666_s1 + $0x670] sm:$0xff] }
  0x66   :  { %1133 = vmatmul.mubr.f32.vlgmr.msra.gmra.mrb[4].mxu1 %v3473_v52  ;;  %2624 = vmatprep.subr.bf16.mxu0 %v2623_v18  ;;  %v252_v52 = vld [vmem:[%s4666_s1 + $0x728] sm:$0xff]  ;;  %v2673_v18 = vpack.c.bf16 %v258_v9, %v257_v7  ;;  %v2675_v23 = vpack.c.bf16 %v276_v16, %v275_v14  ;;  %v230_v34 = vld [vmem:[%s4666_s1 + $0x678] sm:$0xff]  ;;  %v301_v16 = vld [vmem:[%s4666_s1 + $0x8b0] sm:$0xff] }
  0x67   :  { %2654 = vmatpush3.bf16.msra.mxu1 %v2653_v17  ;;  %1272 = vmatprep.mubr.f32.mxu1 %v617_v29  ;;  %v2661_v43 = vpack.c.bf16 %v252_v52, %v251_v35  ;;  %v2641_v17 = vpack.c.bf16 %v226_v6, %v225_v5  ;;  %v2645_v29 = vpack.c.bf16 %v228_v21, %v227_v20  ;;  %v261_v35 = vld [vmem:[%s4666_s1 + $0x770] sm:$0xff]  ;;  %v262_v52 = vld [vmem:[%s4666_s1 + $0x778] sm:$0xff]  ;;  %v332_v5 = vld [vmem:[%s4666_s1 + $0x9a8] sm:$0xff] }
  0x68   :  { %2656 = vmatprep.subr.bf16.mxu1 %v2655_v22  ;;  %v259_v22 = vld [vmem:[%s4666_s1 + $0x760] sm:$0xff]  ;;  %v377_v39 = vld [vmem:[%s4666_s1 + $0xb10] sm:$0xff] }
  0x69   :  { %2626 = vmatpush3.bf16.msra.mxu0 %v2625_v30  ;;  %v19_v30 = vld [vmem:[%s4665_s0 + $0x20] sm:$0xff] }
  0x6a   :  { %2628 = vmatprep.subr.bf16.mxu0 %v2627_v32  ;;  %v2647_v32 = vpack.c.bf16 %v246_v26, %v245_v25  ;;  %v3851_v54 = vrot.slane %v19_v30, %v3149_v13  ;;  %v317_v25 = vld [vmem:[%s4666_s1 + $0x930] sm:$0xff] }
  0x6b   :  { %2658 = vmatpush3.bf16.msra.mxu1 %v2657_v31  ;;  %v2677_v31 = vpack.c.bf16 %v260_v24, %v259_v22  ;;  %v286_v24 = vld [vmem:[%s4666_s1 + $0x838] sm:$0xff] }
  0x6c   :  { %2660 = vmatprep.subr.bf16.mxu1 %v2659_v36  ;;  %v2679_v36 = vpack.c.bf16 %v278_v28, %v277_v27  ;;  %v318_v27 = vld [vmem:[%s4666_s1 + $0x938] sm:$0xff]  ;;  %v303_v28 = vld [vmem:[%s4666_s1 + $0x8c0] sm:$0xff] }
  0x6d   :  { %2630 = vmatpush3.bf16.msra.mxu0 %v2629_v41  ;;  %v618_v41 = vcombine.high %v19_v30, %v19_v30  ;;  %v335_v30 = vld [vmem:[%s4666_s1 + $0x9c0] sm:$0xff] }
  0x6e   :  { %2632 = vmatprep.subr.bf16.mxu0 %v2631_v44  ;;  %v2681_v44 = vpack.c.bf16 %v262_v52, %v261_v35  ;;  %v287_v35 = vld [vmem:[%s4666_s1 + $0x840] sm:$0xff] }
  0x6f   :  { %2662 = vmatpush3.bf16.msra.mxu1 %v2661_v43  ;;  %v2649_v43 = vpack.c.bf16 %v230_v34, %v229_v42  ;;  %v2729_v42 = vpack.c.bf16 %v318_v27, %v317_v25  ;;  %v319_v52 = vld [vmem:[%s4666_s1 + $0x940] sm:$0xff]  ;;  %v344_v25 = vld [vmem:[%s4666_s1 + $0xa08] sm:$0xff] }
  0x70   :  { %2664 = vmatprep.subr.bf16.mxu1 %v2663_v49  ;;  %v311_v49 = vld [vmem:[%s4666_s1 + $0x900] sm:$0xff] }
  0x71   :  { %2634 = vmatpush3.bf16.msra.mxu0 %v2633_v55  ;;  %v329_v55 = vld [vmem:[%s4666_s1 + $0x990] sm:$0xff]  ;;  %v2717_v58 = vpack.c.bf16 %v312_v51, %v311_v49  ;;  %v290_v49 = vld [vmem:[%s4666_s1 + $0x858] sm:$0xff] }
  0x72   :  { %2636 = vmatprep.subr.bf16.mxu0 %v2635_v57  ;;  %v3860_v57 = vrot.slane %v618_v41, %v3149_v13  ;;  %v337_v41 = vld [vmem:[%s4666_s1 + $0x9d0] sm:$0xff] }
  0x73   :  { %2666 = vmatpush3.bf16.msra.mxu1 %v2665_v56  ;;  %v330_v56 = vld [vmem:[%s4666_s1 + $0x998] sm:$0xff] }
  0x74   :  { %2668 = vmatprep.subr.bf16.mxu1 %v2667_v60  ;;  %v281_v60 = vld [vmem:[%s4666_s1 + $0x810] sm:$0xff]  ;;  %v2719_v63 = vpack.c.bf16 %v330_v56, %v329_v55  ;;  %v634_v6 = vcombine.high %v3860_v57, %v3860_v57  ;;  %v308_v55 = vld [vmem:[%s4666_s1 + $0x8e8] sm:$0xff]  ;;  %v339_v56 = vld [vmem:[%s4666_s1 + $0x9e0] sm:$0xff] }
  0x75   :  { %2638 = vmatpush3.bf16.msra.mxu0 %v2637_v2  ;;  %v300_v2 = vld [vmem:[%s4666_s1 + $0x8a8] sm:$0xff]  ;;  %v2689_v7 = vpack.c.bf16 %v282_v61, %v281_v60  ;;  %v2707_v60 = vpack.c.bf16 %v308_v55, %v307_v33  ;;  %v291_v61 = vld [vmem:[%s4666_s1 + $0x860] sm:$0xff] }
  0x76   :  { %2640 = vmatprep.subr.bf16.mxu0 %v2639_v4  ;;  %v331_v4 = vld [vmem:[%s4666_s1 + $0x9a0] sm:$0xff]  ;;  %v2691_v9 = vpack.c.bf16 %v300_v2, %v299_v1  ;;  %v324_v1 = vld [vmem:[%s4666_s1 + $0x968] sm:$0xff]  ;;  %v309_v2 = vld [vmem:[%s4666_s1 + $0x8f0] sm:$0xff] }
  0x77   :  { %2670 = vmatpush3.bf16.msra.mxu1 %v2669_v3  ;;  %v633_v3 = vcombine.high %v3851_v54, %v3851_v54  ;;  %v2723_v14 = vpack.c.bf16 %v332_v5, %v331_v4  ;;  %v341_v4 = vld [vmem:[%s4666_s1 + $0x9f0] sm:$0xff]  ;;  %v342_v5 = vld [vmem:[%s4666_s1 + $0x9f8] sm:$0xff]  ;;  %v348_v33 = vld [vmem:[%s4666_s1 + $0xa28] sm:$0xff] }
  0x78   :  { %2672 = vmatprep.subr.bf16.mxu1 %v2671_v8  ;;  %v2721_v8 = vpack.c.bf16 %v314_v0, %v313_v62  ;;  %v292_v62 = vld [vmem:[%s4666_s1 + $0x868] sm:$0xff]  ;;  %v379_v55 = vld [vmem:[%s4666_s1 + $0xb20] sm:$0xff] }
  0x79   :  { %2642 = vmatpush3.bf16.msra.mxu0 %v2641_v17  ;;  %v302_v17 = vld [vmem:[%s4666_s1 + $0x8b8] sm:$0xff] }
  0x7a   :  { %2644 = vmatprep.subr.bf16.mxu0 %v2643_v19  ;;  %v334_v19 = vld [vmem:[%s4666_s1 + $0x9b8] sm:$0xff]  ;;  %v2695_v22 = vpack.c.bf16 %v302_v17, %v301_v16  ;;  %v359_v16 = vld [vmem:[%s4666_s1 + $0xa80] sm:$0xff]  ;;  %v360_v17 = vld [vmem:[%s4666_s1 + $0xa88] sm:$0xff] }
  0x7b   :  { %2674 = vmatpush3.bf16.msra.mxu1 %v2673_v18  ;;  %v333_v18 = vld [vmem:[%s4666_s1 + $0x9b0] sm:$0xff] }
  0x7c   :  { %2676 = vmatprep.subr.bf16.mxu1 %v2675_v23  ;;  %v285_v23 = vld [vmem:[%s4666_s1 + $0x830] sm:$0xff]  ;;  %v2727_v26 = vpack.c.bf16 %v334_v19, %v333_v18  ;;  %v391_v18 = vld [vmem:[%s4666_s1 + $0xb80] sm:$0xff]  ;;  %v392_v19 = vld [vmem:[%s4666_s1 + $0xb88] sm:$0xff] }
  0x7d   :  { %2646 = vmatpush3.bf16.msra.mxu0 %v2645_v29  ;;  %v304_v29 = vld [vmem:[%s4666_s1 + $0x8c8] sm:$0xff]  ;;  %v2779_v27 = vpack.c.bf16 %v392_v19, %v391_v18 }
  0x7e   :  { %2648 = vmatprep.subr.bf16.mxu0 %v2647_v32  ;;  %v2697_v32 = vpack.c.bf16 %v286_v24, %v285_v23  ;;  %v2699_v34 = vpack.c.bf16 %v304_v29, %v303_v28  ;;  %v2747_v23 = vpack.c.bf16 %v360_v17, %v359_v16  ;;  %v343_v24 = vld [vmem:[%s4666_s1 + $0xa00] sm:$0xff]  ;;  %v376_v28 = vld [vmem:[%s4666_s1 + $0xb08] sm:$0xff]  ;;  %v361_v29 = vld [vmem:[%s4666_s1 + $0xa90] sm:$0xff] }
  0x7f   :  { %2678 = vmatpush3.bf16.msra.mxu1 %v2677_v31  ;;  %v336_v31 = vld [vmem:[%s4666_s1 + $0x9c8] sm:$0xff] }
  0x80   :  { %2680 = vmatprep.subr.bf16.mxu1 %v2679_v36  ;;  %v288_v36 = vld [vmem:[%s4666_s1 + $0x848] sm:$0xff]  ;;  %v2731_v37 = vpack.c.bf16 %v336_v31, %v335_v30  ;;  %v362_v30 = vld [vmem:[%s4666_s1 + $0xa98] sm:$0xff] }
  0x81   :  { %2650 = vmatpush3.bf16.msra.mxu0 %v2649_v43  ;;  %v338_v43 = vld [vmem:[%s4666_s1 + $0x9d8] sm:$0xff] }
  0x82   :  { %2684 = vmatprep.subr.bf16.mxu0 %v2683_v46  ;;  %v2733_v46 = vpack.c.bf16 %v320_v38, %v319_v52  ;;  %v2735_v51 = vpack.c.bf16 %v338_v43, %v337_v41  ;;  %v2751_v52 = vpack.c.bf16 %v362_v30, %v361_v29  ;;  %v346_v38 = vld [vmem:[%s4666_s1 + $0xa18] sm:$0xff]  ;;  %v363_v43 = vld [vmem:[%s4666_s1 + $0xaa0] sm:$0xff] }
  0x83   :  { %2682 = vmatpush3.bf16.msra.mxu1 %v2681_v44  ;;  %v2701_v44 = vpack.c.bf16 %v288_v36, %v287_v35  ;;  %v2749_v35 = vpack.c.bf16 %v344_v25, %v343_v24  ;;  %v378_v41 = vld [vmem:[%s4666_s1 + $0xb18] sm:$0xff] }
  0x84   :  { %2716 = vmatprep.subr.bf16.mxu1 %v2715_v50  ;;  %1203 = vmatmul.mubr.f32.vlgmr.msra.gmra.mrb[6].mxu0 %v3644_v11  ;;  %v283_v11 = vld [vmem:[%s4666_s1 + $0x820] sm:$0xff]  ;;  %v321_v50 = vld [vmem:[%s4666_s1 + $0x950] sm:$0xff] }
  0x85   :  { %2686 = vmatpush3.bf16.msra.mxu0 %v2685_v45  ;;  %1342 = vmatprep.mubr.f32.mxu0 %v633_v3  ;;  %v2693_v20 = vpack.c.bf16 %v284_v10, %v283_v11  ;;  %v340_v45 = vld [vmem:[%s4666_s1 + $0x9e8] sm:$0xff]  ;;  %v310_v3 = vld [vmem:[%s4666_s1 + $0x8f8] sm:$0xff]  ;;  %v293_v11 = vld [vmem:[%s4666_s1 + $0x870] sm:$0xff] }
  0x86   :  { %1273 = vmatmul.mubr.f32.vlgmr.msra.gmra.mrb[6].mxu1 %v3653_v15  ;;  %2688 = vmatprep.subr.bf16.mxu0 %v2687_v59  ;;  %v316_v15 = vld [vmem:[%s4666_s1 + $0x928] sm:$0xff]  ;;  %v2737_v59 = vpack.c.bf16 %v322_v53, %v321_v50  ;;  %v2739_v0 = vpack.c.bf16 %v340_v45, %v339_v56  ;;  %v294_v10 = vld [vmem:[%s4666_s1 + $0x878] sm:$0xff]  ;;  %v365_v45 = vld [vmem:[%s4666_s1 + $0xab0] sm:$0xff] }
  0x87   :  { %2718 = vmatpush3.bf16.msra.mxu1 %v2717_v58  ;;  %1412 = vmatprep.mubr.f32.mxu1 %v634_v6  ;;  %v2725_v21 = vpack.c.bf16 %v316_v15, %v315_v12  ;;  %v2705_v58 = vpack.c.bf16 %v290_v49, %v289_v48  ;;  %v2709_v6 = vpack.c.bf16 %v292_v62, %v291_v61  ;;  %v325_v12 = vld [vmem:[%s4666_s1 + $0x970] sm:$0xff]  ;;  %v326_v15 = vld [vmem:[%s4666_s1 + $0x978] sm:$0xff]  ;;  %v396_v48 = vld [vmem:[%s4666_s1 + $0xba8] sm:$0xff] }
  0x88   :  { %2720 = vmatprep.subr.bf16.mxu1 %v2719_v63  ;;  %v323_v63 = vld [vmem:[%s4666_s1 + $0x960] sm:$0xff] }
  0x89   :  { %2690 = vmatpush3.bf16.msra.mxu0 %v2689_v7  ;;  %v20_v7 = vld [vmem:[%s4665_s0 + $0x28] sm:$0xff] }
  0x8a   :  { %2692 = vmatprep.subr.bf16.mxu0 %v2691_v9  ;;  %v2711_v9 = vpack.c.bf16 %v310_v3, %v309_v2  ;;  %v4058_v31 = vrot.slane %v20_v7, %v3149_v13  ;;  %v381_v2 = vld [vmem:[%s4666_s1 + $0xb30] sm:$0xff] }
  0x8b   :  { %2722 = vmatpush3.bf16.msra.mxu1 %v2721_v8  ;;  %v2741_v8 = vpack.c.bf16 %v324_v1, %v323_v63  ;;  %v350_v1 = vld [vmem:[%s4666_s1 + $0xa38] sm:$0xff] }
  0x8c   :  { %2724 = vmatprep.subr.bf16.mxu1 %v2723_v14  ;;  %v2743_v14 = vpack.c.bf16 %v342_v5, %v341_v4  ;;  %v382_v4 = vld [vmem:[%s4666_s1 + $0xb38] sm:$0xff]  ;;  %v367_v5 = vld [vmem:[%s4666_s1 + $0xac0] sm:$0xff] }
  0x8d   :  { %2694 = vmatpush3.bf16.msra.mxu0 %v2693_v20  ;;  %v635_v20 = vcombine.high %v20_v7, %v20_v7  ;;  %v399_v7 = vld [vmem:[%s4666_s1 + $0xbc0] sm:$0xff] }
  0x8e   :  { %2696 = vmatprep.subr.bf16.mxu0 %v2695_v22  ;;  %v2745_v22 = vpack.c.bf16 %v326_v15, %v325_v12  ;;  %v383_v15 = vld [vmem:[%s4666_s1 + $0xb40] sm:$0xff] }
  0x8f   :  { %2726 = vmatpush3.bf16.msra.mxu1 %v2725_v21  ;;  %v2713_v21 = vpack.c.bf16 %v294_v10, %v293_v11  ;;  %v351_v11 = vld [vmem:[%s4666_s1 + $0xa40] sm:$0xff]  ;;  %v2793_v10 = vpack.c.bf16 %v382_v4, %v381_v2 }
  0x90   :  { %2728 = vmatprep.subr.bf16.mxu1 %v2727_v26  ;;  %v375_v26 = vld [vmem:[%s4666_s1 + $0xb00] sm:$0xff] }
  0x91   :  { %2698 = vmatpush3.bf16.msra.mxu0 %v2697_v32  ;;  %v393_v32 = vld [vmem:[%s4666_s1 + $0xb90] sm:$0xff]  ;;  %v2781_v36 = vpack.c.bf16 %v376_v28, %v375_v26 }
  0x92   :  { %2700 = vmatprep.subr.bf16.mxu0 %v2699_v34  ;;  %v4067_v34 = vrot.slane %v635_v20, %v3149_v13 }
  0x93   :  { %2730 = vmatpush3.bf16.msra.mxu1 %v2729_v42  ;;  %v394_v42 = vld [vmem:[%s4666_s1 + $0xb98] sm:$0xff] }
  0x94   :  { %2732 = vmatprep.subr.bf16.mxu1 %v2731_v37  ;;  %v345_v37 = vld [vmem:[%s4666_s1 + $0xa10] sm:$0xff]  ;;  %v2783_v40 = vpack.c.bf16 %v394_v42, %v393_v32  ;;  %v651_v49 = vcombine.high %v4067_v34, %v4067_v34 }
  0x95   :  { %2702 = vmatpush3.bf16.msra.mxu0 %v2701_v44  ;;  %v364_v44 = vld [vmem:[%s4666_s1 + $0xaa8] sm:$0xff]  ;;  %v2753_v50 = vpack.c.bf16 %v346_v38, %v345_v37 }
  0x96   :  { %2704 = vmatprep.subr.bf16.mxu0 %v2703_v47  ;;  %v395_v47 = vld [vmem:[%s4666_s1 + $0xba0] sm:$0xff]  ;;  %v2755_v53 = vpack.c.bf16 %v364_v44, %v363_v43 }
  0x97   :  { %2734 = vmatpush3.bf16.msra.mxu1 %v2733_v46  ;;  %v650_v46 = vcombine.high %v4058_v31, %v4058_v31  ;;  %v2787_v56 = vpack.c.bf16 %v396_v48, %v395_v47 }
  0x98   :  { %2736 = vmatprep.subr.bf16.mxu1 %v2735_v51  ;;  %v2785_v51 = vpack.c.bf16 %v378_v41, %v377_v39 }
  0x99   :  { %2706 = vmatpush3.bf16.msra.mxu0 %v2705_v58  ;;  %v366_v58 = vld [vmem:[%s4666_s1 + $0xab8] sm:$0xff] }
  0x9a   :  { %2708 = vmatprep.subr.bf16.mxu0 %v2707_v60  ;;  %v398_v60 = vld [vmem:[%s4666_s1 + $0xbb8] sm:$0xff]  ;;  %v2759_v63 = vpack.c.bf16 %v366_v58, %v365_v45 }
  0x9b   :  { %2738 = vmatpush3.bf16.msra.mxu1 %v2737_v59  ;;  %v397_v59 = vld [vmem:[%s4666_s1 + $0xbb0] sm:$0xff] }
  0x9c   :  { %2740 = vmatprep.subr.bf16.mxu1 %v2739_v0  ;;  %v349_v0 = vld [vmem:[%s4666_s1 + $0xa30] sm:$0xff]  ;;  %v2791_v3 = vpack.c.bf16 %v398_v60, %v397_v59 }
  0x9d   :  { %2710 = vmatpush3.bf16.msra.mxu0 %v2709_v6  ;;  %v368_v6 = vld [vmem:[%s4666_s1 + $0xac8] sm:$0xff] }
  0x9e   :  { %2712 = vmatprep.subr.bf16.mxu0 %v2711_v9  ;;  %v2761_v9 = vpack.c.bf16 %v350_v1, %v349_v0  ;;  %v2763_v12 = vpack.c.bf16 %v368_v6, %v367_v5 }
  0x9f   :  { %2742 = vmatpush3.bf16.msra.mxu1 %v2741_v8  ;;  %v400_v8 = vld [vmem:[%s4666_s1 + $0xbc8] sm:$0xff] }
  0xa0   :  { %2744 = vmatprep.subr.bf16.mxu1 %v2743_v14  ;;  %v352_v14 = vld [vmem:[%s4666_s1 + $0xa48] sm:$0xff] }
  0xa1   :  { %2714 = vmatpush3.bf16.msra.mxu0 %v2713_v21 }
  0xa2   :  { %2748 = vmatprep.subr.bf16.mxu0 %v2747_v23 }
  0xa3   :  { %2746 = vmatpush3.bf16.msra.mxu1 %v2745_v22 }
  0xa4   :  { %2780 = vmatprep.subr.bf16.mxu1 %v2779_v27  ;;  %1343 = vmatmul.mubr.f32.vlgmr.msra.gmra.mrb[8].mxu0 %v3851_v54  ;;  %v347_v54 = vld [vmem:[%s4666_s1 + $0xa20] sm:$0xff] }
  0xa5   :  { %2750 = vmatpush3.bf16.msra.mxu0 %v2749_v35  ;;  %1482 = vmatprep.mubr.f32.mxu0 %v650_v46  ;;  %v2757_v61 = vpack.c.bf16 %v348_v33, %v347_v54 }
  0xa6   :  { %1413 = vmatmul.mubr.f32.vlgmr.msra.gmra.mrb[8].mxu1 %v3860_v57  ;;  %2752 = vmatprep.subr.bf16.mxu0 %v2751_v52  ;;  %v380_v57 = vld [vmem:[%s4666_s1 + $0xb28] sm:$0xff] }
  0xa7   :  { %2782 = vmatpush3.bf16.msra.mxu1 %v2781_v36  ;;  %1552 = vmatprep.mubr.f32.mxu1 %v651_v49  ;;  %v2789_v62 = vpack.c.bf16 %v380_v57, %v379_v55 }
  0xa8   :  { %2784 = vmatprep.subr.bf16.mxu1 %v2783_v40 }
  0xa9   :  { %2754 = vmatpush3.bf16.msra.mxu0 %v2753_v50 }
  0xaa   :  { %2756 = vmatprep.subr.bf16.mxu0 %v2755_v53 }
  0xab   :  { %2786 = vmatpush3.bf16.msra.mxu1 %v2785_v51 }
  0xac   :  { %2788 = vmatprep.subr.bf16.mxu1 %v2787_v56 }
  0xad   :  { %2758 = vmatpush3.bf16.msra.mxu0 %v2757_v61 }
  0xae   :  { %2760 = vmatprep.subr.bf16.mxu0 %v2759_v63 }
  0xaf   :  { %2790 = vmatpush3.bf16.msra.mxu1 %v2789_v62 }
  0xb0   :  { %8 = vsyncpa [#allocation3], 0  ;;  %2792 = vmatprep.subr.bf16.mxu1 %v2791_v3  ;;  %v2795_v16 = vpack.c.bf16 %v400_v8, %v399_v7  ;;  %v384_v17 = vld [vmem:[%s4666_s1 + $0xb48] sm:$0xff]  ;;  %v369_v18 = vld [vmem:[%s4666_s1 + $0xad0] sm:$0xff]  ;;  %v2765_v22 = vpack.c.bf16 %v352_v14, %v351_v11  ;;  %vm1838_vm0 = vcmask 74752  }
  0xb1   :  { %v370_v19 = vld [vmem:[%s4666_s1 + $0xad8] sm:$0xff]  ;;  %v401_v20 = vld [vmem:[%s4666_s1 + $0xbd0] sm:$0xff]  ;;  %2762 = vmatpush3.bf16.msra.mxu0 %v2761_v9  ;;  %v2797_v23 = vpack.c.bf16 %v384_v17, %v383_v15  ;;  %v371_v30 = vld [vmem:[%s4666_s1 + $0xae0] sm:$0xff] }
  0xb2   :  { %v402_v21 = vld [vmem:[%s4666_s1 + $0xbd8] sm:$0xff]  ;;  %2764 = vmatprep.subr.bf16.mxu0 %v2763_v12  ;;  %v2767_v24 = vpack.c.bf16 %v370_v19, %v369_v18  ;;  %v353_v25 = vld [vmem:[%s4666_s1 + $0xa50] sm:$0xff]  ;;  %v372_v32 = vld [vmem:[%s4666_s1 + $0xae8] sm:$0xff] }
  0xb3   :  { %2794 = vmatpush3.bf16.msra.mxu1 %v2793_v10  ;;  %v354_v26 = vld [vmem:[%s4666_s1 + $0xa58] sm:$0xff]  ;;  %v385_v27 = vld [vmem:[%s4666_s1 + $0xb50] sm:$0xff]  ;;  %v2799_v28 = vpack.c.bf16 %v402_v21, %v401_v20  ;;  %v403_v42 = vld [vmem:[%s4666_s1 + $0xbe0] sm:$0xff]  ;;  %v2771_v37 = vpack.c.bf16 %v372_v32, %v371_v30 }
  0xb4   :  { %2796 = vmatprep.subr.bf16.mxu1 %v2795_v16  ;;  %v386_v29 = vld [vmem:[%s4666_s1 + $0xb58] sm:$0xff]  ;;  %v404_v35 = vld [vmem:[%s4666_s1 + $0xbe8] sm:$0xff]  ;;  %v2769_v36 = vpack.c.bf16 %v354_v26, %v353_v25  ;;  %v355_v38 = vld [vmem:[%s4666_s1 + $0xa60] sm:$0xff] }
  0xb5   :  { %2766 = vmatpush3.bf16.msra.mxu0 %v2765_v22  ;;  %v2801_v52 = vpack.c.bf16 %v386_v29, %v385_v27  ;;  %v356_v39 = vld [vmem:[%s4666_s1 + $0xa68] sm:$0xff]  ;;  %v387_v40 = vld [vmem:[%s4666_s1 + $0xb60] sm:$0xff]  ;;  %v2803_v41 = vpack.c.bf16 %v404_v35, %v403_v42  ;;  %v373_v44 = vld [vmem:[%s4666_s1 + $0xaf0] sm:$0xff] }
  0xb6   :  { %2768 = vmatprep.subr.bf16.mxu0 %v2767_v24  ;;  %v388_v43 = vld [vmem:[%s4666_s1 + $0xb68] sm:$0xff]  ;;  %v374_v46 = vld [vmem:[%s4666_s1 + $0xaf8] sm:$0xff]  ;;  %v405_v47 = vld [vmem:[%s4666_s1 + $0xbf0] sm:$0xff]  ;;  %v2773_v49 = vpack.c.bf16 %v356_v39, %v355_v38 }
  0xb7   :  { %2798 = vmatpush3.bf16.msra.mxu1 %v2797_v23  ;;  %v406_v48 = vld [vmem:[%s4666_s1 + $0xbf8] sm:$0xff]  ;;  %v21_v50 = vld [vmem:[%s4665_s0 + $0x30] sm:$0xff]  ;;  %v2805_v51 = vpack.c.bf16 %v388_v43, %v387_v40  ;;  %v2775_v53 = vpack.c.bf16 %v374_v46, %v373_v44  ;;  %v423_v45 = vld [vmem:[%s4666_s1 + $0xc80] sm:$0xff] }
  0xb8   :  { %2800 = vmatprep.subr.bf16.mxu1 %v2799_v28  ;;  %v357_v54 = vld [vmem:[%s4666_s1 + $0xa70] sm:$0xff]  ;;  %v358_v33 = vld [vmem:[%s4666_s1 + $0xa78] sm:$0xff]  ;;  %v2807_v56 = vpack.c.bf16 %v406_v48, %v405_v47  ;;  %v424_v58 = vld [vmem:[%s4666_s1 + $0xc88] sm:$0xff]  ;;  %v652_v61 = vcombine.high %v21_v50, %v21_v50  ;;  %v4265_v8 = vrot.slane %v21_v50, %v3149_v13 }
  0xb9   :  { %2770 = vmatpush3.bf16.msra.mxu0 %v2769_v36  ;;  %v389_v55 = vld [vmem:[%s4666_s1 + $0xb70] sm:$0xff]  ;;  %v390_v57 = vld [vmem:[%s4666_s1 + $0xb78] sm:$0xff]  ;;  %v455_v59 = vld [vmem:[%s4666_s1 + $0xd80] sm:$0xff]  ;;  %v2777_v62 = vpack.c.bf16 %v358_v33, %v357_v54  ;;  %v2811_v0 = vpack.c.bf16 %v424_v58, %v423_v45 }
  0xba   :  { %2772 = vmatprep.subr.bf16.mxu0 %v2771_v37  ;;  %v456_v60 = vld [vmem:[%s4666_s1 + $0xd88] sm:$0xff]  ;;  %v2809_v63 = vpack.c.bf16 %v390_v57, %v389_v55  ;;  %v407_v1 = vld [vmem:[%s4666_s1 + $0xc00] sm:$0xff]  ;;  %v425_v6 = vld [vmem:[%s4666_s1 + $0xc90] sm:$0xff]  ;;  %v4274_v10 = vrot.slane %v652_v61, %v3149_v13  ;;  %v667_v23 = vcombine.high %v4265_v8, %v4265_v8 }
  0xbb   :  { %2802 = vmatpush3.bf16.msra.mxu1 %v2801_v52  ;;  %v408_v2 = vld [vmem:[%s4666_s1 + $0xc08] sm:$0xff]  ;;  %v439_v3 = vld [vmem:[%s4666_s1 + $0xd00] sm:$0xff]  ;;  %v2843_v4 = vpack.c.bf16 %v456_v60, %v455_v59  ;;  %v426_v7 = vld [vmem:[%s4666_s1 + $0xc98] sm:$0xff] }
  0xbc   :  { %2804 = vmatprep.subr.bf16.mxu1 %v2803_v41  ;;  %v440_v5 = vld [vmem:[%s4666_s1 + $0xd08] sm:$0xff]  ;;  %v457_v9 = vld [vmem:[%s4666_s1 + $0xd90] sm:$0xff]  ;;  %v458_v11 = vld [vmem:[%s4666_s1 + $0xd98] sm:$0xff]  ;;  %v2813_v12 = vpack.c.bf16 %v408_v2, %v407_v1  ;;  %v2815_v15 = vpack.c.bf16 %v426_v7, %v425_v6  ;;  %v668_v26 = vcombine.high %v4274_v10, %v4274_v10 }
  0xbd   :  { %2774 = vmatpush3.bf16.msra.mxu0 %v2773_v49  ;;  %v2845_v14 = vpack.c.bf16 %v440_v5, %v439_v3  ;;  %v409_v16 = vld [vmem:[%s4666_s1 + $0xc10] sm:$0xff]  ;;  %v410_v17 = vld [vmem:[%s4666_s1 + $0xc18] sm:$0xff]  ;;  %v2847_v19 = vpack.c.bf16 %v458_v11, %v457_v9  ;;  %v427_v21 = vld [vmem:[%s4666_s1 + $0xca0] sm:$0xff] }
  0xbe   :  { %2776 = vmatprep.subr.bf16.mxu0 %v2775_v53  ;;  %v441_v18 = vld [vmem:[%s4666_s1 + $0xd10] sm:$0xff]  ;;  %v442_v20 = vld [vmem:[%s4666_s1 + $0xd18] sm:$0xff]  ;;  %v428_v22 = vld [vmem:[%s4666_s1 + $0xca8] sm:$0xff]  ;;  %v2817_v27 = vpack.c.bf16 %v410_v17, %v409_v16 }
  0xbf   :  { %2806 = vmatpush3.bf16.msra.mxu1 %v2805_v51  ;;  %v459_v24 = vld [vmem:[%s4666_s1 + $0xda0] sm:$0xff]  ;;  %v460_v25 = vld [vmem:[%s4666_s1 + $0xda8] sm:$0xff]  ;;  %v2849_v28 = vpack.c.bf16 %v442_v20, %v441_v18  ;;  %v2819_v29 = vpack.c.bf16 %v428_v22, %v427_v21  ;;  %v429_v35 = vld [vmem:[%s4666_s1 + $0xcb0] sm:$0xff] }
  0xc0   :  { %2808 = vmatprep.subr.bf16.mxu1 %v2807_v56  ;;  %v412_v30 = vld [vmem:[%s4666_s1 + $0xc28] sm:$0xff]  ;;  %v443_v32 = vld [vmem:[%s4666_s1 + $0xd20] sm:$0xff]  ;;  %v2851_v42 = vpack.c.bf16 %v460_v25, %v459_v24  ;;  %v430_v36 = vld [vmem:[%s4666_s1 + $0xcb8] sm:$0xff] }
  0xc1   :  { %2778 = vmatpush3.bf16.msra.mxu0 %v2777_v62  ;;  %v461_v52 = vld [vmem:[%s4666_s1 + $0xdb0] sm:$0xff]  ;;  %v462_v37 = vld [vmem:[%s4666_s1 + $0xdb8] sm:$0xff]  ;;  %v2823_v40 = vpack.c.bf16 %v430_v36, %v429_v35  ;;  %v431_v48 = vld [vmem:[%s4666_s1 + $0xcc0] sm:$0xff] }
  0xc2   :  { %2812 = vmatprep.subr.bf16.mxu0 %v2811_v0  ;;  %v413_v41 = vld [vmem:[%s4666_s1 + $0xc30] sm:$0xff]  ;;  %v414_v43 = vld [vmem:[%s4666_s1 + $0xc38] sm:$0xff]  ;;  %v2855_v46 = vpack.c.bf16 %v462_v37, %v461_v52  ;;  %v432_v49 = vld [vmem:[%s4666_s1 + $0xcc8] sm:$0xff] }
  0xc3   :  { %2810 = vmatpush3.bf16.msra.mxu1 %v2809_v63  ;;  %v445_v44 = vld [vmem:[%s4666_s1 + $0xd30] sm:$0xff]  ;;  %v446_v47 = vld [vmem:[%s4666_s1 + $0xd38] sm:$0xff]  ;;  %v463_v50 = vld [vmem:[%s4666_s1 + $0xdc0] sm:$0xff]  ;;  %v2825_v53 = vpack.c.bf16 %v414_v43, %v413_v41  ;;  %v2827_v33 = vpack.c.bf16 %v432_v49, %v431_v48 }
  0xc4   :  { %2844 = vmatprep.subr.bf16.mxu1 %v2843_v4  ;;  %1483 = vmatmul.mubr.f32.vlgmr.msra.gmra.mrb[10].mxu0 %v4058_v31  ;;  %v411_v31 = vld [vmem:[%s4666_s1 + $0xc20] sm:$0xff]  ;;  %v464_v51 = vld [vmem:[%s4666_s1 + $0xdc8] sm:$0xff]  ;;  %v2857_v54 = vpack.c.bf16 %v446_v47, %v445_v44  ;;  %v433_v59 = vld [vmem:[%s4666_s1 + $0xcd0] sm:$0xff] }
  0xc5   :  { %2814 = vmatpush3.bf16.msra.mxu0 %v2813_v12  ;;  %1622 = vmatprep.mubr.f32.mxu0 %v667_v23  ;;  %v2821_v38 = vpack.c.bf16 %v412_v30, %v411_v31  ;;  %v415_v55 = vld [vmem:[%s4666_s1 + $0xc40] sm:$0xff]  ;;  %v416_v56 = vld [vmem:[%s4666_s1 + $0xc48] sm:$0xff]  ;;  %v2859_v45 = vpack.c.bf16 %v464_v51, %v463_v50  ;;  %v434_v60 = vld [vmem:[%s4666_s1 + $0xcd8] sm:$0xff] }
  0xc6   :  { %1553 = vmatmul.mubr.f32.vlgmr.msra.gmra.mrb[10].mxu1 %v4067_v34  ;;  %2816 = vmatprep.subr.bf16.mxu0 %v2815_v15  ;;  %v444_v34 = vld [vmem:[%s4666_s1 + $0xd28] sm:$0xff]  ;;  %v447_v57 = vld [vmem:[%s4666_s1 + $0xd40] sm:$0xff]  ;;  %v465_v61 = vld [vmem:[%s4666_s1 + $0xdd0] sm:$0xff]  ;;  %v2829_v63 = vpack.c.bf16 %v416_v56, %v415_v55  ;;  %v2831_v1 = vpack.c.bf16 %v434_v60, %v433_v59 }
  0xc7   :  { %2846 = vmatpush3.bf16.msra.mxu1 %v2845_v14  ;;  %1692 = vmatprep.mubr.f32.mxu1 %v668_v26  ;;  %v2853_v39 = vpack.c.bf16 %v444_v34, %v443_v32  ;;  %v448_v58 = vld [vmem:[%s4666_s1 + $0xd48] sm:$0xff]  ;;  %v466_v62 = vld [vmem:[%s4666_s1 + $0xdd8] sm:$0xff]  ;;  %v417_v2 = vld [vmem:[%s4666_s1 + $0xc50] sm:$0xff] }
  0xc8   :  { %2848 = vmatprep.subr.bf16.mxu1 %v2847_v19  ;;  %v2861_v0 = vpack.c.bf16 %v448_v58, %v447_v57  ;;  %v418_v3 = vld [vmem:[%s4666_s1 + $0xc58] sm:$0xff]  ;;  %v449_v4 = vld [vmem:[%s4666_s1 + $0xd50] sm:$0xff]  ;;  %v2863_v5 = vpack.c.bf16 %v466_v62, %v465_v61  ;;  %v435_v7 = vld [vmem:[%s4666_s1 + $0xce0] sm:$0xff] }
  0xc9   :  { %2818 = vmatpush3.bf16.msra.mxu0 %v2817_v27  ;;  %v450_v6 = vld [vmem:[%s4666_s1 + $0xd58] sm:$0xff]  ;;  %v436_v9 = vld [vmem:[%s4666_s1 + $0xce8] sm:$0xff]  ;;  %v467_v11 = vld [vmem:[%s4666_s1 + $0xde0] sm:$0xff]  ;;  %v2833_v14 = vpack.c.bf16 %v418_v3, %v417_v2 }
  0xca   :  { %2820 = vmatprep.subr.bf16.mxu0 %v2819_v29  ;;  %v468_v12 = vld [vmem:[%s4666_s1 + $0xde8] sm:$0xff]  ;;  %v2865_v15 = vpack.c.bf16 %v450_v6, %v449_v4  ;;  %v2835_v16 = vpack.c.bf16 %v436_v9, %v435_v7  ;;  %v419_v17 = vld [vmem:[%s4666_s1 + $0xc60] sm:$0xff]  ;;  %v437_v22 = vld [vmem:[%s4666_s1 + $0xcf0] sm:$0xff] }
  0xcb   :  { %2850 = vmatpush3.bf16.msra.mxu1 %v2849_v28  ;;  %v420_v18 = vld [vmem:[%s4666_s1 + $0xc68] sm:$0xff]  ;;  %v451_v19 = vld [vmem:[%s4666_s1 + $0xd60] sm:$0xff]  ;;  %v2867_v20 = vpack.c.bf16 %v468_v12, %v467_v11  ;;  %v438_v23 = vld [vmem:[%s4666_s1 + $0xcf8] sm:$0xff] }
  0xcc   :  { %2852 = vmatprep.subr.bf16.mxu1 %v2851_v42  ;;  %v452_v21 = vld [vmem:[%s4666_s1 + $0xd68] sm:$0xff]  ;;  %v469_v24 = vld [vmem:[%s4666_s1 + $0xdf0] sm:$0xff]  ;;  %v470_v25 = vld [vmem:[%s4666_s1 + $0xdf8] sm:$0xff]  ;;  %v2837_v26 = vpack.c.bf16 %v420_v18, %v419_v17  ;;  %v2839_v29 = vpack.c.bf16 %v438_v23, %v437_v22 }
  0xcd   :  { %2822 = vmatpush3.bf16.msra.mxu0 %v2821_v38  ;;  %v22_v27 = vld [vmem:[%s4665_s0 + $0x38] sm:$0xff]  ;;  %v2869_v28 = vpack.c.bf16 %v452_v21, %v451_v19  ;;  %v421_v31 = vld [vmem:[%s4666_s1 + $0xc70] sm:$0xff]  ;;  %v2871_v42 = vpack.c.bf16 %v470_v25, %v469_v24  ;;  %v487_v35 = vld [vmem:[%s4666_s1 + $0xe80] sm:$0xff] }
  0xce   :  { %2824 = vmatprep.subr.bf16.mxu0 %v2823_v40  ;;  %v422_v30 = vld [vmem:[%s4666_s1 + $0xc78] sm:$0xff]  ;;  %v453_v32 = vld [vmem:[%s4666_s1 + $0xd70] sm:$0xff]  ;;  %v488_v36 = vld [vmem:[%s4666_s1 + $0xe88] sm:$0xff]  ;;  %v669_v38 = vcombine.high %v22_v27, %v22_v27  ;;  %v4472_v51 = vrot.slane %v22_v27, %v3149_v13 }
  0xcf   :  { %2854 = vmatpush3.bf16.msra.mxu1 %v2853_v39  ;;  %v454_v34 = vld [vmem:[%s4666_s1 + $0xd78] sm:$0xff]  ;;  %v519_v52 = vld [vmem:[%s4666_s1 + $0xf80] sm:$0xff]  ;;  %v520_v37 = vld [vmem:[%s4666_s1 + $0xf88] sm:$0xff]  ;;  %v2841_v39 = vpack.c.bf16 %v422_v30, %v421_v31  ;;  %v2875_v41 = vpack.c.bf16 %v488_v36, %v487_v35 }
  0xd0   :  { %2856 = vmatprep.subr.bf16.mxu1 %v2855_v46  ;;  %v2873_v40 = vpack.c.bf16 %v454_v34, %v453_v32  ;;  %v471_v43 = vld [vmem:[%s4666_s1 + $0xe00] sm:$0xff]  ;;  %v472_v44 = vld [vmem:[%s4666_s1 + $0xe08] sm:$0xff]  ;;  %v2907_v47 = vpack.c.bf16 %v520_v37, %v519_v52  ;;  %v489_v49 = vld [vmem:[%s4666_s1 + $0xe90] sm:$0xff] }
  0xd1   :  { %2826 = vmatpush3.bf16.msra.mxu0 %v2825_v53  ;;  %v503_v46 = vld [vmem:[%s4666_s1 + $0xf00] sm:$0xff]  ;;  %v504_v48 = vld [vmem:[%s4666_s1 + $0xf08] sm:$0xff]  ;;  %v490_v50 = vld [vmem:[%s4666_s1 + $0xe98] sm:$0xff]  ;;  %v2877_v55 = vpack.c.bf16 %v472_v44, %v471_v43 }
  0xd2   :  { %2828 = vmatprep.subr.bf16.mxu0 %v2827_v33  ;;  %v521_v53 = vld [vmem:[%s4666_s1 + $0xf90] sm:$0xff]  ;;  %v4481_v33 = vrot.slane %v669_v38, %v3149_v13  ;;  %v2909_v56 = vpack.c.bf16 %v504_v48, %v503_v46  ;;  %v2879_v57 = vpack.c.bf16 %v490_v50, %v489_v49  ;;  %v474_v58 = vld [vmem:[%s4666_s1 + $0xe18] sm:$0xff]  ;;  %v491_v61 = vld [vmem:[%s4666_s1 + $0xea0] sm:$0xff] }
  0xd3   :  { %2858 = vmatpush3.bf16.msra.mxu1 %v2857_v54  ;;  %v522_v54 = vld [vmem:[%s4666_s1 + $0xf98] sm:$0xff]  ;;  %v505_v59 = vld [vmem:[%s4666_s1 + $0xf10] sm:$0xff]  ;;  %v492_v62 = vld [vmem:[%s4666_s1 + $0xea8] sm:$0xff] }
  0xd4   :  { %2860 = vmatprep.subr.bf16.mxu1 %v2859_v45  ;;  %v473_v45 = vld [vmem:[%s4666_s1 + $0xe10] sm:$0xff]  ;;  %v2911_v13 = vpack.c.bf16 %v522_v54, %v521_v53  ;;  %v506_v60 = vld [vmem:[%s4666_s1 + $0xf18] sm:$0xff]  ;;  %v685_v2 = vcombine.high %v4481_v33, %v4481_v33  ;;  %v476_v6 = vld [vmem:[%s4666_s1 + $0xe28] sm:$0xff] }
  0xd5   :  { %2830 = vmatpush3.bf16.msra.mxu0 %v2829_v63  ;;  %v684_v63 = vcombine.high %v4472_v51, %v4472_v51  ;;  %v2881_v3 = vpack.c.bf16 %v474_v58, %v473_v45  ;;  %v2913_v4 = vpack.c.bf16 %v506_v60, %v505_v59  ;;  %v507_v7 = vld [vmem:[%s4666_s1 + $0xf20] sm:$0xff]  ;;  %v493_v11 = vld [vmem:[%s4666_s1 + $0xeb0] sm:$0xff]  ;;  %v494_v12 = vld [vmem:[%s4666_s1 + $0xeb8] sm:$0xff] }
  0xd6   :  { %2832 = vmatprep.subr.bf16.mxu0 %v2831_v1  ;;  %v524_v1 = vld [vmem:[%s4666_s1 + $0xfa8] sm:$0xff]  ;;  %v2887_v18 = vpack.c.bf16 %v494_v12, %v493_v11  ;;  %v477_v19 = vld [vmem:[%s4666_s1 + $0xe30] sm:$0xff]  ;;  %v510_v23 = vld [vmem:[%s4666_s1 + $0xf38] sm:$0xff] }
  0xd7   :  { %2862 = vmatpush3.bf16.msra.mxu1 %v2861_v0  ;;  %v523_v0 = vld [vmem:[%s4666_s1 + $0xfa0] sm:$0xff]  ;;  %v509_v21 = vld [vmem:[%s4666_s1 + $0xf30] sm:$0xff]  ;;  %v496_v25 = vld [vmem:[%s4666_s1 + $0xec8] sm:$0xff] }
  0xd8   :  { %2864 = vmatprep.subr.bf16.mxu1 %v2863_v5  ;;  %v2883_v5 = vpack.c.bf16 %v492_v62, %v491_v61  ;;  %v2915_v9 = vpack.c.bf16 %v524_v1, %v523_v0  ;;  %v495_v24 = vld [vmem:[%s4666_s1 + $0xec0] sm:$0xff]  ;;  %v528_v27 = vld [vmem:[%s4666_s1 + $0xfc8] sm:$0xff]  ;;  %v497_v36 = vld [vmem:[%s4666_s1 + $0xed0] sm:$0xff] }
  0xd9   :  { %2834 = vmatpush3.bf16.msra.mxu0 %v2833_v14  ;;  %v525_v14 = vld [vmem:[%s4666_s1 + $0xfb0] sm:$0xff]  ;;  %v2891_v31 = vpack.c.bf16 %v496_v25, %v495_v24  ;;  %v479_v30 = vld [vmem:[%s4666_s1 + $0xe40] sm:$0xff]  ;;  %v480_v32 = vld [vmem:[%s4666_s1 + $0xe48] sm:$0xff] }
  0xda   :  { %2836 = vmatprep.subr.bf16.mxu0 %v2835_v16  ;;  %v512_v35 = vld [vmem:[%s4666_s1 + $0xf48] sm:$0xff]  ;;  %v498_v52 = vld [vmem:[%s4666_s1 + $0xed8] sm:$0xff]  ;;  %v529_v37 = vld [vmem:[%s4666_s1 + $0xfd0] sm:$0xff] }
  0xdb   :  { %2866 = vmatpush3.bf16.msra.mxu1 %v2865_v15  ;;  %v526_v15 = vld [vmem:[%s4666_s1 + $0xfb8] sm:$0xff]  ;;  %v481_v43 = vld [vmem:[%s4666_s1 + $0xe50] sm:$0xff]  ;;  %v499_v49 = vld [vmem:[%s4666_s1 + $0xee0] sm:$0xff] }
  0xdc   :  { %2868 = vmatprep.subr.bf16.mxu1 %v2867_v20  ;;  %v478_v20 = vld [vmem:[%s4666_s1 + $0xe38] sm:$0xff]  ;;  %v2919_v22 = vpack.c.bf16 %v526_v15, %v525_v14  ;;  %v513_v46 = vld [vmem:[%s4666_s1 + $0xf50] sm:$0xff]  ;;  %v500_v50 = vld [vmem:[%s4666_s1 + $0xee8] sm:$0xff] }
  0xdd   :  { %2838 = vmatpush3.bf16.msra.mxu0 %v2837_v26  ;;  %v527_v26 = vld [vmem:[%s4666_s1 + $0xfc0] sm:$0xff]  ;;  %v530_v38 = vld [vmem:[%s4666_s1 + $0xfd8] sm:$0xff]  ;;  %v532_v54 = vld [vmem:[%s4666_s1 + $0xfe8] sm:$0xff] }
  0xde   :  { %2840 = vmatprep.subr.bf16.mxu0 %v2839_v29  ;;  %v2921_v29 = vpack.c.bf16 %v510_v23, %v509_v21  ;;  %v2923_v34 = vpack.c.bf16 %v528_v27, %v527_v26  ;;  %v482_v44 = vld [vmem:[%s4666_s1 + $0xe58] sm:$0xff]  ;;  %v531_v53 = vld [vmem:[%s4666_s1 + $0xfe0] sm:$0xff]  ;;  %v484_v58 = vld [vmem:[%s4666_s1 + $0xe68] sm:$0xff] }
  0xdf   :  { %2870 = vmatpush3.bf16.msra.mxu1 %v2869_v28  ;;  %v2889_v28 = vpack.c.bf16 %v478_v20, %v477_v19  ;;  %v514_v48 = vld [vmem:[%s4666_s1 + $0xf58] sm:$0xff]  ;;  %v483_v45 = vld [vmem:[%s4666_s1 + $0xe60] sm:$0xff]  ;;  %v2931_v60 = vpack.c.bf16 %v532_v54, %v531_v53  ;;  %v516_v61 = vld [vmem:[%s4666_s1 + $0xf68] sm:$0xff] }
  0xe0   :  { %2872 = vmatprep.subr.bf16.mxu1 %v2871_v42  ;;  %v511_v42 = vld [vmem:[%s4666_s1 + $0xf40] sm:$0xff]  ;;  %v501_v62 = vld [vmem:[%s4666_s1 + $0xef0] sm:$0xff]  ;;  %v486_v12 = vld [vmem:[%s4666_s1 + $0xe78] sm:$0xff] }
  0xe1   :  { %2842 = vmatpush3.bf16.msra.mxu0 %v2841_v39  ;;  %v2893_v39 = vpack.c.bf16 %v480_v32, %v479_v30  ;;  %v515_v59 = vld [vmem:[%s4666_s1 + $0xf60] sm:$0xff]  ;;  %v485_v11 = vld [vmem:[%s4666_s1 + $0xe70] sm:$0xff] }
  0xe2   :  { %2876 = vmatprep.subr.bf16.mxu0 %v2875_v41  ;;  %v2895_v41 = vpack.c.bf16 %v498_v52, %v497_v36  ;;  %v1866_v0 = vld [vmem:[%s4667_s2] ss:$0 sm:$0xff]  ;;  %v2905_v19 = vpack.c.bf16 %v486_v12, %v485_v11 }
  0xe3   :  { %2874 = vmatpush3.bf16.msra.mxu1 %v2873_v40  ;;  %v2925_v40 = vpack.c.bf16 %v512_v35, %v511_v42 }
  0xe4   :  { %2908 = vmatprep.subr.bf16.mxu1 %v2907_v47  ;;  %1623 = vmatmul.mubr.f32.vlgmr.msra.gmra.mrb[12].mxu0 %v4265_v8  ;;  %v475_v8 = vld [vmem:[%s4666_s1 + $0xe20] sm:$0xff]  ;;  %v2927_v47 = vpack.c.bf16 %v530_v38, %v529_v37 }
  0xe5   :  { %2878 = vmatpush3.bf16.msra.mxu0 %v2877_v55  ;;  %1762 = vmatprep.mubr.f32.mxu0 %v684_v63  ;;  %v2885_v16 = vpack.c.bf16 %v476_v6, %v475_v8  ;;  %v2897_v55 = vpack.c.bf16 %v482_v44, %v481_v43  ;;  %v502_v63 = vld [vmem:[%s4666_s1 + $0xef8] sm:$0xff]  ;;  %v2901_v6 = vpack.c.bf16 %v484_v58, %v483_v45 }
  0xe6   :  { %1693 = vmatmul.mubr.f32.vlgmr.msra.gmra.mrb[12].mxu1 %v4274_v10  ;;  %2880 = vmatprep.subr.bf16.mxu0 %v2879_v57  ;;  %v508_v10 = vld [vmem:[%s4666_s1 + $0xf28] sm:$0xff]  ;;  %v2899_v57 = vpack.c.bf16 %v500_v50, %v499_v49 }
  0xe7   :  { %2910 = vmatpush3.bf16.msra.mxu1 %v2909_v56  ;;  %1832 = vmatprep.mubr.f32.mxu1 %v685_v2  ;;  %v2917_v17 = vpack.c.bf16 %v508_v10, %v507_v7  ;;  %v2929_v56 = vpack.c.bf16 %v514_v48, %v513_v46  ;;  %v2903_v10 = vpack.c.bf16 %v502_v63, %v501_v62 }
  0xe8   :  { %2912 = vmatprep.subr.bf16.mxu1 %v2911_v13 }
  0xe9   :  { %2882 = vmatpush3.bf16.msra.mxu0 %v2881_v3  ;;  %v533_v3 = vld [vmem:[%s4666_s1 + $0xff0] sm:$0xff] }
  0xea   :  { %2884 = vmatprep.subr.bf16.mxu0 %v2883_v5 }
  0xeb   :  { %2914 = vmatpush3.bf16.msra.mxu1 %v2913_v4  ;;  %v534_v4 = vld [vmem:[%s4666_s1 + $0xff8] sm:$0xff] }
  0xec   :  { %2916 = vmatprep.subr.bf16.mxu1 %v2915_v9  ;;  %v2933_v9 = vpack.c.bf16 %v516_v61, %v515_v59  ;;  %v2935_v15 = vpack.c.bf16 %v534_v4, %v533_v3 }
  0xed   :  { %2886 = vmatpush3.bf16.msra.mxu0 %v2885_v16  ;;  %v517_v16 = vld [vmem:[%s4666_s1 + $0xf70] sm:$0xff] }
  0xee   :  { %2888 = vmatprep.subr.bf16.mxu0 %v2887_v18 }
  0xef   :  { %2918 = vmatpush3.bf16.msra.mxu1 %v2917_v17  ;;  %v518_v17 = vld [vmem:[%s4666_s1 + $0xf78] sm:$0xff]  ;;  %s2978_s1 = smov [#allocation2]  }
  0xf0   :  { %2920 = vmatprep.subr.bf16.mxu1 %v2919_v22  ;;  %v2937_v20 = vpack.c.bf16 %v518_v17, %v517_v16  ;;  %s1858_s22 = sshll.u32 %s2978_s1, 4  ;;  %s1859_s22 = int_to_ptr.vmem [resolvable:$true] %s1858_s22 }
  0xf1   :  { %2890 = vmatpush3.bf16.msra.mxu0 %v2889_v28  ;;  %s2953_s23 = scalar_lea.vmem %s1859_s22, 32  ;;  %p2958_p1 = scmp.lt.s32.totalorder %s1859_s22, %s1859_s22 }
  0xf2   :  { %2892 = vmatprep.subr.bf16.mxu0 %v2891_v31  ;;  %p2954_p0 = scmp.ne.s32.totalorder %s1859_s22, %s2953_s23  ;;  %p2959_p2 = scmp.lt.s32.totalorder %s2953_s23, %s2953_s23 }
  0xf3   :  { %2922 = vmatpush3.bf16.msra.mxu1 %v2921_v29 }
  0xf4   :  { %2924 = vmatprep.subr.bf16.mxu1 %v2923_v34  ;;  %p2960_p3 = por %p2959_p2, %p2958_p1 }
  0xf5   :  { %2894 = vmatpush3.bf16.msra.mxu0 %v2893_v39 }
  0xf6   :  { %2896 = vmatprep.subr.bf16.mxu0 %v2895_v41  ;;  %p2961_p4 = pnand %p2960_p3, %p2954_p0 }
  0xf7   :  { %2926 = vmatpush3.bf16.msra.mxu1 %v2925_v40  ;;  %v1899_v13 = vpop.f32.mrb[0].mxu0 }
  0xf8   :  { %2928 = vmatprep.subr.bf16.mxu1 %v2927_v47  ;;  %v1900_v1 = vpop.f32.mrb[1].mxu0 }
  0xf9   :  { %v1934_v2 = vpop.f32.mrb[0].mxu1  ;;  %v1901_v5 = vadd.f32 %v1900_v1, %v1899_v13  ;;  %2898 = vmatpush3.bf16.msra.mxu0 %v2897_v55 }
  0xfa   :  { %v1935_v8 = vpop.f32.mrb[1].mxu1  ;;  %2900 = vmatprep.subr.bf16.mxu0 %v2899_v57 }
  0xfb   :  { %v1936_v7 = vadd.f32 %v1935_v8, %v1934_v2  ;;  %2930 = vmatpush3.bf16.msra.mxu1 %v2929_v56  ;;  %v785_v14 = vadd.f32 %v1901_v5, %v1866_v0 }
  0xfc   :  { %2932 = vmatprep.subr.bf16.mxu1 %v2931_v60 }
  0xfd   :  { %v855_v18 = vadd.f32 %v1936_v7, %v785_v14  ;;  %2902 = vmatpush3.bf16.msra.mxu0 %v2901_v6 }
  0xfe   :  { %2904 = vmatprep.subr.bf16.mxu0 %v2903_v10 }
  0xff   :  { %2934 = vmatpush3.bf16.msra.mxu1 %v2933_v9 }
 0x100   :  { %2936 = vmatprep.subr.bf16.mxu1 %v2935_v15 }
 0x101   :  { %2906 = vmatpush3.bf16.msra.mxu0 %v2905_v19 }
 0x103   :  { %2938 = vmatpush3.bf16.msra.mxu1 %v2937_v20 }
 0x104   :  { %1763 = vmatmul.mubr.f32.vlgmr.msra.gmra.mrb[14].mxu0 %v4472_v51 }
 0x106   :  { %1833 = vmatmul.mubr.f32.vlgmr.msra.gmra.mrb[14].mxu1 %v4481_v33 }
 0x117   :  { %v1969_v21 = vpop.f32.mrb[2].mxu0 }
 0x118   :  { %v1970_v22 = vpop.f32.mrb[3].mxu0 }
 0x119   :  { %v2004_v23 = vpop.f32.mrb[2].mxu1  ;;  %v1971_v24 = vadd.f32 %v1970_v22, %v1969_v21 }
 0x11a   :  { %v2005_v25 = vpop.f32.mrb[3].mxu1 }
 0x11b   :  { %v2006_v26 = vadd.f32 %v2005_v25, %v2004_v23  ;;  %v925_v27 = vadd.f32 %v1971_v24, %v855_v18 }
 0x11d   :  { %v995_v28 = vadd.f32 %v2006_v26, %v925_v27 }
 0x137   :  { %v2039_v29 = vpop.f32.mrb[4].mxu0 }
 0x138   :  { %v2040_v31 = vpop.f32.mrb[5].mxu0 }
 0x139   :  { %v2074_v30 = vpop.f32.mrb[4].mxu1  ;;  %v2041_v32 = vadd.f32 %v2040_v31, %v2039_v29 }
 0x13a   :  { %v2075_v42 = vpop.f32.mrb[5].mxu1 }
 0x13b   :  { %v2076_v34 = vadd.f32 %v2075_v42, %v2074_v30  ;;  %v1065_v35 = vadd.f32 %v2041_v32, %v995_v28 }
 0x13d   :  { %v1135_v36 = vadd.f32 %v2076_v34, %v1065_v35 }
 0x157   :  { %v2109_v52 = vpop.f32.mrb[6].mxu0 }
 0x158   :  { %v2110_v51 = vpop.f32.mrb[7].mxu0 }
 0x159   :  { %v2144_v37 = vpop.f32.mrb[6].mxu1  ;;  %v2111_v33 = vadd.f32 %v2110_v51, %v2109_v52 }
 0x15a   :  { %v2145_v38 = vpop.f32.mrb[7].mxu1 }
 0x15b   :  { %v2146_v39 = vadd.f32 %v2145_v38, %v2144_v37  ;;  %v1205_v40 = vadd.f32 %v2111_v33, %v1135_v36 }
 0x15d   :  { %v1275_v41 = vadd.f32 %v2146_v39, %v1205_v40 }
 0x177   :  { %v2179_v43 = vpop.f32.mrb[8].mxu0 }
 0x178   :  { %v2180_v44 = vpop.f32.mrb[9].mxu0 }
 0x179   :  { %v2214_v46 = vpop.f32.mrb[8].mxu1  ;;  %v2181_v47 = vadd.f32 %v2180_v44, %v2179_v43 }
 0x17a   :  { %v2215_v48 = vpop.f32.mrb[9].mxu1 }
 0x17b   :  { %v2216_v49 = vadd.f32 %v2215_v48, %v2214_v46  ;;  %v1345_v50 = vadd.f32 %v2181_v47, %v1275_v41 }
 0x17d   :  { %v1415_v53 = vadd.f32 %v2216_v49, %v1345_v50 }
 0x197   :  { %v2249_v54 = vpop.f32.mrb[10].mxu0 }
 0x198   :  { %v2250_v55 = vpop.f32.mrb[11].mxu0 }
 0x199   :  { %v2284_v56 = vpop.f32.mrb[10].mxu1  ;;  %v2251_v57 = vadd.f32 %v2250_v55, %v2249_v54 }
 0x19a   :  { %v2285_v45 = vpop.f32.mrb[11].mxu1 }
 0x19b   :  { %v2286_v58 = vadd.f32 %v2285_v45, %v2284_v56  ;;  %v1485_v59 = vadd.f32 %v2251_v57, %v1415_v53 }
 0x19d   :  { %v1555_v13 = vadd.f32 %v2286_v58, %v1485_v59 }
 0x1b7   :  { %v2319_v60 = vpop.f32.mrb[12].mxu0 }
 0x1b8   :  { %v2320_v61 = vpop.f32.mrb[13].mxu0 }
 0x1b9   :  { %v2354_v62 = vpop.f32.mrb[12].mxu1  ;;  %v2321_v63 = vadd.f32 %v2320_v61, %v2319_v60 }
 0x1ba   :  { %v2355_v0 = vpop.f32.mrb[13].mxu1 }
 0x1bb   :  { %v2356_v1 = vadd.f32 %v2355_v0, %v2354_v62  ;;  %v1625_v2 = vadd.f32 %v2321_v63, %v1555_v13 }
 0x1bd   :  { %v1695_v3 = vadd.f32 %v2356_v1, %v1625_v2 }
 0x1d7   :  { %v2389_v4 = vpop.f32.mrb[14].mxu0 }
 0x1d8   :  { %v2390_v5 = vpop.f32.mrb[15].mxu0 }
 0x1d9   :  { %v2424_v8 = vpop.f32.mrb[14].mxu1  ;;  %v2391_v6 = vadd.f32 %v2390_v5, %v2389_v4 }
 0x1da   :  { %v2425_v7 = vpop.f32.mrb[15].mxu1 }
 0x1db   :  { %v2426_v9 = vadd.f32 %v2425_v7, %v2424_v8  ;;  %v1765_v10 = vadd.f32 %v2391_v6, %v1695_v3 }
 0x1dd   :  { %v1835_v11 = vadd.f32 %v2426_v9, %v1765_v10 }
 0x1df   :  { %v1839_v12 = vsel %vm1838_vm0, %v1835_v11, -inf }
 0x1e0   :  { %1840 = vmax.xlane.f32.xlu0 %v1839_v12 }
 0x26d   :  { %v1841_v14 = vpop.xlane.xlu0 %1840 }
 0x26e   :  { %v1842_v15 = vsub.f32 %v1835_v11, %v1841_v14 }
 0x270   :  { %v1843_v16 = vmul.f32 1.442695, %v1842_v15 }
 0x272   :  { %2949 = vpow2.f32 %v1843_v16 }
 0x27c   :  { %v2950_v17 = vpop.eup %2949 }
 0x27d   :  { %v1845_v18 = vsel %vm1838_vm0, %v2950_v17, 0.0 }
 0x27e   :  { %1846 = vadd.xlane.f32.xlu0 %v1845_v18 }
 0x30b   :  { %v1847_v19 = vpop.xlane.xlu0 %1846 }
 0x30c   :  { %2951 = vlog2.f32 %v1847_v19 }
 0x316   :  { %v2952_v20 = vpop.eup %2951 }
 0x317   :  { %v1849_v21 = vmul.f32 0.6931472, %v2952_v20 }
 0x319   :  { %v1850_v22 = vsub.f32 %v1842_v15, %v1849_v21 }
 0x31b   :  { %1851 = vst.msk [vmem:[#allocation2] sm:$0x3] %vm1838_vm0, %v1850_v22 }
 0x31c   :  { %2964 = shalt.err (!%p2961_p4)
}
 0x31d   :  { %s2965_s26 = scalar_lea.hbm %s4668_s3, 32 }
 0x31e   :  { %p2966_p5 = scmp.ne.s32.totalorder %s4668_s3, %s2965_s26  ;;  %p2969_p6 = scmp.lt.u32.totalorder %s2965_s26, %s4668_s3 }
 0x320   :  { %p2971_p7 = pnand %p2969_p6, %p2966_p5 }
 0x322   :  { %2974 = shalt.err (!%p2971_p7)
}
 0x323   :  { %1861 = dma.vmem_to_hbm [thread:$0]  %s1859_s22, 32, %s4668_s3, [#allocation3]  }
 0x324   :  { %2975 = dma.done.wait [#allocation3], 32  }
 0x325   :  { %2976 = vsyncadd [#allocation3], 4294967264 }
 0x326   :  { %1865 = vsyncpa [#allocation3], 1 }

</bundles_post_ra>
